<compile_context>
chip_gen: v7x
topology: tpu7x:2x2x1
jax: 0.10.0
libtpu: 0.0.40
codegen_flags: <defaults>
</compile_context>

<pallas_src>
import math

import jax
import jax.numpy as jnp
from jax.experimental import pallas as pl
from jax.experimental.pallas import tpu as pltpu

# ---------------- model dims (small, consistent with the module) -------------
D_MODEL = 32
N_HEADS = 4
D_K = D_MODEL // N_HEADS
D_FF = 64
N_LAYERS = 2
VOCAB = 50
CMN_SLOTS = 16          # memory_matrix rows; cmn topk == CMN_SLOTS (full attention)
MAX_LEN = 64
LN_EPS = 1e-6


# ===================== in-kernel building blocks (traced inline) =============
def _ln(x3, g, b):
    """Annotated-transformer LayerNorm: unbiased std, eps added to std.
    x3: (B, S, D); g, b: (1, D)."""
    B_, S_, Dm = x3.shape
    x2 = x3.reshape(B_ * S_, Dm)
    mu = jnp.mean(x2, axis=-1, keepdims=True)
    var = jnp.sum((x2 - mu) ** 2, axis=-1, keepdims=True) / (Dm - 1)
    inv = pl.reciprocal(jnp.sqrt(var) + LN_EPS, approx=True)
    y = g * (x2 - mu) * inv + b
    return y.reshape(B_, S_, Dm)


def _ffn(x3, w1, b1, w2, b2):
    """PositionwiseFeedForward: w2(relu(w1 x + b1)) + b2."""
    B_, S_, Dm = x3.shape
    x2 = x3.reshape(B_ * S_, Dm)
    h = jnp.maximum(jnp.dot(x2, w1, preferred_element_type=jnp.float32) + b1, 0.0)
    y = jnp.dot(h, w2, preferred_element_type=jnp.float32) + b2
    return y.reshape(B_, S_, Dm)


def _softmax_lastdim(s):
    s_max = jnp.max(s, axis=-1, keepdims=True)
    p = jnp.exp(s - s_max)
    denom = jnp.sum(p, axis=-1, keepdims=True)
    return p * pl.reciprocal(denom, approx=True)


def _mha(q_in, kv_in, mask, wqkv, bqkv, wo, bo):
    """MultiHeadedAttention with fused QKV weights.
    q_in: (B, Sq, D), kv_in: (B, Sk, D), mask: (B, Sq, Sk) or (B, 1, Sk) float.
    Heads are static lane slices; output projection is accumulated per head to
    avoid any head concatenation / transposes."""
    B_, Sq, Dm = q_in.shape
    Sk = kv_in.shape[1]
    q2 = q_in.reshape(B_ * Sq, Dm)
    kv2 = kv_in.reshape(B_ * Sk, Dm)
    q = jnp.dot(q2, wqkv[:, :Dm], preferred_element_type=jnp.float32) + bqkv[:, :Dm]
    k = jnp.dot(kv2, wqkv[:, Dm:2 * Dm], preferred_element_type=jnp.float32) + bqkv[:, Dm:2 * Dm]
    v = jnp.dot(kv2, wqkv[:, 2 * Dm:], preferred_element_type=jnp.float32) + bqkv[:, 2 * Dm:]
    q3 = q.reshape(B_, Sq, Dm)
    k3 = k.reshape(B_, Sk, Dm)
    v3 = v.reshape(B_, Sk, Dm)

    scale = 1.0 / math.sqrt(D_K)
    keep = jnp.broadcast_to(mask > 0.0, (B_, Sq, Sk))   # hoisted out of head loop

    acc = None
    for h in range(N_HEADS):
        sl = slice(h * D_K, (h + 1) * D_K)
        s = jnp.einsum('bqd,bkd->bqk', q3[:, :, sl], k3[:, :, sl],
                       preferred_element_type=jnp.float32) * scale
        s = jnp.where(keep, s, -1e9)                    # masked_fill(mask == 0, -1e9)
        p = _softmax_lastdim(s)
        oh = jnp.einsum('bqk,bkd->bqd', p, v3[:, :, sl],
                        preferred_element_type=jnp.float32)
        contrib = jnp.dot(oh.reshape(B_ * Sq, D_K), wo[sl, :],
                          preferred_element_type=jnp.float32)
        acc = contrib if acc is None else acc + contrib
    return (acc + bo).reshape(B_, Sq, Dm)


def _cmn_attn(q_in, mem, wqkv, bqkv, wo, bo):
    """MultiThreadMemory with topk == num_slots (== full softmax attention).
    K/V come from the shared (M, D) memory matrix, projected once for all batches."""
    B_, Sq, Dm = q_in.shape
    q2 = q_in.reshape(B_ * Sq, Dm)
    q = jnp.dot(q2, wqkv[:, :Dm], preferred_element_type=jnp.float32) + bqkv[:, :Dm]
    k = jnp.dot(mem, wqkv[:, Dm:2 * Dm], preferred_element_type=jnp.float32) + bqkv[:, Dm:2 * Dm]
    v = jnp.dot(mem, wqkv[:, 2 * Dm:], preferred_element_type=jnp.float32) + bqkv[:, 2 * Dm:]

    scale = 1.0 / math.sqrt(D_K)
    acc = None
    for h in range(N_HEADS):
        sl = slice(h * D_K, (h + 1) * D_K)
        s = jnp.dot(q[:, sl], k[:, sl].T, preferred_element_type=jnp.float32) * scale
        p = _softmax_lastdim(s)                          # (B*Sq, M)
        oh = jnp.dot(p, v[:, sl], preferred_element_type=jnp.float32)
        contrib = jnp.dot(oh, wo[sl, :], preferred_element_type=jnp.float32)
        acc = contrib if acc is None else acc + contrib
    return (acc + bo).reshape(B_, Sq, Dm)
    # TODO(synk): topk < num_slots gather path of memory_querying_responding is not
    # needed here (topk == M is exactly equivalent); it would need a data-dependent
    # gather (pl.ANY + manual DMA) if ever configured differently.


# ============================ fused forward kernel ===========================
def _transformer_kernel(
        # runtime inputs
        src_ref, tgt_ref, smask_ref, tmask_ref, mem_ref,
        # cmn (MultiThreadMemory) attention params
        c_wqkv_ref, c_bqkv_ref, c_wo_ref, c_bo_ref,
        # encoder params, stacked over layers
        e_wqkv_ref, e_bqkv_ref, e_wo_ref, e_bo_ref,
        e_w1_ref, e_b1_ref, e_w2_ref, e_b2_ref,
        e_ln1g_ref, e_ln1b_ref, e_ln2g_ref, e_ln2b_ref,
        e_lng_ref, e_lnb_ref,
        # decoder params, stacked over layers
        d_swqkv_ref, d_sbqkv_ref, d_swo_ref, d_sbo_ref,
        d_xwqkv_ref, d_xbqkv_ref, d_xwo_ref, d_xbo_ref,
        d_w1_ref, d_b1_ref, d_w2_ref, d_b2_ref,
        d_ln1g_ref, d_ln1b_ref, d_ln2g_ref, d_ln2b_ref, d_ln3g_ref, d_ln3b_ref,
        d_lng_ref, d_lnb_ref,
        # output
        out_ref):
    smask = smask_ref[...]            # (B, 1, S_src)
    tmask = tmask_ref[...]            # (B, S_tgt, S_tgt)

    # -------------------------------- encoder --------------------------------
    x = src_ref[...]                  # (B, S_src, D), PE already added in glue
    for l in range(N_LAYERS):
        y = _ln(x, e_ln1g_ref[l], e_ln1b_ref[l])
        x = x + _mha(y, y, smask, e_wqkv_ref[l], e_bqkv_ref[l], e_wo_ref[l], e_bo_ref[l])
        y = _ln(x, e_ln2g_ref[l], e_ln2b_ref[l])
        x = x + _ffn(y, e_w1_ref[l], e_b1_ref[l], e_w2_ref[l], e_b2_ref[l])
    memory = _ln(x, e_lng_ref[...], e_lnb_ref[...])

    # -------------------------------- decoder --------------------------------
    t = tgt_ref[...]                  # (B, S_tgt, D) = embed*sqrt(D) + PE (glue)
    t = t + _cmn_attn(t, mem_ref[...], c_wqkv_ref[...], c_bqkv_ref[...],
                      c_wo_ref[...], c_bo_ref[...])
    for l in range(N_LAYERS):
        y = _ln(t, d_ln1g_ref[l], d_ln1b_ref[l])
        t = t + _mha(y, y, tmask, d_swqkv_ref[l], d_sbqkv_ref[l], d_swo_ref[l], d_sbo_ref[l])
        y = _ln(t, d_ln2g_ref[l], d_ln2b_ref[l])
        t = t + _mha(y, memory, smask, d_xwqkv_ref[l], d_xbqkv_ref[l], d_xwo_ref[l], d_xbo_ref[l])
        y = _ln(t, d_ln3g_ref[l], d_ln3b_ref[l])
        t = t + _ffn(y, d_w1_ref[l], d_b1_ref[l], d_w2_ref[l], d_b2_ref[l])
    out_ref[...] = _ln(t, d_lng_ref[...], d_lnb_ref[...])


# ================================ JAX wrapper =================================
def transformer_forward(params, src, tgt, src_mask, tgt_mask, memory_matrix):
    B, S_src, _ = src.shape
    S_tgt = tgt.shape[1]
    pe = params['pe']                                          # precomputed at init

    # src_embed / tgt_embed glue: PE add + token-embedding gather (dynamic gather
    # stays in XLA; it is a single tiny op).
    src_pe = src + pe[None, :S_src, :]
    tgt_emb = (jnp.take(params['tgt_embed'], tgt, axis=0) * math.sqrt(D_MODEL)
               + pe[None, :S_tgt, :])

    enc, dec, cmn = params['enc'], params['dec'], params['cmn']
    inputs = [
        src_pe, tgt_emb,
        src_mask.astype(jnp.float32), tgt_mask.astype(jnp.float32),
        memory_matrix,
        cmn['wqkv'], cmn['bqkv'], cmn['wo'], cmn['bo'],
        enc['attn_wqkv'], enc['attn_bqkv'], enc['attn_wo'], enc['attn_bo'],
        enc['w1'], enc['b1'], enc['w2'], enc['b2'],
        enc['ln1_g'], enc['ln1_b'], enc['ln2_g'], enc['ln2_b'],
        enc['ln_g'], enc['ln_b'],
        dec['sattn_wqkv'], dec['sattn_bqkv'], dec['sattn_wo'], dec['sattn_bo'],
        dec['xattn_wqkv'], dec['xattn_bqkv'], dec['xattn_wo'], dec['xattn_bo'],
        dec['w1'], dec['b1'], dec['w2'], dec['b2'],
        dec['ln1_g'], dec['ln1_b'], dec['ln2_g'], dec['ln2_b'], dec['ln3_g'], dec['ln3_b'],
        dec['ln_g'], dec['ln_b'],
    ]
    vmem = pl.BlockSpec(memory_space=pltpu.MemorySpace.VMEM)
    return pl.pallas_call(
        _transformer_kernel,
        out_shape=jax.ShapeDtypeStruct((B, S_tgt, D_MODEL), jnp.float32),
        in_specs=[vmem] * len(inputs),
        out_specs=vmem,
    )(*inputs)


# ============================ parameter init ==================================
def make_pe(max_len, d):
    pos = jnp.arange(max_len, dtype=jnp.float32)[:, None]
    div = jnp.exp(jnp.arange(0, d, 2, dtype=jnp.float32) * (-math.log(10000.0) / d))
    pe = jnp.zeros((max_len, d), jnp.float32)
    pe = pe.at[:, 0::2].set(jnp.sin(pos * div))
    pe = pe.at[:, 1::2].set(jnp.cos(pos * div))
    return pe


def init_params(key):
    keys = iter(jax.random.split(key, 256))

    def dense(d_in, d_out):
        w = jax.random.normal(next(keys), (d_in, d_out), jnp.float32) * 0.02
        return w, jnp.zeros((d_out,), jnp.float32)

    def attn_params():
        wq, bq = dense(D_MODEL, D_MODEL)
        wk, bk = dense(D_MODEL, D_MODEL)
        wv, bv = dense(D_MODEL, D_MODEL)
        wo, bo = dense(D_MODEL, D_MODEL)
        return {'wqkv': jnp.concatenate([wq, wk, wv], axis=1),              # (D, 3D)
                'bqkv': jnp.concatenate([bq, bk, bv]).reshape(1, 3 * D_MODEL),
                'wo': wo, 'bo': bo.reshape(1, D_MODEL)}

    def ffn_params():
        w1, b1 = dense(D_MODEL, D_FF)
        w2, b2 = dense(D_FF, D_MODEL)
        return {'w1': w1, 'b1': b1.reshape(1, D_FF),
                'w2': w2, 'b2': b2.reshape(1, D_MODEL)}

    def ln():
        return jnp.ones((1, D_MODEL), jnp.float32), jnp.zeros((1, D_MODEL), jnp.float32)

    enc_layers, dec_layers = [], []
    for _ in range(N_LAYERS):
        g1, b1 = ln(); g2, b2 = ln()
        enc_layers.append({'attn': attn_params(), 'ffn': ffn_params(),
                           'ln1_g': g1, 'ln1_b': b1, 'ln2_g': g2, 'ln2_b': b2})
    for _ in range(N_LAYERS):
        g1, b1 = ln(); g2, b2 = ln(); g3, b3 = ln()
        dec_layers.append({'sattn': attn_params(), 'xattn': attn_params(),
                           'ffn': ffn_params(),
                           'ln1_g': g1, 'ln1_b': b1, 'ln2_g': g2, 'ln2_b': b2,
                           'ln3_g': g3, 'ln3_b': b3})

    def stack(layers, *path):
        def get(layer):
            v = layer
            for k in path:
                v = v[k]
            return v
        return jnp.stack([get(l) for l in layers])

    enc = {
        'attn_wqkv': stack(enc_layers, 'attn', 'wqkv'),
        'attn_bqkv': stack(enc_layers, 'attn', 'bqkv'),
        'attn_wo':   stack(enc_layers, 'attn', 'wo'),
        'attn_bo':   stack(enc_layers, 'attn', 'bo'),
        'w1': stack(enc_layers, 'ffn', 'w1'), 'b1': stack(enc_layers, 'ffn', 'b1'),
        'w2': stack(enc_layers, 'ffn', 'w2'), 'b2': stack(enc_layers, 'ffn', 'b2'),
        'ln1_g': stack(enc_layers, 'ln1_g'), 'ln1_b': stack(enc_layers, 'ln1_b'),
        'ln2_g': stack(enc_layers, 'ln2_g'), 'ln2_b': stack(enc_layers, 'ln2_b'),
    }
    enc['ln_g'], enc['ln_b'] = ln()

    dec = {
        'sattn_wqkv': stack(dec_layers, 'sattn', 'wqkv'),
        'sattn_bqkv': stack(dec_layers, 'sattn', 'bqkv'),
        'sattn_wo':   stack(dec_layers, 'sattn', 'wo'),
        'sattn_bo':   stack(dec_layers, 'sattn', 'bo'),
        'xattn_wqkv': stack(dec_layers, 'xattn', 'wqkv'),
        'xattn_bqkv': stack(dec_layers, 'xattn', 'bqkv'),
        'xattn_wo':   stack(dec_layers, 'xattn', 'wo'),
        'xattn_bo':   stack(dec_layers, 'xattn', 'bo'),
        'w1': stack(dec_layers, 'ffn', 'w1'), 'b1': stack(dec_layers, 'ffn', 'b1'),
        'w2': stack(dec_layers, 'ffn', 'w2'), 'b2': stack(dec_layers, 'ffn', 'b2'),
        'ln1_g': stack(dec_layers, 'ln1_g'), 'ln1_b': stack(dec_layers, 'ln1_b'),
        'ln2_g': stack(dec_layers, 'ln2_g'), 'ln2_b': stack(dec_layers, 'ln2_b'),
        'ln3_g': stack(dec_layers, 'ln3_g'), 'ln3_b': stack(dec_layers, 'ln3_b'),
    }
    dec['ln_g'], dec['ln_b'] = ln()

    fuse_w, fuse_b = dense(2 * D_MODEL, D_MODEL)   # declared in __init__, unused in forward
    return {
        'pe': make_pe(MAX_LEN, D_MODEL),
        'tgt_embed': jax.random.normal(next(keys), (VOCAB, D_MODEL), jnp.float32) * 0.02,
        'cmn': attn_params(),
        'enc': enc, 'dec': dec,
        'fuse_feature': {'w': fuse_w, 'b': fuse_b},
    }


# ================================== main ======================================
if __name__ == "__main__":
    key = jax.random.PRNGKey(0)
    kp, ks, kt, km = jax.random.split(key, 4)

    B, S_SRC, S_TGT = 2, 8, 8
    params = init_params(kp)
    src = jax.random.normal(ks, (B, S_SRC, D_MODEL), jnp.float32)
    tgt = jax.random.randint(kt, (B, S_TGT), 0, VOCAB, dtype=jnp.int32)
    src_mask = jnp.ones((B, 1, S_SRC), jnp.float32)
    tgt_mask = jnp.broadcast_to(jnp.tril(jnp.ones((S_TGT, S_TGT), jnp.float32))[None],
                                (B, S_TGT, S_TGT))
    memory_matrix = jax.random.normal(km, (CMN_SLOTS, D_MODEL), jnp.float32)

    out = jax.jit(transformer_forward)(params, src, tgt, src_mask, tgt_mask, memory_matrix)
    out = jax.block_until_ready(out)
    assert out.shape == (B, S_TGT, D_MODEL)
    assert bool(jnp.all(jnp.isfinite(out)))
    print("KERNEL_OK")
</pallas_src>

<mosaic_0001>
module attributes {stable_mosaic.version = 11 : i64} {
  func.func @_transformer_kernel(%arg0: memref<2x8x32xf32, #tpu.memory_space<vmem>>, %arg1: memref<2x8x32xf32, #tpu.memory_space<vmem>>, %arg2: memref<2x1x8xf32, #tpu.memory_space<vmem>>, %arg3: memref<2x8x8xf32, #tpu.memory_space<vmem>>, %arg4: memref<16x32xf32, #tpu.memory_space<vmem>>, %arg5: memref<32x96xf32, #tpu.memory_space<vmem>>, %arg6: memref<1x96xf32, #tpu.memory_space<vmem>>, %arg7: memref<32x32xf32, #tpu.memory_space<vmem>>, %arg8: memref<1x32xf32, #tpu.memory_space<vmem>>, %arg9: memref<2x32x96xf32, #tpu.memory_space<vmem>>, %arg10: memref<2x1x96xf32, #tpu.memory_space<vmem>>, %arg11: memref<2x32x32xf32, #tpu.memory_space<vmem>>, %arg12: memref<2x1x32xf32, #tpu.memory_space<vmem>>, %arg13: memref<2x32x64xf32, #tpu.memory_space<vmem>>, %arg14: memref<2x1x64xf32, #tpu.memory_space<vmem>>, %arg15: memref<2x64x32xf32, #tpu.memory_space<vmem>>, %arg16: memref<2x1x32xf32, #tpu.memory_space<vmem>>, %arg17: memref<2x1x32xf32, #tpu.memory_space<vmem>>, %arg18: memref<2x1x32xf32, #tpu.memory_space<vmem>>, %arg19: memref<2x1x32xf32, #tpu.memory_space<vmem>>, %arg20: memref<2x1x32xf32, #tpu.memory_space<vmem>>, %arg21: memref<1x32xf32, #tpu.memory_space<vmem>>, %arg22: memref<1x32xf32, #tpu.memory_space<vmem>>, %arg23: memref<2x32x96xf32, #tpu.memory_space<vmem>>, %arg24: memref<2x1x96xf32, #tpu.memory_space<vmem>>, %arg25: memref<2x32x32xf32, #tpu.memory_space<vmem>>, %arg26: memref<2x1x32xf32, #tpu.memory_space<vmem>>, %arg27: memref<2x32x96xf32, #tpu.memory_space<vmem>>, %arg28: memref<2x1x96xf32, #tpu.memory_space<vmem>>, %arg29: memref<2x32x32xf32, #tpu.memory_space<vmem>>, %arg30: memref<2x1x32xf32, #tpu.memory_space<vmem>>, %arg31: memref<2x32x64xf32, #tpu.memory_space<vmem>>, %arg32: memref<2x1x64xf32, #tpu.memory_space<vmem>>, %arg33: memref<2x64x32xf32, #tpu.memory_space<vmem>>, %arg34: memref<2x1x32xf32, #tpu.memory_space<vmem>>, %arg35: memref<2x1x32xf32, #tpu.memory_space<vmem>>, %arg36: memref<2x1x32xf32, #tpu.memory_space<vmem>>, %arg37: memref<2x1x32xf32, #tpu.memory_space<vmem>>, %arg38: memref<2x1x32xf32, #tpu.memory_space<vmem>>, %arg39: memref<2x1x32xf32, #tpu.memory_space<vmem>>, %arg40: memref<2x1x32xf32, #tpu.memory_space<vmem>>, %arg41: memref<1x32xf32, #tpu.memory_space<vmem>>, %arg42: memref<1x32xf32, #tpu.memory_space<vmem>>, %arg43: memref<2x8x32xf32, #tpu.memory_space<vmem>>) attributes {dimension_semantics = [], scalar_prefetch = 0 : i64, scratch_operands = 0 : i64, tpu.core_type = #tpu.core_type<tc>} {
    %c0 = arith.constant 0 : index
    %c0_0 = arith.constant 0 : index
    %c0_1 = arith.constant 0 : index
    %0 = vector.load %arg2[%c0, %c0_0, %c0_1] : memref<2x1x8xf32, #tpu.memory_space<vmem>>, vector<2x1x8xf32>
    %c0_2 = arith.constant 0 : index
    %c0_3 = arith.constant 0 : index
    %c0_4 = arith.constant 0 : index
    %1 = vector.load %arg3[%c0_2, %c0_3, %c0_4] : memref<2x8x8xf32, #tpu.memory_space<vmem>>, vector<2x8x8xf32>
    %c0_5 = arith.constant 0 : index
    %c0_6 = arith.constant 0 : index
    %c0_7 = arith.constant 0 : index
    %2 = vector.load %arg0[%c0_5, %c0_6, %c0_7] : memref<2x8x32xf32, #tpu.memory_space<vmem>>, vector<2x8x32xf32>
    %c0_8 = arith.constant 0 : index
    %c0_9 = arith.constant 0 : index
    %c0_10 = arith.constant 0 : index
    %3 = vector.load %arg17[%c0_8, %c0_9, %c0_10] : memref<2x1x32xf32, #tpu.memory_space<vmem>>, vector<1x1x32xf32>
    %4 = vector.shape_cast %3 : vector<1x1x32xf32> to vector<1x32xf32>
    %c0_11 = arith.constant 0 : index
    %c0_12 = arith.constant 0 : index
    %c0_13 = arith.constant 0 : index
    %5 = vector.load %arg18[%c0_11, %c0_12, %c0_13] : memref<2x1x32xf32, #tpu.memory_space<vmem>>, vector<1x1x32xf32>
    %6 = vector.shape_cast %5 : vector<1x1x32xf32> to vector<1x32xf32>
    %7 = vector.shape_cast %2 : vector<2x8x32xf32> to vector<16x32xf32>
    %cst = arith.constant dense<0.000000e+00> : vector<16xf32>
    %8 = vector.multi_reduction <add>, %7, %cst [1] : vector<16x32xf32> to vector<16xf32>
    %9 = vector.shape_cast %8 : vector<16xf32> to vector<16x1xf32>
    %cst_14 = arith.constant 3.200000e+01 : f32
    %10 = vector.broadcast %cst_14 : f32 to vector<16x1xf32>
    %11 = arith.divf %9, %10 : vector<16x1xf32>
    %12 = vector.broadcast %11 : vector<16x1xf32> to vector<16x32xf32>
    %13 = arith.subf %7, %12 : vector<16x32xf32>
    %14 = arith.mulf %13, %13 : vector<16x32xf32>
    %cst_15 = arith.constant dense<0.000000e+00> : vector<16xf32>
    %15 = vector.multi_reduction <add>, %14, %cst_15 [1] : vector<16x32xf32> to vector<16xf32>
    %16 = vector.shape_cast %15 : vector<16xf32> to vector<16x1xf32>
    %cst_16 = arith.constant 3.100000e+01 : f32
    %17 = vector.broadcast %cst_16 : f32 to vector<16x1xf32>
    %18 = arith.divf %16, %17 : vector<16x1xf32>
    %19 = math.sqrt %18 : vector<16x1xf32>
    %cst_17 = arith.constant 9.99999997E-7 : f32
    %20 = vector.broadcast %cst_17 : f32 to vector<16x1xf32>
    %21 = arith.addf %19, %20 : vector<16x1xf32>
    %22 = tpu.reciprocal %21 {approx = true} : vector<16x1xf32> -> vector<16x1xf32>
    %23 = vector.broadcast %11 : vector<16x1xf32> to vector<16x32xf32>
    %24 = arith.subf %7, %23 : vector<16x32xf32>
    %25 = vector.broadcast %4 : vector<1x32xf32> to vector<16x32xf32>
    %26 = arith.mulf %25, %24 : vector<16x32xf32>
    %27 = vector.broadcast %22 : vector<16x1xf32> to vector<16x32xf32>
    %28 = arith.mulf %26, %27 : vector<16x32xf32>
    %29 = vector.broadcast %6 : vector<1x32xf32> to vector<16x32xf32>
    %30 = arith.addf %28, %29 : vector<16x32xf32>
    %31 = vector.shape_cast %30 : vector<16x32xf32> to vector<2x8x32xf32>
    %c0_18 = arith.constant 0 : index
    %c0_19 = arith.constant 0 : index
    %c0_20 = arith.constant 0 : index
    %32 = vector.load %arg9[%c0_18, %c0_19, %c0_20] : memref<2x32x96xf32, #tpu.memory_space<vmem>>, vector<1x32x96xf32>
    %33 = vector.shape_cast %32 : vector<1x32x96xf32> to vector<32x96xf32>
    %c0_21 = arith.constant 0 : index
    %c0_22 = arith.constant 0 : index
    %c0_23 = arith.constant 0 : index
    %34 = vector.load %arg10[%c0_21, %c0_22, %c0_23] : memref<2x1x96xf32, #tpu.memory_space<vmem>>, vector<1x1x96xf32>
    %35 = vector.shape_cast %34 : vector<1x1x96xf32> to vector<1x96xf32>
    %c0_24 = arith.constant 0 : index
    %c0_25 = arith.constant 0 : index
    %c0_26 = arith.constant 0 : index
    %36 = vector.load %arg11[%c0_24, %c0_25, %c0_26] : memref<2x32x32xf32, #tpu.memory_space<vmem>>, vector<1x32x32xf32>
    %37 = vector.shape_cast %36 : vector<1x32x32xf32> to vector<32x32xf32>
    %c0_27 = arith.constant 0 : index
    %c0_28 = arith.constant 0 : index
    %c0_29 = arith.constant 0 : index
    %38 = vector.load %arg12[%c0_27, %c0_28, %c0_29] : memref<2x1x32xf32, #tpu.memory_space<vmem>>, vector<1x1x32xf32>
    %39 = vector.shape_cast %38 : vector<1x1x32xf32> to vector<1x32xf32>
    %40 = vector.shape_cast %31 : vector<2x8x32xf32> to vector<16x32xf32>
    %41 = vector.shape_cast %31 : vector<2x8x32xf32> to vector<16x32xf32>
    %42 = vector.extract_strided_slice %33 {offsets = [0, 0], sizes = [32, 32], strides = [1, 1]} : vector<32x96xf32> to vector<32x32xf32>
    %cst_30 = arith.constant dense<0.000000e+00> : vector<16x32xf32>
    %43 = tpu.matmul %40, %42, %cst_30 {dimension_numbers = #tpu.dot_dimension_numbers<[1], [0], [0], [1], [0, 0, 1, 1], [], []>} : vector<16x32xf32>, vector<32x32xf32>, vector<16x32xf32> -> vector<16x32xf32>
    %44 = vector.extract_strided_slice %35 {offsets = [0, 0], sizes = [1, 32], strides = [1, 1]} : vector<1x96xf32> to vector<1x32xf32>
    %45 = vector.broadcast %44 : vector<1x32xf32> to vector<16x32xf32>
    %46 = arith.addf %43, %45 : vector<16x32xf32>
    %47 = vector.extract_strided_slice %33 {offsets = [0, 32], sizes = [32, 32], strides = [1, 1]} : vector<32x96xf32> to vector<32x32xf32>
    %cst_31 = arith.constant dense<0.000000e+00> : vector<16x32xf32>
    %48 = tpu.matmul %41, %47, %cst_31 {dimension_numbers = #tpu.dot_dimension_numbers<[1], [0], [0], [1], [0, 0, 1, 1], [], []>} : vector<16x32xf32>, vector<32x32xf32>, vector<16x32xf32> -> vector<16x32xf32>
    %49 = vector.extract_strided_slice %35 {offsets = [0, 32], sizes = [1, 32], strides = [1, 1]} : vector<1x96xf32> to vector<1x32xf32>
    %50 = vector.broadcast %49 : vector<1x32xf32> to vector<16x32xf32>
    %51 = arith.addf %48, %50 : vector<16x32xf32>
    %52 = vector.extract_strided_slice %33 {offsets = [0, 64], sizes = [32, 32], strides = [1, 1]} : vector<32x96xf32> to vector<32x32xf32>
    %cst_32 = arith.constant dense<0.000000e+00> : vector<16x32xf32>
    %53 = tpu.matmul %41, %52, %cst_32 {dimension_numbers = #tpu.dot_dimension_numbers<[1], [0], [0], [1], [0, 0, 1, 1], [], []>} : vector<16x32xf32>, vector<32x32xf32>, vector<16x32xf32> -> vector<16x32xf32>
    %54 = vector.extract_strided_slice %35 {offsets = [0, 64], sizes = [1, 32], strides = [1, 1]} : vector<1x96xf32> to vector<1x32xf32>
    %55 = vector.broadcast %54 : vector<1x32xf32> to vector<16x32xf32>
    %56 = arith.addf %53, %55 : vector<16x32xf32>
    %57 = vector.shape_cast %46 : vector<16x32xf32> to vector<2x8x32xf32>
    %58 = vector.shape_cast %51 : vector<16x32xf32> to vector<2x8x32xf32>
    %59 = vector.shape_cast %56 : vector<16x32xf32> to vector<2x8x32xf32>
    %cst_33 = arith.constant 0.000000e+00 : f32
    %60 = vector.broadcast %cst_33 : f32 to vector<2x1x8xf32>
    %61 = arith.cmpf ogt, %0, %60 : vector<2x1x8xf32>
    %62 = vector.shape_cast %61 : vector<2x1x8xi1> to vector<2x1x8xi1>
    %63 = vector.broadcast %62 : vector<2x1x8xi1> to vector<2x8x8xi1>
    %64 = vector.extract_strided_slice %57 {offsets = [0, 0, 0], sizes = [2, 8, 8], strides = [1, 1, 1]} : vector<2x8x32xf32> to vector<2x8x8xf32>
    %65 = vector.extract_strided_slice %58 {offsets = [0, 0, 0], sizes = [2, 8, 8], strides = [1, 1, 1]} : vector<2x8x32xf32> to vector<2x8x8xf32>
    "tpu.trace_start"() <{level = 10 : i32, message = "bqd,bkd->bqk"}> : () -> ()
    %cst_34 = arith.constant dense<0.000000e+00> : vector<2x8x8xf32>
    %66 = tpu.matmul %64, %65, %cst_34 {dimension_numbers = #tpu.dot_dimension_numbers<[2], [2], [1], [1], [0, 0, 0, 1, 1, 1], [0], [0]>} : vector<2x8x8xf32>, vector<2x8x8xf32>, vector<2x8x8xf32> -> vector<2x8x8xf32>
    "tpu.trace_stop"() : () -> ()
    %cst_35 = arith.constant 0.353553385 : f32
    %67 = vector.broadcast %cst_35 : f32 to vector<2x8x8xf32>
    %68 = arith.mulf %66, %67 : vector<2x8x8xf32>
    %cst_36 = arith.constant -1.000000e+09 : f32
    %69 = vector.broadcast %cst_36 : f32 to vector<2x8x8xf32>
    %70 = arith.select %63, %68, %69 : vector<2x8x8xi1>, vector<2x8x8xf32>
    %cst_37 = arith.constant dense<0xFF800000> : vector<2x8xf32>
    %71 = vector.multi_reduction <maximumf>, %70, %cst_37 [2] : vector<2x8x8xf32> to vector<2x8xf32>
    %72 = vector.shape_cast %71 : vector<2x8xf32> to vector<2x8x1xf32>
    %73 = vector.broadcast %72 : vector<2x8x1xf32> to vector<2x8x8xf32>
    %74 = arith.subf %70, %73 : vector<2x8x8xf32>
    %75 = math.exp %74 : vector<2x8x8xf32>
    %cst_38 = arith.constant dense<0.000000e+00> : vector<2x8xf32>
    %76 = vector.multi_reduction <add>, %75, %cst_38 [2] : vector<2x8x8xf32> to vector<2x8xf32>
    %77 = vector.shape_cast %76 : vector<2x8xf32> to vector<2x8x1xf32>
    %78 = tpu.reciprocal %77 {approx = true} : vector<2x8x1xf32> -> vector<2x8x1xf32>
    %79 = vector.broadcast %78 : vector<2x8x1xf32> to vector<2x8x8xf32>
    %80 = arith.mulf %75, %79 : vector<2x8x8xf32>
    %81 = vector.extract_strided_slice %59 {offsets = [0, 0, 0], sizes = [2, 8, 8], strides = [1, 1, 1]} : vector<2x8x32xf32> to vector<2x8x8xf32>
    "tpu.trace_start"() <{level = 10 : i32, message = "bqk,bkd->bqd"}> : () -> ()
    %cst_39 = arith.constant dense<0.000000e+00> : vector<2x8x8xf32>
    %82 = tpu.matmul %80, %81, %cst_39 {dimension_numbers = #tpu.dot_dimension_numbers<[2], [1], [1], [2], [0, 0, 0, 1, 1, 2], [0], [0]>} : vector<2x8x8xf32>, vector<2x8x8xf32>, vector<2x8x8xf32> -> vector<2x8x8xf32>
    "tpu.trace_stop"() : () -> ()
    %83 = vector.shape_cast %82 : vector<2x8x8xf32> to vector<16x8xf32>
    %84 = vector.extract_strided_slice %37 {offsets = [0, 0], sizes = [8, 32], strides = [1, 1]} : vector<32x32xf32> to vector<8x32xf32>
    %cst_40 = arith.constant dense<0.000000e+00> : vector<16x32xf32>
    %85 = tpu.matmul %83, %84, %cst_40 {dimension_numbers = #tpu.dot_dimension_numbers<[1], [0], [0], [1], [0, 0, 1, 1], [], []>} : vector<16x8xf32>, vector<8x32xf32>, vector<16x32xf32> -> vector<16x32xf32>
    %86 = vector.extract_strided_slice %57 {offsets = [0, 0, 8], sizes = [2, 8, 8], strides = [1, 1, 1]} : vector<2x8x32xf32> to vector<2x8x8xf32>
    %87 = vector.extract_strided_slice %58 {offsets = [0, 0, 8], sizes = [2, 8, 8], strides = [1, 1, 1]} : vector<2x8x32xf32> to vector<2x8x8xf32>
    "tpu.trace_start"() <{level = 10 : i32, message = "bqd,bkd->bqk"}> : () -> ()
    %cst_41 = arith.constant dense<0.000000e+00> : vector<2x8x8xf32>
    %88 = tpu.matmul %86, %87, %cst_41 {dimension_numbers = #tpu.dot_dimension_numbers<[2], [2], [1], [1], [0, 0, 0, 1, 1, 1], [0], [0]>} : vector<2x8x8xf32>, vector<2x8x8xf32>, vector<2x8x8xf32> -> vector<2x8x8xf32>
    "tpu.trace_stop"() : () -> ()
    %cst_42 = arith.constant 0.353553385 : f32
    %89 = vector.broadcast %cst_42 : f32 to vector<2x8x8xf32>
    %90 = arith.mulf %88, %89 : vector<2x8x8xf32>
    %cst_43 = arith.constant -1.000000e+09 : f32
    %91 = vector.broadcast %cst_43 : f32 to vector<2x8x8xf32>
    %92 = arith.select %63, %90, %91 : vector<2x8x8xi1>, vector<2x8x8xf32>
    %cst_44 = arith.constant dense<0xFF800000> : vector<2x8xf32>
    %93 = vector.multi_reduction <maximumf>, %92, %cst_44 [2] : vector<2x8x8xf32> to vector<2x8xf32>
    %94 = vector.shape_cast %93 : vector<2x8xf32> to vector<2x8x1xf32>
    %95 = vector.broadcast %94 : vector<2x8x1xf32> to vector<2x8x8xf32>
    %96 = arith.subf %92, %95 : vector<2x8x8xf32>
    %97 = math.exp %96 : vector<2x8x8xf32>
    %cst_45 = arith.constant dense<0.000000e+00> : vector<2x8xf32>
    %98 = vector.multi_reduction <add>, %97, %cst_45 [2] : vector<2x8x8xf32> to vector<2x8xf32>
    %99 = vector.shape_cast %98 : vector<2x8xf32> to vector<2x8x1xf32>
    %100 = tpu.reciprocal %99 {approx = true} : vector<2x8x1xf32> -> vector<2x8x1xf32>
    %101 = vector.broadcast %100 : vector<2x8x1xf32> to vector<2x8x8xf32>
    %102 = arith.mulf %97, %101 : vector<2x8x8xf32>
    %103 = vector.extract_strided_slice %59 {offsets = [0, 0, 8], sizes = [2, 8, 8], strides = [1, 1, 1]} : vector<2x8x32xf32> to vector<2x8x8xf32>
    "tpu.trace_start"() <{level = 10 : i32, message = "bqk,bkd->bqd"}> : () -> ()
    %cst_46 = arith.constant dense<0.000000e+00> : vector<2x8x8xf32>
    %104 = tpu.matmul %102, %103, %cst_46 {dimension_numbers = #tpu.dot_dimension_numbers<[2], [1], [1], [2], [0, 0, 0, 1, 1, 2], [0], [0]>} : vector<2x8x8xf32>, vector<2x8x8xf32>, vector<2x8x8xf32> -> vector<2x8x8xf32>
    "tpu.trace_stop"() : () -> ()
    %105 = vector.shape_cast %104 : vector<2x8x8xf32> to vector<16x8xf32>
    %106 = vector.extract_strided_slice %37 {offsets = [8, 0], sizes = [8, 32], strides = [1, 1]} : vector<32x32xf32> to vector<8x32xf32>
    %cst_47 = arith.constant dense<0.000000e+00> : vector<16x32xf32>
    %107 = tpu.matmul %105, %106, %cst_47 {dimension_numbers = #tpu.dot_dimension_numbers<[1], [0], [0], [1], [0, 0, 1, 1], [], []>} : vector<16x8xf32>, vector<8x32xf32>, vector<16x32xf32> -> vector<16x32xf32>
    %108 = arith.addf %85, %107 : vector<16x32xf32>
    %109 = vector.extract_strided_slice %57 {offsets = [0, 0, 16], sizes = [2, 8, 8], strides = [1, 1, 1]} : vector<2x8x32xf32> to vector<2x8x8xf32>
    %110 = vector.extract_strided_slice %58 {offsets = [0, 0, 16], sizes = [2, 8, 8], strides = [1, 1, 1]} : vector<2x8x32xf32> to vector<2x8x8xf32>
    "tpu.trace_start"() <{level = 10 : i32, message = "bqd,bkd->bqk"}> : () -> ()
    %cst_48 = arith.constant dense<0.000000e+00> : vector<2x8x8xf32>
    %111 = tpu.matmul %109, %110, %cst_48 {dimension_numbers = #tpu.dot_dimension_numbers<[2], [2], [1], [1], [0, 0, 0, 1, 1, 1], [0], [0]>} : vector<2x8x8xf32>, vector<2x8x8xf32>, vector<2x8x8xf32> -> vector<2x8x8xf32>
    "tpu.trace_stop"() : () -> ()
    %cst_49 = arith.constant 0.353553385 : f32
    %112 = vector.broadcast %cst_49 : f32 to vector<2x8x8xf32>
    %113 = arith.mulf %111, %112 : vector<2x8x8xf32>
    %cst_50 = arith.constant -1.000000e+09 : f32
    %114 = vector.broadcast %cst_50 : f32 to vector<2x8x8xf32>
    %115 = arith.select %63, %113, %114 : vector<2x8x8xi1>, vector<2x8x8xf32>
    %cst_51 = arith.constant dense<0xFF800000> : vector<2x8xf32>
    %116 = vector.multi_reduction <maximumf>, %115, %cst_51 [2] : vector<2x8x8xf32> to vector<2x8xf32>
    %117 = vector.shape_cast %116 : vector<2x8xf32> to vector<2x8x1xf32>
    %118 = vector.broadcast %117 : vector<2x8x1xf32> to vector<2x8x8xf32>
    %119 = arith.subf %115, %118 : vector<2x8x8xf32>
    %120 = math.exp %119 : vector<2x8x8xf32>
    %cst_52 = arith.constant dense<0.000000e+00> : vector<2x8xf32>
    %121 = vector.multi_reduction <add>, %120, %cst_52 [2] : vector<2x8x8xf32> to vector<2x8xf32>
    %122 = vector.shape_cast %121 : vector<2x8xf32> to vector<2x8x1xf32>
    %123 = tpu.reciprocal %122 {approx = true} : vector<2x8x1xf32> -> vector<2x8x1xf32>
    %124 = vector.broadcast %123 : vector<2x8x1xf32> to vector<2x8x8xf32>
    %125 = arith.mulf %120, %124 : vector<2x8x8xf32>
    %126 = vector.extract_strided_slice %59 {offsets = [0, 0, 16], sizes = [2, 8, 8], strides = [1, 1, 1]} : vector<2x8x32xf32> to vector<2x8x8xf32>
    "tpu.trace_start"() <{level = 10 : i32, message = "bqk,bkd->bqd"}> : () -> ()
    %cst_53 = arith.constant dense<0.000000e+00> : vector<2x8x8xf32>
    %127 = tpu.matmul %125, %126, %cst_53 {dimension_numbers = #tpu.dot_dimension_numbers<[2], [1], [1], [2], [0, 0, 0, 1, 1, 2], [0], [0]>} : vector<2x8x8xf32>, vector<2x8x8xf32>, vector<2x8x8xf32> -> vector<2x8x8xf32>
    "tpu.trace_stop"() : () -> ()
    %128 = vector.shape_cast %127 : vector<2x8x8xf32> to vector<16x8xf32>
    %129 = vector.extract_strided_slice %37 {offsets = [16, 0], sizes = [8, 32], strides = [1, 1]} : vector<32x32xf32> to vector<8x32xf32>
    %cst_54 = arith.constant dense<0.000000e+00> : vector<16x32xf32>
    %130 = tpu.matmul %128, %129, %cst_54 {dimension_numbers = #tpu.dot_dimension_numbers<[1], [0], [0], [1], [0, 0, 1, 1], [], []>} : vector<16x8xf32>, vector<8x32xf32>, vector<16x32xf32> -> vector<16x32xf32>
    %131 = arith.addf %108, %130 : vector<16x32xf32>
    %132 = vector.extract_strided_slice %57 {offsets = [0, 0, 24], sizes = [2, 8, 8], strides = [1, 1, 1]} : vector<2x8x32xf32> to vector<2x8x8xf32>
    %133 = vector.extract_strided_slice %58 {offsets = [0, 0, 24], sizes = [2, 8, 8], strides = [1, 1, 1]} : vector<2x8x32xf32> to vector<2x8x8xf32>
    "tpu.trace_start"() <{level = 10 : i32, message = "bqd,bkd->bqk"}> : () -> ()
    %cst_55 = arith.constant dense<0.000000e+00> : vector<2x8x8xf32>
    %134 = tpu.matmul %132, %133, %cst_55 {dimension_numbers = #tpu.dot_dimension_numbers<[2], [2], [1], [1], [0, 0, 0, 1, 1, 1], [0], [0]>} : vector<2x8x8xf32>, vector<2x8x8xf32>, vector<2x8x8xf32> -> vector<2x8x8xf32>
    "tpu.trace_stop"() : () -> ()
    %cst_56 = arith.constant 0.353553385 : f32
    %135 = vector.broadcast %cst_56 : f32 to vector<2x8x8xf32>
    %136 = arith.mulf %134, %135 : vector<2x8x8xf32>
    %cst_57 = arith.constant -1.000000e+09 : f32
    %137 = vector.broadcast %cst_57 : f32 to vector<2x8x8xf32>
    %138 = arith.select %63, %136, %137 : vector<2x8x8xi1>, vector<2x8x8xf32>
    %cst_58 = arith.constant dense<0xFF800000> : vector<2x8xf32>
    %139 = vector.multi_reduction <maximumf>, %138, %cst_58 [2] : vector<2x8x8xf32> to vector<2x8xf32>
    %140 = vector.shape_cast %139 : vector<2x8xf32> to vector<2x8x1xf32>
    %141 = vector.broadcast %140 : vector<2x8x1xf32> to vector<2x8x8xf32>
    %142 = arith.subf %138, %141 : vector<2x8x8xf32>
    %143 = math.exp %142 : vector<2x8x8xf32>
    %cst_59 = arith.constant dense<0.000000e+00> : vector<2x8xf32>
    %144 = vector.multi_reduction <add>, %143, %cst_59 [2] : vector<2x8x8xf32> to vector<2x8xf32>
    %145 = vector.shape_cast %144 : vector<2x8xf32> to vector<2x8x1xf32>
    %146 = tpu.reciprocal %145 {approx = true} : vector<2x8x1xf32> -> vector<2x8x1xf32>
    %147 = vector.broadcast %146 : vector<2x8x1xf32> to vector<2x8x8xf32>
    %148 = arith.mulf %143, %147 : vector<2x8x8xf32>
    %149 = vector.extract_strided_slice %59 {offsets = [0, 0, 24], sizes = [2, 8, 8], strides = [1, 1, 1]} : vector<2x8x32xf32> to vector<2x8x8xf32>
    "tpu.trace_start"() <{level = 10 : i32, message = "bqk,bkd->bqd"}> : () -> ()
    %cst_60 = arith.constant dense<0.000000e+00> : vector<2x8x8xf32>
    %150 = tpu.matmul %148, %149, %cst_60 {dimension_numbers = #tpu.dot_dimension_numbers<[2], [1], [1], [2], [0, 0, 0, 1, 1, 2], [0], [0]>} : vector<2x8x8xf32>, vector<2x8x8xf32>, vector<2x8x8xf32> -> vector<2x8x8xf32>
    "tpu.trace_stop"() : () -> ()
    %151 = vector.shape_cast %150 : vector<2x8x8xf32> to vector<16x8xf32>
    %152 = vector.extract_strided_slice %37 {offsets = [24, 0], sizes = [8, 32], strides = [1, 1]} : vector<32x32xf32> to vector<8x32xf32>
    %cst_61 = arith.constant dense<0.000000e+00> : vector<16x32xf32>
    %153 = tpu.matmul %151, %152, %cst_61 {dimension_numbers = #tpu.dot_dimension_numbers<[1], [0], [0], [1], [0, 0, 1, 1], [], []>} : vector<16x8xf32>, vector<8x32xf32>, vector<16x32xf32> -> vector<16x32xf32>
    %154 = arith.addf %131, %153 : vector<16x32xf32>
    %155 = vector.broadcast %39 : vector<1x32xf32> to vector<16x32xf32>
    %156 = arith.addf %154, %155 : vector<16x32xf32>
    %157 = vector.shape_cast %156 : vector<16x32xf32> to vector<2x8x32xf32>
    %158 = arith.addf %2, %157 : vector<2x8x32xf32>
    %c0_62 = arith.constant 0 : index
    %c0_63 = arith.constant 0 : index
    %c0_64 = arith.constant 0 : index
    %159 = vector.load %arg19[%c0_62, %c0_63, %c0_64] : memref<2x1x32xf32, #tpu.memory_space<vmem>>, vector<1x1x32xf32>
    %160 = vector.shape_cast %159 : vector<1x1x32xf32> to vector<1x32xf32>
    %c0_65 = arith.constant 0 : index
    %c0_66 = arith.constant 0 : index
    %c0_67 = arith.constant 0 : index
    %161 = vector.load %arg20[%c0_65, %c0_66, %c0_67] : memref<2x1x32xf32, #tpu.memory_space<vmem>>, vector<1x1x32xf32>
    %162 = vector.shape_cast %161 : vector<1x1x32xf32> to vector<1x32xf32>
    %163 = vector.shape_cast %158 : vector<2x8x32xf32> to vector<16x32xf32>
    %cst_68 = arith.constant dense<0.000000e+00> : vector<16xf32>
    %164 = vector.multi_reduction <add>, %163, %cst_68 [1] : vector<16x32xf32> to vector<16xf32>
    %165 = vector.shape_cast %164 : vector<16xf32> to vector<16x1xf32>
    %cst_69 = arith.constant 3.200000e+01 : f32
    %166 = vector.broadcast %cst_69 : f32 to vector<16x1xf32>
    %167 = arith.divf %165, %166 : vector<16x1xf32>
    %168 = vector.broadcast %167 : vector<16x1xf32> to vector<16x32xf32>
    %169 = arith.subf %163, %168 : vector<16x32xf32>
    %170 = arith.mulf %169, %169 : vector<16x32xf32>
    %cst_70 = arith.constant dense<0.000000e+00> : vector<16xf32>
    %171 = vector.multi_reduction <add>, %170, %cst_70 [1] : vector<16x32xf32> to vector<16xf32>
    %172 = vector.shape_cast %171 : vector<16xf32> to vector<16x1xf32>
    %cst_71 = arith.constant 3.100000e+01 : f32
    %173 = vector.broadcast %cst_71 : f32 to vector<16x1xf32>
    %174 = arith.divf %172, %173 : vector<16x1xf32>
    %175 = math.sqrt %174 : vector<16x1xf32>
    %cst_72 = arith.constant 9.99999997E-7 : f32
    %176 = vector.broadcast %cst_72 : f32 to vector<16x1xf32>
    %177 = arith.addf %175, %176 : vector<16x1xf32>
    %178 = tpu.reciprocal %177 {approx = true} : vector<16x1xf32> -> vector<16x1xf32>
    %179 = vector.broadcast %167 : vector<16x1xf32> to vector<16x32xf32>
    %180 = arith.subf %163, %179 : vector<16x32xf32>
    %181 = vector.broadcast %160 : vector<1x32xf32> to vector<16x32xf32>
    %182 = arith.mulf %181, %180 : vector<16x32xf32>
    %183 = vector.broadcast %178 : vector<16x1xf32> to vector<16x32xf32>
    %184 = arith.mulf %182, %183 : vector<16x32xf32>
    %185 = vector.broadcast %162 : vector<1x32xf32> to vector<16x32xf32>
    %186 = arith.addf %184, %185 : vector<16x32xf32>
    %187 = vector.shape_cast %186 : vector<16x32xf32> to vector<2x8x32xf32>
    %c0_73 = arith.constant 0 : index
    %c0_74 = arith.constant 0 : index
    %c0_75 = arith.constant 0 : index
    %188 = vector.load %arg13[%c0_73, %c0_74, %c0_75] : memref<2x32x64xf32, #tpu.memory_space<vmem>>, vector<1x32x64xf32>
    %189 = vector.shape_cast %188 : vector<1x32x64xf32> to vector<32x64xf32>
    %c0_76 = arith.constant 0 : index
    %c0_77 = arith.constant 0 : index
    %c0_78 = arith.constant 0 : index
    %190 = vector.load %arg14[%c0_76, %c0_77, %c0_78] : memref<2x1x64xf32, #tpu.memory_space<vmem>>, vector<1x1x64xf32>
    %191 = vector.shape_cast %190 : vector<1x1x64xf32> to vector<1x64xf32>
    %c0_79 = arith.constant 0 : index
    %c0_80 = arith.constant 0 : index
    %c0_81 = arith.constant 0 : index
    %192 = vector.load %arg15[%c0_79, %c0_80, %c0_81] : memref<2x64x32xf32, #tpu.memory_space<vmem>>, vector<1x64x32xf32>
    %193 = vector.shape_cast %192 : vector<1x64x32xf32> to vector<64x32xf32>
    %c0_82 = arith.constant 0 : index
    %c0_83 = arith.constant 0 : index
    %c0_84 = arith.constant 0 : index
    %194 = vector.load %arg16[%c0_82, %c0_83, %c0_84] : memref<2x1x32xf32, #tpu.memory_space<vmem>>, vector<1x1x32xf32>
    %195 = vector.shape_cast %194 : vector<1x1x32xf32> to vector<1x32xf32>
    %196 = vector.shape_cast %187 : vector<2x8x32xf32> to vector<16x32xf32>
    %cst_85 = arith.constant dense<0.000000e+00> : vector<16x64xf32>
    %197 = tpu.matmul %196, %189, %cst_85 {dimension_numbers = #tpu.dot_dimension_numbers<[1], [0], [0], [1], [0, 0, 1, 1], [], []>} : vector<16x32xf32>, vector<32x64xf32>, vector<16x64xf32> -> vector<16x64xf32>
    %198 = vector.broadcast %191 : vector<1x64xf32> to vector<16x64xf32>
    %199 = arith.addf %197, %198 : vector<16x64xf32>
    %cst_86 = arith.constant 0.000000e+00 : f32
    %200 = vector.broadcast %cst_86 : f32 to vector<16x64xf32>
    %201 = arith.maximumf %199, %200 : vector<16x64xf32>
    %cst_87 = arith.constant dense<0.000000e+00> : vector<16x32xf32>
    %202 = tpu.matmul %201, %193, %cst_87 {dimension_numbers = #tpu.dot_dimension_numbers<[1], [0], [0], [1], [0, 0, 1, 1], [], []>} : vector<16x64xf32>, vector<64x32xf32>, vector<16x32xf32> -> vector<16x32xf32>
    %203 = vector.broadcast %195 : vector<1x32xf32> to vector<16x32xf32>
    %204 = arith.addf %202, %203 : vector<16x32xf32>
    %205 = vector.shape_cast %204 : vector<16x32xf32> to vector<2x8x32xf32>
    %206 = arith.addf %158, %205 : vector<2x8x32xf32>
    %c1 = arith.constant 1 : index
    %c0_88 = arith.constant 0 : index
    %c0_89 = arith.constant 0 : index
    %207 = vector.load %arg17[%c1, %c0_88, %c0_89] : memref<2x1x32xf32, #tpu.memory_space<vmem>>, vector<1x1x32xf32>
    %208 = vector.shape_cast %207 : vector<1x1x32xf32> to vector<1x32xf32>
    %c1_90 = arith.constant 1 : index
    %c0_91 = arith.constant 0 : index
    %c0_92 = arith.constant 0 : index
    %209 = vector.load %arg18[%c1_90, %c0_91, %c0_92] : memref<2x1x32xf32, #tpu.memory_space<vmem>>, vector<1x1x32xf32>
    %210 = vector.shape_cast %209 : vector<1x1x32xf32> to vector<1x32xf32>
    %211 = vector.shape_cast %206 : vector<2x8x32xf32> to vector<16x32xf32>
    %cst_93 = arith.constant dense<0.000000e+00> : vector<16xf32>
    %212 = vector.multi_reduction <add>, %211, %cst_93 [1] : vector<16x32xf32> to vector<16xf32>
    %213 = vector.shape_cast %212 : vector<16xf32> to vector<16x1xf32>
    %cst_94 = arith.constant 3.200000e+01 : f32
    %214 = vector.broadcast %cst_94 : f32 to vector<16x1xf32>
    %215 = arith.divf %213, %214 : vector<16x1xf32>
    %216 = vector.broadcast %215 : vector<16x1xf32> to vector<16x32xf32>
    %217 = arith.subf %211, %216 : vector<16x32xf32>
    %218 = arith.mulf %217, %217 : vector<16x32xf32>
    %cst_95 = arith.constant dense<0.000000e+00> : vector<16xf32>
    %219 = vector.multi_reduction <add>, %218, %cst_95 [1] : vector<16x32xf32> to vector<16xf32>
    %220 = vector.shape_cast %219 : vector<16xf32> to vector<16x1xf32>
    %cst_96 = arith.constant 3.100000e+01 : f32
    %221 = vector.broadcast %cst_96 : f32 to vector<16x1xf32>
    %222 = arith.divf %220, %221 : vector<16x1xf32>
    %223 = math.sqrt %222 : vector<16x1xf32>
    %cst_97 = arith.constant 9.99999997E-7 : f32
    %224 = vector.broadcast %cst_97 : f32 to vector<16x1xf32>
    %225 = arith.addf %223, %224 : vector<16x1xf32>
    %226 = tpu.reciprocal %225 {approx = true} : vector<16x1xf32> -> vector<16x1xf32>
    %227 = vector.broadcast %215 : vector<16x1xf32> to vector<16x32xf32>
    %228 = arith.subf %211, %227 : vector<16x32xf32>
    %229 = vector.broadcast %208 : vector<1x32xf32> to vector<16x32xf32>
    %230 = arith.mulf %229, %228 : vector<16x32xf32>
    %231 = vector.broadcast %226 : vector<16x1xf32> to vector<16x32xf32>
    %232 = arith.mulf %230, %231 : vector<16x32xf32>
    %233 = vector.broadcast %210 : vector<1x32xf32> to vector<16x32xf32>
    %234 = arith.addf %232, %233 : vector<16x32xf32>
    %235 = vector.shape_cast %234 : vector<16x32xf32> to vector<2x8x32xf32>
    %c1_98 = arith.constant 1 : index
    %c0_99 = arith.constant 0 : index
    %c0_100 = arith.constant 0 : index
    %236 = vector.load %arg9[%c1_98, %c0_99, %c0_100] : memref<2x32x96xf32, #tpu.memory_space<vmem>>, vector<1x32x96xf32>
    %237 = vector.shape_cast %236 : vector<1x32x96xf32> to vector<32x96xf32>
    %c1_101 = arith.constant 1 : index
    %c0_102 = arith.constant 0 : index
    %c0_103 = arith.constant 0 : index
    %238 = vector.load %arg10[%c1_101, %c0_102, %c0_103] : memref<2x1x96xf32, #tpu.memory_space<vmem>>, vector<1x1x96xf32>
    %239 = vector.shape_cast %238 : vector<1x1x96xf32> to vector<1x96xf32>
    %c1_104 = arith.constant 1 : index
    %c0_105 = arith.constant 0 : index
    %c0_106 = arith.constant 0 : index
    %240 = vector.load %arg11[%c1_104, %c0_105, %c0_106] : memref<2x32x32xf32, #tpu.memory_space<vmem>>, vector<1x32x32xf32>
    %241 = vector.shape_cast %240 : vector<1x32x32xf32> to vector<32x32xf32>
    %c1_107 = arith.constant 1 : index
    %c0_108 = arith.constant 0 : index
    %c0_109 = arith.constant 0 : index
    %242 = vector.load %arg12[%c1_107, %c0_108, %c0_109] : memref<2x1x32xf32, #tpu.memory_space<vmem>>, vector<1x1x32xf32>
    %243 = vector.shape_cast %242 : vector<1x1x32xf32> to vector<1x32xf32>
    %244 = vector.shape_cast %235 : vector<2x8x32xf32> to vector<16x32xf32>
    %245 = vector.shape_cast %235 : vector<2x8x32xf32> to vector<16x32xf32>
    %246 = vector.extract_strided_slice %237 {offsets = [0, 0], sizes = [32, 32], strides = [1, 1]} : vector<32x96xf32> to vector<32x32xf32>
    %cst_110 = arith.constant dense<0.000000e+00> : vector<16x32xf32>
    %247 = tpu.matmul %244, %246, %cst_110 {dimension_numbers = #tpu.dot_dimension_numbers<[1], [0], [0], [1], [0, 0, 1, 1], [], []>} : vector<16x32xf32>, vector<32x32xf32>, vector<16x32xf32> -> vector<16x32xf32>
    %248 = vector.extract_strided_slice %239 {offsets = [0, 0], sizes = [1, 32], strides = [1, 1]} : vector<1x96xf32> to vector<1x32xf32>
    %249 = vector.broadcast %248 : vector<1x32xf32> to vector<16x32xf32>
    %250 = arith.addf %247, %249 : vector<16x32xf32>
    %251 = vector.extract_strided_slice %237 {offsets = [0, 32], sizes = [32, 32], strides = [1, 1]} : vector<32x96xf32> to vector<32x32xf32>
    %cst_111 = arith.constant dense<0.000000e+00> : vector<16x32xf32>
    %252 = tpu.matmul %245, %251, %cst_111 {dimension_numbers = #tpu.dot_dimension_numbers<[1], [0], [0], [1], [0, 0, 1, 1], [], []>} : vector<16x32xf32>, vector<32x32xf32>, vector<16x32xf32> -> vector<16x32xf32>
    %253 = vector.extract_strided_slice %239 {offsets = [0, 32], sizes = [1, 32], strides = [1, 1]} : vector<1x96xf32> to vector<1x32xf32>
    %254 = vector.broadcast %253 : vector<1x32xf32> to vector<16x32xf32>
    %255 = arith.addf %252, %254 : vector<16x32xf32>
    %256 = vector.extract_strided_slice %237 {offsets = [0, 64], sizes = [32, 32], strides = [1, 1]} : vector<32x96xf32> to vector<32x32xf32>
    %cst_112 = arith.constant dense<0.000000e+00> : vector<16x32xf32>
    %257 = tpu.matmul %245, %256, %cst_112 {dimension_numbers = #tpu.dot_dimension_numbers<[1], [0], [0], [1], [0, 0, 1, 1], [], []>} : vector<16x32xf32>, vector<32x32xf32>, vector<16x32xf32> -> vector<16x32xf32>
    %258 = vector.extract_strided_slice %239 {offsets = [0, 64], sizes = [1, 32], strides = [1, 1]} : vector<1x96xf32> to vector<1x32xf32>
    %259 = vector.broadcast %258 : vector<1x32xf32> to vector<16x32xf32>
    %260 = arith.addf %257, %259 : vector<16x32xf32>
    %261 = vector.shape_cast %250 : vector<16x32xf32> to vector<2x8x32xf32>
    %262 = vector.shape_cast %255 : vector<16x32xf32> to vector<2x8x32xf32>
    %263 = vector.shape_cast %260 : vector<16x32xf32> to vector<2x8x32xf32>
    %cst_113 = arith.constant 0.000000e+00 : f32
    %264 = vector.broadcast %cst_113 : f32 to vector<2x1x8xf32>
    %265 = arith.cmpf ogt, %0, %264 : vector<2x1x8xf32>
    %266 = vector.shape_cast %265 : vector<2x1x8xi1> to vector<2x1x8xi1>
    %267 = vector.broadcast %266 : vector<2x1x8xi1> to vector<2x8x8xi1>
    %268 = vector.extract_strided_slice %261 {offsets = [0, 0, 0], sizes = [2, 8, 8], strides = [1, 1, 1]} : vector<2x8x32xf32> to vector<2x8x8xf32>
    %269 = vector.extract_strided_slice %262 {offsets = [0, 0, 0], sizes = [2, 8, 8], strides = [1, 1, 1]} : vector<2x8x32xf32> to vector<2x8x8xf32>
    "tpu.trace_start"() <{level = 10 : i32, message = "bqd,bkd->bqk"}> : () -> ()
    %cst_114 = arith.constant dense<0.000000e+00> : vector<2x8x8xf32>
    %270 = tpu.matmul %268, %269, %cst_114 {dimension_numbers = #tpu.dot_dimension_numbers<[2], [2], [1], [1], [0, 0, 0, 1, 1, 1], [0], [0]>} : vector<2x8x8xf32>, vector<2x8x8xf32>, vector<2x8x8xf32> -> vector<2x8x8xf32>
    "tpu.trace_stop"() : () -> ()
    %cst_115 = arith.constant 0.353553385 : f32
    %271 = vector.broadcast %cst_115 : f32 to vector<2x8x8xf32>
    %272 = arith.mulf %270, %271 : vector<2x8x8xf32>
    %cst_116 = arith.constant -1.000000e+09 : f32
    %273 = vector.broadcast %cst_116 : f32 to vector<2x8x8xf32>
    %274 = arith.select %267, %272, %273 : vector<2x8x8xi1>, vector<2x8x8xf32>
    %cst_117 = arith.constant dense<0xFF800000> : vector<2x8xf32>
    %275 = vector.multi_reduction <maximumf>, %274, %cst_117 [2] : vector<2x8x8xf32> to vector<2x8xf32>
    %276 = vector.shape_cast %275 : vector<2x8xf32> to vector<2x8x1xf32>
    %277 = vector.broadcast %276 : vector<2x8x1xf32> to vector<2x8x8xf32>
    %278 = arith.subf %274, %277 : vector<2x8x8xf32>
    %279 = math.exp %278 : vector<2x8x8xf32>
    %cst_118 = arith.constant dense<0.000000e+00> : vector<2x8xf32>
    %280 = vector.multi_reduction <add>, %279, %cst_118 [2] : vector<2x8x8xf32> to vector<2x8xf32>
    %281 = vector.shape_cast %280 : vector<2x8xf32> to vector<2x8x1xf32>
    %282 = tpu.reciprocal %281 {approx = true} : vector<2x8x1xf32> -> vector<2x8x1xf32>
    %283 = vector.broadcast %282 : vector<2x8x1xf32> to vector<2x8x8xf32>
    %284 = arith.mulf %279, %283 : vector<2x8x8xf32>
    %285 = vector.extract_strided_slice %263 {offsets = [0, 0, 0], sizes = [2, 8, 8], strides = [1, 1, 1]} : vector<2x8x32xf32> to vector<2x8x8xf32>
    "tpu.trace_start"() <{level = 10 : i32, message = "bqk,bkd->bqd"}> : () -> ()
    %cst_119 = arith.constant dense<0.000000e+00> : vector<2x8x8xf32>
    %286 = tpu.matmul %284, %285, %cst_119 {dimension_numbers = #tpu.dot_dimension_numbers<[2], [1], [1], [2], [0, 0, 0, 1, 1, 2], [0], [0]>} : vector<2x8x8xf32>, vector<2x8x8xf32>, vector<2x8x8xf32> -> vector<2x8x8xf32>
    "tpu.trace_stop"() : () -> ()
    %287 = vector.shape_cast %286 : vector<2x8x8xf32> to vector<16x8xf32>
    %288 = vector.extract_strided_slice %241 {offsets = [0, 0], sizes = [8, 32], strides = [1, 1]} : vector<32x32xf32> to vector<8x32xf32>
    %cst_120 = arith.constant dense<0.000000e+00> : vector<16x32xf32>
    %289 = tpu.matmul %287, %288, %cst_120 {dimension_numbers = #tpu.dot_dimension_numbers<[1], [0], [0], [1], [0, 0, 1, 1], [], []>} : vector<16x8xf32>, vector<8x32xf32>, vector<16x32xf32> -> vector<16x32xf32>
    %290 = vector.extract_strided_slice %261 {offsets = [0, 0, 8], sizes = [2, 8, 8], strides = [1, 1, 1]} : vector<2x8x32xf32> to vector<2x8x8xf32>
    %291 = vector.extract_strided_slice %262 {offsets = [0, 0, 8], sizes = [2, 8, 8], strides = [1, 1, 1]} : vector<2x8x32xf32> to vector<2x8x8xf32>
    "tpu.trace_start"() <{level = 10 : i32, message = "bqd,bkd->bqk"}> : () -> ()
    %cst_121 = arith.constant dense<0.000000e+00> : vector<2x8x8xf32>
    %292 = tpu.matmul %290, %291, %cst_121 {dimension_numbers = #tpu.dot_dimension_numbers<[2], [2], [1], [1], [0, 0, 0, 1, 1, 1], [0], [0]>} : vector<2x8x8xf32>, vector<2x8x8xf32>, vector<2x8x8xf32> -> vector<2x8x8xf32>
    "tpu.trace_stop"() : () -> ()
    %cst_122 = arith.constant 0.353553385 : f32
    %293 = vector.broadcast %cst_122 : f32 to vector<2x8x8xf32>
    %294 = arith.mulf %292, %293 : vector<2x8x8xf32>
    %cst_123 = arith.constant -1.000000e+09 : f32
    %295 = vector.broadcast %cst_123 : f32 to vector<2x8x8xf32>
    %296 = arith.select %267, %294, %295 : vector<2x8x8xi1>, vector<2x8x8xf32>
    %cst_124 = arith.constant dense<0xFF800000> : vector<2x8xf32>
    %297 = vector.multi_reduction <maximumf>, %296, %cst_124 [2] : vector<2x8x8xf32> to vector<2x8xf32>
    %298 = vector.shape_cast %297 : vector<2x8xf32> to vector<2x8x1xf32>
    %299 = vector.broadcast %298 : vector<2x8x1xf32> to vector<2x8x8xf32>
    %300 = arith.subf %296, %299 : vector<2x8x8xf32>
    %301 = math.exp %300 : vector<2x8x8xf32>
    %cst_125 = arith.constant dense<0.000000e+00> : vector<2x8xf32>
    %302 = vector.multi_reduction <add>, %301, %cst_125 [2] : vector<2x8x8xf32> to vector<2x8xf32>
    %303 = vector.shape_cast %302 : vector<2x8xf32> to vector<2x8x1xf32>
    %304 = tpu.reciprocal %303 {approx = true} : vector<2x8x1xf32> -> vector<2x8x1xf32>
    %305 = vector.broadcast %304 : vector<2x8x1xf32> to vector<2x8x8xf32>
    %306 = arith.mulf %301, %305 : vector<2x8x8xf32>
    %307 = vector.extract_strided_slice %263 {offsets = [0, 0, 8], sizes = [2, 8, 8], strides = [1, 1, 1]} : vector<2x8x32xf32> to vector<2x8x8xf32>
    "tpu.trace_start"() <{level = 10 : i32, message = "bqk,bkd->bqd"}> : () -> ()
    %cst_126 = arith.constant dense<0.000000e+00> : vector<2x8x8xf32>
    %308 = tpu.matmul %306, %307, %cst_126 {dimension_numbers = #tpu.dot_dimension_numbers<[2], [1], [1], [2], [0, 0, 0, 1, 1, 2], [0], [0]>} : vector<2x8x8xf32>, vector<2x8x8xf32>, vector<2x8x8xf32> -> vector<2x8x8xf32>
    "tpu.trace_stop"() : () -> ()
    %309 = vector.shape_cast %308 : vector<2x8x8xf32> to vector<16x8xf32>
    %310 = vector.extract_strided_slice %241 {offsets = [8, 0], sizes = [8, 32], strides = [1, 1]} : vector<32x32xf32> to vector<8x32xf32>
    %cst_127 = arith.constant dense<0.000000e+00> : vector<16x32xf32>
    %311 = tpu.matmul %309, %310, %cst_127 {dimension_numbers = #tpu.dot_dimension_numbers<[1], [0], [0], [1], [0, 0, 1, 1], [], []>} : vector<16x8xf32>, vector<8x32xf32>, vector<16x32xf32> -> vector<16x32xf32>
    %312 = arith.addf %289, %311 : vector<16x32xf32>
    %313 = vector.extract_strided_slice %261 {offsets = [0, 0, 16], sizes = [2, 8, 8], strides = [1, 1, 1]} : vector<2x8x32xf32> to vector<2x8x8xf32>
    %314 = vector.extract_strided_slice %262 {offsets = [0, 0, 16], sizes = [2, 8, 8], strides = [1, 1, 1]} : vector<2x8x32xf32> to vector<2x8x8xf32>
    "tpu.trace_start"() <{level = 10 : i32, message = "bqd,bkd->bqk"}> : () -> ()
    %cst_128 = arith.constant dense<0.000000e+00> : vector<2x8x8xf32>
    %315 = tpu.matmul %313, %314, %cst_128 {dimension_numbers = #tpu.dot_dimension_numbers<[2], [2], [1], [1], [0, 0, 0, 1, 1, 1], [0], [0]>} : vector<2x8x8xf32>, vector<2x8x8xf32>, vector<2x8x8xf32> -> vector<2x8x8xf32>
    "tpu.trace_stop"() : () -> ()
    %cst_129 = arith.constant 0.353553385 : f32
    %316 = vector.broadcast %cst_129 : f32 to vector<2x8x8xf32>
    %317 = arith.mulf %315, %316 : vector<2x8x8xf32>
    %cst_130 = arith.constant -1.000000e+09 : f32
    %318 = vector.broadcast %cst_130 : f32 to vector<2x8x8xf32>
    %319 = arith.select %267, %317, %318 : vector<2x8x8xi1>, vector<2x8x8xf32>
    %cst_131 = arith.constant dense<0xFF800000> : vector<2x8xf32>
    %320 = vector.multi_reduction <maximumf>, %319, %cst_131 [2] : vector<2x8x8xf32> to vector<2x8xf32>
    %321 = vector.shape_cast %320 : vector<2x8xf32> to vector<2x8x1xf32>
    %322 = vector.broadcast %321 : vector<2x8x1xf32> to vector<2x8x8xf32>
    %323 = arith.subf %319, %322 : vector<2x8x8xf32>
    %324 = math.exp %323 : vector<2x8x8xf32>
    %cst_132 = arith.constant dense<0.000000e+00> : vector<2x8xf32>
    %325 = vector.multi_reduction <add>, %324, %cst_132 [2] : vector<2x8x8xf32> to vector<2x8xf32>
    %326 = vector.shape_cast %325 : vector<2x8xf32> to vector<2x8x1xf32>
    %327 = tpu.reciprocal %326 {approx = true} : vector<2x8x1xf32> -> vector<2x8x1xf32>
    %328 = vector.broadcast %327 : vector<2x8x1xf32> to vector<2x8x8xf32>
    %329 = arith.mulf %324, %328 : vector<2x8x8xf32>
    %330 = vector.extract_strided_slice %263 {offsets = [0, 0, 16], sizes = [2, 8, 8], strides = [1, 1, 1]} : vector<2x8x32xf32> to vector<2x8x8xf32>
    "tpu.trace_start"() <{level = 10 : i32, message = "bqk,bkd->bqd"}> : () -> ()
    %cst_133 = arith.constant dense<0.000000e+00> : vector<2x8x8xf32>
    %331 = tpu.matmul %329, %330, %cst_133 {dimension_numbers = #tpu.dot_dimension_numbers<[2], [1], [1], [2], [0, 0, 0, 1, 1, 2], [0], [0]>} : vector<2x8x8xf32>, vector<2x8x8xf32>, vector<2x8x8xf32> -> vector<2x8x8xf32>
    "tpu.trace_stop"() : () -> ()
    %332 = vector.shape_cast %331 : vector<2x8x8xf32> to vector<16x8xf32>
    %333 = vector.extract_strided_slice %241 {offsets = [16, 0], sizes = [8, 32], strides = [1, 1]} : vector<32x32xf32> to vector<8x32xf32>
    %cst_134 = arith.constant dense<0.000000e+00> : vector<16x32xf32>
    %334 = tpu.matmul %332, %333, %cst_134 {dimension_numbers = #tpu.dot_dimension_numbers<[1], [0], [0], [1], [0, 0, 1, 1], [], []>} : vector<16x8xf32>, vector<8x32xf32>, vector<16x32xf32> -> vector<16x32xf32>
    %335 = arith.addf %312, %334 : vector<16x32xf32>
    %336 = vector.extract_strided_slice %261 {offsets = [0, 0, 24], sizes = [2, 8, 8], strides = [1, 1, 1]} : vector<2x8x32xf32> to vector<2x8x8xf32>
    %337 = vector.extract_strided_slice %262 {offsets = [0, 0, 24], sizes = [2, 8, 8], strides = [1, 1, 1]} : vector<2x8x32xf32> to vector<2x8x8xf32>
    "tpu.trace_start"() <{level = 10 : i32, message = "bqd,bkd->bqk"}> : () -> ()
    %cst_135 = arith.constant dense<0.000000e+00> : vector<2x8x8xf32>
    %338 = tpu.matmul %336, %337, %cst_135 {dimension_numbers = #tpu.dot_dimension_numbers<[2], [2], [1], [1], [0, 0, 0, 1, 1, 1], [0], [0]>} : vector<2x8x8xf32>, vector<2x8x8xf32>, vector<2x8x8xf32> -> vector<2x8x8xf32>
    "tpu.trace_stop"() : () -> ()
    %cst_136 = arith.constant 0.353553385 : f32
    %339 = vector.broadcast %cst_136 : f32 to vector<2x8x8xf32>
    %340 = arith.mulf %338, %339 : vector<2x8x8xf32>
    %cst_137 = arith.constant -1.000000e+09 : f32
    %341 = vector.broadcast %cst_137 : f32 to vector<2x8x8xf32>
    %342 = arith.select %267, %340, %341 : vector<2x8x8xi1>, vector<2x8x8xf32>
    %cst_138 = arith.constant dense<0xFF800000> : vector<2x8xf32>
    %343 = vector.multi_reduction <maximumf>, %342, %cst_138 [2] : vector<2x8x8xf32> to vector<2x8xf32>
    %344 = vector.shape_cast %343 : vector<2x8xf32> to vector<2x8x1xf32>
    %345 = vector.broadcast %344 : vector<2x8x1xf32> to vector<2x8x8xf32>
    %346 = arith.subf %342, %345 : vector<2x8x8xf32>
    %347 = math.exp %346 : vector<2x8x8xf32>
    %cst_139 = arith.constant dense<0.000000e+00> : vector<2x8xf32>
    %348 = vector.multi_reduction <add>, %347, %cst_139 [2] : vector<2x8x8xf32> to vector<2x8xf32>
    %349 = vector.shape_cast %348 : vector<2x8xf32> to vector<2x8x1xf32>
    %350 = tpu.reciprocal %349 {approx = true} : vector<2x8x1xf32> -> vector<2x8x1xf32>
    %351 = vector.broadcast %350 : vector<2x8x1xf32> to vector<2x8x8xf32>
    %352 = arith.mulf %347, %351 : vector<2x8x8xf32>
    %353 = vector.extract_strided_slice %263 {offsets = [0, 0, 24], sizes = [2, 8, 8], strides = [1, 1, 1]} : vector<2x8x32xf32> to vector<2x8x8xf32>
    "tpu.trace_start"() <{level = 10 : i32, message = "bqk,bkd->bqd"}> : () -> ()
    %cst_140 = arith.constant dense<0.000000e+00> : vector<2x8x8xf32>
    %354 = tpu.matmul %352, %353, %cst_140 {dimension_numbers = #tpu.dot_dimension_numbers<[2], [1], [1], [2], [0, 0, 0, 1, 1, 2], [0], [0]>} : vector<2x8x8xf32>, vector<2x8x8xf32>, vector<2x8x8xf32> -> vector<2x8x8xf32>
    "tpu.trace_stop"() : () -> ()
    %355 = vector.shape_cast %354 : vector<2x8x8xf32> to vector<16x8xf32>
    %356 = vector.extract_strided_slice %241 {offsets = [24, 0], sizes = [8, 32], strides = [1, 1]} : vector<32x32xf32> to vector<8x32xf32>
    %cst_141 = arith.constant dense<0.000000e+00> : vector<16x32xf32>
    %357 = tpu.matmul %355, %356, %cst_141 {dimension_numbers = #tpu.dot_dimension_numbers<[1], [0], [0], [1], [0, 0, 1, 1], [], []>} : vector<16x8xf32>, vector<8x32xf32>, vector<16x32xf32> -> vector<16x32xf32>
    %358 = arith.addf %335, %357 : vector<16x32xf32>
    %359 = vector.broadcast %243 : vector<1x32xf32> to vector<16x32xf32>
    %360 = arith.addf %358, %359 : vector<16x32xf32>
    %361 = vector.shape_cast %360 : vector<16x32xf32> to vector<2x8x32xf32>
    %362 = arith.addf %206, %361 : vector<2x8x32xf32>
    %c1_142 = arith.constant 1 : index
    %c0_143 = arith.constant 0 : index
    %c0_144 = arith.constant 0 : index
    %363 = vector.load %arg19[%c1_142, %c0_143, %c0_144] : memref<2x1x32xf32, #tpu.memory_space<vmem>>, vector<1x1x32xf32>
    %364 = vector.shape_cast %363 : vector<1x1x32xf32> to vector<1x32xf32>
    %c1_145 = arith.constant 1 : index
    %c0_146 = arith.constant 0 : index
    %c0_147 = arith.constant 0 : index
    %365 = vector.load %arg20[%c1_145, %c0_146, %c0_147] : memref<2x1x32xf32, #tpu.memory_space<vmem>>, vector<1x1x32xf32>
    %366 = vector.shape_cast %365 : vector<1x1x32xf32> to vector<1x32xf32>
    %367 = vector.shape_cast %362 : vector<2x8x32xf32> to vector<16x32xf32>
    %cst_148 = arith.constant dense<0.000000e+00> : vector<16xf32>
    %368 = vector.multi_reduction <add>, %367, %cst_148 [1] : vector<16x32xf32> to vector<16xf32>
    %369 = vector.shape_cast %368 : vector<16xf32> to vector<16x1xf32>
    %cst_149 = arith.constant 3.200000e+01 : f32
    %370 = vector.broadcast %cst_149 : f32 to vector<16x1xf32>
    %371 = arith.divf %369, %370 : vector<16x1xf32>
    %372 = vector.broadcast %371 : vector<16x1xf32> to vector<16x32xf32>
    %373 = arith.subf %367, %372 : vector<16x32xf32>
    %374 = arith.mulf %373, %373 : vector<16x32xf32>
    %cst_150 = arith.constant dense<0.000000e+00> : vector<16xf32>
    %375 = vector.multi_reduction <add>, %374, %cst_150 [1] : vector<16x32xf32> to vector<16xf32>
    %376 = vector.shape_cast %375 : vector<16xf32> to vector<16x1xf32>
    %cst_151 = arith.constant 3.100000e+01 : f32
    %377 = vector.broadcast %cst_151 : f32 to vector<16x1xf32>
    %378 = arith.divf %376, %377 : vector<16x1xf32>
    %379 = math.sqrt %378 : vector<16x1xf32>
    %cst_152 = arith.constant 9.99999997E-7 : f32
    %380 = vector.broadcast %cst_152 : f32 to vector<16x1xf32>
    %381 = arith.addf %379, %380 : vector<16x1xf32>
    %382 = tpu.reciprocal %381 {approx = true} : vector<16x1xf32> -> vector<16x1xf32>
    %383 = vector.broadcast %371 : vector<16x1xf32> to vector<16x32xf32>
    %384 = arith.subf %367, %383 : vector<16x32xf32>
    %385 = vector.broadcast %364 : vector<1x32xf32> to vector<16x32xf32>
    %386 = arith.mulf %385, %384 : vector<16x32xf32>
    %387 = vector.broadcast %382 : vector<16x1xf32> to vector<16x32xf32>
    %388 = arith.mulf %386, %387 : vector<16x32xf32>
    %389 = vector.broadcast %366 : vector<1x32xf32> to vector<16x32xf32>
    %390 = arith.addf %388, %389 : vector<16x32xf32>
    %391 = vector.shape_cast %390 : vector<16x32xf32> to vector<2x8x32xf32>
    %c1_153 = arith.constant 1 : index
    %c0_154 = arith.constant 0 : index
    %c0_155 = arith.constant 0 : index
    %392 = vector.load %arg13[%c1_153, %c0_154, %c0_155] : memref<2x32x64xf32, #tpu.memory_space<vmem>>, vector<1x32x64xf32>
    %393 = vector.shape_cast %392 : vector<1x32x64xf32> to vector<32x64xf32>
    %c1_156 = arith.constant 1 : index
    %c0_157 = arith.constant 0 : index
    %c0_158 = arith.constant 0 : index
    %394 = vector.load %arg14[%c1_156, %c0_157, %c0_158] : memref<2x1x64xf32, #tpu.memory_space<vmem>>, vector<1x1x64xf32>
    %395 = vector.shape_cast %394 : vector<1x1x64xf32> to vector<1x64xf32>
    %c1_159 = arith.constant 1 : index
    %c0_160 = arith.constant 0 : index
    %c0_161 = arith.constant 0 : index
    %396 = vector.load %arg15[%c1_159, %c0_160, %c0_161] : memref<2x64x32xf32, #tpu.memory_space<vmem>>, vector<1x64x32xf32>
    %397 = vector.shape_cast %396 : vector<1x64x32xf32> to vector<64x32xf32>
    %c1_162 = arith.constant 1 : index
    %c0_163 = arith.constant 0 : index
    %c0_164 = arith.constant 0 : index
    %398 = vector.load %arg16[%c1_162, %c0_163, %c0_164] : memref<2x1x32xf32, #tpu.memory_space<vmem>>, vector<1x1x32xf32>
    %399 = vector.shape_cast %398 : vector<1x1x32xf32> to vector<1x32xf32>
    %400 = vector.shape_cast %391 : vector<2x8x32xf32> to vector<16x32xf32>
    %cst_165 = arith.constant dense<0.000000e+00> : vector<16x64xf32>
    %401 = tpu.matmul %400, %393, %cst_165 {dimension_numbers = #tpu.dot_dimension_numbers<[1], [0], [0], [1], [0, 0, 1, 1], [], []>} : vector<16x32xf32>, vector<32x64xf32>, vector<16x64xf32> -> vector<16x64xf32>
    %402 = vector.broadcast %395 : vector<1x64xf32> to vector<16x64xf32>
    %403 = arith.addf %401, %402 : vector<16x64xf32>
    %cst_166 = arith.constant 0.000000e+00 : f32
    %404 = vector.broadcast %cst_166 : f32 to vector<16x64xf32>
    %405 = arith.maximumf %403, %404 : vector<16x64xf32>
    %cst_167 = arith.constant dense<0.000000e+00> : vector<16x32xf32>
    %406 = tpu.matmul %405, %397, %cst_167 {dimension_numbers = #tpu.dot_dimension_numbers<[1], [0], [0], [1], [0, 0, 1, 1], [], []>} : vector<16x64xf32>, vector<64x32xf32>, vector<16x32xf32> -> vector<16x32xf32>
    %407 = vector.broadcast %399 : vector<1x32xf32> to vector<16x32xf32>
    %408 = arith.addf %406, %407 : vector<16x32xf32>
    %409 = vector.shape_cast %408 : vector<16x32xf32> to vector<2x8x32xf32>
    %410 = arith.addf %362, %409 : vector<2x8x32xf32>
    %c0_168 = arith.constant 0 : index
    %c0_169 = arith.constant 0 : index
    %411 = vector.load %arg21[%c0_168, %c0_169] : memref<1x32xf32, #tpu.memory_space<vmem>>, vector<1x32xf32>
    %c0_170 = arith.constant 0 : index
    %c0_171 = arith.constant 0 : index
    %412 = vector.load %arg22[%c0_170, %c0_171] : memref<1x32xf32, #tpu.memory_space<vmem>>, vector<1x32xf32>
    %413 = vector.shape_cast %410 : vector<2x8x32xf32> to vector<16x32xf32>
    %cst_172 = arith.constant dense<0.000000e+00> : vector<16xf32>
    %414 = vector.multi_reduction <add>, %413, %cst_172 [1] : vector<16x32xf32> to vector<16xf32>
    %415 = vector.shape_cast %414 : vector<16xf32> to vector<16x1xf32>
    %cst_173 = arith.constant 3.200000e+01 : f32
    %416 = vector.broadcast %cst_173 : f32 to vector<16x1xf32>
    %417 = arith.divf %415, %416 : vector<16x1xf32>
    %418 = vector.broadcast %417 : vector<16x1xf32> to vector<16x32xf32>
    %419 = arith.subf %413, %418 : vector<16x32xf32>
    %420 = arith.mulf %419, %419 : vector<16x32xf32>
    %cst_174 = arith.constant dense<0.000000e+00> : vector<16xf32>
    %421 = vector.multi_reduction <add>, %420, %cst_174 [1] : vector<16x32xf32> to vector<16xf32>
    %422 = vector.shape_cast %421 : vector<16xf32> to vector<16x1xf32>
    %cst_175 = arith.constant 3.100000e+01 : f32
    %423 = vector.broadcast %cst_175 : f32 to vector<16x1xf32>
    %424 = arith.divf %422, %423 : vector<16x1xf32>
    %425 = math.sqrt %424 : vector<16x1xf32>
    %cst_176 = arith.constant 9.99999997E-7 : f32
    %426 = vector.broadcast %cst_176 : f32 to vector<16x1xf32>
    %427 = arith.addf %425, %426 : vector<16x1xf32>
    %428 = tpu.reciprocal %427 {approx = true} : vector<16x1xf32> -> vector<16x1xf32>
    %429 = vector.broadcast %417 : vector<16x1xf32> to vector<16x32xf32>
    %430 = arith.subf %413, %429 : vector<16x32xf32>
    %431 = vector.broadcast %411 : vector<1x32xf32> to vector<16x32xf32>
    %432 = arith.mulf %431, %430 : vector<16x32xf32>
    %433 = vector.broadcast %428 : vector<16x1xf32> to vector<16x32xf32>
    %434 = arith.mulf %432, %433 : vector<16x32xf32>
    %435 = vector.broadcast %412 : vector<1x32xf32> to vector<16x32xf32>
    %436 = arith.addf %434, %435 : vector<16x32xf32>
    %437 = vector.shape_cast %436 : vector<16x32xf32> to vector<2x8x32xf32>
    %c0_177 = arith.constant 0 : index
    %c0_178 = arith.constant 0 : index
    %c0_179 = arith.constant 0 : index
    %438 = vector.load %arg1[%c0_177, %c0_178, %c0_179] : memref<2x8x32xf32, #tpu.memory_space<vmem>>, vector<2x8x32xf32>
    %c0_180 = arith.constant 0 : index
    %c0_181 = arith.constant 0 : index
    %439 = vector.load %arg4[%c0_180, %c0_181] : memref<16x32xf32, #tpu.memory_space<vmem>>, vector<16x32xf32>
    %c0_182 = arith.constant 0 : index
    %c0_183 = arith.constant 0 : index
    %440 = vector.load %arg5[%c0_182, %c0_183] : memref<32x96xf32, #tpu.memory_space<vmem>>, vector<32x96xf32>
    %c0_184 = arith.constant 0 : index
    %c0_185 = arith.constant 0 : index
    %441 = vector.load %arg6[%c0_184, %c0_185] : memref<1x96xf32, #tpu.memory_space<vmem>>, vector<1x96xf32>
    %c0_186 = arith.constant 0 : index
    %c0_187 = arith.constant 0 : index
    %442 = vector.load %arg7[%c0_186, %c0_187] : memref<32x32xf32, #tpu.memory_space<vmem>>, vector<32x32xf32>
    %c0_188 = arith.constant 0 : index
    %c0_189 = arith.constant 0 : index
    %443 = vector.load %arg8[%c0_188, %c0_189] : memref<1x32xf32, #tpu.memory_space<vmem>>, vector<1x32xf32>
    %444 = vector.shape_cast %438 : vector<2x8x32xf32> to vector<16x32xf32>
    %445 = vector.extract_strided_slice %440 {offsets = [0, 0], sizes = [32, 32], strides = [1, 1]} : vector<32x96xf32> to vector<32x32xf32>
    %cst_190 = arith.constant dense<0.000000e+00> : vector<16x32xf32>
    %446 = tpu.matmul %444, %445, %cst_190 {dimension_numbers = #tpu.dot_dimension_numbers<[1], [0], [0], [1], [0, 0, 1, 1], [], []>} : vector<16x32xf32>, vector<32x32xf32>, vector<16x32xf32> -> vector<16x32xf32>
    %447 = vector.extract_strided_slice %441 {offsets = [0, 0], sizes = [1, 32], strides = [1, 1]} : vector<1x96xf32> to vector<1x32xf32>
    %448 = vector.broadcast %447 : vector<1x32xf32> to vector<16x32xf32>
    %449 = arith.addf %446, %448 : vector<16x32xf32>
    %450 = vector.extract_strided_slice %440 {offsets = [0, 32], sizes = [32, 32], strides = [1, 1]} : vector<32x96xf32> to vector<32x32xf32>
    %cst_191 = arith.constant dense<0.000000e+00> : vector<16x32xf32>
    %451 = tpu.matmul %439, %450, %cst_191 {dimension_numbers = #tpu.dot_dimension_numbers<[1], [0], [0], [1], [0, 0, 1, 1], [], []>} : vector<16x32xf32>, vector<32x32xf32>, vector<16x32xf32> -> vector<16x32xf32>
    %452 = vector.extract_strided_slice %441 {offsets = [0, 32], sizes = [1, 32], strides = [1, 1]} : vector<1x96xf32> to vector<1x32xf32>
    %453 = vector.broadcast %452 : vector<1x32xf32> to vector<16x32xf32>
    %454 = arith.addf %451, %453 : vector<16x32xf32>
    %455 = vector.extract_strided_slice %440 {offsets = [0, 64], sizes = [32, 32], strides = [1, 1]} : vector<32x96xf32> to vector<32x32xf32>
    %cst_192 = arith.constant dense<0.000000e+00> : vector<16x32xf32>
    %456 = tpu.matmul %439, %455, %cst_192 {dimension_numbers = #tpu.dot_dimension_numbers<[1], [0], [0], [1], [0, 0, 1, 1], [], []>} : vector<16x32xf32>, vector<32x32xf32>, vector<16x32xf32> -> vector<16x32xf32>
    %457 = vector.extract_strided_slice %441 {offsets = [0, 64], sizes = [1, 32], strides = [1, 1]} : vector<1x96xf32> to vector<1x32xf32>
    %458 = vector.broadcast %457 : vector<1x32xf32> to vector<16x32xf32>
    %459 = arith.addf %456, %458 : vector<16x32xf32>
    %460 = vector.extract_strided_slice %449 {offsets = [0, 0], sizes = [16, 8], strides = [1, 1]} : vector<16x32xf32> to vector<16x8xf32>
    %461 = vector.extract_strided_slice %454 {offsets = [0, 0], sizes = [16, 8], strides = [1, 1]} : vector<16x32xf32> to vector<16x8xf32>
    %462 = tpu.transpose %461, [1, 0] : vector<16x8xf32> -> vector<8x16xf32>
    %cst_193 = arith.constant dense<0.000000e+00> : vector<16x16xf32>
    %463 = tpu.matmul %460, %462, %cst_193 {dimension_numbers = #tpu.dot_dimension_numbers<[1], [0], [0], [1], [0, 0, 1, 1], [], []>} : vector<16x8xf32>, vector<8x16xf32>, vector<16x16xf32> -> vector<16x16xf32>
    %cst_194 = arith.constant 0.353553385 : f32
    %464 = vector.broadcast %cst_194 : f32 to vector<16x16xf32>
    %465 = arith.mulf %463, %464 : vector<16x16xf32>
    %cst_195 = arith.constant dense<0xFF800000> : vector<16xf32>
    %466 = vector.multi_reduction <maximumf>, %465, %cst_195 [1] : vector<16x16xf32> to vector<16xf32>
    %467 = vector.shape_cast %466 : vector<16xf32> to vector<16x1xf32>
    %468 = vector.broadcast %467 : vector<16x1xf32> to vector<16x16xf32>
    %469 = arith.subf %465, %468 : vector<16x16xf32>
    %470 = math.exp %469 : vector<16x16xf32>
    %cst_196 = arith.constant dense<0.000000e+00> : vector<16xf32>
    %471 = vector.multi_reduction <add>, %470, %cst_196 [1] : vector<16x16xf32> to vector<16xf32>
    %472 = vector.shape_cast %471 : vector<16xf32> to vector<16x1xf32>
    %473 = tpu.reciprocal %472 {approx = true} : vector<16x1xf32> -> vector<16x1xf32>
    %474 = vector.broadcast %473 : vector<16x1xf32> to vector<16x16xf32>
    %475 = arith.mulf %470, %474 : vector<16x16xf32>
    %476 = vector.extract_strided_slice %459 {offsets = [0, 0], sizes = [16, 8], strides = [1, 1]} : vector<16x32xf32> to vector<16x8xf32>
    %cst_197 = arith.constant dense<0.000000e+00> : vector<16x8xf32>
    %477 = tpu.matmul %475, %476, %cst_197 {dimension_numbers = #tpu.dot_dimension_numbers<[1], [0], [0], [1], [0, 0, 1, 1], [], []>} : vector<16x16xf32>, vector<16x8xf32>, vector<16x8xf32> -> vector<16x8xf32>
    %478 = vector.extract_strided_slice %442 {offsets = [0, 0], sizes = [8, 32], strides = [1, 1]} : vector<32x32xf32> to vector<8x32xf32>
    %cst_198 = arith.constant dense<0.000000e+00> : vector<16x32xf32>
    %479 = tpu.matmul %477, %478, %cst_198 {dimension_numbers = #tpu.dot_dimension_numbers<[1], [0], [0], [1], [0, 0, 1, 1], [], []>} : vector<16x8xf32>, vector<8x32xf32>, vector<16x32xf32> -> vector<16x32xf32>
    %480 = vector.extract_strided_slice %449 {offsets = [0, 8], sizes = [16, 8], strides = [1, 1]} : vector<16x32xf32> to vector<16x8xf32>
    %481 = vector.extract_strided_slice %454 {offsets = [0, 8], sizes = [16, 8], strides = [1, 1]} : vector<16x32xf32> to vector<16x8xf32>
    %482 = tpu.transpose %481, [1, 0] : vector<16x8xf32> -> vector<8x16xf32>
    %cst_199 = arith.constant dense<0.000000e+00> : vector<16x16xf32>
    %483 = tpu.matmul %480, %482, %cst_199 {dimension_numbers = #tpu.dot_dimension_numbers<[1], [0], [0], [1], [0, 0, 1, 1], [], []>} : vector<16x8xf32>, vector<8x16xf32>, vector<16x16xf32> -> vector<16x16xf32>
    %cst_200 = arith.constant 0.353553385 : f32
    %484 = vector.broadcast %cst_200 : f32 to vector<16x16xf32>
    %485 = arith.mulf %483, %484 : vector<16x16xf32>
    %cst_201 = arith.constant dense<0xFF800000> : vector<16xf32>
    %486 = vector.multi_reduction <maximumf>, %485, %cst_201 [1] : vector<16x16xf32> to vector<16xf32>
    %487 = vector.shape_cast %486 : vector<16xf32> to vector<16x1xf32>
    %488 = vector.broadcast %487 : vector<16x1xf32> to vector<16x16xf32>
    %489 = arith.subf %485, %488 : vector<16x16xf32>
    %490 = math.exp %489 : vector<16x16xf32>
    %cst_202 = arith.constant dense<0.000000e+00> : vector<16xf32>
    %491 = vector.multi_reduction <add>, %490, %cst_202 [1] : vector<16x16xf32> to vector<16xf32>
    %492 = vector.shape_cast %491 : vector<16xf32> to vector<16x1xf32>
    %493 = tpu.reciprocal %492 {approx = true} : vector<16x1xf32> -> vector<16x1xf32>
    %494 = vector.broadcast %493 : vector<16x1xf32> to vector<16x16xf32>
    %495 = arith.mulf %490, %494 : vector<16x16xf32>
    %496 = vector.extract_strided_slice %459 {offsets = [0, 8], sizes = [16, 8], strides = [1, 1]} : vector<16x32xf32> to vector<16x8xf32>
    %cst_203 = arith.constant dense<0.000000e+00> : vector<16x8xf32>
    %497 = tpu.matmul %495, %496, %cst_203 {dimension_numbers = #tpu.dot_dimension_numbers<[1], [0], [0], [1], [0, 0, 1, 1], [], []>} : vector<16x16xf32>, vector<16x8xf32>, vector<16x8xf32> -> vector<16x8xf32>
    %498 = vector.extract_strided_slice %442 {offsets = [8, 0], sizes = [8, 32], strides = [1, 1]} : vector<32x32xf32> to vector<8x32xf32>
    %cst_204 = arith.constant dense<0.000000e+00> : vector<16x32xf32>
    %499 = tpu.matmul %497, %498, %cst_204 {dimension_numbers = #tpu.dot_dimension_numbers<[1], [0], [0], [1], [0, 0, 1, 1], [], []>} : vector<16x8xf32>, vector<8x32xf32>, vector<16x32xf32> -> vector<16x32xf32>
    %500 = arith.addf %479, %499 : vector<16x32xf32>
    %501 = vector.extract_strided_slice %449 {offsets = [0, 16], sizes = [16, 8], strides = [1, 1]} : vector<16x32xf32> to vector<16x8xf32>
    %502 = vector.extract_strided_slice %454 {offsets = [0, 16], sizes = [16, 8], strides = [1, 1]} : vector<16x32xf32> to vector<16x8xf32>
    %503 = tpu.transpose %502, [1, 0] : vector<16x8xf32> -> vector<8x16xf32>
    %cst_205 = arith.constant dense<0.000000e+00> : vector<16x16xf32>
    %504 = tpu.matmul %501, %503, %cst_205 {dimension_numbers = #tpu.dot_dimension_numbers<[1], [0], [0], [1], [0, 0, 1, 1], [], []>} : vector<16x8xf32>, vector<8x16xf32>, vector<16x16xf32> -> vector<16x16xf32>
    %cst_206 = arith.constant 0.353553385 : f32
    %505 = vector.broadcast %cst_206 : f32 to vector<16x16xf32>
    %506 = arith.mulf %504, %505 : vector<16x16xf32>
    %cst_207 = arith.constant dense<0xFF800000> : vector<16xf32>
    %507 = vector.multi_reduction <maximumf>, %506, %cst_207 [1] : vector<16x16xf32> to vector<16xf32>
    %508 = vector.shape_cast %507 : vector<16xf32> to vector<16x1xf32>
    %509 = vector.broadcast %508 : vector<16x1xf32> to vector<16x16xf32>
    %510 = arith.subf %506, %509 : vector<16x16xf32>
    %511 = math.exp %510 : vector<16x16xf32>
    %cst_208 = arith.constant dense<0.000000e+00> : vector<16xf32>
    %512 = vector.multi_reduction <add>, %511, %cst_208 [1] : vector<16x16xf32> to vector<16xf32>
    %513 = vector.shape_cast %512 : vector<16xf32> to vector<16x1xf32>
    %514 = tpu.reciprocal %513 {approx = true} : vector<16x1xf32> -> vector<16x1xf32>
    %515 = vector.broadcast %514 : vector<16x1xf32> to vector<16x16xf32>
    %516 = arith.mulf %511, %515 : vector<16x16xf32>
    %517 = vector.extract_strided_slice %459 {offsets = [0, 16], sizes = [16, 8], strides = [1, 1]} : vector<16x32xf32> to vector<16x8xf32>
    %cst_209 = arith.constant dense<0.000000e+00> : vector<16x8xf32>
    %518 = tpu.matmul %516, %517, %cst_209 {dimension_numbers = #tpu.dot_dimension_numbers<[1], [0], [0], [1], [0, 0, 1, 1], [], []>} : vector<16x16xf32>, vector<16x8xf32>, vector<16x8xf32> -> vector<16x8xf32>
    %519 = vector.extract_strided_slice %442 {offsets = [16, 0], sizes = [8, 32], strides = [1, 1]} : vector<32x32xf32> to vector<8x32xf32>
    %cst_210 = arith.constant dense<0.000000e+00> : vector<16x32xf32>
    %520 = tpu.matmul %518, %519, %cst_210 {dimension_numbers = #tpu.dot_dimension_numbers<[1], [0], [0], [1], [0, 0, 1, 1], [], []>} : vector<16x8xf32>, vector<8x32xf32>, vector<16x32xf32> -> vector<16x32xf32>
    %521 = arith.addf %500, %520 : vector<16x32xf32>
    %522 = vector.extract_strided_slice %449 {offsets = [0, 24], sizes = [16, 8], strides = [1, 1]} : vector<16x32xf32> to vector<16x8xf32>
    %523 = vector.extract_strided_slice %454 {offsets = [0, 24], sizes = [16, 8], strides = [1, 1]} : vector<16x32xf32> to vector<16x8xf32>
    %524 = tpu.transpose %523, [1, 0] : vector<16x8xf32> -> vector<8x16xf32>
    %cst_211 = arith.constant dense<0.000000e+00> : vector<16x16xf32>
    %525 = tpu.matmul %522, %524, %cst_211 {dimension_numbers = #tpu.dot_dimension_numbers<[1], [0], [0], [1], [0, 0, 1, 1], [], []>} : vector<16x8xf32>, vector<8x16xf32>, vector<16x16xf32> -> vector<16x16xf32>
    %cst_212 = arith.constant 0.353553385 : f32
    %526 = vector.broadcast %cst_212 : f32 to vector<16x16xf32>
    %527 = arith.mulf %525, %526 : vector<16x16xf32>
    %cst_213 = arith.constant dense<0xFF800000> : vector<16xf32>
    %528 = vector.multi_reduction <maximumf>, %527, %cst_213 [1] : vector<16x16xf32> to vector<16xf32>
    %529 = vector.shape_cast %528 : vector<16xf32> to vector<16x1xf32>
    %530 = vector.broadcast %529 : vector<16x1xf32> to vector<16x16xf32>
    %531 = arith.subf %527, %530 : vector<16x16xf32>
    %532 = math.exp %531 : vector<16x16xf32>
    %cst_214 = arith.constant dense<0.000000e+00> : vector<16xf32>
    %533 = vector.multi_reduction <add>, %532, %cst_214 [1] : vector<16x16xf32> to vector<16xf32>
    %534 = vector.shape_cast %533 : vector<16xf32> to vector<16x1xf32>
    %535 = tpu.reciprocal %534 {approx = true} : vector<16x1xf32> -> vector<16x1xf32>
    %536 = vector.broadcast %535 : vector<16x1xf32> to vector<16x16xf32>
    %537 = arith.mulf %532, %536 : vector<16x16xf32>
    %538 = vector.extract_strided_slice %459 {offsets = [0, 24], sizes = [16, 8], strides = [1, 1]} : vector<16x32xf32> to vector<16x8xf32>
    %cst_215 = arith.constant dense<0.000000e+00> : vector<16x8xf32>
    %539 = tpu.matmul %537, %538, %cst_215 {dimension_numbers = #tpu.dot_dimension_numbers<[1], [0], [0], [1], [0, 0, 1, 1], [], []>} : vector<16x16xf32>, vector<16x8xf32>, vector<16x8xf32> -> vector<16x8xf32>
    %540 = vector.extract_strided_slice %442 {offsets = [24, 0], sizes = [8, 32], strides = [1, 1]} : vector<32x32xf32> to vector<8x32xf32>
    %cst_216 = arith.constant dense<0.000000e+00> : vector<16x32xf32>
    %541 = tpu.matmul %539, %540, %cst_216 {dimension_numbers = #tpu.dot_dimension_numbers<[1], [0], [0], [1], [0, 0, 1, 1], [], []>} : vector<16x8xf32>, vector<8x32xf32>, vector<16x32xf32> -> vector<16x32xf32>
    %542 = arith.addf %521, %541 : vector<16x32xf32>
    %543 = vector.broadcast %443 : vector<1x32xf32> to vector<16x32xf32>
    %544 = arith.addf %542, %543 : vector<16x32xf32>
    %545 = vector.shape_cast %544 : vector<16x32xf32> to vector<2x8x32xf32>
    %546 = arith.addf %438, %545 : vector<2x8x32xf32>
    %c0_217 = arith.constant 0 : index
    %c0_218 = arith.constant 0 : index
    %c0_219 = arith.constant 0 : index
    %547 = vector.load %arg35[%c0_217, %c0_218, %c0_219] : memref<2x1x32xf32, #tpu.memory_space<vmem>>, vector<1x1x32xf32>
    %548 = vector.shape_cast %547 : vector<1x1x32xf32> to vector<1x32xf32>
    %c0_220 = arith.constant 0 : index
    %c0_221 = arith.constant 0 : index
    %c0_222 = arith.constant 0 : index
    %549 = vector.load %arg36[%c0_220, %c0_221, %c0_222] : memref<2x1x32xf32, #tpu.memory_space<vmem>>, vector<1x1x32xf32>
    %550 = vector.shape_cast %549 : vector<1x1x32xf32> to vector<1x32xf32>
    %551 = vector.shape_cast %546 : vector<2x8x32xf32> to vector<16x32xf32>
    %cst_223 = arith.constant dense<0.000000e+00> : vector<16xf32>
    %552 = vector.multi_reduction <add>, %551, %cst_223 [1] : vector<16x32xf32> to vector<16xf32>
    %553 = vector.shape_cast %552 : vector<16xf32> to vector<16x1xf32>
    %cst_224 = arith.constant 3.200000e+01 : f32
    %554 = vector.broadcast %cst_224 : f32 to vector<16x1xf32>
    %555 = arith.divf %553, %554 : vector<16x1xf32>
    %556 = vector.broadcast %555 : vector<16x1xf32> to vector<16x32xf32>
    %557 = arith.subf %551, %556 : vector<16x32xf32>
    %558 = arith.mulf %557, %557 : vector<16x32xf32>
    %cst_225 = arith.constant dense<0.000000e+00> : vector<16xf32>
    %559 = vector.multi_reduction <add>, %558, %cst_225 [1] : vector<16x32xf32> to vector<16xf32>
    %560 = vector.shape_cast %559 : vector<16xf32> to vector<16x1xf32>
    %cst_226 = arith.constant 3.100000e+01 : f32
    %561 = vector.broadcast %cst_226 : f32 to vector<16x1xf32>
    %562 = arith.divf %560, %561 : vector<16x1xf32>
    %563 = math.sqrt %562 : vector<16x1xf32>
    %cst_227 = arith.constant 9.99999997E-7 : f32
    %564 = vector.broadcast %cst_227 : f32 to vector<16x1xf32>
    %565 = arith.addf %563, %564 : vector<16x1xf32>
    %566 = tpu.reciprocal %565 {approx = true} : vector<16x1xf32> -> vector<16x1xf32>
    %567 = vector.broadcast %555 : vector<16x1xf32> to vector<16x32xf32>
    %568 = arith.subf %551, %567 : vector<16x32xf32>
    %569 = vector.broadcast %548 : vector<1x32xf32> to vector<16x32xf32>
    %570 = arith.mulf %569, %568 : vector<16x32xf32>
    %571 = vector.broadcast %566 : vector<16x1xf32> to vector<16x32xf32>
    %572 = arith.mulf %570, %571 : vector<16x32xf32>
    %573 = vector.broadcast %550 : vector<1x32xf32> to vector<16x32xf32>
    %574 = arith.addf %572, %573 : vector<16x32xf32>
    %575 = vector.shape_cast %574 : vector<16x32xf32> to vector<2x8x32xf32>
    %c0_228 = arith.constant 0 : index
    %c0_229 = arith.constant 0 : index
    %c0_230 = arith.constant 0 : index
    %576 = vector.load %arg23[%c0_228, %c0_229, %c0_230] : memref<2x32x96xf32, #tpu.memory_space<vmem>>, vector<1x32x96xf32>
    %577 = vector.shape_cast %576 : vector<1x32x96xf32> to vector<32x96xf32>
    %c0_231 = arith.constant 0 : index
    %c0_232 = arith.constant 0 : index
    %c0_233 = arith.constant 0 : index
    %578 = vector.load %arg24[%c0_231, %c0_232, %c0_233] : memref<2x1x96xf32, #tpu.memory_space<vmem>>, vector<1x1x96xf32>
    %579 = vector.shape_cast %578 : vector<1x1x96xf32> to vector<1x96xf32>
    %c0_234 = arith.constant 0 : index
    %c0_235 = arith.constant 0 : index
    %c0_236 = arith.constant 0 : index
    %580 = vector.load %arg25[%c0_234, %c0_235, %c0_236] : memref<2x32x32xf32, #tpu.memory_space<vmem>>, vector<1x32x32xf32>
    %581 = vector.shape_cast %580 : vector<1x32x32xf32> to vector<32x32xf32>
    %c0_237 = arith.constant 0 : index
    %c0_238 = arith.constant 0 : index
    %c0_239 = arith.constant 0 : index
    %582 = vector.load %arg26[%c0_237, %c0_238, %c0_239] : memref<2x1x32xf32, #tpu.memory_space<vmem>>, vector<1x1x32xf32>
    %583 = vector.shape_cast %582 : vector<1x1x32xf32> to vector<1x32xf32>
    %584 = vector.shape_cast %575 : vector<2x8x32xf32> to vector<16x32xf32>
    %585 = vector.shape_cast %575 : vector<2x8x32xf32> to vector<16x32xf32>
    %586 = vector.extract_strided_slice %577 {offsets = [0, 0], sizes = [32, 32], strides = [1, 1]} : vector<32x96xf32> to vector<32x32xf32>
    %cst_240 = arith.constant dense<0.000000e+00> : vector<16x32xf32>
    %587 = tpu.matmul %584, %586, %cst_240 {dimension_numbers = #tpu.dot_dimension_numbers<[1], [0], [0], [1], [0, 0, 1, 1], [], []>} : vector<16x32xf32>, vector<32x32xf32>, vector<16x32xf32> -> vector<16x32xf32>
    %588 = vector.extract_strided_slice %579 {offsets = [0, 0], sizes = [1, 32], strides = [1, 1]} : vector<1x96xf32> to vector<1x32xf32>
    %589 = vector.broadcast %588 : vector<1x32xf32> to vector<16x32xf32>
    %590 = arith.addf %587, %589 : vector<16x32xf32>
    %591 = vector.extract_strided_slice %577 {offsets = [0, 32], sizes = [32, 32], strides = [1, 1]} : vector<32x96xf32> to vector<32x32xf32>
    %cst_241 = arith.constant dense<0.000000e+00> : vector<16x32xf32>
    %592 = tpu.matmul %585, %591, %cst_241 {dimension_numbers = #tpu.dot_dimension_numbers<[1], [0], [0], [1], [0, 0, 1, 1], [], []>} : vector<16x32xf32>, vector<32x32xf32>, vector<16x32xf32> -> vector<16x32xf32>
    %593 = vector.extract_strided_slice %579 {offsets = [0, 32], sizes = [1, 32], strides = [1, 1]} : vector<1x96xf32> to vector<1x32xf32>
    %594 = vector.broadcast %593 : vector<1x32xf32> to vector<16x32xf32>
    %595 = arith.addf %592, %594 : vector<16x32xf32>
    %596 = vector.extract_strided_slice %577 {offsets = [0, 64], sizes = [32, 32], strides = [1, 1]} : vector<32x96xf32> to vector<32x32xf32>
    %cst_242 = arith.constant dense<0.000000e+00> : vector<16x32xf32>
    %597 = tpu.matmul %585, %596, %cst_242 {dimension_numbers = #tpu.dot_dimension_numbers<[1], [0], [0], [1], [0, 0, 1, 1], [], []>} : vector<16x32xf32>, vector<32x32xf32>, vector<16x32xf32> -> vector<16x32xf32>
    %598 = vector.extract_strided_slice %579 {offsets = [0, 64], sizes = [1, 32], strides = [1, 1]} : vector<1x96xf32> to vector<1x32xf32>
    %599 = vector.broadcast %598 : vector<1x32xf32> to vector<16x32xf32>
    %600 = arith.addf %597, %599 : vector<16x32xf32>
    %601 = vector.shape_cast %590 : vector<16x32xf32> to vector<2x8x32xf32>
    %602 = vector.shape_cast %595 : vector<16x32xf32> to vector<2x8x32xf32>
    %603 = vector.shape_cast %600 : vector<16x32xf32> to vector<2x8x32xf32>
    %cst_243 = arith.constant 0.000000e+00 : f32
    %604 = vector.broadcast %cst_243 : f32 to vector<2x8x8xf32>
    %605 = arith.cmpf ogt, %1, %604 : vector<2x8x8xf32>
    %606 = vector.extract_strided_slice %601 {offsets = [0, 0, 0], sizes = [2, 8, 8], strides = [1, 1, 1]} : vector<2x8x32xf32> to vector<2x8x8xf32>
    %607 = vector.extract_strided_slice %602 {offsets = [0, 0, 0], sizes = [2, 8, 8], strides = [1, 1, 1]} : vector<2x8x32xf32> to vector<2x8x8xf32>
    "tpu.trace_start"() <{level = 10 : i32, message = "bqd,bkd->bqk"}> : () -> ()
    %cst_244 = arith.constant dense<0.000000e+00> : vector<2x8x8xf32>
    %608 = tpu.matmul %606, %607, %cst_244 {dimension_numbers = #tpu.dot_dimension_numbers<[2], [2], [1], [1], [0, 0, 0, 1, 1, 1], [0], [0]>} : vector<2x8x8xf32>, vector<2x8x8xf32>, vector<2x8x8xf32> -> vector<2x8x8xf32>
    "tpu.trace_stop"() : () -> ()
    %cst_245 = arith.constant 0.353553385 : f32
    %609 = vector.broadcast %cst_245 : f32 to vector<2x8x8xf32>
    %610 = arith.mulf %608, %609 : vector<2x8x8xf32>
    %cst_246 = arith.constant -1.000000e+09 : f32
    %611 = vector.broadcast %cst_246 : f32 to vector<2x8x8xf32>
    %612 = arith.select %605, %610, %611 : vector<2x8x8xi1>, vector<2x8x8xf32>
    %cst_247 = arith.constant dense<0xFF800000> : vector<2x8xf32>
    %613 = vector.multi_reduction <maximumf>, %612, %cst_247 [2] : vector<2x8x8xf32> to vector<2x8xf32>
    %614 = vector.shape_cast %613 : vector<2x8xf32> to vector<2x8x1xf32>
    %615 = vector.broadcast %614 : vector<2x8x1xf32> to vector<2x8x8xf32>
    %616 = arith.subf %612, %615 : vector<2x8x8xf32>
    %617 = math.exp %616 : vector<2x8x8xf32>
    %cst_248 = arith.constant dense<0.000000e+00> : vector<2x8xf32>
    %618 = vector.multi_reduction <add>, %617, %cst_248 [2] : vector<2x8x8xf32> to vector<2x8xf32>
    %619 = vector.shape_cast %618 : vector<2x8xf32> to vector<2x8x1xf32>
    %620 = tpu.reciprocal %619 {approx = true} : vector<2x8x1xf32> -> vector<2x8x1xf32>
    %621 = vector.broadcast %620 : vector<2x8x1xf32> to vector<2x8x8xf32>
    %622 = arith.mulf %617, %621 : vector<2x8x8xf32>
    %623 = vector.extract_strided_slice %603 {offsets = [0, 0, 0], sizes = [2, 8, 8], strides = [1, 1, 1]} : vector<2x8x32xf32> to vector<2x8x8xf32>
    "tpu.trace_start"() <{level = 10 : i32, message = "bqk,bkd->bqd"}> : () -> ()
    %cst_249 = arith.constant dense<0.000000e+00> : vector<2x8x8xf32>
    %624 = tpu.matmul %622, %623, %cst_249 {dimension_numbers = #tpu.dot_dimension_numbers<[2], [1], [1], [2], [0, 0, 0, 1, 1, 2], [0], [0]>} : vector<2x8x8xf32>, vector<2x8x8xf32>, vector<2x8x8xf32> -> vector<2x8x8xf32>
    "tpu.trace_stop"() : () -> ()
    %625 = vector.shape_cast %624 : vector<2x8x8xf32> to vector<16x8xf32>
    %626 = vector.extract_strided_slice %581 {offsets = [0, 0], sizes = [8, 32], strides = [1, 1]} : vector<32x32xf32> to vector<8x32xf32>
    %cst_250 = arith.constant dense<0.000000e+00> : vector<16x32xf32>
    %627 = tpu.matmul %625, %626, %cst_250 {dimension_numbers = #tpu.dot_dimension_numbers<[1], [0], [0], [1], [0, 0, 1, 1], [], []>} : vector<16x8xf32>, vector<8x32xf32>, vector<16x32xf32> -> vector<16x32xf32>
    %628 = vector.extract_strided_slice %601 {offsets = [0, 0, 8], sizes = [2, 8, 8], strides = [1, 1, 1]} : vector<2x8x32xf32> to vector<2x8x8xf32>
    %629 = vector.extract_strided_slice %602 {offsets = [0, 0, 8], sizes = [2, 8, 8], strides = [1, 1, 1]} : vector<2x8x32xf32> to vector<2x8x8xf32>
    "tpu.trace_start"() <{level = 10 : i32, message = "bqd,bkd->bqk"}> : () -> ()
    %cst_251 = arith.constant dense<0.000000e+00> : vector<2x8x8xf32>
    %630 = tpu.matmul %628, %629, %cst_251 {dimension_numbers = #tpu.dot_dimension_numbers<[2], [2], [1], [1], [0, 0, 0, 1, 1, 1], [0], [0]>} : vector<2x8x8xf32>, vector<2x8x8xf32>, vector<2x8x8xf32> -> vector<2x8x8xf32>
    "tpu.trace_stop"() : () -> ()
    %cst_252 = arith.constant 0.353553385 : f32
    %631 = vector.broadcast %cst_252 : f32 to vector<2x8x8xf32>
    %632 = arith.mulf %630, %631 : vector<2x8x8xf32>
    %cst_253 = arith.constant -1.000000e+09 : f32
    %633 = vector.broadcast %cst_253 : f32 to vector<2x8x8xf32>
    %634 = arith.select %605, %632, %633 : vector<2x8x8xi1>, vector<2x8x8xf32>
    %cst_254 = arith.constant dense<0xFF800000> : vector<2x8xf32>
    %635 = vector.multi_reduction <maximumf>, %634, %cst_254 [2] : vector<2x8x8xf32> to vector<2x8xf32>
    %636 = vector.shape_cast %635 : vector<2x8xf32> to vector<2x8x1xf32>
    %637 = vector.broadcast %636 : vector<2x8x1xf32> to vector<2x8x8xf32>
    %638 = arith.subf %634, %637 : vector<2x8x8xf32>
    %639 = math.exp %638 : vector<2x8x8xf32>
    %cst_255 = arith.constant dense<0.000000e+00> : vector<2x8xf32>
    %640 = vector.multi_reduction <add>, %639, %cst_255 [2] : vector<2x8x8xf32> to vector<2x8xf32>
    %641 = vector.shape_cast %640 : vector<2x8xf32> to vector<2x8x1xf32>
    %642 = tpu.reciprocal %641 {approx = true} : vector<2x8x1xf32> -> vector<2x8x1xf32>
    %643 = vector.broadcast %642 : vector<2x8x1xf32> to vector<2x8x8xf32>
    %644 = arith.mulf %639, %643 : vector<2x8x8xf32>
    %645 = vector.extract_strided_slice %603 {offsets = [0, 0, 8], sizes = [2, 8, 8], strides = [1, 1, 1]} : vector<2x8x32xf32> to vector<2x8x8xf32>
    "tpu.trace_start"() <{level = 10 : i32, message = "bqk,bkd->bqd"}> : () -> ()
    %cst_256 = arith.constant dense<0.000000e+00> : vector<2x8x8xf32>
    %646 = tpu.matmul %644, %645, %cst_256 {dimension_numbers = #tpu.dot_dimension_numbers<[2], [1], [1], [2], [0, 0, 0, 1, 1, 2], [0], [0]>} : vector<2x8x8xf32>, vector<2x8x8xf32>, vector<2x8x8xf32> -> vector<2x8x8xf32>
    "tpu.trace_stop"() : () -> ()
    %647 = vector.shape_cast %646 : vector<2x8x8xf32> to vector<16x8xf32>
    %648 = vector.extract_strided_slice %581 {offsets = [8, 0], sizes = [8, 32], strides = [1, 1]} : vector<32x32xf32> to vector<8x32xf32>
    %cst_257 = arith.constant dense<0.000000e+00> : vector<16x32xf32>
    %649 = tpu.matmul %647, %648, %cst_257 {dimension_numbers = #tpu.dot_dimension_numbers<[1], [0], [0], [1], [0, 0, 1, 1], [], []>} : vector<16x8xf32>, vector<8x32xf32>, vector<16x32xf32> -> vector<16x32xf32>
    %650 = arith.addf %627, %649 : vector<16x32xf32>
    %651 = vector.extract_strided_slice %601 {offsets = [0, 0, 16], sizes = [2, 8, 8], strides = [1, 1, 1]} : vector<2x8x32xf32> to vector<2x8x8xf32>
    %652 = vector.extract_strided_slice %602 {offsets = [0, 0, 16], sizes = [2, 8, 8], strides = [1, 1, 1]} : vector<2x8x32xf32> to vector<2x8x8xf32>
    "tpu.trace_start"() <{level = 10 : i32, message = "bqd,bkd->bqk"}> : () -> ()
    %cst_258 = arith.constant dense<0.000000e+00> : vector<2x8x8xf32>
    %653 = tpu.matmul %651, %652, %cst_258 {dimension_numbers = #tpu.dot_dimension_numbers<[2], [2], [1], [1], [0, 0, 0, 1, 1, 1], [0], [0]>} : vector<2x8x8xf32>, vector<2x8x8xf32>, vector<2x8x8xf32> -> vector<2x8x8xf32>
    "tpu.trace_stop"() : () -> ()
    %cst_259 = arith.constant 0.353553385 : f32
    %654 = vector.broadcast %cst_259 : f32 to vector<2x8x8xf32>
    %655 = arith.mulf %653, %654 : vector<2x8x8xf32>
    %cst_260 = arith.constant -1.000000e+09 : f32
    %656 = vector.broadcast %cst_260 : f32 to vector<2x8x8xf32>
    %657 = arith.select %605, %655, %656 : vector<2x8x8xi1>, vector<2x8x8xf32>
    %cst_261 = arith.constant dense<0xFF800000> : vector<2x8xf32>
    %658 = vector.multi_reduction <maximumf>, %657, %cst_261 [2] : vector<2x8x8xf32> to vector<2x8xf32>
    %659 = vector.shape_cast %658 : vector<2x8xf32> to vector<2x8x1xf32>
    %660 = vector.broadcast %659 : vector<2x8x1xf32> to vector<2x8x8xf32>
    %661 = arith.subf %657, %660 : vector<2x8x8xf32>
    %662 = math.exp %661 : vector<2x8x8xf32>
    %cst_262 = arith.constant dense<0.000000e+00> : vector<2x8xf32>
    %663 = vector.multi_reduction <add>, %662, %cst_262 [2] : vector<2x8x8xf32> to vector<2x8xf32>
    %664 = vector.shape_cast %663 : vector<2x8xf32> to vector<2x8x1xf32>
    %665 = tpu.reciprocal %664 {approx = true} : vector<2x8x1xf32> -> vector<2x8x1xf32>
    %666 = vector.broadcast %665 : vector<2x8x1xf32> to vector<2x8x8xf32>
    %667 = arith.mulf %662, %666 : vector<2x8x8xf32>
    %668 = vector.extract_strided_slice %603 {offsets = [0, 0, 16], sizes = [2, 8, 8], strides = [1, 1, 1]} : vector<2x8x32xf32> to vector<2x8x8xf32>
    "tpu.trace_start"() <{level = 10 : i32, message = "bqk,bkd->bqd"}> : () -> ()
    %cst_263 = arith.constant dense<0.000000e+00> : vector<2x8x8xf32>
    %669 = tpu.matmul %667, %668, %cst_263 {dimension_numbers = #tpu.dot_dimension_numbers<[2], [1], [1], [2], [0, 0, 0, 1, 1, 2], [0], [0]>} : vector<2x8x8xf32>, vector<2x8x8xf32>, vector<2x8x8xf32> -> vector<2x8x8xf32>
    "tpu.trace_stop"() : () -> ()
    %670 = vector.shape_cast %669 : vector<2x8x8xf32> to vector<16x8xf32>
    %671 = vector.extract_strided_slice %581 {offsets = [16, 0], sizes = [8, 32], strides = [1, 1]} : vector<32x32xf32> to vector<8x32xf32>
    %cst_264 = arith.constant dense<0.000000e+00> : vector<16x32xf32>
    %672 = tpu.matmul %670, %671, %cst_264 {dimension_numbers = #tpu.dot_dimension_numbers<[1], [0], [0], [1], [0, 0, 1, 1], [], []>} : vector<16x8xf32>, vector<8x32xf32>, vector<16x32xf32> -> vector<16x32xf32>
    %673 = arith.addf %650, %672 : vector<16x32xf32>
    %674 = vector.extract_strided_slice %601 {offsets = [0, 0, 24], sizes = [2, 8, 8], strides = [1, 1, 1]} : vector<2x8x32xf32> to vector<2x8x8xf32>
    %675 = vector.extract_strided_slice %602 {offsets = [0, 0, 24], sizes = [2, 8, 8], strides = [1, 1, 1]} : vector<2x8x32xf32> to vector<2x8x8xf32>
    "tpu.trace_start"() <{level = 10 : i32, message = "bqd,bkd->bqk"}> : () -> ()
    %cst_265 = arith.constant dense<0.000000e+00> : vector<2x8x8xf32>
    %676 = tpu.matmul %674, %675, %cst_265 {dimension_numbers = #tpu.dot_dimension_numbers<[2], [2], [1], [1], [0, 0, 0, 1, 1, 1], [0], [0]>} : vector<2x8x8xf32>, vector<2x8x8xf32>, vector<2x8x8xf32> -> vector<2x8x8xf32>
    "tpu.trace_stop"() : () -> ()
    %cst_266 = arith.constant 0.353553385 : f32
    %677 = vector.broadcast %cst_266 : f32 to vector<2x8x8xf32>
    %678 = arith.mulf %676, %677 : vector<2x8x8xf32>
    %cst_267 = arith.constant -1.000000e+09 : f32
    %679 = vector.broadcast %cst_267 : f32 to vector<2x8x8xf32>
    %680 = arith.select %605, %678, %679 : vector<2x8x8xi1>, vector<2x8x8xf32>
    %cst_268 = arith.constant dense<0xFF800000> : vector<2x8xf32>
    %681 = vector.multi_reduction <maximumf>, %680, %cst_268 [2] : vector<2x8x8xf32> to vector<2x8xf32>
    %682 = vector.shape_cast %681 : vector<2x8xf32> to vector<2x8x1xf32>
    %683 = vector.broadcast %682 : vector<2x8x1xf32> to vector<2x8x8xf32>
    %684 = arith.subf %680, %683 : vector<2x8x8xf32>
    %685 = math.exp %684 : vector<2x8x8xf32>
    %cst_269 = arith.constant dense<0.000000e+00> : vector<2x8xf32>
    %686 = vector.multi_reduction <add>, %685, %cst_269 [2] : vector<2x8x8xf32> to vector<2x8xf32>
    %687 = vector.shape_cast %686 : vector<2x8xf32> to vector<2x8x1xf32>
    %688 = tpu.reciprocal %687 {approx = true} : vector<2x8x1xf32> -> vector<2x8x1xf32>
    %689 = vector.broadcast %688 : vector<2x8x1xf32> to vector<2x8x8xf32>
    %690 = arith.mulf %685, %689 : vector<2x8x8xf32>
    %691 = vector.extract_strided_slice %603 {offsets = [0, 0, 24], sizes = [2, 8, 8], strides = [1, 1, 1]} : vector<2x8x32xf32> to vector<2x8x8xf32>
    "tpu.trace_start"() <{level = 10 : i32, message = "bqk,bkd->bqd"}> : () -> ()
    %cst_270 = arith.constant dense<0.000000e+00> : vector<2x8x8xf32>
    %692 = tpu.matmul %690, %691, %cst_270 {dimension_numbers = #tpu.dot_dimension_numbers<[2], [1], [1], [2], [0, 0, 0, 1, 1, 2], [0], [0]>} : vector<2x8x8xf32>, vector<2x8x8xf32>, vector<2x8x8xf32> -> vector<2x8x8xf32>
    "tpu.trace_stop"() : () -> ()
    %693 = vector.shape_cast %692 : vector<2x8x8xf32> to vector<16x8xf32>
    %694 = vector.extract_strided_slice %581 {offsets = [24, 0], sizes = [8, 32], strides = [1, 1]} : vector<32x32xf32> to vector<8x32xf32>
    %cst_271 = arith.constant dense<0.000000e+00> : vector<16x32xf32>
    %695 = tpu.matmul %693, %694, %cst_271 {dimension_numbers = #tpu.dot_dimension_numbers<[1], [0], [0], [1], [0, 0, 1, 1], [], []>} : vector<16x8xf32>, vector<8x32xf32>, vector<16x32xf32> -> vector<16x32xf32>
    %696 = arith.addf %673, %695 : vector<16x32xf32>
    %697 = vector.broadcast %583 : vector<1x32xf32> to vector<16x32xf32>
    %698 = arith.addf %696, %697 : vector<16x32xf32>
    %699 = vector.shape_cast %698 : vector<16x32xf32> to vector<2x8x32xf32>
    %700 = arith.addf %546, %699 : vector<2x8x32xf32>
    %c0_272 = arith.constant 0 : index
    %c0_273 = arith.constant 0 : index
    %c0_274 = arith.constant 0 : index
    %701 = vector.load %arg37[%c0_272, %c0_273, %c0_274] : memref<2x1x32xf32, #tpu.memory_space<vmem>>, vector<1x1x32xf32>
    %702 = vector.shape_cast %701 : vector<1x1x32xf32> to vector<1x32xf32>
    %c0_275 = arith.constant 0 : index
    %c0_276 = arith.constant 0 : index
    %c0_277 = arith.constant 0 : index
    %703 = vector.load %arg38[%c0_275, %c0_276, %c0_277] : memref<2x1x32xf32, #tpu.memory_space<vmem>>, vector<1x1x32xf32>
    %704 = vector.shape_cast %703 : vector<1x1x32xf32> to vector<1x32xf32>
    %705 = vector.shape_cast %700 : vector<2x8x32xf32> to vector<16x32xf32>
    %cst_278 = arith.constant dense<0.000000e+00> : vector<16xf32>
    %706 = vector.multi_reduction <add>, %705, %cst_278 [1] : vector<16x32xf32> to vector<16xf32>
    %707 = vector.shape_cast %706 : vector<16xf32> to vector<16x1xf32>
    %cst_279 = arith.constant 3.200000e+01 : f32
    %708 = vector.broadcast %cst_279 : f32 to vector<16x1xf32>
    %709 = arith.divf %707, %708 : vector<16x1xf32>
    %710 = vector.broadcast %709 : vector<16x1xf32> to vector<16x32xf32>
    %711 = arith.subf %705, %710 : vector<16x32xf32>
    %712 = arith.mulf %711, %711 : vector<16x32xf32>
    %cst_280 = arith.constant dense<0.000000e+00> : vector<16xf32>
    %713 = vector.multi_reduction <add>, %712, %cst_280 [1] : vector<16x32xf32> to vector<16xf32>
    %714 = vector.shape_cast %713 : vector<16xf32> to vector<16x1xf32>
    %cst_281 = arith.constant 3.100000e+01 : f32
    %715 = vector.broadcast %cst_281 : f32 to vector<16x1xf32>
    %716 = arith.divf %714, %715 : vector<16x1xf32>
    %717 = math.sqrt %716 : vector<16x1xf32>
    %cst_282 = arith.constant 9.99999997E-7 : f32
    %718 = vector.broadcast %cst_282 : f32 to vector<16x1xf32>
    %719 = arith.addf %717, %718 : vector<16x1xf32>
    %720 = tpu.reciprocal %719 {approx = true} : vector<16x1xf32> -> vector<16x1xf32>
    %721 = vector.broadcast %709 : vector<16x1xf32> to vector<16x32xf32>
    %722 = arith.subf %705, %721 : vector<16x32xf32>
    %723 = vector.broadcast %702 : vector<1x32xf32> to vector<16x32xf32>
    %724 = arith.mulf %723, %722 : vector<16x32xf32>
    %725 = vector.broadcast %720 : vector<16x1xf32> to vector<16x32xf32>
    %726 = arith.mulf %724, %725 : vector<16x32xf32>
    %727 = vector.broadcast %704 : vector<1x32xf32> to vector<16x32xf32>
    %728 = arith.addf %726, %727 : vector<16x32xf32>
    %729 = vector.shape_cast %728 : vector<16x32xf32> to vector<2x8x32xf32>
    %c0_283 = arith.constant 0 : index
    %c0_284 = arith.constant 0 : index
    %c0_285 = arith.constant 0 : index
    %730 = vector.load %arg27[%c0_283, %c0_284, %c0_285] : memref<2x32x96xf32, #tpu.memory_space<vmem>>, vector<1x32x96xf32>
    %731 = vector.shape_cast %730 : vector<1x32x96xf32> to vector<32x96xf32>
    %c0_286 = arith.constant 0 : index
    %c0_287 = arith.constant 0 : index
    %c0_288 = arith.constant 0 : index
    %732 = vector.load %arg28[%c0_286, %c0_287, %c0_288] : memref<2x1x96xf32, #tpu.memory_space<vmem>>, vector<1x1x96xf32>
    %733 = vector.shape_cast %732 : vector<1x1x96xf32> to vector<1x96xf32>
    %c0_289 = arith.constant 0 : index
    %c0_290 = arith.constant 0 : index
    %c0_291 = arith.constant 0 : index
    %734 = vector.load %arg29[%c0_289, %c0_290, %c0_291] : memref<2x32x32xf32, #tpu.memory_space<vmem>>, vector<1x32x32xf32>
    %735 = vector.shape_cast %734 : vector<1x32x32xf32> to vector<32x32xf32>
    %c0_292 = arith.constant 0 : index
    %c0_293 = arith.constant 0 : index
    %c0_294 = arith.constant 0 : index
    %736 = vector.load %arg30[%c0_292, %c0_293, %c0_294] : memref<2x1x32xf32, #tpu.memory_space<vmem>>, vector<1x1x32xf32>
    %737 = vector.shape_cast %736 : vector<1x1x32xf32> to vector<1x32xf32>
    %738 = vector.shape_cast %729 : vector<2x8x32xf32> to vector<16x32xf32>
    %739 = vector.shape_cast %437 : vector<2x8x32xf32> to vector<16x32xf32>
    %740 = vector.extract_strided_slice %731 {offsets = [0, 0], sizes = [32, 32], strides = [1, 1]} : vector<32x96xf32> to vector<32x32xf32>
    %cst_295 = arith.constant dense<0.000000e+00> : vector<16x32xf32>
    %741 = tpu.matmul %738, %740, %cst_295 {dimension_numbers = #tpu.dot_dimension_numbers<[1], [0], [0], [1], [0, 0, 1, 1], [], []>} : vector<16x32xf32>, vector<32x32xf32>, vector<16x32xf32> -> vector<16x32xf32>
    %742 = vector.extract_strided_slice %733 {offsets = [0, 0], sizes = [1, 32], strides = [1, 1]} : vector<1x96xf32> to vector<1x32xf32>
    %743 = vector.broadcast %742 : vector<1x32xf32> to vector<16x32xf32>
    %744 = arith.addf %741, %743 : vector<16x32xf32>
    %745 = vector.extract_strided_slice %731 {offsets = [0, 32], sizes = [32, 32], strides = [1, 1]} : vector<32x96xf32> to vector<32x32xf32>
    %cst_296 = arith.constant dense<0.000000e+00> : vector<16x32xf32>
    %746 = tpu.matmul %739, %745, %cst_296 {dimension_numbers = #tpu.dot_dimension_numbers<[1], [0], [0], [1], [0, 0, 1, 1], [], []>} : vector<16x32xf32>, vector<32x32xf32>, vector<16x32xf32> -> vector<16x32xf32>
    %747 = vector.extract_strided_slice %733 {offsets = [0, 32], sizes = [1, 32], strides = [1, 1]} : vector<1x96xf32> to vector<1x32xf32>
    %748 = vector.broadcast %747 : vector<1x32xf32> to vector<16x32xf32>
    %749 = arith.addf %746, %748 : vector<16x32xf32>
    %750 = vector.extract_strided_slice %731 {offsets = [0, 64], sizes = [32, 32], strides = [1, 1]} : vector<32x96xf32> to vector<32x32xf32>
    %cst_297 = arith.constant dense<0.000000e+00> : vector<16x32xf32>
    %751 = tpu.matmul %739, %750, %cst_297 {dimension_numbers = #tpu.dot_dimension_numbers<[1], [0], [0], [1], [0, 0, 1, 1], [], []>} : vector<16x32xf32>, vector<32x32xf32>, vector<16x32xf32> -> vector<16x32xf32>
    %752 = vector.extract_strided_slice %733 {offsets = [0, 64], sizes = [1, 32], strides = [1, 1]} : vector<1x96xf32> to vector<1x32xf32>
    %753 = vector.broadcast %752 : vector<1x32xf32> to vector<16x32xf32>
    %754 = arith.addf %751, %753 : vector<16x32xf32>
    %755 = vector.shape_cast %744 : vector<16x32xf32> to vector<2x8x32xf32>
    %756 = vector.shape_cast %749 : vector<16x32xf32> to vector<2x8x32xf32>
    %757 = vector.shape_cast %754 : vector<16x32xf32> to vector<2x8x32xf32>
    %cst_298 = arith.constant 0.000000e+00 : f32
    %758 = vector.broadcast %cst_298 : f32 to vector<2x1x8xf32>
    %759 = arith.cmpf ogt, %0, %758 : vector<2x1x8xf32>
    %760 = vector.shape_cast %759 : vector<2x1x8xi1> to vector<2x1x8xi1>
    %761 = vector.broadcast %760 : vector<2x1x8xi1> to vector<2x8x8xi1>
    %762 = vector.extract_strided_slice %755 {offsets = [0, 0, 0], sizes = [2, 8, 8], strides = [1, 1, 1]} : vector<2x8x32xf32> to vector<2x8x8xf32>
    %763 = vector.extract_strided_slice %756 {offsets = [0, 0, 0], sizes = [2, 8, 8], strides = [1, 1, 1]} : vector<2x8x32xf32> to vector<2x8x8xf32>
    "tpu.trace_start"() <{level = 10 : i32, message = "bqd,bkd->bqk"}> : () -> ()
    %cst_299 = arith.constant dense<0.000000e+00> : vector<2x8x8xf32>
    %764 = tpu.matmul %762, %763, %cst_299 {dimension_numbers = #tpu.dot_dimension_numbers<[2], [2], [1], [1], [0, 0, 0, 1, 1, 1], [0], [0]>} : vector<2x8x8xf32>, vector<2x8x8xf32>, vector<2x8x8xf32> -> vector<2x8x8xf32>
    "tpu.trace_stop"() : () -> ()
    %cst_300 = arith.constant 0.353553385 : f32
    %765 = vector.broadcast %cst_300 : f32 to vector<2x8x8xf32>
    %766 = arith.mulf %764, %765 : vector<2x8x8xf32>
    %cst_301 = arith.constant -1.000000e+09 : f32
    %767 = vector.broadcast %cst_301 : f32 to vector<2x8x8xf32>
    %768 = arith.select %761, %766, %767 : vector<2x8x8xi1>, vector<2x8x8xf32>
    %cst_302 = arith.constant dense<0xFF800000> : vector<2x8xf32>
    %769 = vector.multi_reduction <maximumf>, %768, %cst_302 [2] : vector<2x8x8xf32> to vector<2x8xf32>
    %770 = vector.shape_cast %769 : vector<2x8xf32> to vector<2x8x1xf32>
    %771 = vector.broadcast %770 : vector<2x8x1xf32> to vector<2x8x8xf32>
    %772 = arith.subf %768, %771 : vector<2x8x8xf32>
    %773 = math.exp %772 : vector<2x8x8xf32>
    %cst_303 = arith.constant dense<0.000000e+00> : vector<2x8xf32>
    %774 = vector.multi_reduction <add>, %773, %cst_303 [2] : vector<2x8x8xf32> to vector<2x8xf32>
    %775 = vector.shape_cast %774 : vector<2x8xf32> to vector<2x8x1xf32>
    %776 = tpu.reciprocal %775 {approx = true} : vector<2x8x1xf32> -> vector<2x8x1xf32>
    %777 = vector.broadcast %776 : vector<2x8x1xf32> to vector<2x8x8xf32>
    %778 = arith.mulf %773, %777 : vector<2x8x8xf32>
    %779 = vector.extract_strided_slice %757 {offsets = [0, 0, 0], sizes = [2, 8, 8], strides = [1, 1, 1]} : vector<2x8x32xf32> to vector<2x8x8xf32>
    "tpu.trace_start"() <{level = 10 : i32, message = "bqk,bkd->bqd"}> : () -> ()
    %cst_304 = arith.constant dense<0.000000e+00> : vector<2x8x8xf32>
    %780 = tpu.matmul %778, %779, %cst_304 {dimension_numbers = #tpu.dot_dimension_numbers<[2], [1], [1], [2], [0, 0, 0, 1, 1, 2], [0], [0]>} : vector<2x8x8xf32>, vector<2x8x8xf32>, vector<2x8x8xf32> -> vector<2x8x8xf32>
    "tpu.trace_stop"() : () -> ()
    %781 = vector.shape_cast %780 : vector<2x8x8xf32> to vector<16x8xf32>
    %782 = vector.extract_strided_slice %735 {offsets = [0, 0], sizes = [8, 32], strides = [1, 1]} : vector<32x32xf32> to vector<8x32xf32>
    %cst_305 = arith.constant dense<0.000000e+00> : vector<16x32xf32>
    %783 = tpu.matmul %781, %782, %cst_305 {dimension_numbers = #tpu.dot_dimension_numbers<[1], [0], [0], [1], [0, 0, 1, 1], [], []>} : vector<16x8xf32>, vector<8x32xf32>, vector<16x32xf32> -> vector<16x32xf32>
    %784 = vector.extract_strided_slice %755 {offsets = [0, 0, 8], sizes = [2, 8, 8], strides = [1, 1, 1]} : vector<2x8x32xf32> to vector<2x8x8xf32>
    %785 = vector.extract_strided_slice %756 {offsets = [0, 0, 8], sizes = [2, 8, 8], strides = [1, 1, 1]} : vector<2x8x32xf32> to vector<2x8x8xf32>
    "tpu.trace_start"() <{level = 10 : i32, message = "bqd,bkd->bqk"}> : () -> ()
    %cst_306 = arith.constant dense<0.000000e+00> : vector<2x8x8xf32>
    %786 = tpu.matmul %784, %785, %cst_306 {dimension_numbers = #tpu.dot_dimension_numbers<[2], [2], [1], [1], [0, 0, 0, 1, 1, 1], [0], [0]>} : vector<2x8x8xf32>, vector<2x8x8xf32>, vector<2x8x8xf32> -> vector<2x8x8xf32>
    "tpu.trace_stop"() : () -> ()
    %cst_307 = arith.constant 0.353553385 : f32
    %787 = vector.broadcast %cst_307 : f32 to vector<2x8x8xf32>
    %788 = arith.mulf %786, %787 : vector<2x8x8xf32>
    %cst_308 = arith.constant -1.000000e+09 : f32
    %789 = vector.broadcast %cst_308 : f32 to vector<2x8x8xf32>
    %790 = arith.select %761, %788, %789 : vector<2x8x8xi1>, vector<2x8x8xf32>
    %cst_309 = arith.constant dense<0xFF800000> : vector<2x8xf32>
    %791 = vector.multi_reduction <maximumf>, %790, %cst_309 [2] : vector<2x8x8xf32> to vector<2x8xf32>
    %792 = vector.shape_cast %791 : vector<2x8xf32> to vector<2x8x1xf32>
    %793 = vector.broadcast %792 : vector<2x8x1xf32> to vector<2x8x8xf32>
    %794 = arith.subf %790, %793 : vector<2x8x8xf32>
    %795 = math.exp %794 : vector<2x8x8xf32>
    %cst_310 = arith.constant dense<0.000000e+00> : vector<2x8xf32>
    %796 = vector.multi_reduction <add>, %795, %cst_310 [2] : vector<2x8x8xf32> to vector<2x8xf32>
    %797 = vector.shape_cast %796 : vector<2x8xf32> to vector<2x8x1xf32>
    %798 = tpu.reciprocal %797 {approx = true} : vector<2x8x1xf32> -> vector<2x8x1xf32>
    %799 = vector.broadcast %798 : vector<2x8x1xf32> to vector<2x8x8xf32>
    %800 = arith.mulf %795, %799 : vector<2x8x8xf32>
    %801 = vector.extract_strided_slice %757 {offsets = [0, 0, 8], sizes = [2, 8, 8], strides = [1, 1, 1]} : vector<2x8x32xf32> to vector<2x8x8xf32>
    "tpu.trace_start"() <{level = 10 : i32, message = "bqk,bkd->bqd"}> : () -> ()
    %cst_311 = arith.constant dense<0.000000e+00> : vector<2x8x8xf32>
    %802 = tpu.matmul %800, %801, %cst_311 {dimension_numbers = #tpu.dot_dimension_numbers<[2], [1], [1], [2], [0, 0, 0, 1, 1, 2], [0], [0]>} : vector<2x8x8xf32>, vector<2x8x8xf32>, vector<2x8x8xf32> -> vector<2x8x8xf32>
    "tpu.trace_stop"() : () -> ()
    %803 = vector.shape_cast %802 : vector<2x8x8xf32> to vector<16x8xf32>
    %804 = vector.extract_strided_slice %735 {offsets = [8, 0], sizes = [8, 32], strides = [1, 1]} : vector<32x32xf32> to vector<8x32xf32>
    %cst_312 = arith.constant dense<0.000000e+00> : vector<16x32xf32>
    %805 = tpu.matmul %803, %804, %cst_312 {dimension_numbers = #tpu.dot_dimension_numbers<[1], [0], [0], [1], [0, 0, 1, 1], [], []>} : vector<16x8xf32>, vector<8x32xf32>, vector<16x32xf32> -> vector<16x32xf32>
    %806 = arith.addf %783, %805 : vector<16x32xf32>
    %807 = vector.extract_strided_slice %755 {offsets = [0, 0, 16], sizes = [2, 8, 8], strides = [1, 1, 1]} : vector<2x8x32xf32> to vector<2x8x8xf32>
    %808 = vector.extract_strided_slice %756 {offsets = [0, 0, 16], sizes = [2, 8, 8], strides = [1, 1, 1]} : vector<2x8x32xf32> to vector<2x8x8xf32>
    "tpu.trace_start"() <{level = 10 : i32, message = "bqd,bkd->bqk"}> : () -> ()
    %cst_313 = arith.constant dense<0.000000e+00> : vector<2x8x8xf32>
    %809 = tpu.matmul %807, %808, %cst_313 {dimension_numbers = #tpu.dot_dimension_numbers<[2], [2], [1], [1], [0, 0, 0, 1, 1, 1], [0], [0]>} : vector<2x8x8xf32>, vector<2x8x8xf32>, vector<2x8x8xf32> -> vector<2x8x8xf32>
    "tpu.trace_stop"() : () -> ()
    %cst_314 = arith.constant 0.353553385 : f32
    %810 = vector.broadcast %cst_314 : f32 to vector<2x8x8xf32>
    %811 = arith.mulf %809, %810 : vector<2x8x8xf32>
    %cst_315 = arith.constant -1.000000e+09 : f32
    %812 = vector.broadcast %cst_315 : f32 to vector<2x8x8xf32>
    %813 = arith.select %761, %811, %812 : vector<2x8x8xi1>, vector<2x8x8xf32>
    %cst_316 = arith.constant dense<0xFF800000> : vector<2x8xf32>
    %814 = vector.multi_reduction <maximumf>, %813, %cst_316 [2] : vector<2x8x8xf32> to vector<2x8xf32>
    %815 = vector.shape_cast %814 : vector<2x8xf32> to vector<2x8x1xf32>
    %816 = vector.broadcast %815 : vector<2x8x1xf32> to vector<2x8x8xf32>
    %817 = arith.subf %813, %816 : vector<2x8x8xf32>
    %818 = math.exp %817 : vector<2x8x8xf32>
    %cst_317 = arith.constant dense<0.000000e+00> : vector<2x8xf32>
    %819 = vector.multi_reduction <add>, %818, %cst_317 [2] : vector<2x8x8xf32> to vector<2x8xf32>
    %820 = vector.shape_cast %819 : vector<2x8xf32> to vector<2x8x1xf32>
    %821 = tpu.reciprocal %820 {approx = true} : vector<2x8x1xf32> -> vector<2x8x1xf32>
    %822 = vector.broadcast %821 : vector<2x8x1xf32> to vector<2x8x8xf32>
    %823 = arith.mulf %818, %822 : vector<2x8x8xf32>
    %824 = vector.extract_strided_slice %757 {offsets = [0, 0, 16], sizes = [2, 8, 8], strides = [1, 1, 1]} : vector<2x8x32xf32> to vector<2x8x8xf32>
    "tpu.trace_start"() <{level = 10 : i32, message = "bqk,bkd->bqd"}> : () -> ()
    %cst_318 = arith.constant dense<0.000000e+00> : vector<2x8x8xf32>
    %825 = tpu.matmul %823, %824, %cst_318 {dimension_numbers = #tpu.dot_dimension_numbers<[2], [1], [1], [2], [0, 0, 0, 1, 1, 2], [0], [0]>} : vector<2x8x8xf32>, vector<2x8x8xf32>, vector<2x8x8xf32> -> vector<2x8x8xf32>
    "tpu.trace_stop"() : () -> ()
    %826 = vector.shape_cast %825 : vector<2x8x8xf32> to vector<16x8xf32>
    %827 = vector.extract_strided_slice %735 {offsets = [16, 0], sizes = [8, 32], strides = [1, 1]} : vector<32x32xf32> to vector<8x32xf32>
    %cst_319 = arith.constant dense<0.000000e+00> : vector<16x32xf32>
    %828 = tpu.matmul %826, %827, %cst_319 {dimension_numbers = #tpu.dot_dimension_numbers<[1], [0], [0], [1], [0, 0, 1, 1], [], []>} : vector<16x8xf32>, vector<8x32xf32>, vector<16x32xf32> -> vector<16x32xf32>
    %829 = arith.addf %806, %828 : vector<16x32xf32>
    %830 = vector.extract_strided_slice %755 {offsets = [0, 0, 24], sizes = [2, 8, 8], strides = [1, 1, 1]} : vector<2x8x32xf32> to vector<2x8x8xf32>
    %831 = vector.extract_strided_slice %756 {offsets = [0, 0, 24], sizes = [2, 8, 8], strides = [1, 1, 1]} : vector<2x8x32xf32> to vector<2x8x8xf32>
    "tpu.trace_start"() <{level = 10 : i32, message = "bqd,bkd->bqk"}> : () -> ()
    %cst_320 = arith.constant dense<0.000000e+00> : vector<2x8x8xf32>
    %832 = tpu.matmul %830, %831, %cst_320 {dimension_numbers = #tpu.dot_dimension_numbers<[2], [2], [1], [1], [0, 0, 0, 1, 1, 1], [0], [0]>} : vector<2x8x8xf32>, vector<2x8x8xf32>, vector<2x8x8xf32> -> vector<2x8x8xf32>
    "tpu.trace_stop"() : () -> ()
    %cst_321 = arith.constant 0.353553385 : f32
    %833 = vector.broadcast %cst_321 : f32 to vector<2x8x8xf32>
    %834 = arith.mulf %832, %833 : vector<2x8x8xf32>
    %cst_322 = arith.constant -1.000000e+09 : f32
    %835 = vector.broadcast %cst_322 : f32 to vector<2x8x8xf32>
    %836 = arith.select %761, %834, %835 : vector<2x8x8xi1>, vector<2x8x8xf32>
    %cst_323 = arith.constant dense<0xFF800000> : vector<2x8xf32>
    %837 = vector.multi_reduction <maximumf>, %836, %cst_323 [2] : vector<2x8x8xf32> to vector<2x8xf32>
    %838 = vector.shape_cast %837 : vector<2x8xf32> to vector<2x8x1xf32>
    %839 = vector.broadcast %838 : vector<2x8x1xf32> to vector<2x8x8xf32>
    %840 = arith.subf %836, %839 : vector<2x8x8xf32>
    %841 = math.exp %840 : vector<2x8x8xf32>
    %cst_324 = arith.constant dense<0.000000e+00> : vector<2x8xf32>
    %842 = vector.multi_reduction <add>, %841, %cst_324 [2] : vector<2x8x8xf32> to vector<2x8xf32>
    %843 = vector.shape_cast %842 : vector<2x8xf32> to vector<2x8x1xf32>
    %844 = tpu.reciprocal %843 {approx = true} : vector<2x8x1xf32> -> vector<2x8x1xf32>
    %845 = vector.broadcast %844 : vector<2x8x1xf32> to vector<2x8x8xf32>
    %846 = arith.mulf %841, %845 : vector<2x8x8xf32>
    %847 = vector.extract_strided_slice %757 {offsets = [0, 0, 24], sizes = [2, 8, 8], strides = [1, 1, 1]} : vector<2x8x32xf32> to vector<2x8x8xf32>
    "tpu.trace_start"() <{level = 10 : i32, message = "bqk,bkd->bqd"}> : () -> ()
    %cst_325 = arith.constant dense<0.000000e+00> : vector<2x8x8xf32>
    %848 = tpu.matmul %846, %847, %cst_325 {dimension_numbers = #tpu.dot_dimension_numbers<[2], [1], [1], [2], [0, 0, 0, 1, 1, 2], [0], [0]>} : vector<2x8x8xf32>, vector<2x8x8xf32>, vector<2x8x8xf32> -> vector<2x8x8xf32>
    "tpu.trace_stop"() : () -> ()
    %849 = vector.shape_cast %848 : vector<2x8x8xf32> to vector<16x8xf32>
    %850 = vector.extract_strided_slice %735 {offsets = [24, 0], sizes = [8, 32], strides = [1, 1]} : vector<32x32xf32> to vector<8x32xf32>
    %cst_326 = arith.constant dense<0.000000e+00> : vector<16x32xf32>
    %851 = tpu.matmul %849, %850, %cst_326 {dimension_numbers = #tpu.dot_dimension_numbers<[1], [0], [0], [1], [0, 0, 1, 1], [], []>} : vector<16x8xf32>, vector<8x32xf32>, vector<16x32xf32> -> vector<16x32xf32>
    %852 = arith.addf %829, %851 : vector<16x32xf32>
    %853 = vector.broadcast %737 : vector<1x32xf32> to vector<16x32xf32>
    %854 = arith.addf %852, %853 : vector<16x32xf32>
    %855 = vector.shape_cast %854 : vector<16x32xf32> to vector<2x8x32xf32>
    %856 = arith.addf %700, %855 : vector<2x8x32xf32>
    %c0_327 = arith.constant 0 : index
    %c0_328 = arith.constant 0 : index
    %c0_329 = arith.constant 0 : index
    %857 = vector.load %arg39[%c0_327, %c0_328, %c0_329] : memref<2x1x32xf32, #tpu.memory_space<vmem>>, vector<1x1x32xf32>
    %858 = vector.shape_cast %857 : vector<1x1x32xf32> to vector<1x32xf32>
    %c0_330 = arith.constant 0 : index
    %c0_331 = arith.constant 0 : index
    %c0_332 = arith.constant 0 : index
    %859 = vector.load %arg40[%c0_330, %c0_331, %c0_332] : memref<2x1x32xf32, #tpu.memory_space<vmem>>, vector<1x1x32xf32>
    %860 = vector.shape_cast %859 : vector<1x1x32xf32> to vector<1x32xf32>
    %861 = vector.shape_cast %856 : vector<2x8x32xf32> to vector<16x32xf32>
    %cst_333 = arith.constant dense<0.000000e+00> : vector<16xf32>
    %862 = vector.multi_reduction <add>, %861, %cst_333 [1] : vector<16x32xf32> to vector<16xf32>
    %863 = vector.shape_cast %862 : vector<16xf32> to vector<16x1xf32>
    %cst_334 = arith.constant 3.200000e+01 : f32
    %864 = vector.broadcast %cst_334 : f32 to vector<16x1xf32>
    %865 = arith.divf %863, %864 : vector<16x1xf32>
    %866 = vector.broadcast %865 : vector<16x1xf32> to vector<16x32xf32>
    %867 = arith.subf %861, %866 : vector<16x32xf32>
    %868 = arith.mulf %867, %867 : vector<16x32xf32>
    %cst_335 = arith.constant dense<0.000000e+00> : vector<16xf32>
    %869 = vector.multi_reduction <add>, %868, %cst_335 [1] : vector<16x32xf32> to vector<16xf32>
    %870 = vector.shape_cast %869 : vector<16xf32> to vector<16x1xf32>
    %cst_336 = arith.constant 3.100000e+01 : f32
    %871 = vector.broadcast %cst_336 : f32 to vector<16x1xf32>
    %872 = arith.divf %870, %871 : vector<16x1xf32>
    %873 = math.sqrt %872 : vector<16x1xf32>
    %cst_337 = arith.constant 9.99999997E-7 : f32
    %874 = vector.broadcast %cst_337 : f32 to vector<16x1xf32>
    %875 = arith.addf %873, %874 : vector<16x1xf32>
    %876 = tpu.reciprocal %875 {approx = true} : vector<16x1xf32> -> vector<16x1xf32>
    %877 = vector.broadcast %865 : vector<16x1xf32> to vector<16x32xf32>
    %878 = arith.subf %861, %877 : vector<16x32xf32>
    %879 = vector.broadcast %858 : vector<1x32xf32> to vector<16x32xf32>
    %880 = arith.mulf %879, %878 : vector<16x32xf32>
    %881 = vector.broadcast %876 : vector<16x1xf32> to vector<16x32xf32>
    %882 = arith.mulf %880, %881 : vector<16x32xf32>
    %883 = vector.broadcast %860 : vector<1x32xf32> to vector<16x32xf32>
    %884 = arith.addf %882, %883 : vector<16x32xf32>
    %885 = vector.shape_cast %884 : vector<16x32xf32> to vector<2x8x32xf32>
    %c0_338 = arith.constant 0 : index
    %c0_339 = arith.constant 0 : index
    %c0_340 = arith.constant 0 : index
    %886 = vector.load %arg31[%c0_338, %c0_339, %c0_340] : memref<2x32x64xf32, #tpu.memory_space<vmem>>, vector<1x32x64xf32>
    %887 = vector.shape_cast %886 : vector<1x32x64xf32> to vector<32x64xf32>
    %c0_341 = arith.constant 0 : index
    %c0_342 = arith.constant 0 : index
    %c0_343 = arith.constant 0 : index
    %888 = vector.load %arg32[%c0_341, %c0_342, %c0_343] : memref<2x1x64xf32, #tpu.memory_space<vmem>>, vector<1x1x64xf32>
    %889 = vector.shape_cast %888 : vector<1x1x64xf32> to vector<1x64xf32>
    %c0_344 = arith.constant 0 : index
    %c0_345 = arith.constant 0 : index
    %c0_346 = arith.constant 0 : index
    %890 = vector.load %arg33[%c0_344, %c0_345, %c0_346] : memref<2x64x32xf32, #tpu.memory_space<vmem>>, vector<1x64x32xf32>
    %891 = vector.shape_cast %890 : vector<1x64x32xf32> to vector<64x32xf32>
    %c0_347 = arith.constant 0 : index
    %c0_348 = arith.constant 0 : index
    %c0_349 = arith.constant 0 : index
    %892 = vector.load %arg34[%c0_347, %c0_348, %c0_349] : memref<2x1x32xf32, #tpu.memory_space<vmem>>, vector<1x1x32xf32>
    %893 = vector.shape_cast %892 : vector<1x1x32xf32> to vector<1x32xf32>
    %894 = vector.shape_cast %885 : vector<2x8x32xf32> to vector<16x32xf32>
    %cst_350 = arith.constant dense<0.000000e+00> : vector<16x64xf32>
    %895 = tpu.matmul %894, %887, %cst_350 {dimension_numbers = #tpu.dot_dimension_numbers<[1], [0], [0], [1], [0, 0, 1, 1], [], []>} : vector<16x32xf32>, vector<32x64xf32>, vector<16x64xf32> -> vector<16x64xf32>
    %896 = vector.broadcast %889 : vector<1x64xf32> to vector<16x64xf32>
    %897 = arith.addf %895, %896 : vector<16x64xf32>
    %cst_351 = arith.constant 0.000000e+00 : f32
    %898 = vector.broadcast %cst_351 : f32 to vector<16x64xf32>
    %899 = arith.maximumf %897, %898 : vector<16x64xf32>
    %cst_352 = arith.constant dense<0.000000e+00> : vector<16x32xf32>
    %900 = tpu.matmul %899, %891, %cst_352 {dimension_numbers = #tpu.dot_dimension_numbers<[1], [0], [0], [1], [0, 0, 1, 1], [], []>} : vector<16x64xf32>, vector<64x32xf32>, vector<16x32xf32> -> vector<16x32xf32>
    %901 = vector.broadcast %893 : vector<1x32xf32> to vector<16x32xf32>
    %902 = arith.addf %900, %901 : vector<16x32xf32>
    %903 = vector.shape_cast %902 : vector<16x32xf32> to vector<2x8x32xf32>
    %904 = arith.addf %856, %903 : vector<2x8x32xf32>
    %c1_353 = arith.constant 1 : index
    %c0_354 = arith.constant 0 : index
    %c0_355 = arith.constant 0 : index
    %905 = vector.load %arg35[%c1_353, %c0_354, %c0_355] : memref<2x1x32xf32, #tpu.memory_space<vmem>>, vector<1x1x32xf32>
    %906 = vector.shape_cast %905 : vector<1x1x32xf32> to vector<1x32xf32>
    %c1_356 = arith.constant 1 : index
    %c0_357 = arith.constant 0 : index
    %c0_358 = arith.constant 0 : index
    %907 = vector.load %arg36[%c1_356, %c0_357, %c0_358] : memref<2x1x32xf32, #tpu.memory_space<vmem>>, vector<1x1x32xf32>
    %908 = vector.shape_cast %907 : vector<1x1x32xf32> to vector<1x32xf32>
    %909 = vector.shape_cast %904 : vector<2x8x32xf32> to vector<16x32xf32>
    %cst_359 = arith.constant dense<0.000000e+00> : vector<16xf32>
    %910 = vector.multi_reduction <add>, %909, %cst_359 [1] : vector<16x32xf32> to vector<16xf32>
    %911 = vector.shape_cast %910 : vector<16xf32> to vector<16x1xf32>
    %cst_360 = arith.constant 3.200000e+01 : f32
    %912 = vector.broadcast %cst_360 : f32 to vector<16x1xf32>
    %913 = arith.divf %911, %912 : vector<16x1xf32>
    %914 = vector.broadcast %913 : vector<16x1xf32> to vector<16x32xf32>
    %915 = arith.subf %909, %914 : vector<16x32xf32>
    %916 = arith.mulf %915, %915 : vector<16x32xf32>
    %cst_361 = arith.constant dense<0.000000e+00> : vector<16xf32>
    %917 = vector.multi_reduction <add>, %916, %cst_361 [1] : vector<16x32xf32> to vector<16xf32>
    %918 = vector.shape_cast %917 : vector<16xf32> to vector<16x1xf32>
    %cst_362 = arith.constant 3.100000e+01 : f32
    %919 = vector.broadcast %cst_362 : f32 to vector<16x1xf32>
    %920 = arith.divf %918, %919 : vector<16x1xf32>
    %921 = math.sqrt %920 : vector<16x1xf32>
    %cst_363 = arith.constant 9.99999997E-7 : f32
    %922 = vector.broadcast %cst_363 : f32 to vector<16x1xf32>
    %923 = arith.addf %921, %922 : vector<16x1xf32>
    %924 = tpu.reciprocal %923 {approx = true} : vector<16x1xf32> -> vector<16x1xf32>
    %925 = vector.broadcast %913 : vector<16x1xf32> to vector<16x32xf32>
    %926 = arith.subf %909, %925 : vector<16x32xf32>
    %927 = vector.broadcast %906 : vector<1x32xf32> to vector<16x32xf32>
    %928 = arith.mulf %927, %926 : vector<16x32xf32>
    %929 = vector.broadcast %924 : vector<16x1xf32> to vector<16x32xf32>
    %930 = arith.mulf %928, %929 : vector<16x32xf32>
    %931 = vector.broadcast %908 : vector<1x32xf32> to vector<16x32xf32>
    %932 = arith.addf %930, %931 : vector<16x32xf32>
    %933 = vector.shape_cast %932 : vector<16x32xf32> to vector<2x8x32xf32>
    %c1_364 = arith.constant 1 : index
    %c0_365 = arith.constant 0 : index
    %c0_366 = arith.constant 0 : index
    %934 = vector.load %arg23[%c1_364, %c0_365, %c0_366] : memref<2x32x96xf32, #tpu.memory_space<vmem>>, vector<1x32x96xf32>
    %935 = vector.shape_cast %934 : vector<1x32x96xf32> to vector<32x96xf32>
    %c1_367 = arith.constant 1 : index
    %c0_368 = arith.constant 0 : index
    %c0_369 = arith.constant 0 : index
    %936 = vector.load %arg24[%c1_367, %c0_368, %c0_369] : memref<2x1x96xf32, #tpu.memory_space<vmem>>, vector<1x1x96xf32>
    %937 = vector.shape_cast %936 : vector<1x1x96xf32> to vector<1x96xf32>
    %c1_370 = arith.constant 1 : index
    %c0_371 = arith.constant 0 : index
    %c0_372 = arith.constant 0 : index
    %938 = vector.load %arg25[%c1_370, %c0_371, %c0_372] : memref<2x32x32xf32, #tpu.memory_space<vmem>>, vector<1x32x32xf32>
    %939 = vector.shape_cast %938 : vector<1x32x32xf32> to vector<32x32xf32>
    %c1_373 = arith.constant 1 : index
    %c0_374 = arith.constant 0 : index
    %c0_375 = arith.constant 0 : index
    %940 = vector.load %arg26[%c1_373, %c0_374, %c0_375] : memref<2x1x32xf32, #tpu.memory_space<vmem>>, vector<1x1x32xf32>
    %941 = vector.shape_cast %940 : vector<1x1x32xf32> to vector<1x32xf32>
    %942 = vector.shape_cast %933 : vector<2x8x32xf32> to vector<16x32xf32>
    %943 = vector.shape_cast %933 : vector<2x8x32xf32> to vector<16x32xf32>
    %944 = vector.extract_strided_slice %935 {offsets = [0, 0], sizes = [32, 32], strides = [1, 1]} : vector<32x96xf32> to vector<32x32xf32>
    %cst_376 = arith.constant dense<0.000000e+00> : vector<16x32xf32>
    %945 = tpu.matmul %942, %944, %cst_376 {dimension_numbers = #tpu.dot_dimension_numbers<[1], [0], [0], [1], [0, 0, 1, 1], [], []>} : vector<16x32xf32>, vector<32x32xf32>, vector<16x32xf32> -> vector<16x32xf32>
    %946 = vector.extract_strided_slice %937 {offsets = [0, 0], sizes = [1, 32], strides = [1, 1]} : vector<1x96xf32> to vector<1x32xf32>
    %947 = vector.broadcast %946 : vector<1x32xf32> to vector<16x32xf32>
    %948 = arith.addf %945, %947 : vector<16x32xf32>
    %949 = vector.extract_strided_slice %935 {offsets = [0, 32], sizes = [32, 32], strides = [1, 1]} : vector<32x96xf32> to vector<32x32xf32>
    %cst_377 = arith.constant dense<0.000000e+00> : vector<16x32xf32>
    %950 = tpu.matmul %943, %949, %cst_377 {dimension_numbers = #tpu.dot_dimension_numbers<[1], [0], [0], [1], [0, 0, 1, 1], [], []>} : vector<16x32xf32>, vector<32x32xf32>, vector<16x32xf32> -> vector<16x32xf32>
    %951 = vector.extract_strided_slice %937 {offsets = [0, 32], sizes = [1, 32], strides = [1, 1]} : vector<1x96xf32> to vector<1x32xf32>
    %952 = vector.broadcast %951 : vector<1x32xf32> to vector<16x32xf32>
    %953 = arith.addf %950, %952 : vector<16x32xf32>
    %954 = vector.extract_strided_slice %935 {offsets = [0, 64], sizes = [32, 32], strides = [1, 1]} : vector<32x96xf32> to vector<32x32xf32>
    %cst_378 = arith.constant dense<0.000000e+00> : vector<16x32xf32>
    %955 = tpu.matmul %943, %954, %cst_378 {dimension_numbers = #tpu.dot_dimension_numbers<[1], [0], [0], [1], [0, 0, 1, 1], [], []>} : vector<16x32xf32>, vector<32x32xf32>, vector<16x32xf32> -> vector<16x32xf32>
    %956 = vector.extract_strided_slice %937 {offsets = [0, 64], sizes = [1, 32], strides = [1, 1]} : vector<1x96xf32> to vector<1x32xf32>
    %957 = vector.broadcast %956 : vector<1x32xf32> to vector<16x32xf32>
    %958 = arith.addf %955, %957 : vector<16x32xf32>
    %959 = vector.shape_cast %948 : vector<16x32xf32> to vector<2x8x32xf32>
    %960 = vector.shape_cast %953 : vector<16x32xf32> to vector<2x8x32xf32>
    %961 = vector.shape_cast %958 : vector<16x32xf32> to vector<2x8x32xf32>
    %cst_379 = arith.constant 0.000000e+00 : f32
    %962 = vector.broadcast %cst_379 : f32 to vector<2x8x8xf32>
    %963 = arith.cmpf ogt, %1, %962 : vector<2x8x8xf32>
    %964 = vector.extract_strided_slice %959 {offsets = [0, 0, 0], sizes = [2, 8, 8], strides = [1, 1, 1]} : vector<2x8x32xf32> to vector<2x8x8xf32>
    %965 = vector.extract_strided_slice %960 {offsets = [0, 0, 0], sizes = [2, 8, 8], strides = [1, 1, 1]} : vector<2x8x32xf32> to vector<2x8x8xf32>
    "tpu.trace_start"() <{level = 10 : i32, message = "bqd,bkd->bqk"}> : () -> ()
    %cst_380 = arith.constant dense<0.000000e+00> : vector<2x8x8xf32>
    %966 = tpu.matmul %964, %965, %cst_380 {dimension_numbers = #tpu.dot_dimension_numbers<[2], [2], [1], [1], [0, 0, 0, 1, 1, 1], [0], [0]>} : vector<2x8x8xf32>, vector<2x8x8xf32>, vector<2x8x8xf32> -> vector<2x8x8xf32>
    "tpu.trace_stop"() : () -> ()
    %cst_381 = arith.constant 0.353553385 : f32
    %967 = vector.broadcast %cst_381 : f32 to vector<2x8x8xf32>
    %968 = arith.mulf %966, %967 : vector<2x8x8xf32>
    %cst_382 = arith.constant -1.000000e+09 : f32
    %969 = vector.broadcast %cst_382 : f32 to vector<2x8x8xf32>
    %970 = arith.select %963, %968, %969 : vector<2x8x8xi1>, vector<2x8x8xf32>
    %cst_383 = arith.constant dense<0xFF800000> : vector<2x8xf32>
    %971 = vector.multi_reduction <maximumf>, %970, %cst_383 [2] : vector<2x8x8xf32> to vector<2x8xf32>
    %972 = vector.shape_cast %971 : vector<2x8xf32> to vector<2x8x1xf32>
    %973 = vector.broadcast %972 : vector<2x8x1xf32> to vector<2x8x8xf32>
    %974 = arith.subf %970, %973 : vector<2x8x8xf32>
    %975 = math.exp %974 : vector<2x8x8xf32>
    %cst_384 = arith.constant dense<0.000000e+00> : vector<2x8xf32>
    %976 = vector.multi_reduction <add>, %975, %cst_384 [2] : vector<2x8x8xf32> to vector<2x8xf32>
    %977 = vector.shape_cast %976 : vector<2x8xf32> to vector<2x8x1xf32>
    %978 = tpu.reciprocal %977 {approx = true} : vector<2x8x1xf32> -> vector<2x8x1xf32>
    %979 = vector.broadcast %978 : vector<2x8x1xf32> to vector<2x8x8xf32>
    %980 = arith.mulf %975, %979 : vector<2x8x8xf32>
    %981 = vector.extract_strided_slice %961 {offsets = [0, 0, 0], sizes = [2, 8, 8], strides = [1, 1, 1]} : vector<2x8x32xf32> to vector<2x8x8xf32>
    "tpu.trace_start"() <{level = 10 : i32, message = "bqk,bkd->bqd"}> : () -> ()
    %cst_385 = arith.constant dense<0.000000e+00> : vector<2x8x8xf32>
    %982 = tpu.matmul %980, %981, %cst_385 {dimension_numbers = #tpu.dot_dimension_numbers<[2], [1], [1], [2], [0, 0, 0, 1, 1, 2], [0], [0]>} : vector<2x8x8xf32>, vector<2x8x8xf32>, vector<2x8x8xf32> -> vector<2x8x8xf32>
    "tpu.trace_stop"() : () -> ()
    %983 = vector.shape_cast %982 : vector<2x8x8xf32> to vector<16x8xf32>
    %984 = vector.extract_strided_slice %939 {offsets = [0, 0], sizes = [8, 32], strides = [1, 1]} : vector<32x32xf32> to vector<8x32xf32>
    %cst_386 = arith.constant dense<0.000000e+00> : vector<16x32xf32>
    %985 = tpu.matmul %983, %984, %cst_386 {dimension_numbers = #tpu.dot_dimension_numbers<[1], [0], [0], [1], [0, 0, 1, 1], [], []>} : vector<16x8xf32>, vector<8x32xf32>, vector<16x32xf32> -> vector<16x32xf32>
    %986 = vector.extract_strided_slice %959 {offsets = [0, 0, 8], sizes = [2, 8, 8], strides = [1, 1, 1]} : vector<2x8x32xf32> to vector<2x8x8xf32>
    %987 = vector.extract_strided_slice %960 {offsets = [0, 0, 8], sizes = [2, 8, 8], strides = [1, 1, 1]} : vector<2x8x32xf32> to vector<2x8x8xf32>
    "tpu.trace_start"() <{level = 10 : i32, message = "bqd,bkd->bqk"}> : () -> ()
    %cst_387 = arith.constant dense<0.000000e+00> : vector<2x8x8xf32>
    %988 = tpu.matmul %986, %987, %cst_387 {dimension_numbers = #tpu.dot_dimension_numbers<[2], [2], [1], [1], [0, 0, 0, 1, 1, 1], [0], [0]>} : vector<2x8x8xf32>, vector<2x8x8xf32>, vector<2x8x8xf32> -> vector<2x8x8xf32>
    "tpu.trace_stop"() : () -> ()
    %cst_388 = arith.constant 0.353553385 : f32
    %989 = vector.broadcast %cst_388 : f32 to vector<2x8x8xf32>
    %990 = arith.mulf %988, %989 : vector<2x8x8xf32>
    %cst_389 = arith.constant -1.000000e+09 : f32
    %991 = vector.broadcast %cst_389 : f32 to vector<2x8x8xf32>
    %992 = arith.select %963, %990, %991 : vector<2x8x8xi1>, vector<2x8x8xf32>
    %cst_390 = arith.constant dense<0xFF800000> : vector<2x8xf32>
    %993 = vector.multi_reduction <maximumf>, %992, %cst_390 [2] : vector<2x8x8xf32> to vector<2x8xf32>
    %994 = vector.shape_cast %993 : vector<2x8xf32> to vector<2x8x1xf32>
    %995 = vector.broadcast %994 : vector<2x8x1xf32> to vector<2x8x8xf32>
    %996 = arith.subf %992, %995 : vector<2x8x8xf32>
    %997 = math.exp %996 : vector<2x8x8xf32>
    %cst_391 = arith.constant dense<0.000000e+00> : vector<2x8xf32>
    %998 = vector.multi_reduction <add>, %997, %cst_391 [2] : vector<2x8x8xf32> to vector<2x8xf32>
    %999 = vector.shape_cast %998 : vector<2x8xf32> to vector<2x8x1xf32>
    %1000 = tpu.reciprocal %999 {approx = true} : vector<2x8x1xf32> -> vector<2x8x1xf32>
    %1001 = vector.broadcast %1000 : vector<2x8x1xf32> to vector<2x8x8xf32>
    %1002 = arith.mulf %997, %1001 : vector<2x8x8xf32>
    %1003 = vector.extract_strided_slice %961 {offsets = [0, 0, 8], sizes = [2, 8, 8], strides = [1, 1, 1]} : vector<2x8x32xf32> to vector<2x8x8xf32>
    "tpu.trace_start"() <{level = 10 : i32, message = "bqk,bkd->bqd"}> : () -> ()
    %cst_392 = arith.constant dense<0.000000e+00> : vector<2x8x8xf32>
    %1004 = tpu.matmul %1002, %1003, %cst_392 {dimension_numbers = #tpu.dot_dimension_numbers<[2], [1], [1], [2], [0, 0, 0, 1, 1, 2], [0], [0]>} : vector<2x8x8xf32>, vector<2x8x8xf32>, vector<2x8x8xf32> -> vector<2x8x8xf32>
    "tpu.trace_stop"() : () -> ()
    %1005 = vector.shape_cast %1004 : vector<2x8x8xf32> to vector<16x8xf32>
    %1006 = vector.extract_strided_slice %939 {offsets = [8, 0], sizes = [8, 32], strides = [1, 1]} : vector<32x32xf32> to vector<8x32xf32>
    %cst_393 = arith.constant dense<0.000000e+00> : vector<16x32xf32>
    %1007 = tpu.matmul %1005, %1006, %cst_393 {dimension_numbers = #tpu.dot_dimension_numbers<[1], [0], [0], [1], [0, 0, 1, 1], [], []>} : vector<16x8xf32>, vector<8x32xf32>, vector<16x32xf32> -> vector<16x32xf32>
    %1008 = arith.addf %985, %1007 : vector<16x32xf32>
    %1009 = vector.extract_strided_slice %959 {offsets = [0, 0, 16], sizes = [2, 8, 8], strides = [1, 1, 1]} : vector<2x8x32xf32> to vector<2x8x8xf32>
    %1010 = vector.extract_strided_slice %960 {offsets = [0, 0, 16], sizes = [2, 8, 8], strides = [1, 1, 1]} : vector<2x8x32xf32> to vector<2x8x8xf32>
    "tpu.trace_start"() <{level = 10 : i32, message = "bqd,bkd->bqk"}> : () -> ()
    %cst_394 = arith.constant dense<0.000000e+00> : vector<2x8x8xf32>
    %1011 = tpu.matmul %1009, %1010, %cst_394 {dimension_numbers = #tpu.dot_dimension_numbers<[2], [2], [1], [1], [0, 0, 0, 1, 1, 1], [0], [0]>} : vector<2x8x8xf32>, vector<2x8x8xf32>, vector<2x8x8xf32> -> vector<2x8x8xf32>
    "tpu.trace_stop"() : () -> ()
    %cst_395 = arith.constant 0.353553385 : f32
    %1012 = vector.broadcast %cst_395 : f32 to vector<2x8x8xf32>
    %1013 = arith.mulf %1011, %1012 : vector<2x8x8xf32>
    %cst_396 = arith.constant -1.000000e+09 : f32
    %1014 = vector.broadcast %cst_396 : f32 to vector<2x8x8xf32>
    %1015 = arith.select %963, %1013, %1014 : vector<2x8x8xi1>, vector<2x8x8xf32>
    %cst_397 = arith.constant dense<0xFF800000> : vector<2x8xf32>
    %1016 = vector.multi_reduction <maximumf>, %1015, %cst_397 [2] : vector<2x8x8xf32> to vector<2x8xf32>
    %1017 = vector.shape_cast %1016 : vector<2x8xf32> to vector<2x8x1xf32>
    %1018 = vector.broadcast %1017 : vector<2x8x1xf32> to vector<2x8x8xf32>
    %1019 = arith.subf %1015, %1018 : vector<2x8x8xf32>
    %1020 = math.exp %1019 : vector<2x8x8xf32>
    %cst_398 = arith.constant dense<0.000000e+00> : vector<2x8xf32>
    %1021 = vector.multi_reduction <add>, %1020, %cst_398 [2] : vector<2x8x8xf32> to vector<2x8xf32>
    %1022 = vector.shape_cast %1021 : vector<2x8xf32> to vector<2x8x1xf32>
    %1023 = tpu.reciprocal %1022 {approx = true} : vector<2x8x1xf32> -> vector<2x8x1xf32>
    %1024 = vector.broadcast %1023 : vector<2x8x1xf32> to vector<2x8x8xf32>
    %1025 = arith.mulf %1020, %1024 : vector<2x8x8xf32>
    %1026 = vector.extract_strided_slice %961 {offsets = [0, 0, 16], sizes = [2, 8, 8], strides = [1, 1, 1]} : vector<2x8x32xf32> to vector<2x8x8xf32>
    "tpu.trace_start"() <{level = 10 : i32, message = "bqk,bkd->bqd"}> : () -> ()
    %cst_399 = arith.constant dense<0.000000e+00> : vector<2x8x8xf32>
    %1027 = tpu.matmul %1025, %1026, %cst_399 {dimension_numbers = #tpu.dot_dimension_numbers<[2], [1], [1], [2], [0, 0, 0, 1, 1, 2], [0], [0]>} : vector<2x8x8xf32>, vector<2x8x8xf32>, vector<2x8x8xf32> -> vector<2x8x8xf32>
    "tpu.trace_stop"() : () -> ()
    %1028 = vector.shape_cast %1027 : vector<2x8x8xf32> to vector<16x8xf32>
    %1029 = vector.extract_strided_slice %939 {offsets = [16, 0], sizes = [8, 32], strides = [1, 1]} : vector<32x32xf32> to vector<8x32xf32>
    %cst_400 = arith.constant dense<0.000000e+00> : vector<16x32xf32>
    %1030 = tpu.matmul %1028, %1029, %cst_400 {dimension_numbers = #tpu.dot_dimension_numbers<[1], [0], [0], [1], [0, 0, 1, 1], [], []>} : vector<16x8xf32>, vector<8x32xf32>, vector<16x32xf32> -> vector<16x32xf32>
    %1031 = arith.addf %1008, %1030 : vector<16x32xf32>
    %1032 = vector.extract_strided_slice %959 {offsets = [0, 0, 24], sizes = [2, 8, 8], strides = [1, 1, 1]} : vector<2x8x32xf32> to vector<2x8x8xf32>
    %1033 = vector.extract_strided_slice %960 {offsets = [0, 0, 24], sizes = [2, 8, 8], strides = [1, 1, 1]} : vector<2x8x32xf32> to vector<2x8x8xf32>
    "tpu.trace_start"() <{level = 10 : i32, message = "bqd,bkd->bqk"}> : () -> ()
    %cst_401 = arith.constant dense<0.000000e+00> : vector<2x8x8xf32>
    %1034 = tpu.matmul %1032, %1033, %cst_401 {dimension_numbers = #tpu.dot_dimension_numbers<[2], [2], [1], [1], [0, 0, 0, 1, 1, 1], [0], [0]>} : vector<2x8x8xf32>, vector<2x8x8xf32>, vector<2x8x8xf32> -> vector<2x8x8xf32>
    "tpu.trace_stop"() : () -> ()
    %cst_402 = arith.constant 0.353553385 : f32
    %1035 = vector.broadcast %cst_402 : f32 to vector<2x8x8xf32>
    %1036 = arith.mulf %1034, %1035 : vector<2x8x8xf32>
    %cst_403 = arith.constant -1.000000e+09 : f32
    %1037 = vector.broadcast %cst_403 : f32 to vector<2x8x8xf32>
    %1038 = arith.select %963, %1036, %1037 : vector<2x8x8xi1>, vector<2x8x8xf32>
    %cst_404 = arith.constant dense<0xFF800000> : vector<2x8xf32>
    %1039 = vector.multi_reduction <maximumf>, %1038, %cst_404 [2] : vector<2x8x8xf32> to vector<2x8xf32>
    %1040 = vector.shape_cast %1039 : vector<2x8xf32> to vector<2x8x1xf32>
    %1041 = vector.broadcast %1040 : vector<2x8x1xf32> to vector<2x8x8xf32>
    %1042 = arith.subf %1038, %1041 : vector<2x8x8xf32>
    %1043 = math.exp %1042 : vector<2x8x8xf32>
    %cst_405 = arith.constant dense<0.000000e+00> : vector<2x8xf32>
    %1044 = vector.multi_reduction <add>, %1043, %cst_405 [2] : vector<2x8x8xf32> to vector<2x8xf32>
    %1045 = vector.shape_cast %1044 : vector<2x8xf32> to vector<2x8x1xf32>
    %1046 = tpu.reciprocal %1045 {approx = true} : vector<2x8x1xf32> -> vector<2x8x1xf32>
    %1047 = vector.broadcast %1046 : vector<2x8x1xf32> to vector<2x8x8xf32>
    %1048 = arith.mulf %1043, %1047 : vector<2x8x8xf32>
    %1049 = vector.extract_strided_slice %961 {offsets = [0, 0, 24], sizes = [2, 8, 8], strides = [1, 1, 1]} : vector<2x8x32xf32> to vector<2x8x8xf32>
    "tpu.trace_start"() <{level = 10 : i32, message = "bqk,bkd->bqd"}> : () -> ()
    %cst_406 = arith.constant dense<0.000000e+00> : vector<2x8x8xf32>
    %1050 = tpu.matmul %1048, %1049, %cst_406 {dimension_numbers = #tpu.dot_dimension_numbers<[2], [1], [1], [2], [0, 0, 0, 1, 1, 2], [0], [0]>} : vector<2x8x8xf32>, vector<2x8x8xf32>, vector<2x8x8xf32> -> vector<2x8x8xf32>
    "tpu.trace_stop"() : () -> ()
    %1051 = vector.shape_cast %1050 : vector<2x8x8xf32> to vector<16x8xf32>
    %1052 = vector.extract_strided_slice %939 {offsets = [24, 0], sizes = [8, 32], strides = [1, 1]} : vector<32x32xf32> to vector<8x32xf32>
    %cst_407 = arith.constant dense<0.000000e+00> : vector<16x32xf32>
    %1053 = tpu.matmul %1051, %1052, %cst_407 {dimension_numbers = #tpu.dot_dimension_numbers<[1], [0], [0], [1], [0, 0, 1, 1], [], []>} : vector<16x8xf32>, vector<8x32xf32>, vector<16x32xf32> -> vector<16x32xf32>
    %1054 = arith.addf %1031, %1053 : vector<16x32xf32>
    %1055 = vector.broadcast %941 : vector<1x32xf32> to vector<16x32xf32>
    %1056 = arith.addf %1054, %1055 : vector<16x32xf32>
    %1057 = vector.shape_cast %1056 : vector<16x32xf32> to vector<2x8x32xf32>
    %1058 = arith.addf %904, %1057 : vector<2x8x32xf32>
    %c1_408 = arith.constant 1 : index
    %c0_409 = arith.constant 0 : index
    %c0_410 = arith.constant 0 : index
    %1059 = vector.load %arg37[%c1_408, %c0_409, %c0_410] : memref<2x1x32xf32, #tpu.memory_space<vmem>>, vector<1x1x32xf32>
    %1060 = vector.shape_cast %1059 : vector<1x1x32xf32> to vector<1x32xf32>
    %c1_411 = arith.constant 1 : index
    %c0_412 = arith.constant 0 : index
    %c0_413 = arith.constant 0 : index
    %1061 = vector.load %arg38[%c1_411, %c0_412, %c0_413] : memref<2x1x32xf32, #tpu.memory_space<vmem>>, vector<1x1x32xf32>
    %1062 = vector.shape_cast %1061 : vector<1x1x32xf32> to vector<1x32xf32>
    %1063 = vector.shape_cast %1058 : vector<2x8x32xf32> to vector<16x32xf32>
    %cst_414 = arith.constant dense<0.000000e+00> : vector<16xf32>
    %1064 = vector.multi_reduction <add>, %1063, %cst_414 [1] : vector<16x32xf32> to vector<16xf32>
    %1065 = vector.shape_cast %1064 : vector<16xf32> to vector<16x1xf32>
    %cst_415 = arith.constant 3.200000e+01 : f32
    %1066 = vector.broadcast %cst_415 : f32 to vector<16x1xf32>
    %1067 = arith.divf %1065, %1066 : vector<16x1xf32>
    %1068 = vector.broadcast %1067 : vector<16x1xf32> to vector<16x32xf32>
    %1069 = arith.subf %1063, %1068 : vector<16x32xf32>
    %1070 = arith.mulf %1069, %1069 : vector<16x32xf32>
    %cst_416 = arith.constant dense<0.000000e+00> : vector<16xf32>
    %1071 = vector.multi_reduction <add>, %1070, %cst_416 [1] : vector<16x32xf32> to vector<16xf32>
    %1072 = vector.shape_cast %1071 : vector<16xf32> to vector<16x1xf32>
    %cst_417 = arith.constant 3.100000e+01 : f32
    %1073 = vector.broadcast %cst_417 : f32 to vector<16x1xf32>
    %1074 = arith.divf %1072, %1073 : vector<16x1xf32>
    %1075 = math.sqrt %1074 : vector<16x1xf32>
    %cst_418 = arith.constant 9.99999997E-7 : f32
    %1076 = vector.broadcast %cst_418 : f32 to vector<16x1xf32>
    %1077 = arith.addf %1075, %1076 : vector<16x1xf32>
    %1078 = tpu.reciprocal %1077 {approx = true} : vector<16x1xf32> -> vector<16x1xf32>
    %1079 = vector.broadcast %1067 : vector<16x1xf32> to vector<16x32xf32>
    %1080 = arith.subf %1063, %1079 : vector<16x32xf32>
    %1081 = vector.broadcast %1060 : vector<1x32xf32> to vector<16x32xf32>
    %1082 = arith.mulf %1081, %1080 : vector<16x32xf32>
    %1083 = vector.broadcast %1078 : vector<16x1xf32> to vector<16x32xf32>
    %1084 = arith.mulf %1082, %1083 : vector<16x32xf32>
    %1085 = vector.broadcast %1062 : vector<1x32xf32> to vector<16x32xf32>
    %1086 = arith.addf %1084, %1085 : vector<16x32xf32>
    %1087 = vector.shape_cast %1086 : vector<16x32xf32> to vector<2x8x32xf32>
    %c1_419 = arith.constant 1 : index
    %c0_420 = arith.constant 0 : index
    %c0_421 = arith.constant 0 : index
    %1088 = vector.load %arg27[%c1_419, %c0_420, %c0_421] : memref<2x32x96xf32, #tpu.memory_space<vmem>>, vector<1x32x96xf32>
    %1089 = vector.shape_cast %1088 : vector<1x32x96xf32> to vector<32x96xf32>
    %c1_422 = arith.constant 1 : index
    %c0_423 = arith.constant 0 : index
    %c0_424 = arith.constant 0 : index
    %1090 = vector.load %arg28[%c1_422, %c0_423, %c0_424] : memref<2x1x96xf32, #tpu.memory_space<vmem>>, vector<1x1x96xf32>
    %1091 = vector.shape_cast %1090 : vector<1x1x96xf32> to vector<1x96xf32>
    %c1_425 = arith.constant 1 : index
    %c0_426 = arith.constant 0 : index
    %c0_427 = arith.constant 0 : index
    %1092 = vector.load %arg29[%c1_425, %c0_426, %c0_427] : memref<2x32x32xf32, #tpu.memory_space<vmem>>, vector<1x32x32xf32>
    %1093 = vector.shape_cast %1092 : vector<1x32x32xf32> to vector<32x32xf32>
    %c1_428 = arith.constant 1 : index
    %c0_429 = arith.constant 0 : index
    %c0_430 = arith.constant 0 : index
    %1094 = vector.load %arg30[%c1_428, %c0_429, %c0_430] : memref<2x1x32xf32, #tpu.memory_space<vmem>>, vector<1x1x32xf32>
    %1095 = vector.shape_cast %1094 : vector<1x1x32xf32> to vector<1x32xf32>
    %1096 = vector.shape_cast %1087 : vector<2x8x32xf32> to vector<16x32xf32>
    %1097 = vector.shape_cast %437 : vector<2x8x32xf32> to vector<16x32xf32>
    %1098 = vector.extract_strided_slice %1089 {offsets = [0, 0], sizes = [32, 32], strides = [1, 1]} : vector<32x96xf32> to vector<32x32xf32>
    %cst_431 = arith.constant dense<0.000000e+00> : vector<16x32xf32>
    %1099 = tpu.matmul %1096, %1098, %cst_431 {dimension_numbers = #tpu.dot_dimension_numbers<[1], [0], [0], [1], [0, 0, 1, 1], [], []>} : vector<16x32xf32>, vector<32x32xf32>, vector<16x32xf32> -> vector<16x32xf32>
    %1100 = vector.extract_strided_slice %1091 {offsets = [0, 0], sizes = [1, 32], strides = [1, 1]} : vector<1x96xf32> to vector<1x32xf32>
    %1101 = vector.broadcast %1100 : vector<1x32xf32> to vector<16x32xf32>
    %1102 = arith.addf %1099, %1101 : vector<16x32xf32>
    %1103 = vector.extract_strided_slice %1089 {offsets = [0, 32], sizes = [32, 32], strides = [1, 1]} : vector<32x96xf32> to vector<32x32xf32>
    %cst_432 = arith.constant dense<0.000000e+00> : vector<16x32xf32>
    %1104 = tpu.matmul %1097, %1103, %cst_432 {dimension_numbers = #tpu.dot_dimension_numbers<[1], [0], [0], [1], [0, 0, 1, 1], [], []>} : vector<16x32xf32>, vector<32x32xf32>, vector<16x32xf32> -> vector<16x32xf32>
    %1105 = vector.extract_strided_slice %1091 {offsets = [0, 32], sizes = [1, 32], strides = [1, 1]} : vector<1x96xf32> to vector<1x32xf32>
    %1106 = vector.broadcast %1105 : vector<1x32xf32> to vector<16x32xf32>
    %1107 = arith.addf %1104, %1106 : vector<16x32xf32>
    %1108 = vector.extract_strided_slice %1089 {offsets = [0, 64], sizes = [32, 32], strides = [1, 1]} : vector<32x96xf32> to vector<32x32xf32>
    %cst_433 = arith.constant dense<0.000000e+00> : vector<16x32xf32>
    %1109 = tpu.matmul %1097, %1108, %cst_433 {dimension_numbers = #tpu.dot_dimension_numbers<[1], [0], [0], [1], [0, 0, 1, 1], [], []>} : vector<16x32xf32>, vector<32x32xf32>, vector<16x32xf32> -> vector<16x32xf32>
    %1110 = vector.extract_strided_slice %1091 {offsets = [0, 64], sizes = [1, 32], strides = [1, 1]} : vector<1x96xf32> to vector<1x32xf32>
    %1111 = vector.broadcast %1110 : vector<1x32xf32> to vector<16x32xf32>
    %1112 = arith.addf %1109, %1111 : vector<16x32xf32>
    %1113 = vector.shape_cast %1102 : vector<16x32xf32> to vector<2x8x32xf32>
    %1114 = vector.shape_cast %1107 : vector<16x32xf32> to vector<2x8x32xf32>
    %1115 = vector.shape_cast %1112 : vector<16x32xf32> to vector<2x8x32xf32>
    %cst_434 = arith.constant 0.000000e+00 : f32
    %1116 = vector.broadcast %cst_434 : f32 to vector<2x1x8xf32>
    %1117 = arith.cmpf ogt, %0, %1116 : vector<2x1x8xf32>
    %1118 = vector.shape_cast %1117 : vector<2x1x8xi1> to vector<2x1x8xi1>
    %1119 = vector.broadcast %1118 : vector<2x1x8xi1> to vector<2x8x8xi1>
    %1120 = vector.extract_strided_slice %1113 {offsets = [0, 0, 0], sizes = [2, 8, 8], strides = [1, 1, 1]} : vector<2x8x32xf32> to vector<2x8x8xf32>
    %1121 = vector.extract_strided_slice %1114 {offsets = [0, 0, 0], sizes = [2, 8, 8], strides = [1, 1, 1]} : vector<2x8x32xf32> to vector<2x8x8xf32>
    "tpu.trace_start"() <{level = 10 : i32, message = "bqd,bkd->bqk"}> : () -> ()
    %cst_435 = arith.constant dense<0.000000e+00> : vector<2x8x8xf32>
    %1122 = tpu.matmul %1120, %1121, %cst_435 {dimension_numbers = #tpu.dot_dimension_numbers<[2], [2], [1], [1], [0, 0, 0, 1, 1, 1], [0], [0]>} : vector<2x8x8xf32>, vector<2x8x8xf32>, vector<2x8x8xf32> -> vector<2x8x8xf32>
    "tpu.trace_stop"() : () -> ()
    %cst_436 = arith.constant 0.353553385 : f32
    %1123 = vector.broadcast %cst_436 : f32 to vector<2x8x8xf32>
    %1124 = arith.mulf %1122, %1123 : vector<2x8x8xf32>
    %cst_437 = arith.constant -1.000000e+09 : f32
    %1125 = vector.broadcast %cst_437 : f32 to vector<2x8x8xf32>
    %1126 = arith.select %1119, %1124, %1125 : vector<2x8x8xi1>, vector<2x8x8xf32>
    %cst_438 = arith.constant dense<0xFF800000> : vector<2x8xf32>
    %1127 = vector.multi_reduction <maximumf>, %1126, %cst_438 [2] : vector<2x8x8xf32> to vector<2x8xf32>
    %1128 = vector.shape_cast %1127 : vector<2x8xf32> to vector<2x8x1xf32>
    %1129 = vector.broadcast %1128 : vector<2x8x1xf32> to vector<2x8x8xf32>
    %1130 = arith.subf %1126, %1129 : vector<2x8x8xf32>
    %1131 = math.exp %1130 : vector<2x8x8xf32>
    %cst_439 = arith.constant dense<0.000000e+00> : vector<2x8xf32>
    %1132 = vector.multi_reduction <add>, %1131, %cst_439 [2] : vector<2x8x8xf32> to vector<2x8xf32>
    %1133 = vector.shape_cast %1132 : vector<2x8xf32> to vector<2x8x1xf32>
    %1134 = tpu.reciprocal %1133 {approx = true} : vector<2x8x1xf32> -> vector<2x8x1xf32>
    %1135 = vector.broadcast %1134 : vector<2x8x1xf32> to vector<2x8x8xf32>
    %1136 = arith.mulf %1131, %1135 : vector<2x8x8xf32>
    %1137 = vector.extract_strided_slice %1115 {offsets = [0, 0, 0], sizes = [2, 8, 8], strides = [1, 1, 1]} : vector<2x8x32xf32> to vector<2x8x8xf32>
    "tpu.trace_start"() <{level = 10 : i32, message = "bqk,bkd->bqd"}> : () -> ()
    %cst_440 = arith.constant dense<0.000000e+00> : vector<2x8x8xf32>
    %1138 = tpu.matmul %1136, %1137, %cst_440 {dimension_numbers = #tpu.dot_dimension_numbers<[2], [1], [1], [2], [0, 0, 0, 1, 1, 2], [0], [0]>} : vector<2x8x8xf32>, vector<2x8x8xf32>, vector<2x8x8xf32> -> vector<2x8x8xf32>
    "tpu.trace_stop"() : () -> ()
    %1139 = vector.shape_cast %1138 : vector<2x8x8xf32> to vector<16x8xf32>
    %1140 = vector.extract_strided_slice %1093 {offsets = [0, 0], sizes = [8, 32], strides = [1, 1]} : vector<32x32xf32> to vector<8x32xf32>
    %cst_441 = arith.constant dense<0.000000e+00> : vector<16x32xf32>
    %1141 = tpu.matmul %1139, %1140, %cst_441 {dimension_numbers = #tpu.dot_dimension_numbers<[1], [0], [0], [1], [0, 0, 1, 1], [], []>} : vector<16x8xf32>, vector<8x32xf32>, vector<16x32xf32> -> vector<16x32xf32>
    %1142 = vector.extract_strided_slice %1113 {offsets = [0, 0, 8], sizes = [2, 8, 8], strides = [1, 1, 1]} : vector<2x8x32xf32> to vector<2x8x8xf32>
    %1143 = vector.extract_strided_slice %1114 {offsets = [0, 0, 8], sizes = [2, 8, 8], strides = [1, 1, 1]} : vector<2x8x32xf32> to vector<2x8x8xf32>
    "tpu.trace_start"() <{level = 10 : i32, message = "bqd,bkd->bqk"}> : () -> ()
    %cst_442 = arith.constant dense<0.000000e+00> : vector<2x8x8xf32>
    %1144 = tpu.matmul %1142, %1143, %cst_442 {dimension_numbers = #tpu.dot_dimension_numbers<[2], [2], [1], [1], [0, 0, 0, 1, 1, 1], [0], [0]>} : vector<2x8x8xf32>, vector<2x8x8xf32>, vector<2x8x8xf32> -> vector<2x8x8xf32>
    "tpu.trace_stop"() : () -> ()
    %cst_443 = arith.constant 0.353553385 : f32
    %1145 = vector.broadcast %cst_443 : f32 to vector<2x8x8xf32>
    %1146 = arith.mulf %1144, %1145 : vector<2x8x8xf32>
    %cst_444 = arith.constant -1.000000e+09 : f32
    %1147 = vector.broadcast %cst_444 : f32 to vector<2x8x8xf32>
    %1148 = arith.select %1119, %1146, %1147 : vector<2x8x8xi1>, vector<2x8x8xf32>
    %cst_445 = arith.constant dense<0xFF800000> : vector<2x8xf32>
    %1149 = vector.multi_reduction <maximumf>, %1148, %cst_445 [2] : vector<2x8x8xf32> to vector<2x8xf32>
    %1150 = vector.shape_cast %1149 : vector<2x8xf32> to vector<2x8x1xf32>
    %1151 = vector.broadcast %1150 : vector<2x8x1xf32> to vector<2x8x8xf32>
    %1152 = arith.subf %1148, %1151 : vector<2x8x8xf32>
    %1153 = math.exp %1152 : vector<2x8x8xf32>
    %cst_446 = arith.constant dense<0.000000e+00> : vector<2x8xf32>
    %1154 = vector.multi_reduction <add>, %1153, %cst_446 [2] : vector<2x8x8xf32> to vector<2x8xf32>
    %1155 = vector.shape_cast %1154 : vector<2x8xf32> to vector<2x8x1xf32>
    %1156 = tpu.reciprocal %1155 {approx = true} : vector<2x8x1xf32> -> vector<2x8x1xf32>
    %1157 = vector.broadcast %1156 : vector<2x8x1xf32> to vector<2x8x8xf32>
    %1158 = arith.mulf %1153, %1157 : vector<2x8x8xf32>
    %1159 = vector.extract_strided_slice %1115 {offsets = [0, 0, 8], sizes = [2, 8, 8], strides = [1, 1, 1]} : vector<2x8x32xf32> to vector<2x8x8xf32>
    "tpu.trace_start"() <{level = 10 : i32, message = "bqk,bkd->bqd"}> : () -> ()
    %cst_447 = arith.constant dense<0.000000e+00> : vector<2x8x8xf32>
    %1160 = tpu.matmul %1158, %1159, %cst_447 {dimension_numbers = #tpu.dot_dimension_numbers<[2], [1], [1], [2], [0, 0, 0, 1, 1, 2], [0], [0]>} : vector<2x8x8xf32>, vector<2x8x8xf32>, vector<2x8x8xf32> -> vector<2x8x8xf32>
    "tpu.trace_stop"() : () -> ()
    %1161 = vector.shape_cast %1160 : vector<2x8x8xf32> to vector<16x8xf32>
    %1162 = vector.extract_strided_slice %1093 {offsets = [8, 0], sizes = [8, 32], strides = [1, 1]} : vector<32x32xf32> to vector<8x32xf32>
    %cst_448 = arith.constant dense<0.000000e+00> : vector<16x32xf32>
    %1163 = tpu.matmul %1161, %1162, %cst_448 {dimension_numbers = #tpu.dot_dimension_numbers<[1], [0], [0], [1], [0, 0, 1, 1], [], []>} : vector<16x8xf32>, vector<8x32xf32>, vector<16x32xf32> -> vector<16x32xf32>
    %1164 = arith.addf %1141, %1163 : vector<16x32xf32>
    %1165 = vector.extract_strided_slice %1113 {offsets = [0, 0, 16], sizes = [2, 8, 8], strides = [1, 1, 1]} : vector<2x8x32xf32> to vector<2x8x8xf32>
    %1166 = vector.extract_strided_slice %1114 {offsets = [0, 0, 16], sizes = [2, 8, 8], strides = [1, 1, 1]} : vector<2x8x32xf32> to vector<2x8x8xf32>
    "tpu.trace_start"() <{level = 10 : i32, message = "bqd,bkd->bqk"}> : () -> ()
    %cst_449 = arith.constant dense<0.000000e+00> : vector<2x8x8xf32>
    %1167 = tpu.matmul %1165, %1166, %cst_449 {dimension_numbers = #tpu.dot_dimension_numbers<[2], [2], [1], [1], [0, 0, 0, 1, 1, 1], [0], [0]>} : vector<2x8x8xf32>, vector<2x8x8xf32>, vector<2x8x8xf32> -> vector<2x8x8xf32>
    "tpu.trace_stop"() : () -> ()
    %cst_450 = arith.constant 0.353553385 : f32
    %1168 = vector.broadcast %cst_450 : f32 to vector<2x8x8xf32>
    %1169 = arith.mulf %1167, %1168 : vector<2x8x8xf32>
    %cst_451 = arith.constant -1.000000e+09 : f32
    %1170 = vector.broadcast %cst_451 : f32 to vector<2x8x8xf32>
    %1171 = arith.select %1119, %1169, %1170 : vector<2x8x8xi1>, vector<2x8x8xf32>
    %cst_452 = arith.constant dense<0xFF800000> : vector<2x8xf32>
    %1172 = vector.multi_reduction <maximumf>, %1171, %cst_452 [2] : vector<2x8x8xf32> to vector<2x8xf32>
    %1173 = vector.shape_cast %1172 : vector<2x8xf32> to vector<2x8x1xf32>
    %1174 = vector.broadcast %1173 : vector<2x8x1xf32> to vector<2x8x8xf32>
    %1175 = arith.subf %1171, %1174 : vector<2x8x8xf32>
    %1176 = math.exp %1175 : vector<2x8x8xf32>
    %cst_453 = arith.constant dense<0.000000e+00> : vector<2x8xf32>
    %1177 = vector.multi_reduction <add>, %1176, %cst_453 [2] : vector<2x8x8xf32> to vector<2x8xf32>
    %1178 = vector.shape_cast %1177 : vector<2x8xf32> to vector<2x8x1xf32>
    %1179 = tpu.reciprocal %1178 {approx = true} : vector<2x8x1xf32> -> vector<2x8x1xf32>
    %1180 = vector.broadcast %1179 : vector<2x8x1xf32> to vector<2x8x8xf32>
    %1181 = arith.mulf %1176, %1180 : vector<2x8x8xf32>
    %1182 = vector.extract_strided_slice %1115 {offsets = [0, 0, 16], sizes = [2, 8, 8], strides = [1, 1, 1]} : vector<2x8x32xf32> to vector<2x8x8xf32>
    "tpu.trace_start"() <{level = 10 : i32, message = "bqk,bkd->bqd"}> : () -> ()
    %cst_454 = arith.constant dense<0.000000e+00> : vector<2x8x8xf32>
    %1183 = tpu.matmul %1181, %1182, %cst_454 {dimension_numbers = #tpu.dot_dimension_numbers<[2], [1], [1], [2], [0, 0, 0, 1, 1, 2], [0], [0]>} : vector<2x8x8xf32>, vector<2x8x8xf32>, vector<2x8x8xf32> -> vector<2x8x8xf32>
    "tpu.trace_stop"() : () -> ()
    %1184 = vector.shape_cast %1183 : vector<2x8x8xf32> to vector<16x8xf32>
    %1185 = vector.extract_strided_slice %1093 {offsets = [16, 0], sizes = [8, 32], strides = [1, 1]} : vector<32x32xf32> to vector<8x32xf32>
    %cst_455 = arith.constant dense<0.000000e+00> : vector<16x32xf32>
    %1186 = tpu.matmul %1184, %1185, %cst_455 {dimension_numbers = #tpu.dot_dimension_numbers<[1], [0], [0], [1], [0, 0, 1, 1], [], []>} : vector<16x8xf32>, vector<8x32xf32>, vector<16x32xf32> -> vector<16x32xf32>
    %1187 = arith.addf %1164, %1186 : vector<16x32xf32>
    %1188 = vector.extract_strided_slice %1113 {offsets = [0, 0, 24], sizes = [2, 8, 8], strides = [1, 1, 1]} : vector<2x8x32xf32> to vector<2x8x8xf32>
    %1189 = vector.extract_strided_slice %1114 {offsets = [0, 0, 24], sizes = [2, 8, 8], strides = [1, 1, 1]} : vector<2x8x32xf32> to vector<2x8x8xf32>
    "tpu.trace_start"() <{level = 10 : i32, message = "bqd,bkd->bqk"}> : () -> ()
    %cst_456 = arith.constant dense<0.000000e+00> : vector<2x8x8xf32>
    %1190 = tpu.matmul %1188, %1189, %cst_456 {dimension_numbers = #tpu.dot_dimension_numbers<[2], [2], [1], [1], [0, 0, 0, 1, 1, 1], [0], [0]>} : vector<2x8x8xf32>, vector<2x8x8xf32>, vector<2x8x8xf32> -> vector<2x8x8xf32>
    "tpu.trace_stop"() : () -> ()
    %cst_457 = arith.constant 0.353553385 : f32
    %1191 = vector.broadcast %cst_457 : f32 to vector<2x8x8xf32>
    %1192 = arith.mulf %1190, %1191 : vector<2x8x8xf32>
    %cst_458 = arith.constant -1.000000e+09 : f32
    %1193 = vector.broadcast %cst_458 : f32 to vector<2x8x8xf32>
    %1194 = arith.select %1119, %1192, %1193 : vector<2x8x8xi1>, vector<2x8x8xf32>
    %cst_459 = arith.constant dense<0xFF800000> : vector<2x8xf32>
    %1195 = vector.multi_reduction <maximumf>, %1194, %cst_459 [2] : vector<2x8x8xf32> to vector<2x8xf32>
    %1196 = vector.shape_cast %1195 : vector<2x8xf32> to vector<2x8x1xf32>
    %1197 = vector.broadcast %1196 : vector<2x8x1xf32> to vector<2x8x8xf32>
    %1198 = arith.subf %1194, %1197 : vector<2x8x8xf32>
    %1199 = math.exp %1198 : vector<2x8x8xf32>
    %cst_460 = arith.constant dense<0.000000e+00> : vector<2x8xf32>
    %1200 = vector.multi_reduction <add>, %1199, %cst_460 [2] : vector<2x8x8xf32> to vector<2x8xf32>
    %1201 = vector.shape_cast %1200 : vector<2x8xf32> to vector<2x8x1xf32>
    %1202 = tpu.reciprocal %1201 {approx = true} : vector<2x8x1xf32> -> vector<2x8x1xf32>
    %1203 = vector.broadcast %1202 : vector<2x8x1xf32> to vector<2x8x8xf32>
    %1204 = arith.mulf %1199, %1203 : vector<2x8x8xf32>
    %1205 = vector.extract_strided_slice %1115 {offsets = [0, 0, 24], sizes = [2, 8, 8], strides = [1, 1, 1]} : vector<2x8x32xf32> to vector<2x8x8xf32>
    "tpu.trace_start"() <{level = 10 : i32, message = "bqk,bkd->bqd"}> : () -> ()
    %cst_461 = arith.constant dense<0.000000e+00> : vector<2x8x8xf32>
    %1206 = tpu.matmul %1204, %1205, %cst_461 {dimension_numbers = #tpu.dot_dimension_numbers<[2], [1], [1], [2], [0, 0, 0, 1, 1, 2], [0], [0]>} : vector<2x8x8xf32>, vector<2x8x8xf32>, vector<2x8x8xf32> -> vector<2x8x8xf32>
    "tpu.trace_stop"() : () -> ()
    %1207 = vector.shape_cast %1206 : vector<2x8x8xf32> to vector<16x8xf32>
    %1208 = vector.extract_strided_slice %1093 {offsets = [24, 0], sizes = [8, 32], strides = [1, 1]} : vector<32x32xf32> to vector<8x32xf32>
    %cst_462 = arith.constant dense<0.000000e+00> : vector<16x32xf32>
    %1209 = tpu.matmul %1207, %1208, %cst_462 {dimension_numbers = #tpu.dot_dimension_numbers<[1], [0], [0], [1], [0, 0, 1, 1], [], []>} : vector<16x8xf32>, vector<8x32xf32>, vector<16x32xf32> -> vector<16x32xf32>
    %1210 = arith.addf %1187, %1209 : vector<16x32xf32>
    %1211 = vector.broadcast %1095 : vector<1x32xf32> to vector<16x32xf32>
    %1212 = arith.addf %1210, %1211 : vector<16x32xf32>
    %1213 = vector.shape_cast %1212 : vector<16x32xf32> to vector<2x8x32xf32>
    %1214 = arith.addf %1058, %1213 : vector<2x8x32xf32>
    %c1_463 = arith.constant 1 : index
    %c0_464 = arith.constant 0 : index
    %c0_465 = arith.constant 0 : index
    %1215 = vector.load %arg39[%c1_463, %c0_464, %c0_465] : memref<2x1x32xf32, #tpu.memory_space<vmem>>, vector<1x1x32xf32>
    %1216 = vector.shape_cast %1215 : vector<1x1x32xf32> to vector<1x32xf32>
    %c1_466 = arith.constant 1 : index
    %c0_467 = arith.constant 0 : index
    %c0_468 = arith.constant 0 : index
    %1217 = vector.load %arg40[%c1_466, %c0_467, %c0_468] : memref<2x1x32xf32, #tpu.memory_space<vmem>>, vector<1x1x32xf32>
    %1218 = vector.shape_cast %1217 : vector<1x1x32xf32> to vector<1x32xf32>
    %1219 = vector.shape_cast %1214 : vector<2x8x32xf32> to vector<16x32xf32>
    %cst_469 = arith.constant dense<0.000000e+00> : vector<16xf32>
    %1220 = vector.multi_reduction <add>, %1219, %cst_469 [1] : vector<16x32xf32> to vector<16xf32>
    %1221 = vector.shape_cast %1220 : vector<16xf32> to vector<16x1xf32>
    %cst_470 = arith.constant 3.200000e+01 : f32
    %1222 = vector.broadcast %cst_470 : f32 to vector<16x1xf32>
    %1223 = arith.divf %1221, %1222 : vector<16x1xf32>
    %1224 = vector.broadcast %1223 : vector<16x1xf32> to vector<16x32xf32>
    %1225 = arith.subf %1219, %1224 : vector<16x32xf32>
    %1226 = arith.mulf %1225, %1225 : vector<16x32xf32>
    %cst_471 = arith.constant dense<0.000000e+00> : vector<16xf32>
    %1227 = vector.multi_reduction <add>, %1226, %cst_471 [1] : vector<16x32xf32> to vector<16xf32>
    %1228 = vector.shape_cast %1227 : vector<16xf32> to vector<16x1xf32>
    %cst_472 = arith.constant 3.100000e+01 : f32
    %1229 = vector.broadcast %cst_472 : f32 to vector<16x1xf32>
    %1230 = arith.divf %1228, %1229 : vector<16x1xf32>
    %1231 = math.sqrt %1230 : vector<16x1xf32>
    %cst_473 = arith.constant 9.99999997E-7 : f32
    %1232 = vector.broadcast %cst_473 : f32 to vector<16x1xf32>
    %1233 = arith.addf %1231, %1232 : vector<16x1xf32>
    %1234 = tpu.reciprocal %1233 {approx = true} : vector<16x1xf32> -> vector<16x1xf32>
    %1235 = vector.broadcast %1223 : vector<16x1xf32> to vector<16x32xf32>
    %1236 = arith.subf %1219, %1235 : vector<16x32xf32>
    %1237 = vector.broadcast %1216 : vector<1x32xf32> to vector<16x32xf32>
    %1238 = arith.mulf %1237, %1236 : vector<16x32xf32>
    %1239 = vector.broadcast %1234 : vector<16x1xf32> to vector<16x32xf32>
    %1240 = arith.mulf %1238, %1239 : vector<16x32xf32>
    %1241 = vector.broadcast %1218 : vector<1x32xf32> to vector<16x32xf32>
    %1242 = arith.addf %1240, %1241 : vector<16x32xf32>
    %1243 = vector.shape_cast %1242 : vector<16x32xf32> to vector<2x8x32xf32>
    %c1_474 = arith.constant 1 : index
    %c0_475 = arith.constant 0 : index
    %c0_476 = arith.constant 0 : index
    %1244 = vector.load %arg31[%c1_474, %c0_475, %c0_476] : memref<2x32x64xf32, #tpu.memory_space<vmem>>, vector<1x32x64xf32>
    %1245 = vector.shape_cast %1244 : vector<1x32x64xf32> to vector<32x64xf32>
    %c1_477 = arith.constant 1 : index
    %c0_478 = arith.constant 0 : index
    %c0_479 = arith.constant 0 : index
    %1246 = vector.load %arg32[%c1_477, %c0_478, %c0_479] : memref<2x1x64xf32, #tpu.memory_space<vmem>>, vector<1x1x64xf32>
    %1247 = vector.shape_cast %1246 : vector<1x1x64xf32> to vector<1x64xf32>
    %c1_480 = arith.constant 1 : index
    %c0_481 = arith.constant 0 : index
    %c0_482 = arith.constant 0 : index
    %1248 = vector.load %arg33[%c1_480, %c0_481, %c0_482] : memref<2x64x32xf32, #tpu.memory_space<vmem>>, vector<1x64x32xf32>
    %1249 = vector.shape_cast %1248 : vector<1x64x32xf32> to vector<64x32xf32>
    %c1_483 = arith.constant 1 : index
    %c0_484 = arith.constant 0 : index
    %c0_485 = arith.constant 0 : index
    %1250 = vector.load %arg34[%c1_483, %c0_484, %c0_485] : memref<2x1x32xf32, #tpu.memory_space<vmem>>, vector<1x1x32xf32>
    %1251 = vector.shape_cast %1250 : vector<1x1x32xf32> to vector<1x32xf32>
    %1252 = vector.shape_cast %1243 : vector<2x8x32xf32> to vector<16x32xf32>
    %cst_486 = arith.constant dense<0.000000e+00> : vector<16x64xf32>
    %1253 = tpu.matmul %1252, %1245, %cst_486 {dimension_numbers = #tpu.dot_dimension_numbers<[1], [0], [0], [1], [0, 0, 1, 1], [], []>} : vector<16x32xf32>, vector<32x64xf32>, vector<16x64xf32> -> vector<16x64xf32>
    %1254 = vector.broadcast %1247 : vector<1x64xf32> to vector<16x64xf32>
    %1255 = arith.addf %1253, %1254 : vector<16x64xf32>
    %cst_487 = arith.constant 0.000000e+00 : f32
    %1256 = vector.broadcast %cst_487 : f32 to vector<16x64xf32>
    %1257 = arith.maximumf %1255, %1256 : vector<16x64xf32>
    %cst_488 = arith.constant dense<0.000000e+00> : vector<16x32xf32>
    %1258 = tpu.matmul %1257, %1249, %cst_488 {dimension_numbers = #tpu.dot_dimension_numbers<[1], [0], [0], [1], [0, 0, 1, 1], [], []>} : vector<16x64xf32>, vector<64x32xf32>, vector<16x32xf32> -> vector<16x32xf32>
    %1259 = vector.broadcast %1251 : vector<1x32xf32> to vector<16x32xf32>
    %1260 = arith.addf %1258, %1259 : vector<16x32xf32>
    %1261 = vector.shape_cast %1260 : vector<16x32xf32> to vector<2x8x32xf32>
    %1262 = arith.addf %1214, %1261 : vector<2x8x32xf32>
    %c0_489 = arith.constant 0 : index
    %c0_490 = arith.constant 0 : index
    %1263 = vector.load %arg41[%c0_489, %c0_490] : memref<1x32xf32, #tpu.memory_space<vmem>>, vector<1x32xf32>
    %c0_491 = arith.constant 0 : index
    %c0_492 = arith.constant 0 : index
    %1264 = vector.load %arg42[%c0_491, %c0_492] : memref<1x32xf32, #tpu.memory_space<vmem>>, vector<1x32xf32>
    %1265 = vector.shape_cast %1262 : vector<2x8x32xf32> to vector<16x32xf32>
    %cst_493 = arith.constant dense<0.000000e+00> : vector<16xf32>
    %1266 = vector.multi_reduction <add>, %1265, %cst_493 [1] : vector<16x32xf32> to vector<16xf32>
    %1267 = vector.shape_cast %1266 : vector<16xf32> to vector<16x1xf32>
    %cst_494 = arith.constant 3.200000e+01 : f32
    %1268 = vector.broadcast %cst_494 : f32 to vector<16x1xf32>
    %1269 = arith.divf %1267, %1268 : vector<16x1xf32>
    %1270 = vector.broadcast %1269 : vector<16x1xf32> to vector<16x32xf32>
    %1271 = arith.subf %1265, %1270 : vector<16x32xf32>
    %1272 = arith.mulf %1271, %1271 : vector<16x32xf32>
    %cst_495 = arith.constant dense<0.000000e+00> : vector<16xf32>
    %1273 = vector.multi_reduction <add>, %1272, %cst_495 [1] : vector<16x32xf32> to vector<16xf32>
    %1274 = vector.shape_cast %1273 : vector<16xf32> to vector<16x1xf32>
    %cst_496 = arith.constant 3.100000e+01 : f32
    %1275 = vector.broadcast %cst_496 : f32 to vector<16x1xf32>
    %1276 = arith.divf %1274, %1275 : vector<16x1xf32>
    %1277 = math.sqrt %1276 : vector<16x1xf32>
    %cst_497 = arith.constant 9.99999997E-7 : f32
    %1278 = vector.broadcast %cst_497 : f32 to vector<16x1xf32>
    %1279 = arith.addf %1277, %1278 : vector<16x1xf32>
    %1280 = tpu.reciprocal %1279 {approx = true} : vector<16x1xf32> -> vector<16x1xf32>
    %1281 = vector.broadcast %1269 : vector<16x1xf32> to vector<16x32xf32>
    %1282 = arith.subf %1265, %1281 : vector<16x32xf32>
    %1283 = vector.broadcast %1263 : vector<1x32xf32> to vector<16x32xf32>
    %1284 = arith.mulf %1283, %1282 : vector<16x32xf32>
    %1285 = vector.broadcast %1280 : vector<16x1xf32> to vector<16x32xf32>
    %1286 = arith.mulf %1284, %1285 : vector<16x32xf32>
    %1287 = vector.broadcast %1264 : vector<1x32xf32> to vector<16x32xf32>
    %1288 = arith.addf %1286, %1287 : vector<16x32xf32>
    %1289 = vector.shape_cast %1288 : vector<16x32xf32> to vector<2x8x32xf32>
    %c0_498 = arith.constant 0 : index
    %c0_499 = arith.constant 0 : index
    %c0_500 = arith.constant 0 : index
    %1290 = vector.load %arg43[%c0_498, %c0_499, %c0_500] : memref<2x8x32xf32, #tpu.memory_space<vmem>>, vector<2x8x32xf32>
    tpu.vector_store %arg43[%c0_498, %c0_499, %c0_500], %1289 {strides = array<i32>} : memref<2x8x32xf32, #tpu.memory_space<vmem>>, vector<2x8x32xf32>,
    return
  }
}

</mosaic_0001>

<bundles_post_ra>
// kernel: transformer_forward.1
= control target key start
LH: loop header
LB: loop body
LE: loop exit
PB: predicated region body
PF: predicated region fallthrough
CT: control target
= control target key end

     0   :  { %s18235_s6 = smov 1   ;;  %s18236_s10 = smov 2   ;;  %s20325_s0 = inlined_call_operand.smem [shape: u32[44], index: -1, kind: input, shape index: {}] }
   0x1   :  { %s18313_s5 = sld [smem:[%s20325_s0]]   ;;  %s18237_s14 = smov 3  }
   0x2   :  { %s18318_s9 = sld [smem:[%s20325_s0 + %s18235_s6]]   ;;  %s18238_s18 = smov 4  }
   0x3   :  { %s18323_s13 = sld [smem:[%s20325_s0 + %s18236_s10]]   ;;  %s18239_s22 = smov 5  }
   0x4   :  { %s18328_s17 = sld [smem:[%s20325_s0 + %s18237_s14]]   ;;  %s18240_s26 = smov 6  }
   0x5   :  { %s18333_s21 = sld [smem:[%s20325_s0 + %s18238_s18]]   ;;  %s18241_s30 = smov 7  }
   0x6   :  { %s18338_s25 = sld [smem:[%s20325_s0 + %s18239_s22]]   ;;  %s18242_s4 = smov 8  }
   0x7   :  { %s18343_s29 = sld [smem:[%s20325_s0 + %s18240_s26]]   ;;  %s18243_s10 = smov 9  }
   0x8   :  { %20350 = sst [smem:[#allocation35_spill]] %s18318_s9  ;;  %s18244_s15 = smov 10  }
   0x9   :  { %20351 = sst [smem:[#allocation36_spill]] %s18323_s13  ;;  %s18245_s20 = smov 11  }
   0xa   :  { %20352 = sst [smem:[#allocation37_spill]] %s18328_s17  ;;  %s18246_s26 = smov 12  }
   0xb   :  { %20353 = sst [smem:[#allocation38_spill]] %s18333_s21  ;;  %s18247_s1 = smov 13  }
   0xc   :  { %20354 = sst [smem:[#allocation39_spill]] %s18338_s25  ;;  %s18248_s7 = smov 14  }
   0xd   :  { %s18348_s3 = sld [smem:[%s20325_s0 + %s18241_s30]]   ;;  %s18250_s22 = smov 16  }
   0xe   :  { %s18353_s8 = sld [smem:[%s20325_s0 + %s18242_s4]]   ;;  %s18251_s28 = smov 17  }
   0xf   :  { %s18358_s14 = sld [smem:[%s20325_s0 + %s18243_s10]]  }
  0x10   :  { %s18363_s19 = sld [smem:[%s20325_s0 + %s18244_s15]]   ;;  %s18249_s15 = smov 15  }
  0x11   :  { %s18368_s24 = sld [smem:[%s20325_s0 + %s18245_s20]]  }
  0x12   :  { %s18373_s30 = sld [smem:[%s20325_s0 + %s18246_s26]]  }
  0x13   :  { %20355 = sst [smem:[#allocation40_spill]] %s18348_s3 }
  0x14   :  { %s18378_s6 = sld [smem:[%s20325_s0 + %s18247_s1]]  }
  0x15   :  { %s18383_s12 = sld [smem:[%s20325_s0 + %s18248_s7]]   ;;  %s18252_s7 = smov 18  }
  0x16   :  { %s18388_s20 = sld [smem:[%s20325_s0 + %s18249_s15]]   ;;  %s18253_s15 = smov 19  }
  0x17   :  { %20356 = sst [smem:[#allocation41_spill]] %s18368_s24 }
  0x18   :  { %20357 = sst [smem:[#allocation42_spill]] %s18373_s30 }
  0x19   :  { %s18393_s27 = sld [smem:[%s20325_s0 + %s18250_s22]]   ;;  %s18254_s22 = smov 20  }
  0x1a   :  { %20358 = sst [smem:[#allocation43_spill]] %s18378_s6 }
  0x1b   :  { %20359 = sst [smem:[#allocation44_spill]] %s18383_s12 }
  0x1c   :  { %20360 = sst [smem:[#allocation45_spill]] %s18388_s20 }
  0x1d   :  { %s18398_s4 = sld [smem:[%s20325_s0 + %s18251_s28]]   ;;  %s18255_s28 = smov 21  }
  0x1e   :  { %s18403_s17 = sld [smem:[%s20325_s0 + %s18252_s7]]   ;;  %s18256_s7 = smov 22  }
  0x1f   :  { %20361 = sst [smem:[#allocation46_spill]] %s18393_s27 }
  0x20   :  { %s18408_s3 = sld [smem:[%s20325_s0 + %s18253_s15]]   ;;  %s18257_s15 = smov 23  }
  0x21   :  { %s18413_s21 = sld [smem:[%s20325_s0 + %s18254_s22]]   ;;  %s18258_s22 = smov 24  }
  0x22   :  { %s18418_s9 = sld [smem:[%s20325_s0 + %s18255_s28]]   ;;  %s18259_s28 = smov 25  }
  0x23   :  { %20362 = sst [smem:[#allocation47_spill]] %s18398_s4 }
  0x24   :  { %20363 = sst [smem:[#allocation48_spill]] %s18403_s17 }
  0x25   :  { %s18423_s25 = sld [smem:[%s20325_s0 + %s18256_s7]]   ;;  %s18260_s7 = smov 26  }
  0x26   :  { %20364 = sst [smem:[#allocation49_spill]] %s18408_s3 }
  0x27   :  { %20365 = sst [smem:[#allocation50_spill]] %s18413_s21 }
  0x28   :  { %20366 = sst [smem:[#allocation51_spill]] %s18418_s9 }
  0x29   :  { %s18428_s27 = sld [smem:[%s20325_s0 + %s18257_s15]]   ;;  %s18261_s15 = smov 27  }
  0x2a   :  { %s18433_s12 = sld [smem:[%s20325_s0 + %s18258_s22]]   ;;  %s18262_s22 = smov 28  }
  0x2b   :  { %20367 = sst [smem:[#allocation52_spill]] %s18423_s25 }
  0x2c   :  { %s18438_s9 = sld [smem:[%s20325_s0 + %s18259_s28]]   ;;  %s18263_s28 = smov 29  }
  0x2d   :  { %s18443_s25 = sld [smem:[%s20325_s0 + %s18260_s7]]   ;;  %s18264_s7 = smov 30  }
  0x2e   :  { %s18453_s21 = sld [smem:[%s20325_s0 + %s18262_s22]]   ;;  %s18266_s22 = smov 32  }
  0x2f   :  { %20368 = sst [smem:[#allocation53_spill]] %s18428_s27 }
  0x30   :  { %s18448_s27 = sld [smem:[%s20325_s0 + %s18261_s15]]   ;;  %s18265_s15 = smov 31  }
  0x31   :  { %s18463_s3 = sld [smem:[%s20325_s0 + %s18264_s7]]   ;;  %s18268_s7 = smov 34  }
  0x32   :  { %20369 = sst [smem:[#allocation54_spill]] %s18438_s9 }
  0x33   :  { %s18458_s9 = sld [smem:[%s20325_s0 + %s18263_s28]]   ;;  %s18267_s28 = smov 33  }
  0x34   :  { %20371 = sst [smem:[#allocation56_spill]] %s18453_s21 }
  0x35   :  { %s18473_s21 = sld [smem:[%s20325_s0 + %s18266_s22]]   ;;  %s18270_s22 = smov 36  }
  0x36   :  { %20370 = sst [smem:[#allocation55_spill]] %s18448_s27 }
  0x37   :  { %20373 = sst [smem:[#allocation58_spill]] %s18463_s3 }
  0x38   :  { %s18468_s27 = sld [smem:[%s20325_s0 + %s18265_s15]]   ;;  %s18269_s15 = smov 35  }
  0x39   :  { %20372 = sst [smem:[#allocation57_spill]] %s18458_s9 }
  0x3a   :  { %s18478_s9 = sld [smem:[%s20325_s0 + %s18267_s28]]   ;;  %s18271_s28 = smov 37  }
  0x3b   :  { %s18483_s3 = sld [smem:[%s20325_s0 + %s18268_s7]]   ;;  %s18272_s7 = smov 38  }
  0x3c   :  { %s18493_s20 = sld [smem:[%s20325_s0 + %s18270_s22]]   ;;  %s18274_s22 = smov 40  }
  0x3d   :  { %s18503_s6 = sld [smem:[%s20325_s0 + %s18272_s7]]   ;;  %s18276_s7 = smov 42  }
  0x3e   :  { %20374 = sst [smem:[#allocation59_spill]] %s18468_s27 }
  0x3f   :  { %s18488_s27 = sld [smem:[%s20325_s0 + %s18269_s15]]   ;;  %s18273_s15 = smov 39  }
  0x40   :  { %20375 = sst [smem:[#allocation60_spill]] %s18478_s9 }
  0x41   :  { %s18498_s9 = sld [smem:[%s20325_s0 + %s18271_s28]]   ;;  %s18275_s28 = smov 41  }
  0x42   :  { %s18508_s30 = sld [smem:[%s20325_s0 + %s18273_s15]]   ;;  %s18277_s15 = smov 43  }
  0x43   :  { %s18513_s24 = sld [smem:[%s20325_s0 + %s18274_s22]]  }
  0x44   :  { %s18518_s13 = sld [smem:[%s20325_s0 + %s18275_s28]]  }
  0x45   :  { %s18523_s17 = sld [smem:[%s20325_s0 + %s18276_s7]]  }
  0x46   :  { %s18528_s4 = sld [smem:[%s20325_s0 + %s18277_s15]]  }
  0x47   :  { %92 = vsyncpa [#allocation3], 0 }
  0x48   :  { %93 = vsyncpa [#allocation6], 0 }
  0x49   :  { %94 = vsyncpa [#allocation9], 0 }
  0x4a   :  { %95 = vsyncpa [#allocation12], 0 }
  0x4b   :  { %96 = vsyncpa [#allocation15], 0 }
  0x4c   :  { %97 = vsyncpa [#allocation18], 0 }
  0x4d   :  { %98 = vsyncpa [#allocation21], 0 }
  0x4e   :  { %99 = vsyncpa [#allocation24], 0 }
  0x4f   :  { %100 = vsyncpa [#allocation4], 0  ;;  %s18278_s22 = smov [#allocation5]   ;;  %s17887_s26 = scalar_lea.hbm %s18353_s8, 16 }
  0x50   :  { %s131_s23 = sshll.u32 %s18278_s22, 4  ;;  %p17888_p0 = scmp.ne.s32.totalorder %s18353_s8, %s17887_s26  ;;  %s132_s23 = int_to_ptr.vmem [resolvable:$true] %s131_s23 }
  0x51   :  { %p17891_p1 = scmp.lt.u32.totalorder %s17887_s26, %s18353_s8 }
  0x53   :  { %p17893_p2 = pnand %p17891_p1, %p17888_p0 }
  0x55   :  { %17896 = shalt.err (!%p17893_p2)
}
  0x56   :  { %s17897_s0 = scalar_lea.vmem %s132_s23, 16  ;;  %s17901_s28 = scalar_lea.vmem %s132_s23, 32 }
  0x57   :  { %p17898_p3 = scmp.ne.s32.totalorder %s132_s23, %s17897_s0  ;;  %p17902_p4 = scmp.lt.s32.totalorder %s132_s23, %s132_s23 }
  0x58   :  { %p17903_p5 = scmp.lt.s32.totalorder %s17901_s28, %s17897_s0 }
  0x5a   :  { %p17904_p6 = por %p17903_p5, %p17902_p4 }
  0x5c   :  { %p17905_p7 = pnand %p17904_p6, %p17898_p3 }
  0x5e   :  { %17908 = shalt.err (!%p17905_p7)
}
  0x5f   :  { %134 = dma.hbm_to_vmem [thread:$0]  %s18353_s8, 16, %s132_s23, [#allocation6]  }
  0x60   :  { %s18279_s1 = smov [#allocation8]   ;;  %s18280_s7 = smov [#allocation11]  }
  0x61   :  { %s184_s2 = sshll.u32 %s18279_s1, 4  ;;  %s220_s10 = sshll.u32 %s18280_s7, 4  ;;  %s185_s2 = int_to_ptr.vmem [resolvable:$true] %s184_s2  ;;  %s221_s10 = int_to_ptr.vmem [resolvable:$true] %s220_s10 }
  0x62   :  { %s17909_s11 = scalar_lea.hbm %s18443_s25, 32 }
  0x63   :  { %p17910_p8 = scmp.ne.s32.totalorder %s18443_s25, %s17909_s11  ;;  %p17913_p9 = scmp.lt.u32.totalorder %s17909_s11, %s18443_s25 }
  0x65   :  { %p17915_p10 = pnand %p17913_p9, %p17910_p8 }
  0x67   :  { %17918 = shalt.err (!%p17915_p10)
}
  0x68   :  { %s17919_s15 = scalar_lea.vmem %s185_s2, 32  ;;  %p17924_p12 = scmp.lt.s32.totalorder %s185_s2, %s185_s2 }
  0x69   :  { %p17920_p11 = scmp.ne.s32.totalorder %s185_s2, %s17919_s15  ;;  %p17925_p13 = scmp.lt.s32.totalorder %s17919_s15, %s17919_s15 }
  0x6b   :  { %p17926_p0 = por %p17925_p13, %p17924_p12 }
  0x6d   :  { %p17927_p1 = pnand %p17926_p0, %p17920_p11 }
  0x6f   :  { %17930 = shalt.err (!%p17927_p1)
}
  0x70   :  { %s18281_s16 = smov 16   ;;  %s18282_s8 = smov 1  }
  0x71   :  { %190 = dma.hbm_to_vmem [thread:$0]  %s18443_s25, 32, %s185_s2, [#allocation9], %s18281_s16, %s18281_s16, %s18282_s8  }
  0x72   :  { %s17931_s18 = scalar_lea.hbm %s18483_s3, 32 }
  0x73   :  { %p17932_p2 = scmp.ne.s32.totalorder %s18483_s3, %s17931_s18  ;;  %p17935_p3 = scmp.lt.u32.totalorder %s17931_s18, %s18483_s3 }
  0x75   :  { %p17937_p4 = pnand %p17935_p3, %p17932_p2 }
  0x77   :  { %17940 = shalt.err (!%p17937_p4)
}
  0x78   :  { %s17941_s22 = scalar_lea.vmem %s221_s10, 32  ;;  %p17946_p6 = scmp.lt.s32.totalorder %s221_s10, %s221_s10 }
  0x79   :  { %p17942_p5 = scmp.ne.s32.totalorder %s221_s10, %s17941_s22  ;;  %p17947_p7 = scmp.lt.s32.totalorder %s17941_s22, %s17941_s22 }
  0x7b   :  { %p17948_p8 = por %p17947_p7, %p17946_p6 }
  0x7d   :  { %p17949_p9 = pnand %p17948_p8, %p17942_p5 }
  0x7f   :  { %17952 = shalt.err (!%p17949_p9)
}
  0x80   :  { %226 = dma.hbm_to_vmem [thread:$0]  %s18483_s3, 32, %s221_s10, [#allocation12], %s18281_s16, %s18281_s16, %s18282_s8  }
  0x81   :  { %s18283_s25 = smov [#allocation14]   ;;  %s18284_s26 = smov [#allocation17]  }
  0x82   :  { %s244_s23 = sshll.u32 %s18283_s25, 4  ;;  %s268_s0 = sshll.u32 %s18284_s26, 4  ;;  %s245_s23 = int_to_ptr.vmem [resolvable:$true] %s244_s23  ;;  %s269_s0 = int_to_ptr.vmem [resolvable:$true] %s268_s0 }
  0x83   :  { %s17953_s28 = scalar_lea.hbm %s18493_s20, 32 }
  0x84   :  { %p17954_p10 = scmp.ne.s32.totalorder %s18493_s20, %s17953_s28  ;;  %p17957_p11 = scmp.lt.u32.totalorder %s17953_s28, %s18493_s20 }
  0x86   :  { %p17959_p12 = pnand %p17957_p11, %p17954_p10 }
  0x88   :  { %17962 = shalt.err (!%p17959_p12)
}
  0x89   :  { %s17963_s1 = scalar_lea.vmem %s245_s23, 32  ;;  %p17968_p0 = scmp.lt.s32.totalorder %s245_s23, %s245_s23 }
  0x8a   :  { %p17964_p13 = scmp.ne.s32.totalorder %s245_s23, %s17963_s1  ;;  %p17969_p1 = scmp.lt.s32.totalorder %s17963_s1, %s17963_s1 }
  0x8c   :  { %p17970_p2 = por %p17969_p1, %p17968_p0 }
  0x8e   :  { %p17971_p3 = pnand %p17970_p2, %p17964_p13 }
  0x90   :  { %17974 = shalt.err (!%p17971_p3)
}
  0x91   :  { %250 = dma.hbm_to_vmem [thread:$0]  %s18493_s20, 32, %s245_s23, [#allocation15], %s18281_s16, %s18281_s16, %s18282_s8  }
  0x92   :  { %s17975_s3 = scalar_lea.hbm %s18503_s6, 32 }
  0x93   :  { %p17976_p4 = scmp.ne.s32.totalorder %s18503_s6, %s17975_s3  ;;  %p17979_p5 = scmp.lt.u32.totalorder %s17975_s3, %s18503_s6 }
  0x95   :  { %p17981_p6 = pnand %p17979_p5, %p17976_p4 }
  0x97   :  { %17984 = shalt.err (!%p17981_p6)
}
  0x98   :  { %s17985_s2 = scalar_lea.vmem %s269_s0, 32  ;;  %p17990_p8 = scmp.lt.s32.totalorder %s269_s0, %s269_s0 }
  0x99   :  { %p17986_p7 = scmp.ne.s32.totalorder %s269_s0, %s17985_s2  ;;  %p17991_p9 = scmp.lt.s32.totalorder %s17985_s2, %s17985_s2 }
  0x9b   :  { %p17992_p10 = por %p17991_p9, %p17990_p8 }
  0x9d   :  { %p17993_p11 = pnand %p17992_p10, %p17986_p7 }
  0x9f   :  { %17996 = shalt.err (!%p17993_p11)
}
  0xa0   :  { %274 = dma.hbm_to_vmem [thread:$0]  %s18503_s6, 32, %s269_s0, [#allocation18], %s18281_s16, %s18281_s16, %s18282_s8  }
  0xa1   :  { %s18285_s20 = smov [#allocation20]   ;;  %s18286_s10 = smov [#allocation2]  }
  0xa2   :  { %s292_s7 = sshll.u32 %s18285_s20, 4  ;;  %s119_s11 = sshll.u32 %s18286_s10, 4  ;;  %s293_s7 = int_to_ptr.vmem [resolvable:$true] %s292_s7  ;;  %s120_s11 = int_to_ptr.vmem [resolvable:$true] %s119_s11 }
  0xa3   :  { %s17997_s15 = scalar_lea.hbm %s18513_s24, 32 }
  0xa4   :  { %p17998_p12 = scmp.ne.s32.totalorder %s18513_s24, %s17997_s15  ;;  %p18001_p13 = scmp.lt.u32.totalorder %s17997_s15, %s18513_s24 }
  0xa6   :  { %p18003_p0 = pnand %p18001_p13, %p17998_p12 }
  0xa8   :  { %18006 = shalt.err (!%p18003_p0)
}
  0xa9   :  { %s18007_s18 = scalar_lea.vmem %s293_s7, 32  ;;  %p18012_p2 = scmp.lt.s32.totalorder %s293_s7, %s293_s7 }
  0xaa   :  { %p18008_p1 = scmp.ne.s32.totalorder %s293_s7, %s18007_s18  ;;  %p18013_p3 = scmp.lt.s32.totalorder %s18007_s18, %s18007_s18 }
  0xac   :  { %p18014_p4 = por %p18013_p3, %p18012_p2 }
  0xae   :  { %p18015_p5 = pnand %p18014_p4, %p18008_p1 }
  0xb0   :  { %18018 = shalt.err (!%p18015_p5)
}
  0xb1   :  { %298 = dma.hbm_to_vmem [thread:$0]  %s18513_s24, 32, %s293_s7, [#allocation21], %s18281_s16, %s18281_s16, %s18282_s8  }
  0xb2   :  { %s18019_s6 = scalar_lea.hbm %s18343_s29, 16 }
  0xb3   :  { %p18020_p6 = scmp.ne.s32.totalorder %s18343_s29, %s18019_s6  ;;  %p18023_p7 = scmp.lt.u32.totalorder %s18019_s6, %s18343_s29 }
  0xb5   :  { %p18025_p8 = pnand %p18023_p7, %p18020_p6 }
  0xb7   :  { %18028 = shalt.err (!%p18025_p8)
}
  0xb8   :  { %s18029_s22 = scalar_lea.vmem %s120_s11, 16  ;;  %s18033_s25 = scalar_lea.vmem %s120_s11, 32 }
  0xb9   :  { %p18030_p9 = scmp.ne.s32.totalorder %s120_s11, %s18029_s22  ;;  %p18034_p10 = scmp.lt.s32.totalorder %s120_s11, %s120_s11 }
  0xba   :  { %p18035_p11 = scmp.lt.s32.totalorder %s18033_s25, %s18029_s22 }
  0xbc   :  { %p18036_p12 = por %p18035_p11, %p18034_p10 }
  0xbe   :  { %p18037_p13 = pnand %p18036_p12, %p18030_p9 }
  0xc0   :  { %18040 = shalt.err (!%p18037_p13)
}
  0xc1   :  { %122 = dma.hbm_to_vmem [thread:$0]  %s18343_s29, 16, %s120_s11, [#allocation3]  }
  0xc2   :  { %s18287_s24 = smov [#allocation7]   ;;  %s18288_s26 = smov [#allocation10]  }
  0xc3   :  { %s170_s23 = sshll.u32 %s18287_s24, 4  ;;  %s206_s0 = sshll.u32 %s18288_s26, 4  ;;  %s171_s23 = int_to_ptr.vmem [resolvable:$true] %s170_s23  ;;  %s207_s0 = int_to_ptr.vmem [resolvable:$true] %s206_s0 }
  0xc4   :  { %s18041_s28 = scalar_lea.hbm %s18433_s12, 32 }
  0xc5   :  { %p18042_p0 = scmp.ne.s32.totalorder %s18433_s12, %s18041_s28  ;;  %p18045_p1 = scmp.lt.u32.totalorder %s18041_s28, %s18433_s12 }
  0xc7   :  { %p18047_p2 = pnand %p18045_p1, %p18042_p0 }
  0xc9   :  { %18050 = shalt.err (!%p18047_p2)
}
  0xca   :  { %s18051_s1 = scalar_lea.vmem %s171_s23, 32  ;;  %p18056_p4 = scmp.lt.s32.totalorder %s171_s23, %s171_s23 }
  0xcb   :  { %p18052_p3 = scmp.ne.s32.totalorder %s171_s23, %s18051_s1  ;;  %p18057_p5 = scmp.lt.s32.totalorder %s18051_s1, %s18051_s1 }
  0xcd   :  { %p18058_p6 = por %p18057_p5, %p18056_p4 }
  0xcf   :  { %p18059_p7 = pnand %p18058_p6, %p18052_p3 }
  0xd1   :  { %18062 = shalt.err (!%p18059_p7)
}
  0xd2   :  { %176 = dma.hbm_to_vmem [thread:$0]  %s18433_s12, 32, %s171_s23, [#allocation6], %s18281_s16, %s18281_s16, %s18282_s8  }
  0xd3   :  { %s18063_s29 = scalar_lea.hbm %s18473_s21, 32 }
  0xd4   :  { %p18064_p8 = scmp.ne.s32.totalorder %s18473_s21, %s18063_s29  ;;  %p18067_p9 = scmp.lt.u32.totalorder %s18063_s29, %s18473_s21 }
  0xd6   :  { %p18069_p10 = pnand %p18067_p9, %p18064_p8 }
  0xd8   :  { %18072 = shalt.err (!%p18069_p10)
}
  0xd9   :  { %s18073_s3 = scalar_lea.vmem %s207_s0, 32  ;;  %p18078_p12 = scmp.lt.s32.totalorder %s207_s0, %s207_s0 }
  0xda   :  { %p18074_p11 = scmp.ne.s32.totalorder %s207_s0, %s18073_s3  ;;  %p18079_p13 = scmp.lt.s32.totalorder %s18073_s3, %s18073_s3 }
  0xdc   :  { %p18080_p0 = por %p18079_p13, %p18078_p12 }
  0xde   :  { %p18081_p1 = pnand %p18080_p0, %p18074_p11 }
  0xe0   :  { %18084 = shalt.err (!%p18081_p1)
}
  0xe1   :  { %212 = dma.hbm_to_vmem [thread:$0]  %s18473_s21, 32, %s207_s0, [#allocation9], %s18281_s16, %s18281_s16, %s18282_s8  }
  0xe2   :  { %s18289_s12 = smov [#allocation13]   ;;  %s18290_s20 = smov [#allocation16]  }
  0xe3   :  { %s232_s2 = sshll.u32 %s18289_s12, 4  ;;  %s256_s7 = sshll.u32 %s18290_s20, 4  ;;  %s233_s2 = int_to_ptr.vmem [resolvable:$true] %s232_s2  ;;  %s257_s7 = int_to_ptr.vmem [resolvable:$true] %s256_s7 }
  0xe4   :  { %s18085_s10 = scalar_lea.hbm %s18488_s27, 32 }
  0xe5   :  { %p18086_p2 = scmp.ne.s32.totalorder %s18488_s27, %s18085_s10  ;;  %p18089_p3 = scmp.lt.u32.totalorder %s18085_s10, %s18488_s27 }
  0xe7   :  { %p18091_p4 = pnand %p18089_p3, %p18086_p2 }
  0xe9   :  { %18094 = shalt.err (!%p18091_p4)
}
  0xea   :  { %s18095_s11 = scalar_lea.vmem %s233_s2, 32  ;;  %p18100_p6 = scmp.lt.s32.totalorder %s233_s2, %s233_s2 }
  0xeb   :  { %p18096_p5 = scmp.ne.s32.totalorder %s233_s2, %s18095_s11  ;;  %p18101_p7 = scmp.lt.s32.totalorder %s18095_s11, %s18095_s11 }
  0xed   :  { %p18102_p8 = por %p18101_p7, %p18100_p6 }
  0xef   :  { %p18103_p9 = pnand %p18102_p8, %p18096_p5 }
  0xf1   :  { %18106 = shalt.err (!%p18103_p9)
}
  0xf2   :  { %238 = dma.hbm_to_vmem [thread:$0]  %s18488_s27, 32, %s233_s2, [#allocation12], %s18281_s16, %s18281_s16, %s18282_s8  }
  0xf3   :  { %s18107_s21 = scalar_lea.hbm %s18498_s9, 32 }
  0xf4   :  { %p18108_p10 = scmp.ne.s32.totalorder %s18498_s9, %s18107_s21  ;;  %p18111_p11 = scmp.lt.u32.totalorder %s18107_s21, %s18498_s9 }
  0xf6   :  { %p18113_p12 = pnand %p18111_p11, %p18108_p10 }
  0xf8   :  { %18116 = shalt.err (!%p18113_p12)
}
  0xf9   :  { %s18117_s15 = scalar_lea.vmem %s257_s7, 32  ;;  %p18122_p0 = scmp.lt.s32.totalorder %s257_s7, %s257_s7 }
  0xfa   :  { %p18118_p13 = scmp.ne.s32.totalorder %s257_s7, %s18117_s15  ;;  %p18123_p1 = scmp.lt.s32.totalorder %s18117_s15, %s18117_s15 }
  0xfc   :  { %p18124_p2 = por %p18123_p1, %p18122_p0 }
  0xfe   :  { %p18125_p3 = pnand %p18124_p2, %p18118_p13 }
 0x100   :  { %18128 = shalt.err (!%p18125_p3)
}
 0x101   :  { %262 = dma.hbm_to_vmem [thread:$0]  %s18498_s9, 32, %s257_s7, [#allocation15], %s18281_s16, %s18281_s16, %s18282_s8  }
 0x102   :  { %s18291_s27 = smov [#allocation19]   ;;  %s18292_s6 = smov [#allocation22]  }
 0x103   :  { %s280_s18 = sshll.u32 %s18291_s27, 4  ;;  %s305_s22 = sshll.u32 %s18292_s6, 4  ;;  %s281_s18 = int_to_ptr.vmem [resolvable:$true] %s280_s18  ;;  %s306_s22 = int_to_ptr.vmem [resolvable:$true] %s305_s22 }
 0x104   :  { %s18129_s25 = scalar_lea.hbm %s18508_s30, 32 }
 0x105   :  { %p18130_p4 = scmp.ne.s32.totalorder %s18508_s30, %s18129_s25  ;;  %p18133_p5 = scmp.lt.u32.totalorder %s18129_s25, %s18508_s30 }
 0x107   :  { %p18135_p6 = pnand %p18133_p5, %p18130_p4 }
 0x109   :  { %18138 = shalt.err (!%p18135_p6)
}
 0x10a   :  { %s18139_s24 = scalar_lea.vmem %s281_s18, 32  ;;  %p18144_p8 = scmp.lt.s32.totalorder %s281_s18, %s281_s18 }
 0x10b   :  { %p18140_p7 = scmp.ne.s32.totalorder %s281_s18, %s18139_s24  ;;  %p18145_p9 = scmp.lt.s32.totalorder %s18139_s24, %s18139_s24 }
 0x10d   :  { %p18146_p10 = por %p18145_p9, %p18144_p8 }
 0x10f   :  { %p18147_p11 = pnand %p18146_p10, %p18140_p7 }
 0x111   :  { %18150 = shalt.err (!%p18147_p11)
}
 0x112   :  { %286 = dma.hbm_to_vmem [thread:$0]  %s18508_s30, 32, %s281_s18, [#allocation18], %s18281_s16, %s18281_s16, %s18282_s8  }
 0x113   :  { %s18151_s9 = scalar_lea.hbm %s18518_s13, 16 }
 0x114   :  { %p18152_p12 = scmp.ne.s32.totalorder %s18518_s13, %s18151_s9  ;;  %p18155_p13 = scmp.lt.u32.totalorder %s18151_s9, %s18518_s13 }
 0x116   :  { %p18157_p0 = pnand %p18155_p13, %p18152_p12 }
 0x118   :  { %18160 = shalt.err (!%p18157_p0)
}
 0x119   :  { %s18161_s23 = scalar_lea.vmem %s306_s22, 16  ;;  %s18165_s26 = scalar_lea.vmem %s306_s22, 32 }
 0x11a   :  { %p18162_p1 = scmp.ne.s32.totalorder %s306_s22, %s18161_s23  ;;  %p18166_p2 = scmp.lt.s32.totalorder %s306_s22, %s306_s22 }
 0x11b   :  { %p18167_p3 = scmp.lt.s32.totalorder %s18165_s26, %s18161_s23 }
 0x11d   :  { %p18168_p4 = por %p18167_p3, %p18166_p2 }
 0x11f   :  { %p18169_p5 = pnand %p18168_p4, %p18162_p1 }
 0x121   :  { %18172 = shalt.err (!%p18169_p5)
}
 0x122   :  { %308 = dma.hbm_to_vmem [thread:$0]  %s18518_s13, 16, %s306_s22, [#allocation21]  }
 0x123   :  { %s18293_s30 = smov [#allocation23]   ;;  %s18173_s8 = scalar_lea.hbm %s18523_s17, 16 }
 0x124   :  { %s315_s16 = sshll.u32 %s18293_s30, 4  ;;  %p18174_p6 = scmp.ne.s32.totalorder %s18523_s17, %s18173_s8  ;;  %s316_s16 = int_to_ptr.vmem [resolvable:$true] %s315_s16 }
 0x125   :  { %p18177_p7 = scmp.lt.u32.totalorder %s18173_s8, %s18523_s17 }
 0x127   :  { %p18179_p8 = pnand %p18177_p7, %p18174_p6 }
 0x129   :  { %18182 = shalt.err (!%p18179_p8)
}
 0x12a   :  { %s18183_s0 = scalar_lea.vmem %s316_s16, 16  ;;  %s18187_s28 = scalar_lea.vmem %s316_s16, 32 }
 0x12b   :  { %p18184_p9 = scmp.ne.s32.totalorder %s316_s16, %s18183_s0  ;;  %p18188_p10 = scmp.lt.s32.totalorder %s316_s16, %s316_s16 }
 0x12c   :  { %p18189_p11 = scmp.lt.s32.totalorder %s18187_s28, %s18183_s0 }
 0x12e   :  { %p18190_p12 = por %p18189_p11, %p18188_p10 }
 0x130   :  { %p18191_p13 = pnand %p18190_p12, %p18184_p9 }
 0x132   :  { %18194 = shalt.err (!%p18191_p13)
}
 0x133   :  { %318 = dma.hbm_to_vmem [thread:$0]  %s18523_s17, 16, %s316_s16, [#allocation24]  }
 0x134   :  { %18217 = dma.done.wait [#allocation3], 16  }
 0x135   :  { %18218 = vsyncadd [#allocation3], 4294967280 }
 0x136   :  { %18219 = dma.done.wait [#allocation6], 48  }
 0x137   :  { %18220 = vsyncadd [#allocation6], 4294967248 }
 0x138   :  { %18221 = dma.done.wait [#allocation9], 64  }
 0x139   :  { %18222 = vsyncadd [#allocation9], 4294967232 }
 0x13a   :  { %18223 = dma.done.wait [#allocation12], 64  }
 0x13b   :  { %18224 = vsyncadd [#allocation12], 4294967232 }
 0x13c   :  { %18225 = dma.done.wait [#allocation15], 64  }
 0x13d   :  { %18226 = vsyncadd [#allocation15], 4294967232 }
 0x13e   :  { %18227 = dma.done.wait [#allocation18], 64  }
 0x13f   :  { %18228 = vsyncadd [#allocation18], 4294967232 }
 0x140   :  { %18229 = dma.done.wait [#allocation21], 48  }
 0x141   :  { %18230 = vsyncadd [#allocation21], 4294967248 }
 0x142   :  { %18231 = dma.done.wait [#allocation24], 16  }
 0x143   :  { %18232 = vsyncadd [#allocation24], 4294967280  ;;  %vm369_vm0 = vcmask 261120   ;;  %v18617_v0 = vld [vmem:[%s18313_s5] sm:$0xff]  ;;  %v18620_v1 = vld [vmem:[%s18313_s5 + $0x8] sm:$0xff]  ;;  %s18294_s13 = smov 96  }
 0x144   :  { %v370_v2 = vsel %vm369_vm0, %v18617_v0, 0.0  ;;  %v373_v3 = vsel %vm369_vm0, %v18620_v1, 0.0  ;;  %v428_v4 = vld [vmem:[%s18358_s14] sm:$0xff]  ;;  %v429_v5 = vld [vmem:[%s18358_s14 + $0x8] sm:$0xff]  ;;  %v430_v7 = vld [vmem:[%s18358_s14 + $0x10] sm:$0xff]  ;;  %s18295_s5 = smov 64  }
 0x145   :  { %371 = vadd.xlane.f32.xlu0 %v370_v2  ;;  %v17396_v6 = vpack.i.bf16 %v429_v5, %v428_v4  ;;  %v431_v8 = vld [vmem:[%s18358_s14 + $0x18] sm:$0xff]  ;;  %v18646_v20 = vld [vmem:[%s18363_s19] ss:$0 sm:$0xff]  ;;  %v16980_v21 = vpack.c.bf16 %v429_v5, %v428_v4  ;;  %s20376_s17 = sld [smem:[#allocation47_spill]]  ;;  %s20377_s1 = sld [smem:[#allocation48_spill]]  ;;  %v18296_v4 = vmov 0.0  }
 0x146   :  { %v17411_v9 = vpack.i.bf16 %v431_v8, %v430_v7  ;;  %v16984_v22 = vpack.c.bf16 %v431_v8, %v430_v7  ;;  %vm18297_vm5 = vmmov 0   ;;  %s20378_s29 = sld [smem:[#allocation36_spill]]  ;;  %vm723_vm6 = vcmask 64512   ;;  %s18299_s3 = smov 120  }
 0x147   :  { %16981 = vmatprep.subr.bf16.mxu1 %v16980_v21  ;;  %s18300_s12 = smov 112   ;;  %s18301_s2 = smov 104   ;;  %vm2557_vm15 = vcmask 523264  }
 0x148   :  { %16983 = vmatpush3.bf16.msra.mxu1 %v16980_v21  ;;  %s20379_s20 = sld [smem:[#allocation41_spill]]  ;;  %s20380_s7 = sld [smem:[#allocation42_spill]] }
 0x149   :  { %374 = vadd.xlane.f32.xlu0 %v373_v3  ;;  %16985 = vmatprep.subr.bf16.mxu1 %v16984_v22  ;;  %s20381_s10 = sld [smem:[#allocation43_spill]]  ;;  %s20382_s11 = sld [smem:[#allocation45_spill]] }
 0x14a   :  { %s20383_s21 = sld [smem:[#allocation49_spill]]  ;;  %s20384_s15 = sld [smem:[#allocation50_spill]] }
 0x14b   :  { %v15069_v53 = vld [vmem:[%s20376_s17] ss:$0 sm:$0xff]  ;;  %s20385_s27 = sld [smem:[#allocation44_spill]]  ;;  %s20386_s18 = sld [smem:[#allocation46_spill]] }
 0x14c   :  { %16987 = vmatpush3.bf16.msra.mxu1 %v16984_v22  ;;  %v15070_v56 = vld [vmem:[%s20377_s1] ss:$0 sm:$0xff]  ;;  %s20389_s6 = sld [smem:[#allocation38_spill]]  ;;  %s20392_s22 = sld [smem:[#allocation40_spill]] }
 0x14d   :  { %s20393_s25 = sld [smem:[#allocation53_spill]]  ;;  %s20395_s9 = sld [smem:[#allocation54_spill]] }
 0x14e   :  { %s20394_s24 = sld [smem:[#allocation37_spill]]  ;;  %s20396_s23 = sld [smem:[#allocation55_spill]] }
 0x14f   :  { %s20397_s26 = sld [smem:[#allocation51_spill]]  ;;  %s20398_s30 = sld [smem:[#allocation52_spill]] }
 0x150   :  { %s20399_s16 = sld [smem:[#allocation56_spill]]  ;;  %s20400_s8 = sld [smem:[#allocation57_spill]] }
 0x151   :  { %s20401_s0 = sld [smem:[#allocation58_spill]]  ;;  %s20402_s28 = sld [smem:[#allocation59_spill]] }
 0x15f   :  { %17397 = vrot.lane.b32.xlu0 %v17396_v6, %s18294_s13 }
 0x163   :  { %17412 = vrot.lane.b32.xlu0 %v17411_v9, %s18295_s5 }
 0x1d2   :  { %v372_v10 = vpop.xlane.xlu0 %371 }
 0x1d3   :  { %v377_v11 = vmul.f32 0.03125, %v372_v10 }
 0x1d5   :  { %v18633_v12 = vsub.f32 %v18617_v0, %v377_v11 }
 0x1d6   :  { %v375_v13 = vpop.xlane.xlu0 %374 }
 0x1d7   :  { %v378_v14 = vmul.f32 0.03125, %v375_v13  ;;  %v381_v15 = vmul.f32 %v18633_v12, %v18633_v12  ;;  %v416_v54 = vmul.f32 %v15069_v53, %v18633_v12 }
 0x1d9   :  { %v18638_v16 = vsub.f32 %v18620_v1, %v378_v14  ;;  %v383_v17 = vsel %vm369_vm0, %v381_v15, 0.0  ;;  %v713_v15 = vlaneseq }
 0x1da   :  { %384 = vadd.xlane.f32.xlu1 %v383_v17  ;;  %v17398_v23 = vpop.permute.xlu0 %17397  ;;  %v361_v17 = vld [vmem:[%s20378_s29] sm:$0x1] }
 0x1db   :  { %v382_v18 = vmul.f32 %v18638_v16, %v18638_v16  ;;  %v17400_v24 = vunpack.i.h.bf16 %v17398_v23  ;;  %v17399_v25 = vunpack.i.l.bf16 %v17398_v23  ;;  %v417_v58 = vmul.f32 %v15069_v53, %v18638_v16  ;;  %v362_v23 = vld [vmem:[%s20378_s29 + $0x1] sm:$0x1] }
 0x1dc   :  { %v714_v16 = vshrl.u32 %v713_v15, 7  ;;  %vm709_vm7 = vcmp.gt.f32.partialorder %v361_v17, 0.0  ;;  %vm710_vm8 = vcmp.gt.f32.partialorder %v362_v23, 0.0 }
 0x1dd   :  { %v386_v19 = vsel %vm369_vm0, %v382_v18, 0.0  ;;  %v16988_v26 = vpack.c.bf16 %v17400_v24, %v17399_v25 }
 0x1de   :  { %387 = vadd.xlane.f32.xlu1 %v386_v19  ;;  %v17413_v33 = vpop.permute.xlu0 %17412  ;;  %v715_v18 = vsub.s32 0, %v714_v16  ;;  %v18298_v19 = vmov 0  }
 0x1df   :  { %16989 = vmatprep.subr.bf16.mxu1 %v16988_v26  ;;  %v17415_v37 = vunpack.i.h.bf16 %v17413_v33  ;;  %v17414_v38 = vunpack.i.l.bf16 %v17413_v33  ;;  %v711_v21 = vsel %vm709_vm7, 1, %v18298_v19  ;;  %v712_v24 = vsel %vm710_vm8, 1, %v18298_v19 }
 0x1e0   :  { %v18696_v22 = vrot.slane %v711_v21, %v715_v18 }
 0x1e1   :  { %v17000_v49 = vpack.c.bf16 %v17415_v37, %v17414_v38 }
 0x1e2   :  { %vm721_vm10 = vcmp.eq.s32.totalorder %v18696_v22, 1 }
 0x1ef   :  { %17402 = vrot.lane.b32.xlu1 %v17411_v9, %s18294_s13 }
 0x1f3   :  { %541 = vrot.lane.b32.xlu1 %v18646_v20, %s18294_s13 }
 0x1f7   :  { %17407 = vrot.lane.b32.xlu1 %v17396_v6, %s18295_s5 }
 0x267   :  { %v385_v27 = vpop.xlane.xlu1 %384 }
 0x268   :  { %v390_v28 = vmul.f32 0.032258064, %v385_v27 }
 0x26a   :  { %17566 = vrsqrt.f32 %v390_v28  ;;  %vm394_vm1 = vcmp.eq.f32.partialorder %v390_v28, inf  ;;  %v397_v36 = vand.u32 2147483648, %v390_v28  ;;  %vm396_vm2 = vcmp.eq.f32.partialorder %v390_v28, 0.0 }
 0x26b   :  { %v388_v29 = vpop.xlane.xlu1 %387 }
 0x26c   :  { %v391_v30 = vmul.f32 0.032258064, %v388_v29 }
 0x26e   :  { %17568 = vrsqrt.f32 %v391_v30  ;;  %vm401_vm3 = vcmp.eq.f32.partialorder %v391_v30, inf  ;;  %v404_v47 = vand.u32 2147483648, %v391_v30  ;;  %vm403_vm4 = vcmp.eq.f32.partialorder %v391_v30, 0.0 }
 0x26f   :  { %v17403_v31 = vpop.permute.xlu1 %17402 }
 0x270   :  { %v17405_v59 = vunpack.i.h.bf16 %v17403_v31  ;;  %v17404_v60 = vunpack.i.l.bf16 %v17403_v31 }
 0x272   :  { %v16992_v3 = vpack.c.bf16 %v17405_v59, %v17404_v60 }
 0x273   :  { %v18651_v32 = vpop.permute.xlu1 %541 }
 0x274   :  { %v17567_v34 = vpop.eup %17566 }
 0x275   :  { %v393_v35 = vmul.f32 %v17567_v34, %v390_v28 }
 0x277   :  { %v395_v39 = vsel %vm394_vm1, %v390_v28, %v393_v35  ;;  %v17408_v40 = vpop.permute.xlu1 %17407 }
 0x278   :  { %v17569_v41 = vpop.eup %17568  ;;  %v17410_v42 = vunpack.i.h.bf16 %v17408_v40  ;;  %v17409_v43 = vunpack.i.l.bf16 %v17408_v40  ;;  %v398_v44 = vsel %vm396_vm2, %v397_v36, %v395_v39 }
 0x279   :  { %v400_v45 = vmul.f32 %v17569_v41, %v391_v30  ;;  %v406_v46 = vadd.f32 1e-06, %v398_v44 }
 0x27a   :  { %v16996_v48 = vpack.c.bf16 %v17410_v42, %v17409_v43 }
 0x27b   :  { %v402_v50 = vsel %vm401_vm3, %v391_v30, %v400_v45  ;;  %17570 = vrcp.f32 %v406_v46 }
 0x27c   :  { %16997 = vmatprep.subr.bf16.mxu0 %v16996_v48  ;;  %v405_v51 = vsel %vm403_vm4, %v404_v47, %v402_v50 }
 0x27d   :  { %16999 = vmatpush3.bf16.msra.mxu0 %v16996_v48  ;;  %v407_v52 = vadd.f32 1e-06, %v405_v51 }
 0x27e   :  { %17001 = vmatprep.subr.bf16.mxu0 %v17000_v49 }
 0x27f   :  { %17572 = vrcp.f32 %v407_v52 }
 0x281   :  { %17003 = vmatpush3.bf16.msra.mxu0 %v17000_v49 }
 0x282   :  { %15996 = vmatprep.subr.mxu0 %v18296_v4 }
 0x285   :  { %v17571_v55 = vpop.eup %17570 }
 0x286   :  { %v418_v57 = vmul.f32 %v17571_v55, %v416_v54 }
 0x288   :  { %v426_v61 = vadd.f32 %v15070_v56, %v418_v57 }
 0x289   :  { %v17573_v62 = vpop.eup %17572 }
 0x28a   :  { %v419_v63 = vmul.f32 %v17573_v62, %v417_v58  ;;  %15961 = vmatprep.mubr.msk.f32.mxu1 %vm369_vm0, %v426_v61  ;;  %15983 = vmatprep.mubr.msk.f32.mxu0 %vm369_vm0, %v426_v61 }
 0x28c   :  { %v427_v2 = vadd.f32 %v15070_v56, %v419_v63 }
 0x28e   :  { %15962 = vmatmul.mubr.msk.f32.vlgmr.msra.gmra.mrb[0].mxu1 %vm369_vm0, %v427_v2  ;;  %15984 = vmatmul.mubr.msk.f32.vlgmr.msra.gmra.mrb[0].mxu0 %vm369_vm0, %v427_v2 }
 0x28f   :  { %16991 = vmatpush3.bf16.msra.mxu1 %v16988_v26  ;;  %15972 = vmatprep.mubr.msk.f32.mxu1 %vm369_vm0, %v426_v61  ;;  %v18699_v26 = vrot.slane %v712_v24, %v715_v18 }
 0x290   :  { %16993 = vmatprep.subr.bf16.mxu1 %v16992_v3  ;;  %15998 = vmatprep.mubr.msk.f32.mxu0 %vm18297_vm5, %v18296_v4 }
 0x291   :  { %vm722_vm9 = vcmp.eq.s32.totalorder %v18699_v26, 1 }
 0x293   :  { %16995 = vmatpush3.bf16.msra.mxu1 %v16992_v3 }
 0x294   :  { %15986 = vmatprep.subr.mxu1 %v18296_v4 }
 0x296   :  { %15973 = vmatmul.mubr.msk.f32.vlgmr.msra.gmra.mrb[2].mxu1 %vm369_vm0, %v427_v2 }
 0x297   :  { %15988 = vmatprep.mubr.msk.f32.mxu1 %vm18297_vm5, %v18296_v4 }
 0x361   :  { %v15963_v5 = vpop.f32.mrb[0].mxu1  ;;  %v15985_v6 = vpop.f32.mrb[0].mxu0 }
 0x362   :  { %v516_v7 = vpop.f32.mrb[1].mxu1  ;;  %v700_v8 = vpop.f32.mrb[1].mxu0  ;;  %v18688_v14 = vadd.f32 %v15963_v5, %v18646_v20 }
 0x363   :  { %v18675_v12 = vadd.f32 %v18646_v20, %v516_v7 }
 0x369   :  { %v15974_v9 = vpop.f32.mrb[2].mxu1 }
 0x36a   :  { %v610_v10 = vpop.f32.mrb[3].mxu1  ;;  %v18679_v13 = vadd.f32 %v15974_v9, %v18651_v32 }
 0x36b   :  { %v18670_v11 = vadd.f32 %v610_v10, %v18651_v32 }
 0x36d   :  { %15987 = vmatpush3.xpose.msk.msra.mxu1 %vm723_vm6, %v18670_v11 }
 0x36e   :  { %15991 = vmatprep.subr.mxu1 %v18296_v4 }
 0x370   :  { %15989 = vmatmul.mubr.msk.f32.vlgmr.msra.gmra.mrb[4].mxu1 %vm723_vm6, %v18675_v12 }
 0x371   :  { %15992 = vmatpush3.xpose.msk.msra.mxu1 %vm723_vm6, %v18679_v13  ;;  %15993 = vmatprep.mubr.msk.f32.mxu1 %vm18297_vm5, %v18296_v4 }
 0x372   :  { %16001 = vmatprep.subr.mxu1 %v18296_v4 }
 0x374   :  { %15994 = vmatmul.mubr.msk.f32.vlgmr.msra.gmra.mrb[6].mxu1 %vm723_vm6, %v18688_v14 }
 0x375   :  { %16003 = vmatprep.mubr.msk.f32.mxu1 %vm18297_vm5, %v18296_v4 }
 0x443   :  { %v796_v25 = vpop.f32.mrb[4].mxu1 }
 0x444   :  { %v15990_v27 = vpop.f32.mrb[5].mxu1  ;;  %v876_v38 = vmul.f32 0.35355338, %v796_v25 }
 0x446   :  { %v878_v39 = vsel %vm721_vm10, %v876_v38, -1e+09 }
 0x447   :  { %v872_v28 = vpop.f32.mrb[6].mxu1  ;;  %v880_v40 = vsel %vm723_vm6, %v878_v39, -inf }
 0x448   :  { %v877_v29 = vmul.f32 0.35355338, %v872_v28  ;;  %v15995_v30 = vpop.f32.mrb[7].mxu1 }
 0x44a   :  { %v879_v31 = vsel %vm722_vm9, %v877_v29, -1e+09 }
 0x44b   :  { %v883_v32 = vsel %vm723_vm6, %v879_v31, -inf }
 0x44c   :  { %884 = vmax.xlane.f32.xlu1 %v883_v32 }
 0x45d   :  { %1128 = vrot.lane.b32.xlu1 %v18679_v13, %s18299_s3 }
 0x461   :  { %1126 = vrot.lane.b32.xlu1 %v18688_v14, %s18299_s3 }
 0x4d9   :  { %v885_v33 = vpop.xlane.xlu1 %884 }
 0x4da   :  { %v887_v34 = vsub.f32 %v879_v31, %v885_v33 }
 0x4dc   :  { %v890_v35 = vmul.f32 1.442695, %v887_v34 }
 0x4dd   :  { %v1129_v45 = vpop.permute.xlu1 %1128 }
 0x4de   :  { %17574 = vpow2.f32 %v890_v35 }
 0x4e1   :  { %v1127_v47 = vpop.permute.xlu1 %1126 }
 0x4e8   :  { %v17575_v36 = vpop.eup %17574 }
 0x4e9   :  { %v895_v37 = vsel %vm723_vm6, %v17575_v36, 0.0 }
 0x4ea   :  { %896 = vadd.xlane.f32.xlu0 %v895_v37 }
 0x500   :  { %631 = vrot.lane.b32.xlu0 %v18646_v20, %s18295_s5 }
 0x51f   :  { %881 = vmax.xlane.f32.xlu0 %v880_v40 }
 0x535   :  { %1050 = vrot.lane.b32.xlu0 %v18670_v11, %s18299_s3 }
 0x577   :  { %v897_v41 = vpop.xlane.xlu0 %896 }
 0x578   :  { %17576 = vrcp.f32 %v897_v41 }
 0x57b   :  { %v632_v42 = vpop.permute.xlu0 %631 }
 0x57c   :  { %v18718_v43 = vadd.f32 %v700_v8, %v632_v42  ;;  %v18720_v44 = vadd.f32 %v15985_v6, %v632_v42 }
 0x57e   :  { %15997 = vmatpush3.msra.mxu0 %v18718_v43  ;;  %16002 = vmatpush3.msra.mxu1 %v18720_v44 }
 0x57f   :  { %16011 = vmatprep.subr.mxu1 %v18296_v4  ;;  %16006 = vmatprep.subr.mxu0 %v18296_v4 }
 0x582   :  { %v17577_v20 = vpop.eup %17576 }
 0x583   :  { %v901_v46 = vmul.f32 %v17577_v20, %v17575_v36 }
 0x585   :  { %16004 = vmatmul.mubr.msk.f32.vlgmr.msra.gmra.mrb[8].mxu1 %vm723_vm6, %v901_v46 }
 0x586   :  { %16012 = vmatpush3.xpose.msk.msra.mxu1 %vm723_vm6, %v1129_v45  ;;  %16013 = vmatprep.mubr.msk.f32.mxu1 %vm18297_vm5, %v18296_v4 }
 0x587   :  { %16021 = vmatprep.subr.mxu1 %v18296_v4 }
 0x589   :  { %16014 = vmatmul.mubr.msk.f32.vlgmr.msra.gmra.mrb[10].mxu1 %vm723_vm6, %v1127_v47 }
 0x58a   :  { %16023 = vmatprep.mubr.msk.f32.mxu1 %vm18297_vm5, %v18296_v4 }
 0x5ac   :  { %v882_v48 = vpop.xlane.xlu0 %881 }
 0x5ad   :  { %v886_v49 = vsub.f32 %v878_v39, %v882_v48 }
 0x5af   :  { %v888_v50 = vmul.f32 1.442695, %v886_v49 }
 0x5b0   :  { %v1051_v56 = vpop.permute.xlu0 %1050 }
 0x5b1   :  { %17578 = vpow2.f32 %v888_v50 }
 0x5bb   :  { %v17579_v51 = vpop.eup %17578 }
 0x5bc   :  { %v892_v52 = vsel %vm723_vm6, %v17579_v51, 0.0 }
 0x5bd   :  { %893 = vadd.xlane.f32.xlu1 %v892_v52  ;;  %v433_v52 = vld [vmem:[%s20379_s20] sm:$0xff] }
 0x5ce   :  { %1048 = vrot.lane.b32.xlu1 %v18675_v12, %s18299_s3 }
 0x5d2   :  { %1548 = vrot.lane.b32.xlu1 %v18670_v11, %s18300_s12 }
 0x64a   :  { %v894_v53 = vpop.xlane.xlu1 %893 }
 0x64b   :  { %17580 = vrcp.f32 %v894_v53 }
 0x64e   :  { %v1049_v59 = vpop.permute.xlu1 %1048 }
 0x652   :  { %v1549_v23 = vpop.permute.xlu1 %1548 }
 0x655   :  { %v17581_v54 = vpop.eup %17580 }
 0x656   :  { %v900_v55 = vmul.f32 %v17581_v54, %v17579_v51  ;;  %v434_v51 = vld [vmem:[%s20379_s20 + $0x8] sm:$0xff] }
 0x658   :  { %15999 = vmatmul.mubr.msk.f32.vlgmr.msra.gmra.mrb[2].mxu0 %vm723_vm6, %v900_v55  ;;  %v18740_v57 = vpop.f32.mrb[8].mxu1 }
 0x659   :  { %16007 = vmatpush3.xpose.msk.msra.mxu0 %vm723_vm6, %v1051_v56  ;;  %v16005_v58 = vpop.f32.mrb[9].mxu1  ;;  %16008 = vmatprep.mubr.msk.f32.mxu0 %vm18297_vm5, %v18296_v4 }
 0x65a   :  { %16016 = vmatprep.subr.mxu0 %v18296_v4 }
 0x65c   :  { %16009 = vmatmul.mubr.msk.f32.vlgmr.msra.gmra.mrb[4].mxu0 %vm723_vm6, %v1049_v59  ;;  %v1200_v60 = vpop.f32.mrb[10].mxu1 }
 0x65d   :  { %v1205_v61 = vmul.f32 0.35355338, %v1200_v60  ;;  %v16015_v62 = vpop.f32.mrb[11].mxu1  ;;  %16018 = vmatprep.mubr.msk.f32.mxu0 %vm18297_vm5, %v18296_v4 }
 0x65f   :  { %v1207_v63 = vsel %vm722_vm9, %v1205_v61, -1e+09 }
 0x660   :  { %v1211_v2 = vsel %vm723_vm6, %v1207_v63, -inf }
 0x661   :  { %1212 = vmax.xlane.f32.xlu0 %v1211_v2 }
 0x677   :  { %1308 = vrot.lane.b32.xlu0 %v18720_v44, %s18299_s3 }
 0x67b   :  { %1546 = vrot.lane.b32.xlu0 %v18675_v12, %s18300_s12 }
 0x67f   :  { %1624 = vrot.lane.b32.xlu0 %v18688_v14, %s18300_s12 }
 0x6ee   :  { %v1213_v3 = vpop.xlane.xlu0 %1212 }
 0x6ef   :  { %v1215_v5 = vsub.f32 %v1207_v63, %v1213_v3 }
 0x6f1   :  { %v1218_v6 = vmul.f32 1.442695, %v1215_v5 }
 0x6f2   :  { %v1309_v7 = vpop.permute.xlu0 %1308 }
 0x6f3   :  { %17582 = vpow2.f32 %v1218_v6  ;;  %16022 = vmatpush3.msra.mxu1 %v1309_v7  ;;  %v435_v6 = vld [vmem:[%s20379_s20 + $0x10] sm:$0xff] }
 0x6f4   :  { %16036 = vmatprep.subr.mxu1 %v18296_v4 }
 0x6f6   :  { %v1547_v28 = vpop.permute.xlu0 %1546 }
 0x6fa   :  { %v1625_v30 = vpop.permute.xlu0 %1624 }
 0x6fd   :  { %v17583_v8 = vpop.eup %17582 }
 0x6fe   :  { %v1223_v9 = vsel %vm723_vm6, %v17583_v8, 0.0 }
 0x6ff   :  { %1224 = vadd.xlane.f32.xlu1 %v1223_v9 }
 0x710   :  { %1626 = vrot.lane.b32.xlu1 %v18679_v13, %s18300_s12 }
 0x72b   :  { %v18762_v10 = vpop.f32.mrb[2].mxu0 }
 0x72c   :  { %v16000_v15 = vpop.f32.mrb[3].mxu0 }
 0x72f   :  { %v1122_v16 = vpop.f32.mrb[4].mxu0 }
 0x730   :  { %v1204_v17 = vmul.f32 0.35355338, %v1122_v16  ;;  %v16010_v18 = vpop.f32.mrb[5].mxu0 }
 0x732   :  { %v1206_v19 = vsel %vm721_vm10, %v1204_v17, -1e+09 }
 0x733   :  { %v1208_v21 = vsel %vm723_vm6, %v1206_v19, -inf }
 0x734   :  { %1209 = vmax.xlane.f32.xlu1 %v1208_v21 }
 0x78c   :  { %v1225_v24 = vpop.xlane.xlu1 %1224 }
 0x78d   :  { %17584 = vrcp.f32 %v1225_v24 }
 0x790   :  { %v1627_v29 = vpop.permute.xlu1 %1626 }
 0x797   :  { %v17585_v25 = vpop.eup %17584 }
 0x798   :  { %v1229_v27 = vmul.f32 %v17585_v25, %v17583_v8 }
 0x79a   :  { %16024 = vmatmul.mubr.msk.f32.vlgmr.msra.gmra.mrb[12].mxu1 %vm723_vm6, %v1229_v27 }
 0x79b   :  { %16037 = vmatpush3.xpose.msk.msra.mxu1 %vm723_vm6, %v1549_v23  ;;  %16038 = vmatprep.mubr.msk.f32.mxu1 %vm18297_vm5, %v18296_v4 }
 0x79c   :  { %16041 = vmatprep.subr.mxu1 %v18296_v4 }
 0x79e   :  { %16039 = vmatmul.mubr.msk.f32.vlgmr.msra.gmra.mrb[14].mxu1 %vm723_vm6, %v1547_v28 }
 0x79f   :  { %16042 = vmatpush3.xpose.msk.msra.mxu1 %vm723_vm6, %v1627_v29  ;;  %16043 = vmatprep.mubr.msk.f32.mxu1 %vm18297_vm5, %v18296_v4 }
 0x7a0   :  { %16051 = vmatprep.subr.mxu1 %v18296_v4 }
 0x7a2   :  { %16044 = vmatmul.mubr.msk.f32.vlgmr.msra.gmra.mrb[16].mxu1 %vm723_vm6, %v1625_v30 }
 0x7a3   :  { %16053 = vmatprep.mubr.msk.f32.mxu1 %vm18297_vm5, %v18296_v4 }
 0x7c1   :  { %v1210_v31 = vpop.xlane.xlu1 %1209 }
 0x7c2   :  { %v1214_v32 = vsub.f32 %v1206_v19, %v1210_v31 }
 0x7c4   :  { %v1216_v33 = vmul.f32 1.442695, %v1214_v32 }
 0x7c6   :  { %17586 = vpow2.f32 %v1216_v33 }
 0x7d0   :  { %v17587_v34 = vpop.eup %17586 }
 0x7d1   :  { %v1220_v35 = vsel %vm723_vm6, %v17587_v34, 0.0 }
 0x7d2   :  { %1221 = vadd.xlane.f32.xlu0 %v1220_v35 }
 0x7e8   :  { %1231 = vrot.lane.b32.xlu0 %v18718_v43, %s18299_s3 }
 0x7ec   :  { %1804 = vrot.lane.b32.xlu0 %v18720_v44, %s18300_s12 }
 0x7f0   :  { %1965 = vrot.lane.b32.xlu0 %v18670_v11, %s18301_s2 }
 0x7f4   :  { %2043 = vrot.lane.b32.xlu0 %v18679_v13, %s18301_s2 }
 0x7f8   :  { %1963 = vrot.lane.b32.xlu0 %v18675_v12, %s18301_s2 }
 0x85f   :  { %v1222_v36 = vpop.xlane.xlu0 %1221 }
 0x860   :  { %17588 = vrcp.f32 %v1222_v36 }
 0x863   :  { %v1232_v37 = vpop.permute.xlu0 %1231 }
 0x864   :  { %16017 = vmatpush3.msra.mxu0 %v1232_v37 }
 0x865   :  { %16026 = vmatprep.subr.mxu0 %v434_v51 }
 0x867   :  { %v1805_v38 = vpop.permute.xlu0 %1804 }
 0x868   :  { %16052 = vmatpush3.msra.mxu1 %v1805_v38 }
 0x869   :  { %16061 = vmatprep.subr.mxu1 %v18296_v4 }
 0x86a   :  { %v17589_v39 = vpop.eup %17588 }
 0x86b   :  { %v1228_v40 = vmul.f32 %v17589_v39, %v17587_v34  ;;  %v1966_v8 = vpop.permute.xlu0 %1965 }
 0x86d   :  { %16019 = vmatmul.mubr.msk.f32.vlgmr.msra.gmra.mrb[6].mxu0 %vm723_vm6, %v1228_v40  ;;  %v1380_v11 = vpop.f32.mrb[12].mxu1 }
 0x86e   :  { %v16025_v41 = vpop.f32.mrb[13].mxu1  ;;  %16027 = vmatpush3.msra.mxu0 %v434_v51  ;;  %v436_v51 = vld [vmem:[%s20379_s20 + $0x18] sm:$0xff] }
 0x86f   :  { %16031 = vmatprep.subr.mxu0 %v433_v52  ;;  %v2044_v16 = vpop.permute.xlu0 %2043 }
 0x871   :  { %v1620_v13 = vpop.f32.mrb[14].mxu1 }
 0x872   :  { %v1702_v42 = vmul.f32 0.35355338, %v1620_v13  ;;  %v16040_v20 = vpop.f32.mrb[15].mxu1 }
 0x873   :  { %v1964_v17 = vpop.permute.xlu0 %1963 }
 0x874   :  { %v1704_v12 = vsel %vm721_vm10, %v1702_v42, -1e+09 }
 0x875   :  { %v1698_v45 = vpop.f32.mrb[16].mxu1  ;;  %v1706_v46 = vsel %vm723_vm6, %v1704_v12, -inf }
 0x876   :  { %v1703_v47 = vmul.f32 0.35355338, %v1698_v45  ;;  %1707 = vmax.xlane.f32.xlu1 %v1706_v46  ;;  %v16045_v48 = vpop.f32.mrb[17].mxu1 }
 0x878   :  { %v1705_v49 = vsel %vm722_vm9, %v1703_v47, -1e+09 }
 0x879   :  { %v1709_v50 = vsel %vm723_vm6, %v1705_v49, -inf }
 0x87a   :  { %1710 = vmax.xlane.f32.xlu1 %v1709_v50 }
 0x903   :  { %v1708_v53 = vpop.xlane.xlu1 %1707 }
 0x904   :  { %v1712_v54 = vsub.f32 %v1704_v12, %v1708_v53 }
 0x906   :  { %v1714_v55 = vmul.f32 1.442695, %v1712_v54 }
 0x907   :  { %v1711_v56 = vpop.xlane.xlu1 %1710 }
 0x908   :  { %17590 = vpow2.f32 %v1714_v55  ;;  %v1713_v58 = vsub.f32 %v1705_v49, %v1711_v56  ;;  %v15110_v55 = vld [vmem:[%s20380_s7] ss:$0 sm:$0xff] }
 0x90a   :  { %v1716_v59 = vmul.f32 1.442695, %v1713_v58 }
 0x90c   :  { %17592 = vpow2.f32 %v1716_v59 }
 0x912   :  { %v17591_v60 = vpop.eup %17590 }
 0x913   :  { %v1718_v61 = vsel %vm723_vm6, %v17591_v60, 0.0 }
 0x914   :  { %1719 = vadd.xlane.f32.xlu1 %v1718_v61 }
 0x916   :  { %v17593_v62 = vpop.eup %17592 }
 0x917   :  { %v1721_v63 = vsel %vm723_vm6, %v17593_v62, 0.0 }
 0x918   :  { %1722 = vadd.xlane.f32.xlu1 %v1721_v63 }
 0x929   :  { %1728 = vrot.lane.b32.xlu1 %v18718_v43, %s18300_s12 }
 0x92d   :  { %2041 = vrot.lane.b32.xlu1 %v18688_v14, %s18301_s2 }
 0x940   :  { %v1303_v2 = vpop.f32.mrb[6].mxu0 }
 0x941   :  { %v16020_v3 = vpop.f32.mrb[7].mxu0  ;;  %16028 = vmatprep.mubr.msk.f32.mxu0 %vm723_vm6, %v1303_v2 }
 0x942   :  { %16029 = vmatmul.mubr.msk.f32.vlgmr.msra.gmra.mrb[8].mxu0 %vm723_vm6, %v1380_v11 }
 0x943   :  { %16033 = vmatprep.mubr.msk.f32.mxu0 %vm723_vm6, %v18762_v10  ;;  %16032 = vmatpush3.msra.mxu0 %v433_v52 }
 0x944   :  { %16046 = vmatprep.subr.mxu0 %v18296_v4 }
 0x94a   :  { %16034 = vmatmul.mubr.msk.f32.vlgmr.msra.gmra.mrb[8].mxu0 %vm723_vm6, %v18740_v57 }
 0x94b   :  { %16048 = vmatprep.mubr.msk.f32.mxu0 %vm18297_vm5, %v18296_v4 }
 0x9a1   :  { %v1720_v5 = vpop.xlane.xlu1 %1719 }
 0x9a2   :  { %17594 = vrcp.f32 %v1720_v5 }
 0x9a5   :  { %v1723_v14 = vpop.xlane.xlu1 %1722 }
 0x9a6   :  { %17596 = vrcp.f32 %v1723_v14 }
 0x9a9   :  { %v1729_v7 = vpop.permute.xlu1 %1728 }
 0x9aa   :  { %16047 = vmatpush3.msra.mxu0 %v1729_v7 }
 0x9ab   :  { %16056 = vmatprep.subr.mxu0 %v435_v6 }
 0x9ac   :  { %v17595_v9 = vpop.eup %17594 }
 0x9ad   :  { %v1726_v10 = vmul.f32 %v17595_v9, %v17591_v60  ;;  %v2042_v24 = vpop.permute.xlu1 %2041 }
 0x9af   :  { %16049 = vmatmul.mubr.msk.f32.vlgmr.msra.gmra.mrb[10].mxu0 %vm723_vm6, %v1726_v10 }
 0x9b0   :  { %v17597_v15 = vpop.eup %17596  ;;  %16057 = vmatpush3.msra.mxu0 %v435_v6 }
 0x9b1   :  { %v1727_v57 = vmul.f32 %v17597_v15, %v17593_v62  ;;  %16066 = vmatprep.subr.mxu0 %v18296_v4  ;;  %v2448_v15 = vld [vmem:[%s20381_s10] sm:$0xff] }
 0x9b3   :  { %16054 = vmatmul.mubr.msk.f32.vlgmr.msra.gmra.mrb[18].mxu1 %vm723_vm6, %v1727_v57  ;;  %v2450_v57 = vld [vmem:[%s20381_s10 + $0x10] sm:$0xff] }
 0x9b4   :  { %16062 = vmatpush3.xpose.msk.msra.mxu1 %vm723_vm6, %v1966_v8  ;;  %16063 = vmatprep.mubr.msk.f32.mxu1 %vm18297_vm5, %v18296_v4 }
 0x9b5   :  { %16071 = vmatprep.subr.mxu1 %v18296_v4 }
 0x9b7   :  { %16064 = vmatmul.mubr.msk.f32.vlgmr.msra.gmra.mrb[20].mxu1 %vm723_vm6, %v1964_v17 }
 0x9b8   :  { %16073 = vmatprep.mubr.msk.f32.mxu1 %vm18297_vm5, %v18296_v4 }
 0xa82   :  { %v1800_v18 = vpop.f32.mrb[10].mxu0 }
 0xa83   :  { %v16050_v19 = vpop.f32.mrb[11].mxu0  ;;  %16058 = vmatprep.mubr.msk.f32.mxu0 %vm723_vm6, %v1800_v18  ;;  %v2451_v18 = vld [vmem:[%s20381_s10 + $0x18] sm:$0xff] }
 0xa84   :  { %v17008_v19 = vpack.c.bf16 %v2451_v18, %v2450_v57 }
 0xa86   :  { %v1876_v21 = vpop.f32.mrb[18].mxu1 }
 0xa87   :  { %v16055_v23 = vpop.f32.mrb[19].mxu1  ;;  %16059 = vmatmul.mubr.msk.f32.vlgmr.msra.gmra.mrb[8].mxu0 %vm723_vm6, %v1876_v21  ;;  %v2453_v21 = vld [vmem:[%s20382_s11] sm:$0xff] }
 0xa88   :  { %16067 = vmatpush3.xpose.msk.msra.mxu0 %vm723_vm6, %v2044_v16  ;;  %16068 = vmatprep.mubr.msk.f32.mxu0 %vm18297_vm5, %v18296_v4  ;;  %v2449_v16 = vld [vmem:[%s20381_s10 + $0x8] sm:$0xff] }
 0xa89   :  { %16076 = vmatprep.subr.mxu0 %v18296_v4  ;;  %v17004_v17 = vpack.c.bf16 %v2449_v16, %v2448_v15  ;;  %v2454_v23 = vld [vmem:[%s20382_s11 + $0x8] sm:$0xff] }
 0xa8a   :  { %v2037_v25 = vpop.f32.mrb[20].mxu1 }
 0xa8b   :  { %v2119_v27 = vmul.f32 0.35355338, %v2037_v25  ;;  %v16065_v28 = vpop.f32.mrb[21].mxu1  ;;  %16069 = vmatmul.mubr.msk.f32.vlgmr.msra.gmra.mrb[12].mxu0 %vm723_vm6, %v2042_v24  ;;  %v2455_v24 = vld [vmem:[%s20382_s11 + $0x10] sm:$0xff]  ;;  %v17012_v25 = vpack.c.bf16 %v2454_v23, %v2453_v21 }
 0xa8c   :  { %16078 = vmatprep.mubr.msk.f32.mxu0 %vm18297_vm5, %v18296_v4 }
 0xa8d   :  { %v2121_v29 = vsel %vm721_vm10, %v2119_v27, -1e+09  ;;  %v2456_v27 = vld [vmem:[%s20382_s11 + $0x18] sm:$0xff] }
 0xa8e   :  { %v2123_v30 = vsel %vm723_vm6, %v2121_v29, -inf  ;;  %v17016_v28 = vpack.c.bf16 %v2456_v27, %v2455_v24  ;;  %v15126_v27 = vld [vmem:[%s18358_s14 + $0x38] sm:$0xff] }
 0xa8f   :  { %2124 = vmax.xlane.f32.xlu0 %v2123_v30  ;;  %v2458_v30 = vld [vmem:[%s20382_s11 + $0x28] sm:$0xff] }
 0xb1c   :  { %v2125_v31 = vpop.xlane.xlu0 %2124 }
 0xb1d   :  { %v2129_v32 = vsub.f32 %v2121_v29, %v2125_v31  ;;  %v2457_v29 = vld [vmem:[%s20382_s11 + $0x20] sm:$0xff] }
 0xb1e   :  { %v17020_v31 = vpack.c.bf16 %v2458_v30, %v2457_v29  ;;  %v15123_v29 = vld [vmem:[%s18358_s14 + $0x20] sm:$0xff]  ;;  %v15124_v30 = vld [vmem:[%s18358_s14 + $0x28] sm:$0xff] }
 0xb1f   :  { %v2131_v33 = vmul.f32 1.442695, %v2129_v32 }
 0xb21   :  { %17598 = vpow2.f32 %v2131_v33 }
 0xb2b   :  { %v17599_v34 = vpop.eup %17598 }
 0xb2c   :  { %v2135_v35 = vsel %vm723_vm6, %v17599_v34, 0.0 }
 0xb2d   :  { %2136 = vadd.xlane.f32.xlu0 %v2135_v35 }
 0xb5e   :  { %v2115_v36 = vpop.f32.mrb[12].mxu0 }
 0xb5f   :  { %v2120_v37 = vmul.f32 0.35355338, %v2115_v36  ;;  %v16070_v38 = vpop.f32.mrb[13].mxu0 }
 0xb61   :  { %v2122_v39 = vsel %vm722_vm9, %v2120_v37, -1e+09 }
 0xb62   :  { %v2126_v40 = vsel %vm723_vm6, %v2122_v39, -inf }
 0xb63   :  { %2127 = vmax.xlane.f32.xlu1 %v2126_v40 }
 0xb74   :  { %2221 = vrot.lane.b32.xlu1 %v18720_v44, %s18301_s2 }
 0xbba   :  { %v2137_v45 = vpop.xlane.xlu0 %2136 }
 0xbf0   :  { %v2128_v11 = vpop.xlane.xlu1 %2127 }
 0xbf1   :  { %v2130_v41 = vsub.f32 %v2122_v39, %v2128_v11 }
 0xbf3   :  { %v2133_v13 = vmul.f32 1.442695, %v2130_v41 }
 0xbf4   :  { %v2222_v42 = vpop.permute.xlu1 %2221 }
 0xbf5   :  { %17600 = vpow2.f32 %v2133_v13  ;;  %16077 = vmatpush3.msra.mxu0 %v2222_v42 }
 0xbf6   :  { %17602 = vrcp.f32 %v2137_v45  ;;  %16081 = vmatprep.subr.mxu0 %v436_v51 }
 0xbff   :  { %v17601_v20 = vpop.eup %17600 }
 0xc00   :  { %v2138_v12 = vsel %vm723_vm6, %v17601_v20, 0.0  ;;  %v17603_v47 = vpop.eup %17602 }
 0xc01   :  { %2139 = vadd.xlane.f32.xlu0 %v2138_v12  ;;  %v2143_v48 = vmul.f32 %v17603_v47, %v17599_v34 }
 0xc17   :  { %2145 = vrot.lane.b32.xlu0 %v18718_v43, %s18301_s2 }
 0xc8e   :  { %v2140_v46 = vpop.xlane.xlu0 %2139 }
 0xc8f   :  { %17604 = vrcp.f32 %v2140_v46  ;;  %v15111_v46 = vld [vmem:[%s20383_s21] ss:$0 sm:$0xff] }
 0xc92   :  { %v2146_v44 = vpop.permute.xlu0 %2145 }
 0xc93   :  { %16072 = vmatpush3.msra.mxu1 %v2146_v44 }
 0xc94   :  { %16074 = vmatmul.mubr.msk.f32.vlgmr.msra.gmra.mrb[22].mxu1 %vm723_vm6, %v2143_v48  ;;  %17005 = vmatprep.subr.bf16.mxu1 %v17004_v17 }
 0xc95   :  { %17007 = vmatpush3.bf16.msra.mxu1 %v17004_v17 }
 0xc96   :  { %17009 = vmatprep.subr.bf16.mxu1 %v17008_v19 }
 0xc99   :  { %v17605_v49 = vpop.eup %17604  ;;  %17011 = vmatpush3.bf16.msra.mxu1 %v17008_v19 }
 0xc9a   :  { %v2144_v50 = vmul.f32 %v17605_v49, %v17601_v20 }
 0xc9c   :  { %16079 = vmatmul.mubr.msk.f32.vlgmr.msra.gmra.mrb[14].mxu0 %vm723_vm6, %v2144_v50  ;;  %v15112_v50 = vld [vmem:[%s20384_s15] ss:$0 sm:$0xff] }
 0xc9d   :  { %16082 = vmatpush3.msra.mxu0 %v436_v51 }
 0xc9e   :  { %17013 = vmatprep.subr.bf16.mxu0 %v17012_v25 }
 0xd67   :  { %v2217_v52 = vpop.f32.mrb[22].mxu1 }
 0xd68   :  { %v16075_v43 = vpop.f32.mrb[23].mxu1  ;;  %16083 = vmatprep.mubr.msk.f32.mxu0 %vm723_vm6, %v2217_v52 }
 0xd6f   :  { %v2293_v53 = vpop.f32.mrb[14].mxu0 }
 0xd70   :  { %v16080_v54 = vpop.f32.mrb[15].mxu0  ;;  %16084 = vmatmul.mubr.msk.f32.vlgmr.msra.gmra.mrb[8].mxu0 %vm723_vm6, %v2293_v53 }
 0xd71   :  { %17015 = vmatpush3.bf16.msra.mxu0 %v17012_v25  ;;  %v2459_v54 = vld [vmem:[%s20382_s11 + $0x30] sm:$0xff] }
 0xd72   :  { %17017 = vmatprep.subr.bf16.mxu0 %v17016_v28  ;;  %v15125_v25 = vld [vmem:[%s18358_s14 + $0x30] sm:$0xff]  ;;  %s20387_s14 = sld [smem:[#allocation39_spill]] }
 0xd75   :  { %17019 = vmatpush3.bf16.msra.mxu0 %v17016_v28  ;;  %v17421_v28 = vpack.i.bf16 %v15126_v27, %v15125_v25 }
 0xd76   :  { %17021 = vmatprep.subr.bf16.mxu0 %v17020_v31 }
 0xd79   :  { %17023 = vmatpush3.bf16.msra.mxu0 %v17020_v31  ;;  %v18916_v31 = vld [vmem:[%s18363_s19 + $0x1] ss:$0 sm:$0xff]  ;;  %s20388_s19 = sld [smem:[#allocation35_spill]] }
 0xe43   :  { %v16085_v56 = vpop.f32.mrb[8].mxu0 }
 0xe44   :  { %v2387_v58 = vadd.f32 %v16085_v56, %v15110_v55  ;;  %v2369_v59 = vpop.f32.mrb[9].mxu0 }
 0xe45   :  { %v2386_v60 = vadd.f32 %v15110_v55, %v2369_v59  ;;  %v2460_v55 = vld [vmem:[%s20382_s11 + $0x38] sm:$0xff] }
 0xe46   :  { %v18855_v61 = vadd.f32 %v2387_v58, %v18620_v1  ;;  %v17024_v56 = vpack.c.bf16 %v2460_v55, %v2459_v54  ;;  %v15113_v58 = vld [vmem:[%s20385_s27] ss:$0 sm:$0xff] }
 0xe47   :  { %v18858_v62 = vadd.f32 %v2386_v60, %v18617_v0 }
 0xe48   :  { %v2395_v63 = vsel %vm369_vm0, %v18855_v61, 0.0  ;;  %17025 = vmatprep.subr.bf16.mxu0 %v17024_v56 }
 0xe49   :  { %2396 = vadd.xlane.f32.xlu0 %v2395_v63  ;;  %v2392_v2 = vsel %vm369_vm0, %v18858_v62, 0.0  ;;  %17027 = vmatpush3.bf16.msra.mxu0 %v17024_v56 }
 0xe4a   :  { %2393 = vadd.xlane.f32.xlu1 %v2392_v2 }
 0xed6   :  { %v2397_v3 = vpop.xlane.xlu0 %2396 }
 0xed7   :  { %v2399_v5 = vmul.f32 0.03125, %v2397_v3  ;;  %v2394_v14 = vpop.xlane.xlu1 %2393 }
 0xed8   :  { %v2398_v1 = vmul.f32 0.03125, %v2394_v14  ;;  %v15116_v14 = vld [vmem:[%s20386_s18] ss:$0 sm:$0xff] }
 0xed9   :  { %v2401_v6 = vsub.f32 %v18855_v61, %v2399_v5 }
 0xeda   :  { %v2400_v0 = vsub.f32 %v18858_v62, %v2398_v1 }
 0xedb   :  { %v2403_v7 = vmul.f32 %v2401_v6, %v2401_v6  ;;  %v2437_v47 = vmul.f32 %v15111_v46, %v2401_v6 }
 0xedc   :  { %v2402_v8 = vmul.f32 %v2400_v0, %v2400_v0  ;;  %v2436_v48 = vmul.f32 %v15111_v46, %v2400_v0 }
 0xedd   :  { %v2407_v9 = vsel %vm369_vm0, %v2403_v7, 0.0 }
 0xede   :  { %2408 = vadd.xlane.f32.xlu1 %v2407_v9  ;;  %v2404_v10 = vsel %vm369_vm0, %v2402_v8, 0.0 }
 0xedf   :  { %2405 = vadd.xlane.f32.xlu0 %v2404_v10 }
 0xf6b   :  { %v2409_v32 = vpop.xlane.xlu1 %2408 }
 0xf6c   :  { %v2411_v33 = vmul.f32 0.032258064, %v2409_v32  ;;  %v2406_v34 = vpop.xlane.xlu0 %2405  ;;  %v17416_v32 = vpack.i.bf16 %v15124_v30, %v15123_v29 }
 0xf6d   :  { %v2410_v35 = vmul.f32 0.032258064, %v2406_v34  ;;  %v17032_v34 = vpack.c.bf16 %v15126_v27, %v15125_v25 }
 0xf6e   :  { %17606 = vrsqrt.f32 %v2411_v33  ;;  %vm2421_vm11 = vcmp.eq.f32.partialorder %v2411_v33, inf  ;;  %v2424_v39 = vand.u32 2147483648, %v2411_v33  ;;  %vm2423_vm12 = vcmp.eq.f32.partialorder %v2411_v33, 0.0 }
 0xf6f   :  { %17608 = vrsqrt.f32 %v2410_v35  ;;  %vm2414_vm13 = vcmp.eq.f32.partialorder %v2410_v35, inf  ;;  %v2417_v41 = vand.u32 2147483648, %v2410_v35  ;;  %vm2416_vm14 = vcmp.eq.f32.partialorder %v2410_v35, 0.0 }
 0xf78   :  { %v17607_v36 = vpop.eup %17606 }
 0xf79   :  { %v17609_v37 = vpop.eup %17608  ;;  %v2420_v38 = vmul.f32 %v17607_v36, %v2411_v33 }
 0xf7a   :  { %v2413_v40 = vmul.f32 %v17609_v37, %v2410_v35 }
 0xf7b   :  { %v2422_v11 = vsel %vm2421_vm11, %v2411_v33, %v2420_v38  ;;  %v17028_v33 = vpack.c.bf16 %v15124_v30, %v15123_v29 }
 0xf7c   :  { %v2425_v13 = vsel %vm2423_vm12, %v2424_v39, %v2422_v11  ;;  %v2415_v42 = vsel %vm2414_vm13, %v2410_v35, %v2413_v40  ;;  %vm19214_vm13 = vmpackc.low %vm723_vm6, %vm723_vm6 }
 0xf7d   :  { %v2427_v20 = vadd.f32 1e-06, %v2425_v13  ;;  %v2418_v12 = vsel %vm2416_vm14, %v2417_v41, %v2415_v42  ;;  %17029 = vmatprep.subr.bf16.mxu1 %v17028_v33  ;;  %vm5346_vm14 = vcmask 130048  }
 0xf7e   :  { %v2426_v45 = vadd.f32 1e-06, %v2418_v12 }
 0xf7f   :  { %17610 = vrcp.f32 %v2427_v20 }
 0xf80   :  { %17612 = vrcp.f32 %v2426_v45 }
 0xf89   :  { %v17611_v44 = vpop.eup %17610 }
 0xf8a   :  { %v17613_v49 = vpop.eup %17612  ;;  %v2439_v51 = vmul.f32 %v17611_v44, %v2437_v47 }
 0xf8b   :  { %v2438_v52 = vmul.f32 %v17613_v49, %v2436_v48 }
 0xf8c   :  { %v2447_v53 = vadd.f32 %v15112_v50, %v2439_v51 }
 0xf8d   :  { %v2446_v43 = vadd.f32 %v15112_v50, %v2438_v52 }
 0xf8f   :  { %16094 = vmatprep.mubr.msk.f32.mxu1 %vm369_vm0, %v2446_v43 }
 0xf90   :  { %16095 = vmatmul.mubr.msk.f32.vlgmr.msra.gmra.mrb[24].mxu1 %vm369_vm0, %v2447_v53 }
 0xf91   :  { %17031 = vmatpush3.bf16.msra.mxu1 %v17028_v33 }
 0xf92   :  { %17033 = vmatprep.subr.bf16.mxu1 %v17032_v34 }
 0xf95   :  { %17035 = vmatpush3.bf16.msra.mxu1 %v17032_v34 }
0x1063   :  { %v16096_v59 = vpop.f32.mrb[24].mxu1 }
0x1064   :  { %v2546_v60 = vadd.f32 %v16096_v59, %v15113_v58  ;;  %v2540_v63 = vpop.f32.mrb[25].mxu1 }
0x1065   :  { %v2541_v2 = vadd.f32 %v15113_v58, %v2540_v63 }
0x1066   :  { %v2550_v5 = vmax.f32 %v2546_v60, 0.0 }
0x1067   :  { %v2549_v3 = vmax.f32 %v2541_v2, 0.0  ;;  %v15121_v2 = vld [vmem:[%s20376_s17 + $0x1] ss:$0 sm:$0xff]  ;;  %s20403_s17 = sld [smem:[#allocation60_spill]] }
0x1069   :  { %16113 = vmatprep.mubr.msk.f32.mxu0 %vm2557_vm15, %v2549_v3 }
0x106a   :  { %16114 = vmatmul.mubr.msk.f32.vlgmr.msra.gmra.mrb[16].mxu0 %vm2557_vm15, %v2550_v5 }
0x113d   :  { %v16115_v1 = vpop.f32.mrb[16].mxu0 }
0x113e   :  { %v2636_v6 = vadd.f32 %v16115_v1, %v15116_v14  ;;  %v2630_v0 = vpop.f32.mrb[17].mxu0 }
0x113f   :  { %v2631_v7 = vadd.f32 %v15116_v14, %v2630_v0 }
0x1140   :  { %v18889_v8 = vadd.f32 %v2636_v6, %v18855_v61 }
0x1141   :  { %v18892_v9 = vadd.f32 %v2631_v7, %v18858_v62  ;;  %v15122_v7 = vld [vmem:[%s20377_s1 + $0x1] ss:$0 sm:$0xff] }
0x1142   :  { %v2648_v10 = vsel %vm369_vm0, %v18889_v8, 0.0 }
0x1143   :  { %2649 = vadd.xlane.f32.xlu1 %v2648_v10  ;;  %v2645_v15 = vsel %vm369_vm0, %v18892_v9, 0.0 }
0x1144   :  { %2646 = vadd.xlane.f32.xlu0 %v2645_v15 }
0x11d0   :  { %v2650_v16 = vpop.xlane.xlu1 %2649 }
0x11d1   :  { %v2652_v57 = vmul.f32 0.03125, %v2650_v16  ;;  %v2647_v17 = vpop.xlane.xlu0 %2646 }
0x11d2   :  { %v2651_v61 = vmul.f32 0.03125, %v2647_v17 }
0x11d3   :  { %v18899_v62 = vsub.f32 %v18889_v8, %v2652_v57 }
0x11d4   :  { %v18902_v18 = vsub.f32 %v18892_v9, %v2651_v61 }
0x11d5   :  { %v2656_v19 = vmul.f32 %v18899_v62, %v18899_v62  ;;  %v2690_v3 = vmul.f32 %v15121_v2, %v18899_v62 }
0x11d6   :  { %v2655_v21 = vmul.f32 %v18902_v18, %v18902_v18  ;;  %v2689_v14 = vmul.f32 %v15121_v2, %v18902_v18 }
0x11d7   :  { %v2660_v23 = vsel %vm369_vm0, %v2656_v19, 0.0 }
0x11d8   :  { %2661 = vadd.xlane.f32.xlu1 %v2660_v23  ;;  %v2657_v24 = vsel %vm369_vm0, %v2655_v21, 0.0 }
0x11d9   :  { %2658 = vadd.xlane.f32.xlu0 %v2657_v24 }
0x11e9   :  { %17422 = vrot.lane.b32.xlu1 %v17421_v28, %s18294_s13 }
0x11ed   :  { %2818 = vrot.lane.b32.xlu1 %v18916_v31, %s18294_s13 }
0x11ef   :  { %17417 = vrot.lane.b32.xlu0 %v17416_v32, %s18294_s13 }
0x11f1   :  { %17427 = vrot.lane.b32.xlu1 %v17416_v32, %s18295_s5 }
0x11f3   :  { %17432 = vrot.lane.b32.xlu0 %v17421_v28, %s18295_s5 }
0x1265   :  { %v2662_v35 = vpop.xlane.xlu1 %2661 }
0x1266   :  { %v2664_v36 = vmul.f32 0.032258064, %v2662_v35  ;;  %v2659_v37 = vpop.xlane.xlu0 %2658 }
0x1267   :  { %v2663_v38 = vmul.f32 0.032258064, %v2659_v37 }
0x1268   :  { %17614 = vrsqrt.f32 %v2664_v36  ;;  %vm2674_vm1 = vcmp.eq.f32.partialorder %v2664_v36, inf  ;;  %v2677_v51 = vand.u32 2147483648, %v2664_v36  ;;  %vm2676_vm2 = vcmp.eq.f32.partialorder %v2664_v36, 0.0 }
0x1269   :  { %17616 = vrsqrt.f32 %v2663_v38  ;;  %v17423_v39 = vpop.permute.xlu1 %17422  ;;  %vm2667_vm3 = vcmp.eq.f32.partialorder %v2663_v38, inf  ;;  %v2670_v55 = vand.u32 2147483648, %v2663_v38  ;;  %vm2669_vm4 = vcmp.eq.f32.partialorder %v2663_v38, 0.0 }
0x126a   :  { %v17418_v40 = vpop.permute.xlu0 %17417  ;;  %v17425_v6 = vunpack.i.h.bf16 %v17423_v39  ;;  %v17424_v0 = vunpack.i.l.bf16 %v17423_v39 }
0x126b   :  { %v17420_v11 = vunpack.i.h.bf16 %v17418_v40  ;;  %v17419_v41 = vunpack.i.l.bf16 %v17418_v40 }
0x126c   :  { %v17040_v17 = vpack.c.bf16 %v17425_v6, %v17424_v0 }
0x126d   :  { %v18923_v13 = vpop.permute.xlu1 %2818  ;;  %v17036_v42 = vpack.c.bf16 %v17420_v11, %v17419_v41 }
0x126e   :  { %v17433_v20 = vpop.permute.xlu0 %17432 }
0x126f   :  { %17037 = vmatprep.subr.bf16.mxu1 %v17036_v42  ;;  %v17435_v12 = vunpack.i.h.bf16 %v17433_v20  ;;  %v17434_v45 = vunpack.i.l.bf16 %v17433_v20 }
0x1271   :  { %v17428_v46 = vpop.permute.xlu1 %17427  ;;  %v17048_v53 = vpack.c.bf16 %v17435_v12, %v17434_v45 }
0x1272   :  { %v17615_v47 = vpop.eup %17614  ;;  %v17430_v44 = vunpack.i.h.bf16 %v17428_v46  ;;  %v17429_v48 = vunpack.i.l.bf16 %v17428_v46 }
0x1273   :  { %v17617_v49 = vpop.eup %17616  ;;  %v2673_v50 = vmul.f32 %v17615_v47, %v2664_v36 }
0x1274   :  { %v2666_v52 = vmul.f32 %v17617_v49, %v2663_v38  ;;  %v17044_v43 = vpack.c.bf16 %v17430_v44, %v17429_v48 }
0x1275   :  { %v2675_v54 = vsel %vm2674_vm1, %v2664_v36, %v2673_v50 }
0x1276   :  { %v2678_v56 = vsel %vm2676_vm2, %v2677_v51, %v2675_v54  ;;  %v2668_v58 = vsel %vm2667_vm3, %v2663_v38, %v2666_v52  ;;  %17045 = vmatprep.subr.bf16.mxu0 %v17044_v43 }
0x1277   :  { %v2680_v59 = vadd.f32 1e-06, %v2678_v56  ;;  %17047 = vmatpush3.bf16.msra.mxu0 %v17044_v43  ;;  %v2671_v60 = vsel %vm2669_vm4, %v2670_v55, %v2668_v58 }
0x1278   :  { %17049 = vmatprep.subr.bf16.mxu0 %v17048_v53  ;;  %v2679_v63 = vadd.f32 1e-06, %v2671_v60 }
0x1279   :  { %17618 = vrcp.f32 %v2680_v59 }
0x127a   :  { %17620 = vrcp.f32 %v2679_v63 }
0x127b   :  { %17051 = vmatpush3.bf16.msra.mxu0 %v17048_v53 }
0x127c   :  { %16159 = vmatprep.subr.mxu0 %v18296_v4 }
0x1283   :  { %v17619_v5 = vpop.eup %17618 }
0x1284   :  { %v17621_v1 = vpop.eup %17620  ;;  %v2692_v10 = vmul.f32 %v17619_v5, %v2690_v3 }
0x1285   :  { %v2691_v15 = vmul.f32 %v17621_v1, %v2689_v14 }
0x1286   :  { %v2700_v57 = vadd.f32 %v15122_v7, %v2692_v10 }
0x1287   :  { %v2699_v16 = vadd.f32 %v15122_v7, %v2691_v15 }
0x1289   :  { %16124 = vmatprep.mubr.msk.f32.mxu1 %vm369_vm0, %v2699_v16  ;;  %16146 = vmatprep.mubr.msk.f32.mxu0 %vm369_vm0, %v2699_v16 }
0x128a   :  { %16125 = vmatmul.mubr.msk.f32.vlgmr.msra.gmra.mrb[26].mxu1 %vm369_vm0, %v2700_v57  ;;  %16147 = vmatmul.mubr.msk.f32.vlgmr.msra.gmra.mrb[18].mxu0 %vm369_vm0, %v2700_v57 }
0x128b   :  { %17039 = vmatpush3.bf16.msra.mxu1 %v17036_v42  ;;  %16135 = vmatprep.mubr.msk.f32.mxu1 %vm369_vm0, %v2699_v16 }
0x128c   :  { %17041 = vmatprep.subr.bf16.mxu1 %v17040_v17  ;;  %16161 = vmatprep.mubr.msk.f32.mxu0 %vm18297_vm5, %v18296_v4 }
0x128f   :  { %17043 = vmatpush3.bf16.msra.mxu1 %v17040_v17 }
0x1290   :  { %16149 = vmatprep.subr.mxu1 %v18296_v4 }
0x1292   :  { %16136 = vmatmul.mubr.msk.f32.vlgmr.msra.gmra.mrb[28].mxu1 %vm369_vm0, %v2700_v57 }
0x1293   :  { %16151 = vmatprep.mubr.msk.f32.mxu1 %vm18297_vm5, %v18296_v4 }
0x135d   :  { %v16126_v61 = vpop.f32.mrb[26].mxu1  ;;  %v16148_v62 = vpop.f32.mrb[18].mxu0 }
0x135e   :  { %v2793_v18 = vpop.f32.mrb[27].mxu1  ;;  %v2977_v19 = vpop.f32.mrb[19].mxu0  ;;  %v18960_v28 = vadd.f32 %v16126_v61, %v18916_v31 }
0x135f   :  { %v18947_v25 = vadd.f32 %v18916_v31, %v2793_v18 }
0x1365   :  { %v16137_v21 = vpop.f32.mrb[28].mxu1 }
0x1366   :  { %v2887_v23 = vpop.f32.mrb[29].mxu1  ;;  %v18951_v27 = vadd.f32 %v16137_v21, %v18923_v13 }
0x1367   :  { %v18942_v24 = vadd.f32 %v2887_v23, %v18923_v13 }
0x1369   :  { %16150 = vmatpush3.xpose.msk.msra.mxu1 %vm723_vm6, %v18942_v24 }
0x136a   :  { %16154 = vmatprep.subr.mxu1 %v18296_v4 }
0x136c   :  { %16152 = vmatmul.mubr.msk.f32.vlgmr.msra.gmra.mrb[30].mxu1 %vm723_vm6, %v18947_v25 }
0x136d   :  { %16155 = vmatpush3.xpose.msk.msra.mxu1 %vm723_vm6, %v18951_v27  ;;  %16156 = vmatprep.mubr.msk.f32.mxu1 %vm18297_vm5, %v18296_v4 }
0x136e   :  { %16164 = vmatprep.subr.mxu1 %v18296_v4 }
0x1370   :  { %16157 = vmatmul.mubr.msk.f32.vlgmr.msra.gmra.mrb[32].mxu1 %vm723_vm6, %v18960_v28 }
0x1371   :  { %16166 = vmatprep.mubr.msk.f32.mxu1 %vm18297_vm5, %v18296_v4 }
0x143f   :  { %v3058_v29 = vpop.f32.mrb[30].mxu1 }
0x1440   :  { %v16153_v30 = vpop.f32.mrb[31].mxu1  ;;  %v3138_v41 = vmul.f32 0.35355338, %v3058_v29 }
0x1442   :  { %v3140_v13 = vsel %vm721_vm10, %v3138_v41, -1e+09 }
0x1443   :  { %v3134_v32 = vpop.f32.mrb[32].mxu1  ;;  %v3142_v42 = vsel %vm723_vm6, %v3140_v13, -inf }
0x1444   :  { %v3139_v33 = vmul.f32 0.35355338, %v3134_v32  ;;  %v16158_v34 = vpop.f32.mrb[33].mxu1 }
0x1446   :  { %v3141_v35 = vsel %vm722_vm9, %v3139_v33, -1e+09 }
0x1447   :  { %v3145_v36 = vsel %vm723_vm6, %v3141_v35, -inf }
0x1448   :  { %3146 = vmax.xlane.f32.xlu1 %v3145_v36 }
0x1459   :  { %3390 = vrot.lane.b32.xlu1 %v18951_v27, %s18299_s3 }
0x145d   :  { %3388 = vrot.lane.b32.xlu1 %v18960_v28, %s18299_s3 }
0x14d5   :  { %v3147_v37 = vpop.xlane.xlu1 %3146 }
0x14d6   :  { %v3149_v38 = vsub.f32 %v3141_v35, %v3147_v37 }
0x14d8   :  { %v3152_v39 = vmul.f32 1.442695, %v3149_v38 }
0x14d9   :  { %v3391_v47 = vpop.permute.xlu1 %3390 }
0x14da   :  { %17622 = vpow2.f32 %v3152_v39 }
0x14dd   :  { %v3389_v48 = vpop.permute.xlu1 %3388 }
0x14e4   :  { %v17623_v40 = vpop.eup %17622 }
0x14e5   :  { %v3157_v11 = vsel %vm723_vm6, %v17623_v40, 0.0 }
0x14e6   :  { %3158 = vadd.xlane.f32.xlu0 %v3157_v11 }
0x14fc   :  { %2908 = vrot.lane.b32.xlu0 %v18916_v31, %s18295_s5 }
0x151b   :  { %3143 = vmax.xlane.f32.xlu0 %v3142_v42 }
0x1531   :  { %3312 = vrot.lane.b32.xlu0 %v18942_v24, %s18299_s3 }
0x1573   :  { %v3159_v20 = vpop.xlane.xlu0 %3158 }
0x1574   :  { %17624 = vrcp.f32 %v3159_v20 }
0x1577   :  { %v2909_v12 = vpop.permute.xlu0 %2908 }
0x1578   :  { %v18982_v45 = vadd.f32 %v2977_v19, %v2909_v12  ;;  %v18984_v46 = vadd.f32 %v16148_v62, %v2909_v12 }
0x157a   :  { %16160 = vmatpush3.msra.mxu0 %v18982_v45  ;;  %16165 = vmatpush3.msra.mxu1 %v18984_v46 }
0x157b   :  { %16174 = vmatprep.subr.mxu1 %v18296_v4  ;;  %16169 = vmatprep.subr.mxu0 %v18296_v4 }
0x157e   :  { %v17625_v31 = vpop.eup %17624 }
0x157f   :  { %v3163_v44 = vmul.f32 %v17625_v31, %v17623_v40 }
0x1581   :  { %16167 = vmatmul.mubr.msk.f32.vlgmr.msra.gmra.mrb[34].mxu1 %vm723_vm6, %v3163_v44 }
0x1582   :  { %16175 = vmatpush3.xpose.msk.msra.mxu1 %vm723_vm6, %v3391_v47  ;;  %16176 = vmatprep.mubr.msk.f32.mxu1 %vm18297_vm5, %v18296_v4 }
0x1583   :  { %16184 = vmatprep.subr.mxu1 %v18296_v4 }
0x1585   :  { %16177 = vmatmul.mubr.msk.f32.vlgmr.msra.gmra.mrb[36].mxu1 %vm723_vm6, %v3389_v48 }
0x1586   :  { %16186 = vmatprep.mubr.msk.f32.mxu1 %vm18297_vm5, %v18296_v4 }
0x15a8   :  { %v3144_v49 = vpop.xlane.xlu0 %3143 }
0x15a9   :  { %v3148_v50 = vsub.f32 %v3140_v13, %v3144_v49 }
0x15ab   :  { %v3150_v51 = vmul.f32 1.442695, %v3148_v50 }
0x15ac   :  { %v3313_v56 = vpop.permute.xlu0 %3312 }
0x15ad   :  { %17626 = vpow2.f32 %v3150_v51 }
0x15b7   :  { %v17627_v52 = vpop.eup %17626 }
0x15b8   :  { %v3154_v43 = vsel %vm723_vm6, %v17627_v52, 0.0 }
0x15b9   :  { %3155 = vadd.xlane.f32.xlu1 %v3154_v43  ;;  %v15128_v43 = vld [vmem:[%s20379_s20 + $0x20] sm:$0xff] }
0x15ca   :  { %3310 = vrot.lane.b32.xlu1 %v18947_v25, %s18299_s3 }
0x15ce   :  { %3810 = vrot.lane.b32.xlu1 %v18942_v24, %s18300_s12 }
0x1646   :  { %v3156_v53 = vpop.xlane.xlu1 %3155 }
0x1647   :  { %17628 = vrcp.f32 %v3156_v53 }
0x164a   :  { %v3311_v60 = vpop.permute.xlu1 %3310 }
0x164e   :  { %v3811_v21 = vpop.permute.xlu1 %3810 }
0x1651   :  { %v17629_v54 = vpop.eup %17628 }
0x1652   :  { %v3162_v55 = vmul.f32 %v17629_v54, %v17627_v52  ;;  %v15129_v52 = vld [vmem:[%s20379_s20 + $0x28] sm:$0xff] }
0x1654   :  { %16162 = vmatmul.mubr.msk.f32.vlgmr.msra.gmra.mrb[20].mxu0 %vm723_vm6, %v3162_v55  ;;  %v19004_v58 = vpop.f32.mrb[34].mxu1 }
0x1655   :  { %16170 = vmatpush3.xpose.msk.msra.mxu0 %vm723_vm6, %v3313_v56  ;;  %v16168_v59 = vpop.f32.mrb[35].mxu1  ;;  %16171 = vmatprep.mubr.msk.f32.mxu0 %vm18297_vm5, %v18296_v4 }
0x1656   :  { %16179 = vmatprep.subr.mxu0 %v18296_v4 }
0x1658   :  { %16172 = vmatmul.mubr.msk.f32.vlgmr.msra.gmra.mrb[22].mxu0 %vm723_vm6, %v3311_v60  ;;  %v3462_v63 = vpop.f32.mrb[36].mxu1 }
0x1659   :  { %v3467_v2 = vmul.f32 0.35355338, %v3462_v63  ;;  %v16178_v3 = vpop.f32.mrb[37].mxu1  ;;  %16181 = vmatprep.mubr.msk.f32.mxu0 %vm18297_vm5, %v18296_v4 }
0x165b   :  { %v3469_v5 = vsel %vm722_vm9, %v3467_v2, -1e+09 }
0x165c   :  { %v3473_v14 = vsel %vm723_vm6, %v3469_v5, -inf }
0x165d   :  { %3474 = vmax.xlane.f32.xlu0 %v3473_v14 }
0x1673   :  { %3570 = vrot.lane.b32.xlu0 %v18984_v46, %s18299_s3 }
0x1677   :  { %3808 = vrot.lane.b32.xlu0 %v18947_v25, %s18300_s12 }
0x167b   :  { %3886 = vrot.lane.b32.xlu0 %v18960_v28, %s18300_s12 }
0x16ea   :  { %v3475_v1 = vpop.xlane.xlu0 %3474 }
0x16eb   :  { %v3477_v6 = vsub.f32 %v3469_v5, %v3475_v1 }
0x16ed   :  { %v3480_v0 = vmul.f32 1.442695, %v3477_v6 }
0x16ee   :  { %v3571_v7 = vpop.permute.xlu0 %3570 }
0x16ef   :  { %17630 = vpow2.f32 %v3480_v0  ;;  %16185 = vmatpush3.msra.mxu1 %v3571_v7  ;;  %v15130_v0 = vld [vmem:[%s20379_s20 + $0x30] sm:$0xff] }
0x16f0   :  { %16199 = vmatprep.subr.mxu1 %v18296_v4 }
0x16f2   :  { %v3809_v32 = vpop.permute.xlu0 %3808 }
0x16f6   :  { %v3887_v34 = vpop.permute.xlu0 %3886 }
0x16f9   :  { %v17631_v10 = vpop.eup %17630 }
0x16fa   :  { %v3485_v15 = vsel %vm723_vm6, %v17631_v10, 0.0 }
0x16fb   :  { %3486 = vadd.xlane.f32.xlu1 %v3485_v15 }
0x170c   :  { %3888 = vrot.lane.b32.xlu1 %v18951_v27, %s18300_s12 }
0x1727   :  { %v19026_v16 = vpop.f32.mrb[20].mxu0 }
0x1728   :  { %v16163_v57 = vpop.f32.mrb[21].mxu0 }
0x172b   :  { %v3384_v17 = vpop.f32.mrb[22].mxu0 }
0x172c   :  { %v3466_v61 = vmul.f32 0.35355338, %v3384_v17  ;;  %v16173_v62 = vpop.f32.mrb[23].mxu0 }
0x172e   :  { %v3468_v18 = vsel %vm721_vm10, %v3466_v61, -1e+09 }
0x172f   :  { %v3470_v19 = vsel %vm723_vm6, %v3468_v18, -inf }
0x1730   :  { %3471 = vmax.xlane.f32.xlu1 %v3470_v19 }
0x1788   :  { %v3487_v23 = vpop.xlane.xlu1 %3486 }
0x1789   :  { %17632 = vrcp.f32 %v3487_v23 }
0x178c   :  { %v3889_v33 = vpop.permute.xlu1 %3888 }
0x1793   :  { %v17633_v29 = vpop.eup %17632 }
0x1794   :  { %v3491_v30 = vmul.f32 %v17633_v29, %v17631_v10 }
0x1796   :  { %16187 = vmatmul.mubr.msk.f32.vlgmr.msra.gmra.mrb[38].mxu1 %vm723_vm6, %v3491_v30 }
0x1797   :  { %16200 = vmatpush3.xpose.msk.msra.mxu1 %vm723_vm6, %v3811_v21  ;;  %16201 = vmatprep.mubr.msk.f32.mxu1 %vm18297_vm5, %v18296_v4 }
0x1798   :  { %16204 = vmatprep.subr.mxu1 %v18296_v4 }
0x179a   :  { %16202 = vmatmul.mubr.msk.f32.vlgmr.msra.gmra.mrb[40].mxu1 %vm723_vm6, %v3809_v32 }
0x179b   :  { %16205 = vmatpush3.xpose.msk.msra.mxu1 %vm723_vm6, %v3889_v33  ;;  %16206 = vmatprep.mubr.msk.f32.mxu1 %vm18297_vm5, %v18296_v4 }
0x179c   :  { %16214 = vmatprep.subr.mxu1 %v18296_v4 }
0x179e   :  { %16207 = vmatmul.mubr.msk.f32.vlgmr.msra.gmra.mrb[42].mxu1 %vm723_vm6, %v3887_v34 }
0x179f   :  { %16216 = vmatprep.mubr.msk.f32.mxu1 %vm18297_vm5, %v18296_v4 }
0x17bd   :  { %v3472_v35 = vpop.xlane.xlu1 %3471 }
0x17be   :  { %v3476_v36 = vsub.f32 %v3468_v18, %v3472_v35 }
0x17c0   :  { %v3478_v37 = vmul.f32 1.442695, %v3476_v36 }
0x17c2   :  { %17634 = vpow2.f32 %v3478_v37 }
0x17cc   :  { %v17635_v38 = vpop.eup %17634 }
0x17cd   :  { %v3482_v39 = vsel %vm723_vm6, %v17635_v38, 0.0 }
0x17ce   :  { %3483 = vadd.xlane.f32.xlu0 %v3482_v39 }
0x17e4   :  { %3493 = vrot.lane.b32.xlu0 %v18982_v45, %s18299_s3 }
0x17e8   :  { %4066 = vrot.lane.b32.xlu0 %v18984_v46, %s18300_s12 }
0x17ec   :  { %4227 = vrot.lane.b32.xlu0 %v18942_v24, %s18301_s2 }
0x17f0   :  { %4305 = vrot.lane.b32.xlu0 %v18951_v27, %s18301_s2 }
0x17f4   :  { %4225 = vrot.lane.b32.xlu0 %v18947_v25, %s18301_s2 }
0x185b   :  { %v3484_v40 = vpop.xlane.xlu0 %3483 }
0x185c   :  { %17636 = vrcp.f32 %v3484_v40 }
0x185f   :  { %v3494_v11 = vpop.permute.xlu0 %3493 }
0x1860   :  { %16180 = vmatpush3.msra.mxu0 %v3494_v11 }
0x1861   :  { %16189 = vmatprep.subr.mxu0 %v15129_v52 }
0x1863   :  { %v4067_v41 = vpop.permute.xlu0 %4066 }
0x1864   :  { %16215 = vmatpush3.msra.mxu1 %v4067_v41 }
0x1865   :  { %16224 = vmatprep.subr.mxu1 %v18296_v4 }
0x1866   :  { %v17637_v13 = vpop.eup %17636 }
0x1867   :  { %v3490_v42 = vmul.f32 %v17637_v13, %v17635_v38  ;;  %v4228_v10 = vpop.permute.xlu0 %4227 }
0x1869   :  { %16182 = vmatmul.mubr.msk.f32.vlgmr.msra.gmra.mrb[24].mxu0 %vm723_vm6, %v3490_v42  ;;  %v3642_v24 = vpop.f32.mrb[38].mxu1 }
0x186a   :  { %v16188_v20 = vpop.f32.mrb[39].mxu1  ;;  %16190 = vmatpush3.msra.mxu0 %v15129_v52  ;;  %v15131_v52 = vld [vmem:[%s20379_s20 + $0x38] sm:$0xff] }
0x186b   :  { %16194 = vmatprep.subr.mxu0 %v15128_v43  ;;  %v4306_v17 = vpop.permute.xlu0 %4305 }
0x186d   :  { %v3882_v27 = vpop.f32.mrb[40].mxu1 }
0x186e   :  { %v3964_v12 = vmul.f32 0.35355338, %v3882_v27  ;;  %v16203_v31 = vpop.f32.mrb[41].mxu1 }
0x186f   :  { %v4226_v61 = vpop.permute.xlu0 %4225 }
0x1870   :  { %v3966_v25 = vsel %vm721_vm10, %v3964_v12, -1e+09 }
0x1871   :  { %v3960_v47 = vpop.f32.mrb[42].mxu1  ;;  %v3968_v44 = vsel %vm723_vm6, %v3966_v25, -inf }
0x1872   :  { %v3965_v48 = vmul.f32 0.35355338, %v3960_v47  ;;  %3969 = vmax.xlane.f32.xlu1 %v3968_v44  ;;  %v16208_v49 = vpop.f32.mrb[43].mxu1 }
0x1874   :  { %v3967_v50 = vsel %vm722_vm9, %v3965_v48, -1e+09 }
0x1875   :  { %v3971_v51 = vsel %vm723_vm6, %v3967_v50, -inf }
0x1876   :  { %3972 = vmax.xlane.f32.xlu1 %v3971_v51 }
0x18ff   :  { %v3970_v53 = vpop.xlane.xlu1 %3969 }
0x1900   :  { %v3974_v54 = vsub.f32 %v3966_v25, %v3970_v53 }
0x1902   :  { %v3976_v55 = vmul.f32 1.442695, %v3974_v54 }
0x1903   :  { %v3973_v56 = vpop.xlane.xlu1 %3972 }
0x1904   :  { %17638 = vpow2.f32 %v3976_v55  ;;  %v3975_v59 = vsub.f32 %v3967_v50, %v3973_v56  ;;  %v15172_v55 = vld [vmem:[%s20380_s7 + $0x1] ss:$0 sm:$0xff] }
0x1906   :  { %v3978_v60 = vmul.f32 1.442695, %v3975_v59 }
0x1908   :  { %17640 = vpow2.f32 %v3978_v60 }
0x190e   :  { %v17639_v63 = vpop.eup %17638 }
0x190f   :  { %v3980_v2 = vsel %vm723_vm6, %v17639_v63, 0.0 }
0x1910   :  { %3981 = vadd.xlane.f32.xlu1 %v3980_v2 }
0x1912   :  { %v17641_v3 = vpop.eup %17640 }
0x1913   :  { %v3983_v5 = vsel %vm723_vm6, %v17641_v3, 0.0 }
0x1914   :  { %3984 = vadd.xlane.f32.xlu1 %v3983_v5 }
0x1925   :  { %3990 = vrot.lane.b32.xlu1 %v18982_v45, %s18300_s12 }
0x1929   :  { %4303 = vrot.lane.b32.xlu1 %v18960_v28, %s18301_s2 }
0x193c   :  { %v3565_v14 = vpop.f32.mrb[24].mxu0 }
0x193d   :  { %v16183_v1 = vpop.f32.mrb[25].mxu0  ;;  %16191 = vmatprep.mubr.msk.f32.mxu0 %vm723_vm6, %v3565_v14 }
0x193e   :  { %16192 = vmatmul.mubr.msk.f32.vlgmr.msra.gmra.mrb[26].mxu0 %vm723_vm6, %v3642_v24 }
0x193f   :  { %16196 = vmatprep.mubr.msk.f32.mxu0 %vm723_vm6, %v19026_v16  ;;  %16195 = vmatpush3.msra.mxu0 %v15128_v43 }
0x1940   :  { %16209 = vmatprep.subr.mxu0 %v18296_v4 }
0x1946   :  { %16197 = vmatmul.mubr.msk.f32.vlgmr.msra.gmra.mrb[26].mxu0 %vm723_vm6, %v19004_v58 }
0x1947   :  { %16211 = vmatprep.mubr.msk.f32.mxu0 %vm18297_vm5, %v18296_v4 }
0x199d   :  { %v3982_v6 = vpop.xlane.xlu1 %3981 }
0x199e   :  { %17642 = vrcp.f32 %v3982_v6 }
0x19a1   :  { %v3985_v28 = vpop.xlane.xlu1 %3984 }
0x19a2   :  { %17644 = vrcp.f32 %v3985_v28 }
0x19a5   :  { %v3991_v7 = vpop.permute.xlu1 %3990 }
0x19a6   :  { %16210 = vmatpush3.msra.mxu0 %v3991_v7 }
0x19a7   :  { %16219 = vmatprep.subr.mxu0 %v15130_v0 }
0x19a8   :  { %v17643_v15 = vpop.eup %17642 }
0x19a9   :  { %v3988_v16 = vmul.f32 %v17643_v15, %v17639_v63  ;;  %v4304_v23 = vpop.permute.xlu1 %4303 }
0x19ab   :  { %16212 = vmatmul.mubr.msk.f32.vlgmr.msra.gmra.mrb[28].mxu0 %vm723_vm6, %v3988_v16 }
0x19ac   :  { %v17645_v57 = vpop.eup %17644  ;;  %16220 = vmatpush3.msra.mxu0 %v15130_v0 }
0x19ad   :  { %v3989_v58 = vmul.f32 %v17645_v57, %v17641_v3  ;;  %16229 = vmatprep.subr.mxu0 %v18296_v4  ;;  %v19141_v57 = vld [vmem:[%s20387_s14 + $0x10] sm:$0xff] }
0x19af   :  { %16217 = vmatmul.mubr.msk.f32.vlgmr.msra.gmra.mrb[44].mxu1 %vm723_vm6, %v3989_v58 }
0x19b0   :  { %16225 = vmatpush3.xpose.msk.msra.mxu1 %vm723_vm6, %v4228_v10  ;;  %16226 = vmatprep.mubr.msk.f32.mxu1 %vm18297_vm5, %v18296_v4 }
0x19b1   :  { %16234 = vmatprep.subr.mxu1 %v18296_v4 }
0x19b3   :  { %16227 = vmatmul.mubr.msk.f32.vlgmr.msra.gmra.mrb[46].mxu1 %vm723_vm6, %v4226_v61  ;;  %v4970_v61 = vld [vmem:[%s20387_s14] sm:$0xff] }
0x19b4   :  { %16236 = vmatprep.mubr.msk.f32.mxu1 %vm18297_vm5, %v18296_v4 }
0x1a7e   :  { %v4062_v62 = vpop.f32.mrb[28].mxu0 }
0x1a7f   :  { %v16213_v18 = vpop.f32.mrb[29].mxu0  ;;  %16221 = vmatprep.mubr.msk.f32.mxu0 %vm723_vm6, %v4062_v62  ;;  %v4971_v62 = vld [vmem:[%s20387_s14 + $0x8] sm:$0xff] }
0x1a80   :  { %v19154_v18 = vpack.i.bf16 %v4971_v62, %v4970_v61 }
0x1a82   :  { %v4138_v19 = vpop.f32.mrb[44].mxu1 }
0x1a83   :  { %v16218_v21 = vpop.f32.mrb[45].mxu1  ;;  %16222 = vmatmul.mubr.msk.f32.vlgmr.msra.gmra.mrb[26].mxu0 %vm723_vm6, %v4138_v19  ;;  %v15177_v19 = vld [vmem:[%s20381_s10 + $0x20] sm:$0xff] }
0x1a84   :  { %16230 = vmatpush3.xpose.msk.msra.mxu0 %vm723_vm6, %v4306_v17  ;;  %16231 = vmatprep.mubr.msk.f32.mxu0 %vm18297_vm5, %v18296_v4  ;;  %v19144_v17 = vld [vmem:[%s20387_s14 + $0x18] sm:$0xff]  ;;  %v15178_v21 = vld [vmem:[%s20381_s10 + $0x28] sm:$0xff] }
0x1a85   :  { %16239 = vmatprep.subr.mxu0 %v18296_v4  ;;  %v19148_v58 = vpack.i.bf16 %v19144_v17, %v19141_v57 }
0x1a86   :  { %v4299_v29 = vpop.f32.mrb[46].mxu1 }
0x1a87   :  { %v4381_v30 = vmul.f32 0.35355338, %v4299_v29  ;;  %v16228_v32 = vpop.f32.mrb[47].mxu1  ;;  %16232 = vmatmul.mubr.msk.f32.vlgmr.msra.gmra.mrb[30].mxu0 %vm723_vm6, %v4304_v23  ;;  %v15179_v23 = vld [vmem:[%s20381_s10 + $0x30] sm:$0xff]  ;;  %v17052_v29 = vpack.c.bf16 %v15178_v21, %v15177_v19  ;;  %v15189_v19 = vld [vmem:[%s20382_s11 + $0x78] sm:$0xff] }
0x1a88   :  { %16241 = vmatprep.mubr.msk.f32.mxu0 %vm18297_vm5, %v18296_v4 }
0x1a89   :  { %v4383_v33 = vsel %vm721_vm10, %v4381_v30, -1e+09  ;;  %v15180_v30 = vld [vmem:[%s20381_s10 + $0x38] sm:$0xff] }
0x1a8a   :  { %v4385_v34 = vsel %vm723_vm6, %v4383_v33, -inf  ;;  %v17056_v32 = vpack.c.bf16 %v15180_v30, %v15179_v23  ;;  %v15191_v23 = vld [vmem:[%s20385_s27 + $0x1] ss:$0 sm:$0xff] }
0x1a8b   :  { %4386 = vmax.xlane.f32.xlu0 %v4385_v34  ;;  %v19162_v34 = vld [vmem:[#allocation2] ss:$0 sm:$0xff] }
0x1b18   :  { %v4387_v35 = vpop.xlane.xlu0 %4386 }
0x1b19   :  { %v4391_v36 = vsub.f32 %v4383_v33, %v4387_v35  ;;  %v17076_v33 = vpack.c.bf16 %v4971_v62, %v4970_v61  ;;  %v15182_v35 = vld [vmem:[%s20382_s11 + $0x40] sm:$0xff]  ;;  %v19193_v61 = vld [vmem:[%s20389_s6 + $0x8] sm:$0xff]  ;;  %v15188_v62 = vld [vmem:[%s20382_s11 + $0x70] sm:$0xff] }
0x1b1a   :  { %v17072_v21 = vpack.c.bf16 %v15189_v19, %v15188_v62 }
0x1b1b   :  { %v4393_v37 = vmul.f32 1.442695, %v4391_v36  ;;  %v15183_v36 = vld [vmem:[%s20382_s11 + $0x48] sm:$0xff] }
0x1b1d   :  { %17646 = vpow2.f32 %v4393_v37  ;;  %v17060_v37 = vpack.c.bf16 %v15183_v36, %v15182_v35 }
0x1b27   :  { %v17647_v38 = vpop.eup %17646 }
0x1b28   :  { %v4397_v39 = vsel %vm723_vm6, %v17647_v38, 0.0 }
0x1b29   :  { %4398 = vadd.xlane.f32.xlu0 %v4397_v39  ;;  %v15185_v39 = vld [vmem:[%s20382_s11 + $0x58] sm:$0xff] }
0x1b5a   :  { %v4377_v40 = vpop.f32.mrb[30].mxu0 }
0x1b5b   :  { %v4382_v11 = vmul.f32 0.35355338, %v4377_v40  ;;  %v16233_v41 = vpop.f32.mrb[31].mxu0 }
0x1b5c   :  { %v15187_v41 = vld [vmem:[%s20382_s11 + $0x68] sm:$0xff] }
0x1b5d   :  { %v4384_v13 = vsel %vm722_vm9, %v4382_v11, -1e+09  ;;  %v15186_v11 = vld [vmem:[%s20382_s11 + $0x60] sm:$0xff] }
0x1b5e   :  { %v4388_v42 = vsel %vm723_vm6, %v4384_v13, -inf }
0x1b5f   :  { %4389 = vmax.xlane.f32.xlu1 %v4388_v42 }
0x1b70   :  { %4483 = vrot.lane.b32.xlu1 %v18984_v46, %s18301_s2 }
0x1bb6   :  { %v4399_v47 = vpop.xlane.xlu0 %4398 }
0x1bec   :  { %v4390_v24 = vpop.xlane.xlu1 %4389 }
0x1bed   :  { %v4392_v20 = vsub.f32 %v4384_v13, %v4390_v24  ;;  %v17068_v13 = vpack.c.bf16 %v15187_v41, %v15186_v11 }
0x1bef   :  { %v4395_v27 = vmul.f32 1.442695, %v4392_v20 }
0x1bf0   :  { %v4484_v12 = vpop.permute.xlu1 %4483 }
0x1bf1   :  { %17648 = vpow2.f32 %v4395_v27  ;;  %16240 = vmatpush3.msra.mxu0 %v4484_v12 }
0x1bf2   :  { %17650 = vrcp.f32 %v4399_v47  ;;  %16244 = vmatprep.subr.mxu0 %v15131_v52 }
0x1bfb   :  { %v17649_v31 = vpop.eup %17648 }
0x1bfc   :  { %v4400_v25 = vsel %vm723_vm6, %v17649_v31, 0.0  ;;  %v17651_v48 = vpop.eup %17650 }
0x1bfd   :  { %4401 = vadd.xlane.f32.xlu0 %v4400_v25  ;;  %v4405_v49 = vmul.f32 %v17651_v48, %v17647_v38  ;;  %v15184_v38 = vld [vmem:[%s20382_s11 + $0x50] sm:$0xff] }
0x1bfe   :  { %v17064_v40 = vpack.c.bf16 %v15185_v39, %v15184_v38 }
0x1c13   :  { %4407 = vrot.lane.b32.xlu0 %v18982_v45, %s18301_s2 }
0x1c8a   :  { %v4402_v44 = vpop.xlane.xlu0 %4401 }
0x1c8b   :  { %17652 = vrcp.f32 %v4402_v44 }
0x1c8e   :  { %v4408_v46 = vpop.permute.xlu0 %4407 }
0x1c8f   :  { %16235 = vmatpush3.msra.mxu1 %v4408_v46 }
0x1c90   :  { %16237 = vmatmul.mubr.msk.f32.vlgmr.msra.gmra.mrb[48].mxu1 %vm723_vm6, %v4405_v49  ;;  %17053 = vmatprep.subr.bf16.mxu1 %v17052_v29 }
0x1c91   :  { %17055 = vmatpush3.bf16.msra.mxu1 %v17052_v29 }
0x1c92   :  { %17057 = vmatprep.subr.bf16.mxu1 %v17056_v32 }
0x1c95   :  { %v17653_v50 = vpop.eup %17652  ;;  %17059 = vmatpush3.bf16.msra.mxu1 %v17056_v32 }
0x1c96   :  { %v4406_v51 = vmul.f32 %v17653_v50, %v17649_v31  ;;  %17077 = vmatprep.subr.bf16.mxu1 %v17076_v33 }
0x1c98   :  { %16242 = vmatmul.mubr.msk.f32.vlgmr.msra.gmra.mrb[32].mxu0 %vm723_vm6, %v4406_v51 }
0x1c99   :  { %16245 = vmatpush3.msra.mxu0 %v15131_v52 }
0x1c9a   :  { %17061 = vmatprep.subr.bf16.mxu0 %v17060_v37 }
0x1d63   :  { %v4479_v43 = vpop.f32.mrb[48].mxu1 }
0x1d64   :  { %v16238_v45 = vpop.f32.mrb[49].mxu1  ;;  %16246 = vmatprep.mubr.msk.f32.mxu0 %vm723_vm6, %v4479_v43 }
0x1d65   :  { %v15175_v45 = vld [vmem:[%s20383_s21 + $0x1] ss:$0 sm:$0xff] }
0x1d6b   :  { %v4555_v53 = vpop.f32.mrb[32].mxu0 }
0x1d6c   :  { %v16243_v54 = vpop.f32.mrb[33].mxu0  ;;  %16247 = vmatmul.mubr.msk.f32.vlgmr.msra.gmra.mrb[26].mxu0 %vm723_vm6, %v4555_v53 }
0x1d6d   :  { %17063 = vmatpush3.bf16.msra.mxu0 %v17060_v37 }
0x1d6e   :  { %17065 = vmatprep.subr.bf16.mxu0 %v17064_v40 }
0x1d71   :  { %17067 = vmatpush3.bf16.msra.mxu0 %v17064_v40 }
0x1d72   :  { %17069 = vmatprep.subr.bf16.mxu0 %v17068_v13 }
0x1d75   :  { %17071 = vmatpush3.bf16.msra.mxu0 %v17068_v13 }
0x1d76   :  { %17073 = vmatprep.subr.bf16.mxu0 %v17072_v21 }
0x1d79   :  { %17075 = vmatpush3.bf16.msra.mxu0 %v17072_v21 }
0x1e3f   :  { %v16248_v56 = vpop.f32.mrb[26].mxu0 }
0x1e40   :  { %v4649_v59 = vadd.f32 %v16248_v56, %v15172_v55  ;;  %v4631_v60 = vpop.f32.mrb[27].mxu0 }
0x1e41   :  { %v4648_v63 = vadd.f32 %v15172_v55, %v4631_v60 }
0x1e42   :  { %v19119_v2 = vadd.f32 %v4649_v59, %v18889_v8  ;;  %v15176_v59 = vld [vmem:[%s20384_s15 + $0x1] ss:$0 sm:$0xff] }
0x1e43   :  { %v19122_v3 = vadd.f32 %v4648_v63, %v18892_v9 }
0x1e44   :  { %v4659_v5 = vsel %vm369_vm0, %v19119_v2, 0.0 }
0x1e45   :  { %4660 = vadd.xlane.f32.xlu0 %v4659_v5  ;;  %v4656_v14 = vsel %vm369_vm0, %v19122_v3, 0.0 }
0x1e46   :  { %4657 = vadd.xlane.f32.xlu1 %v4656_v14 }
0x1ed2   :  { %v4661_v1 = vpop.xlane.xlu0 %4660 }
0x1ed3   :  { %v4663_v6 = vmul.f32 0.03125, %v4661_v1  ;;  %v4658_v28 = vpop.xlane.xlu1 %4657 }
0x1ed4   :  { %v4662_v8 = vmul.f32 0.03125, %v4658_v28 }
0x1ed5   :  { %v19129_v0 = vsub.f32 %v19119_v2, %v4663_v6 }
0x1ed6   :  { %v19132_v9 = vsub.f32 %v19122_v3, %v4662_v8  ;;  %v17080_v8 = vpack.c.bf16 %v19144_v17, %v19141_v57  ;;  %v4968_v17 = vld [vmem:[%s20389_s6] sm:$0xff] }
0x1ed7   :  { %v4667_v7 = vmul.f32 %v19129_v0, %v19129_v0  ;;  %v4701_v53 = vmul.f32 %v15175_v45, %v19129_v0 }
0x1ed8   :  { %v4666_v10 = vmul.f32 %v19132_v9, %v19132_v9  ;;  %v4700_v55 = vmul.f32 %v15175_v45, %v19132_v9 }
0x1ed9   :  { %v4671_v15 = vsel %vm369_vm0, %v4667_v7, 0.0  ;;  %v19179_v7 = vld [vmem:[%s20388_s19] sm:$0xff] }
0x1eda   :  { %4672 = vadd.xlane.f32.xlu1 %v4671_v15  ;;  %v4668_v16 = vsel %vm369_vm0, %v4666_v10, 0.0 }
0x1edb   :  { %4669 = vadd.xlane.f32.xlu0 %v4668_v16  ;;  %v19186_v16 = vld [vmem:[%s20388_s19 + $0x8] sm:$0xff] }
0x1eeb   :  { %17442 = vrot.lane.b32.xlu1 %v19148_v58, %s18294_s13 }
0x1eef   :  { %5083 = vrot.lane.b32.xlu1 %v19162_v34, %s18294_s13 }
0x1ef1   :  { %17437 = vrot.lane.b32.xlu0 %v19154_v18, %s18294_s13 }
0x1f67   :  { %v4673_v42 = vpop.xlane.xlu1 %4672 }
0x1f68   :  { %v4675_v24 = vmul.f32 0.032258064, %v4673_v42  ;;  %v4670_v20 = vpop.xlane.xlu0 %4669 }
0x1f69   :  { %v4674_v27 = vmul.f32 0.032258064, %v4670_v20 }
0x1f6a   :  { %17654 = vrsqrt.f32 %v4675_v24  ;;  %vm4685_vm7 = vcmp.eq.f32.partialorder %v4675_v24, inf  ;;  %v4688_v47 = vand.u32 2147483648, %v4675_v24  ;;  %vm4687_vm8 = vcmp.eq.f32.partialorder %v4675_v24, 0.0 }
0x1f6b   :  { %17656 = vrsqrt.f32 %v4674_v27  ;;  %vm4678_vm11 = vcmp.eq.f32.partialorder %v4674_v27, inf  ;;  %v4681_v46 = vand.u32 2147483648, %v4674_v27  ;;  %vm4680_vm12 = vcmp.eq.f32.partialorder %v4674_v27, 0.0  ;;  %v17443_v0 = vpop.permute.xlu1 %17442 }
0x1f6c   :  { %v17438_v5 = vpop.permute.xlu0 %17437  ;;  %v17445_v9 = vunpack.i.h.bf16 %v17443_v0  ;;  %v17444_v10 = vunpack.i.l.bf16 %v17443_v0 }
0x1f6d   :  { %v17440_v6 = vunpack.i.h.bf16 %v17438_v5  ;;  %v17439_v28 = vunpack.i.l.bf16 %v17438_v5 }
0x1f6e   :  { %v17088_v57 = vpack.c.bf16 %v17445_v9, %v17444_v10 }
0x1f6f   :  { %v17084_v15 = vpack.c.bf16 %v17440_v6, %v17439_v28  ;;  %v5084_v40 = vpop.permute.xlu1 %5083 }
0x1f74   :  { %v17655_v12 = vpop.eup %17654 }
0x1f75   :  { %v17657_v31 = vpop.eup %17656  ;;  %v4684_v25 = vmul.f32 %v17655_v12, %v4675_v24 }
0x1f76   :  { %v4677_v44 = vmul.f32 %v17657_v31, %v4674_v27 }
0x1f77   :  { %v4686_v48 = vsel %vm4685_vm7, %v4675_v24, %v4684_v25  ;;  %v4975_v24 = vld [vmem:[%s20392_s22] sm:$0xff] }
0x1f78   :  { %v4689_v49 = vsel %vm4687_vm8, %v4688_v47, %v4686_v48  ;;  %v4679_v50 = vsel %vm4678_vm11, %v4674_v27, %v4677_v44 }
0x1f79   :  { %v4691_v51 = vadd.f32 1e-06, %v4689_v49  ;;  %v4682_v52 = vsel %vm4680_vm12, %v4681_v46, %v4679_v50 }
0x1f7a   :  { %v4690_v43 = vadd.f32 1e-06, %v4682_v52 }
0x1f7b   :  { %17658 = vrcp.f32 %v4691_v51 }
0x1f7c   :  { %17660 = vrcp.f32 %v4690_v43 }
0x1f85   :  { %v17659_v54 = vpop.eup %17658 }
0x1f86   :  { %v17661_v56 = vpop.eup %17660  ;;  %v4703_v60 = vmul.f32 %v17659_v54, %v4701_v53 }
0x1f87   :  { %v4702_v63 = vmul.f32 %v17661_v56, %v4700_v55 }
0x1f88   :  { %v4711_v1 = vadd.f32 %v15176_v59, %v4703_v60 }
0x1f89   :  { %v4710_v14 = vadd.f32 %v15176_v59, %v4702_v63  ;;  %v15194_v63 = vld [vmem:[%s20386_s18 + $0x1] ss:$0 sm:$0xff] }
0x1f8b   :  { %16257 = vmatprep.mubr.msk.f32.mxu1 %vm369_vm0, %v4710_v14 }
0x1f8c   :  { %16258 = vmatmul.mubr.msk.f32.vlgmr.msra.gmra.mrb[50].mxu1 %vm369_vm0, %v4711_v1 }
0x1f8d   :  { %17079 = vmatpush3.bf16.msra.mxu1 %v17076_v33  ;;  %16287 = vmatprep.mubr.msk.f32.mxu1 %vm369_vm0, %v19179_v7 }
0x1f8e   :  { %17081 = vmatprep.subr.bf16.mxu1 %v17080_v8 }
0x1f91   :  { %17083 = vmatpush3.bf16.msra.mxu1 %v17080_v8 }
0x1f92   :  { %17085 = vmatprep.subr.bf16.mxu1 %v17084_v15 }
0x1f94   :  { %16288 = vmatmul.mubr.msk.f32.vlgmr.msra.gmra.mrb[52].mxu1 %vm369_vm0, %v19186_v16 }
0x1f95   :  { %17087 = vmatpush3.bf16.msra.mxu1 %v17084_v15  ;;  %16298 = vmatprep.mubr.msk.f32.mxu1 %vm369_vm0, %v4968_v17 }
0x1f96   :  { %17089 = vmatprep.subr.bf16.mxu1 %v17088_v57 }
0x1f99   :  { %17091 = vmatpush3.bf16.msra.mxu1 %v17088_v57 }
0x1f9c   :  { %16299 = vmatmul.mubr.msk.f32.vlgmr.msra.gmra.mrb[54].mxu1 %vm369_vm0, %v19193_v61 }
0x205f   :  { %v16259_v29 = vpop.f32.mrb[50].mxu1 }
0x2060   :  { %v4814_v30 = vadd.f32 %v16259_v29, %v15191_v23  ;;  %v4808_v32 = vpop.f32.mrb[51].mxu1 }
0x2061   :  { %v4809_v33 = vadd.f32 %v15191_v23, %v4808_v32 }
0x2062   :  { %v4818_v36 = vmax.f32 %v4814_v30, 0.0 }
0x2063   :  { %v4817_v35 = vmax.f32 %v4809_v33, 0.0 }
0x2065   :  { %16276 = vmatprep.mubr.msk.f32.mxu0 %vm2557_vm15, %v4817_v35 }
0x2066   :  { %16277 = vmatmul.mubr.msk.f32.vlgmr.msra.gmra.mrb[34].mxu0 %vm2557_vm15, %v4818_v36 }
0x2067   :  { %v16289_v37 = vpop.f32.mrb[52].mxu1  ;;  %16309 = vmatprep.mubr.msk.f32.mxu0 %vm369_vm0, %v4968_v17 }
0x2068   :  { %v5058_v38 = vpop.f32.mrb[53].mxu1 }
0x2069   :  { %v19204_v39 = vadd.f32 %v19162_v34, %v5058_v38 }
0x206b   :  { %5450 = vrot.lane.b32.xlu0 %v19204_v39, %s18299_s3  ;;  %16316 = vmatprep.mubr.msk.f32.mxu1 %vm723_vm6, %v19204_v39 }
0x206f   :  { %v16300_v11 = vpop.f32.mrb[54].mxu1  ;;  %17452 = vrot.lane.b32.xlu0 %v19154_v18, %s18295_s5  ;;  %v19229_v18 = vadd.f32 %v16289_v37, %v19162_v34 }
0x2070   :  { %v5164_v41 = vadd.f32 %v16300_v11, %v5084_v40  ;;  %v5158_v13 = vpop.f32.mrb[55].mxu1 }
0x2071   :  { %v5159_v42 = vadd.f32 %v5158_v13, %v5084_v40 }
0x2073   :  { %v19218_v20 = vpack.i.bf16 %v5164_v41, %v5159_v42  ;;  %v17100_v27 = vpack.c.bf16 %v5164_v41, %v5159_v42 }
0x2075   :  { %17447 = vrot.lane.b32.xlu1 %v19218_v20, %s18299_s3  ;;  %17102 = vmatprep.subr.msk.bf16.mxu1 %vm19214_vm13, %v17100_v27 }
0x2076   :  { %17462 = vrot.lane.b32.xlu0 %v19218_v20, %s18300_s12  ;;  %17105 = vmatpush3.bf16.xpose.msk.msra.mxu1 %vm19214_vm13, %v17100_v27 }
0x2079   :  { %5452 = vrot.lane.b32.xlu1 %v19229_v18, %s18299_s3 }
0x207a   :  { %5818 = vrot.lane.b32.xlu0 %v19229_v18, %s18300_s12 }
0x207d   :  { %17457 = vrot.lane.b32.xlu1 %v19148_v58, %s18295_s5  ;;  %16317 = vmatmul.mubr.msk.f32.vlgmr.msra.gmra.mrb[56].mxu1 %vm723_vm6, %v19229_v18 }
0x2081   :  { %5816 = vrot.lane.b32.xlu1 %v19204_v39, %s18300_s12 }
0x20dd   :  { %v5451_v12 = vpop.permute.xlu0 %5450 }
0x20de   :  { %16330 = vmatprep.mubr.msk.f32.mxu1 %vm723_vm6, %v5451_v12 }
0x20e1   :  { %v17453_v31 = vpop.permute.xlu0 %17452 }
0x20e2   :  { %v17455_v25 = vunpack.i.h.bf16 %v17453_v31  ;;  %v17454_v47 = vunpack.i.l.bf16 %v17453_v31 }
0x20e4   :  { %v17092_v44 = vpack.c.bf16 %v17455_v25, %v17454_v47 }
0x20e6   :  { %17093 = vmatprep.subr.bf16.mxu0 %v17092_v44 }
0x20e7   :  { %v17448_v48 = vpop.permute.xlu1 %17447  ;;  %17095 = vmatpush3.bf16.msra.mxu0 %v17092_v44 }
0x20e8   :  { %v17450_v46 = vunpack.i.h.bf16 %v17448_v48  ;;  %v17449_v49 = vunpack.i.l.bf16 %v17448_v48  ;;  %v17463_v50 = vpop.permute.xlu0 %17462 }
0x20e9   :  { %v17465_v58 = vunpack.i.h.bf16 %v17463_v50  ;;  %v17464_v51 = vunpack.i.l.bf16 %v17463_v50 }
0x20ea   :  { %v17110_v52 = vpack.c.bf16 %v17450_v46, %v17449_v49 }
0x20eb   :  { %v5453_v43 = vpop.permute.xlu1 %5452  ;;  %v17120_v45 = vpack.c.bf16 %v17465_v58, %v17464_v51 }
0x20ec   :  { %17112 = vmatprep.subr.msk.bf16.mxu1 %vm19214_vm13, %v17110_v52  ;;  %v5819_v60 = vpop.permute.xlu0 %5818 }
0x20ed   :  { %17115 = vmatpush3.bf16.xpose.msk.msra.mxu1 %vm19214_vm13, %v17110_v52 }
0x20ee   :  { %17122 = vmatprep.subr.msk.bf16.mxu1 %vm19214_vm13, %v17120_v45 }
0x20ef   :  { %v17458_v53 = vpop.permute.xlu1 %17457 }
0x20f0   :  { %v17460_v54 = vunpack.i.h.bf16 %v17458_v53  ;;  %v17459_v55 = vunpack.i.l.bf16 %v17458_v53 }
0x20f2   :  { %v17096_v56 = vpack.c.bf16 %v17460_v54, %v17459_v55 }
0x20f3   :  { %v5817_v59 = vpop.permute.xlu1 %5816 }
0x20f4   :  { %16331 = vmatmul.mubr.msk.f32.vlgmr.msra.gmra.mrb[58].mxu1 %vm723_vm6, %v5453_v43  ;;  %17097 = vmatprep.subr.bf16.mxu0 %v17096_v56 }
0x20f5   :  { %17125 = vmatpush3.bf16.xpose.msk.msra.mxu1 %vm19214_vm13, %v17120_v45  ;;  %16354 = vmatprep.mubr.msk.f32.mxu1 %vm723_vm6, %v5817_v59 }
0x20f6   :  { %17099 = vmatpush3.bf16.msra.mxu0 %v17096_v56 }
0x20f9   :  { %16310 = vmatmul.mubr.msk.f32.vlgmr.msra.gmra.mrb[36].mxu0 %vm369_vm0, %v19193_v61 }
0x20fc   :  { %16355 = vmatmul.mubr.msk.f32.vlgmr.msra.gmra.mrb[60].mxu1 %vm723_vm6, %v5819_v60 }
0x2139   :  { %v16278_v5 = vpop.f32.mrb[34].mxu0 }
0x213a   :  { %v19256_v14 = vadd.f32 %v16278_v5, %v15194_v63  ;;  %v19258_v1 = vpop.f32.mrb[35].mxu0 }
0x2150   :  { %v16318_v6 = vpop.f32.mrb[56].mxu1 }
0x2151   :  { %v5345_v28 = vmul.f32 0.35355338, %v16318_v6  ;;  %v5335_v8 = vpop.f32.mrb[57].mxu1 }
0x2152   :  { %v5344_v0 = vmul.f32 0.35355338, %v5335_v8 }
0x2153   :  { %v5350_v9 = vsel %vm5346_vm14, %v5345_v28, -inf }
0x2154   :  { %5351 = vmax.xlane.f32.xlu0 %v5350_v9  ;;  %v5347_v10 = vsel %vm5346_vm14, %v5344_v0, -inf }
0x2155   :  { %5348 = vmax.xlane.f32.xlu1 %v5347_v10 }
0x2166   :  { %5179 = vrot.lane.b32.xlu1 %v19162_v34, %s18295_s5 }
0x21c7   :  { %v16332_v15 = vpop.f32.mrb[58].mxu1 }
0x21c8   :  { %v5532_v57 = vpop.f32.mrb[59].mxu1  ;;  %v5542_v61 = vmul.f32 0.35355338, %v16332_v15 }
0x21c9   :  { %v5541_v17 = vmul.f32 0.35355338, %v5532_v57 }
0x21ca   :  { %v5546_v29 = vsel %vm5346_vm14, %v5542_v61, -inf }
0x21cb   :  { %v5543_v62 = vsel %vm5346_vm14, %v5541_v17, -inf }
0x21cc   :  { %5544 = vmax.xlane.f32.xlu0 %v5543_v62  ;;  %v16311_v19 = vpop.f32.mrb[36].mxu0 }
0x21cd   :  { %v5248_v21 = vpop.f32.mrb[37].mxu0 }
0x21cf   :  { %v19265_v23 = vpop.f32.mrb[60].mxu1 }
0x21d0   :  { %v5898_v30 = vpop.f32.mrb[61].mxu1  ;;  %5547 = vmax.xlane.f32.xlu0 %v5546_v29 }
0x21d1   :  { %v5907_v25 = vmul.f32 0.35355338, %v5898_v30 }
0x21d3   :  { %v5909_v47 = vsel %vm5346_vm14, %v5907_v25, -inf }
0x21e1   :  { %v5352_v32 = vpop.xlane.xlu0 %5351 }
0x21e2   :  { %v5354_v33 = vsub.f32 %v5345_v28, %v5352_v32  ;;  %v5349_v35 = vpop.xlane.xlu1 %5348  ;;  %v5908_v28 = vmul.f32 0.35355338, %v19265_v23 }
0x21e3   :  { %v5353_v36 = vsub.f32 %v5344_v0, %v5349_v35 }
0x21e4   :  { %v5357_v34 = vmul.f32 1.442695, %v5354_v33  ;;  %v5912_v0 = vsel %vm5346_vm14, %v5908_v28, -inf }
0x21e5   :  { %v5355_v37 = vmul.f32 1.442695, %v5353_v36 }
0x21e6   :  { %17662 = vpow2.f32 %v5357_v34  ;;  %v5180_v38 = vpop.permute.xlu1 %5179 }
0x21e7   :  { %v5254_v40 = vadd.f32 %v16311_v19, %v5180_v38  ;;  %v5249_v11 = vadd.f32 %v5248_v21, %v5180_v38  ;;  %17664 = vpow2.f32 %v5355_v37 }
0x21e9   :  { %v19268_v41 = vpack.i.bf16 %v5254_v40, %v5249_v11  ;;  %v17106_v31 = vpack.c.bf16 %v5254_v40, %v5249_v11  ;;  %v4976_v40 = vld [vmem:[%s20392_s22 + $0x8] sm:$0xff] }
0x21eb   :  { %17467 = vrot.lane.b32.xlu1 %v19268_v41, %s18299_s3  ;;  %17107 = vmatprep.subr.bf16.mxu0 %v17106_v31 }
0x21ec   :  { %17109 = vmatpush3.bf16.msra.mxu0 %v17106_v31 }
0x21ef   :  { %6101 = vrot.lane.b32.xlu1 %v19204_v39, %s18301_s2 }
0x21f0   :  { %v17663_v13 = vpop.eup %17662 }
0x21f1   :  { %v5362_v42 = vsel %vm5346_vm14, %v17663_v13, 0.0  ;;  %v17665_v27 = vpop.eup %17664 }
0x21f2   :  { %5363 = vadd.xlane.f32.xlu0 %v5362_v42  ;;  %v5359_v12 = vsel %vm5346_vm14, %v17665_v27, 0.0 }
0x21f3   :  { %6103 = vrot.lane.b32.xlu1 %v19229_v18, %s18301_s2 }
0x21f6   :  { %5360 = vadd.xlane.f32.xlu0 %v5359_v12 }
0x2217   :  { %5910 = vmax.xlane.f32.xlu1 %v5909_v47 }
0x2259   :  { %v5545_v44 = vpop.xlane.xlu0 %5544 }
0x225a   :  { %v5549_v39 = vsub.f32 %v5541_v17, %v5545_v44 }
0x225c   :  { %v5551_v48 = vmul.f32 1.442695, %v5549_v39 }
0x225d   :  { %v5548_v46 = vpop.xlane.xlu0 %5547  ;;  %v17468_v49 = vpop.permute.xlu1 %17467 }
0x225e   :  { %17666 = vpow2.f32 %v5551_v48  ;;  %v5550_v50 = vsub.f32 %v5542_v61, %v5548_v46  ;;  %v17470_v54 = vunpack.i.h.bf16 %v17468_v49  ;;  %v17469_v55 = vunpack.i.l.bf16 %v17468_v49 }
0x2260   :  { %v5553_v58 = vmul.f32 1.442695, %v5550_v50  ;;  %v17116_v59 = vpack.c.bf16 %v17470_v54, %v17469_v55 }
0x2261   :  { %v6102_v51 = vpop.permute.xlu1 %6101 }
0x2262   :  { %17668 = vpow2.f32 %v5553_v58  ;;  %16373 = vmatprep.mubr.msk.f32.mxu1 %vm723_vm6, %v6102_v51  ;;  %17117 = vmatprep.subr.bf16.mxu0 %v17116_v59 }
0x2265   :  { %v6104_v8 = vpop.permute.xlu1 %6103 }
0x2268   :  { %v17667_v18 = vpop.eup %17666 }
0x2269   :  { %v5555_v52 = vsel %vm5346_vm14, %v17667_v18, 0.0 }
0x226a   :  { %5556 = vadd.xlane.f32.xlu0 %v5555_v52 }
0x226c   :  { %v17669_v43 = vpop.eup %17668 }
0x226d   :  { %v5558_v45 = vsel %vm5346_vm14, %v17669_v43, 0.0 }
0x226e   :  { %5559 = vadd.xlane.f32.xlu0 %v5558_v45 }
0x227f   :  { %v5364_v53 = vpop.xlane.xlu0 %5363 }
0x2280   :  { %17670 = vrcp.f32 %v5364_v53  ;;  %v4977_v53 = vld [vmem:[%s20392_s22 + $0x10] sm:$0xff] }
0x2283   :  { %v5361_v56 = vpop.xlane.xlu0 %5360 }
0x2284   :  { %17672 = vrcp.f32 %v5361_v56  ;;  %17472 = vrot.lane.b32.xlu0 %v19218_v20, %s18301_s2 }
0x228a   :  { %v17671_v60 = vpop.eup %17670 }
0x228b   :  { %v5368_v6 = vmul.f32 %v17671_v60, %v17663_v13 }
0x228e   :  { %v17673_v63 = vpop.eup %17672 }
0x228f   :  { %v5367_v5 = vmul.f32 %v17673_v63, %v17665_v27 }
0x2291   :  { %16323 = vmatprep.mubr.msk.f32.mxu0 %vm5346_vm14, %v5367_v5 }
0x2292   :  { %16324 = vmatmul.mubr.msk.f32.vlgmr.msra.gmra.mrb[38].mxu0 %vm5346_vm14, %v5368_v6 }
0x2293   :  { %17119 = vmatpush3.bf16.msra.mxu0 %v17116_v59 }
0x2294   :  { %16340 = vmatprep.subr.mxu0 %v4976_v40 }
0x22a3   :  { %5913 = vmax.xlane.f32.xlu0 %v5912_v0 }
0x22a4   :  { %v5911_v9 = vpop.xlane.xlu1 %5910 }
0x22a5   :  { %v5915_v10 = vsub.f32 %v5907_v25, %v5911_v9 }
0x22a7   :  { %v5917_v20 = vmul.f32 1.442695, %v5915_v10 }
0x22a9   :  { %17674 = vpow2.f32 %v5917_v20 }
0x22b3   :  { %v17675_v15 = vpop.eup %17674 }
0x22b4   :  { %v5921_v57 = vsel %vm5346_vm14, %v17675_v15, 0.0 }
0x22b5   :  { %5922 = vadd.xlane.f32.xlu1 %v5921_v57 }
0x22b9   :  { %17477 = vrot.lane.b32.xlu0 %v19268_v41, %s18300_s12 }
0x22f7   :  { %v5557_v17 = vpop.xlane.xlu0 %5556 }
0x22f8   :  { %17676 = vrcp.f32 %v5557_v17 }
0x22fb   :  { %v5560_v61 = vpop.xlane.xlu0 %5559 }
0x22fc   :  { %17678 = vrcp.f32 %v5560_v61 }
0x22ff   :  { %v17473_v62 = vpop.permute.xlu0 %17472 }
0x2300   :  { %v17475_v19 = vunpack.i.h.bf16 %v17473_v62  ;;  %v17474_v21 = vunpack.i.l.bf16 %v17473_v62  ;;  %v4978_v62 = vld [vmem:[%s20392_s22 + $0x18] sm:$0xff] }
0x2302   :  { %v17677_v23 = vpop.eup %17676  ;;  %v17130_v29 = vpack.c.bf16 %v17475_v19, %v17474_v21 }
0x2303   :  { %v5563_v30 = vmul.f32 %v17677_v23, %v17667_v18 }
0x2304   :  { %17132 = vmatprep.subr.msk.bf16.mxu1 %vm19214_vm13, %v17130_v29 }
0x2305   :  { %16337 = vmatprep.mubr.msk.f32.mxu0 %vm5346_vm14, %v5563_v30  ;;  %17135 = vmatpush3.bf16.xpose.msk.msra.mxu1 %vm19214_vm13, %v17130_v29 }
0x2306   :  { %v17679_v32 = vpop.eup %17678 }
0x2307   :  { %v5564_v33 = vmul.f32 %v17679_v32, %v17669_v43  ;;  %v15238_v32 = vld [vmem:[#allocation5] ss:$0 sm:$0xff] }
0x2309   :  { %16338 = vmatmul.mubr.msk.f32.vlgmr.msra.gmra.mrb[40].mxu0 %vm5346_vm14, %v5564_v33 }
0x230a   :  { %16341 = vmatpush3.msra.mxu0 %v4976_v40 }
0x230b   :  { %16345 = vmatprep.subr.mxu0 %v4975_v24 }
0x230c   :  { %16374 = vmatmul.mubr.msk.f32.vlgmr.msra.gmra.mrb[62].mxu1 %vm723_vm6, %v6104_v8 }
0x2330   :  { %v5914_v35 = vpop.xlane.xlu0 %5913 }
0x2331   :  { %v5916_v36 = vsub.f32 %v5908_v28, %v5914_v35 }
0x2333   :  { %v5919_v34 = vmul.f32 1.442695, %v5916_v36 }
0x2334   :  { %v17478_v27 = vpop.permute.xlu0 %17477 }
0x2335   :  { %17680 = vpow2.f32 %v5919_v34  ;;  %v17480_v31 = vunpack.i.h.bf16 %v17478_v27  ;;  %v17479_v25 = vunpack.i.l.bf16 %v17478_v27 }
0x2337   :  { %v17126_v48 = vpack.c.bf16 %v17480_v31, %v17479_v25 }
0x233f   :  { %v17681_v37 = vpop.eup %17680 }
0x2340   :  { %v5924_v38 = vsel %vm5346_vm14, %v17681_v37, 0.0 }
0x2341   :  { %5925 = vadd.xlane.f32.xlu1 %v5924_v38 }
0x2342   :  { %v5923_v42 = vpop.xlane.xlu1 %5922 }
0x2343   :  { %17682 = vrcp.f32 %v5923_v42 }
0x234d   :  { %v17683_v51 = vpop.eup %17682 }
0x234e   :  { %v5929_v43 = vmul.f32 %v17683_v51, %v17675_v15 }
0x2365   :  { %v16325_v11 = vpop.f32.mrb[38].mxu0 }
0x2366   :  { %v5441_v13 = vpop.f32.mrb[39].mxu0 }
0x23ce   :  { %v5926_v12 = vpop.xlane.xlu1 %5925 }
0x23cf   :  { %17684 = vrcp.f32 %v5926_v12 }
0x23d9   :  { %v17685_v18 = vpop.eup %17684 }
0x23da   :  { %v5930_v45 = vmul.f32 %v17685_v18, %v17681_v37  ;;  %v19351_v18 = vld [vmem:[#allocation7] ss:$0 sm:$0xff] }
0x23dc   :  { %v16339_v47 = vpop.f32.mrb[40].mxu0 }
0x23dd   :  { %v5645_v44 = vpop.f32.mrb[41].mxu0 }
0x23de   :  { %16342 = vmatprep.mubr.msk.f32.mxu0 %vm723_vm6, %v5645_v44 }
0x23df   :  { %16343 = vmatmul.mubr.msk.f32.vlgmr.msra.gmra.mrb[42].mxu0 %vm723_vm6, %v16339_v47  ;;  %v16375_v39 = vpop.f32.mrb[62].mxu1 }
0x23e0   :  { %16346 = vmatpush3.msra.mxu0 %v4975_v24  ;;  %16347 = vmatprep.mubr.msk.f32.mxu0 %vm723_vm6, %v5441_v13  ;;  %v6183_v46 = vpop.f32.mrb[63].mxu1  ;;  %v6193_v50 = vmul.f32 0.35355338, %v16375_v39  ;;  %v6457_v13 = vld [vmem:[%s20393_s25 + $0x18] sm:$0xff] }
0x23e1   :  { %17127 = vmatprep.subr.bf16.mxu0 %v17126_v48  ;;  %v6192_v49 = vmul.f32 0.35355338, %v6183_v46  ;;  %v6454_v46 = vld [vmem:[%s20393_s25] sm:$0xff] }
0x23e2   :  { %v6197_v52 = vsel %vm5346_vm14, %v6193_v50, -inf }
0x23e3   :  { %v6194_v58 = vsel %vm5346_vm14, %v6192_v49, -inf }
0x23e4   :  { %6195 = vmax.xlane.f32.xlu1 %v6194_v58 }
0x23e7   :  { %16348 = vmatmul.mubr.msk.f32.vlgmr.msra.gmra.mrb[42].mxu0 %vm723_vm6, %v16325_v11  ;;  %v6456_v11 = vld [vmem:[%s20393_s25 + $0x10] sm:$0xff] }
0x23e8   :  { %17129 = vmatpush3.bf16.msra.mxu0 %v17126_v48  ;;  %6198 = vmax.xlane.f32.xlu1 %v6197_v52  ;;  %v17491_v42 = vpack.i.bf16 %v6457_v13, %v6456_v11  ;;  %v17144_v51 = vpack.c.bf16 %v6457_v13, %v6456_v11 }
0x23e9   :  { %16361 = vmatprep.mubr.msk.f32.mxu0 %vm5346_vm14, %v5929_v43  ;;  %16364 = vmatprep.subr.mxu0 %v4977_v53 }
0x23eb   :  { %16362 = vmatmul.mubr.msk.f32.vlgmr.msra.gmra.mrb[44].mxu0 %vm5346_vm14, %v5930_v45 }
0x23ec   :  { %16365 = vmatpush3.msra.mxu0 %v4977_v53 }
0x2471   :  { %v6196_v54 = vpop.xlane.xlu1 %6195 }
0x2472   :  { %v6200_v55 = vsub.f32 %v6192_v49, %v6196_v54  ;;  %v6455_v49 = vld [vmem:[%s20393_s25 + $0x8] sm:$0xff] }
0x2473   :  { %v17140_v58 = vpack.c.bf16 %v6455_v49, %v6454_v46 }
0x2474   :  { %v6202_v60 = vmul.f32 1.442695, %v6200_v55 }
0x2475   :  { %v6199_v56 = vpop.xlane.xlu1 %6198  ;;  %17141 = vmatprep.subr.bf16.mxu1 %v17140_v58 }
0x2476   :  { %v6201_v59 = vsub.f32 %v6193_v50, %v6199_v56  ;;  %v17486_v50 = vpack.i.bf16 %v6455_v49, %v6454_v46  ;;  %17143 = vmatpush3.bf16.msra.mxu1 %v17140_v58 }
0x2477   :  { %17145 = vmatprep.subr.bf16.mxu1 %v17144_v51 }
0x2478   :  { %v6204_v63 = vmul.f32 1.442695, %v6201_v59 }
0x247a   :  { %17686 = vpow2.f32 %v6204_v63  ;;  %17147 = vmatpush3.bf16.msra.mxu1 %v17144_v51  ;;  %v19394_v51 = vld [vmem:[%s20394_s24 + $0x8] sm:$0xff] }
0x247b   :  { %17688 = vpow2.f32 %v6202_v60  ;;  %vm6736_vm7 = vcmp.gt.f32.partialorder %v19394_v51, 0.0 }
0x2484   :  { %v17687_v5 = vpop.eup %17686 }
0x2485   :  { %v6209_v6 = vsel %vm5346_vm14, %v17687_v5, 0.0  ;;  %v17689_v28 = vpop.eup %17688 }
0x2486   :  { %6210 = vadd.xlane.f32.xlu1 %v6209_v6  ;;  %v6206_v8 = vsel %vm5346_vm14, %v17689_v28, 0.0 }
0x248a   :  { %6207 = vadd.xlane.f32.xlu1 %v6206_v8 }
0x249b   :  { %17482 = vrot.lane.b32.xlu1 %v19268_v41, %s18301_s2 }
0x24be   :  { %v16363_v0 = vpop.f32.mrb[44].mxu0 }
0x24bf   :  { %v6009_v9 = vpop.f32.mrb[45].mxu0 }
0x24c0   :  { %16366 = vmatprep.mubr.msk.f32.mxu0 %vm723_vm6, %v6009_v9 }
0x24c1   :  { %16367 = vmatmul.mubr.msk.f32.vlgmr.msra.gmra.mrb[42].mxu0 %vm723_vm6, %v16363_v0 }
0x2513   :  { %v6211_v10 = vpop.xlane.xlu1 %6210 }
0x2514   :  { %17690 = vrcp.f32 %v6211_v10 }
0x2517   :  { %v6208_v20 = vpop.xlane.xlu1 %6207 }
0x2518   :  { %17692 = vrcp.f32 %v6208_v20 }
0x251b   :  { %v17483_v15 = vpop.permute.xlu1 %17482 }
0x251c   :  { %v17485_v57 = vunpack.i.h.bf16 %v17483_v15  ;;  %v17484_v17 = vunpack.i.l.bf16 %v17483_v15 }
0x251e   :  { %v17136_v61 = vpack.c.bf16 %v17485_v57, %v17484_v17  ;;  %v17691_v19 = vpop.eup %17690 }
0x251f   :  { %v6215_v23 = vmul.f32 %v17691_v19, %v17687_v5 }
0x2520   :  { %17137 = vmatprep.subr.bf16.mxu0 %v17136_v61 }
0x2521   :  { %17139 = vmatpush3.bf16.msra.mxu0 %v17136_v61 }
0x2522   :  { %v17693_v21 = vpop.eup %17692  ;;  %16383 = vmatprep.subr.mxu0 %v4978_v62 }
0x2523   :  { %v6214_v41 = vmul.f32 %v17693_v21, %v17689_v28 }
0x2525   :  { %16380 = vmatprep.mubr.msk.f32.mxu0 %vm5346_vm14, %v6214_v41 }
0x2526   :  { %16381 = vmatmul.mubr.msk.f32.vlgmr.msra.gmra.mrb[46].mxu0 %vm5346_vm14, %v6215_v23 }
0x2527   :  { %16384 = vmatpush3.msra.mxu0 %v4978_v62 }
0x25f9   :  { %v16382_v29 = vpop.f32.mrb[46].mxu0 }
0x25fa   :  { %v6294_v30 = vpop.f32.mrb[47].mxu0 }
0x25fb   :  { %16385 = vmatprep.mubr.msk.f32.mxu0 %vm723_vm6, %v6294_v30  ;;  %v15239_v30 = vld [vmem:[#allocation13] ss:$0 sm:$0xff] }
0x25fc   :  { %16386 = vmatmul.mubr.msk.f32.vlgmr.msra.gmra.mrb[42].mxu0 %vm723_vm6, %v16382_v29 }
0x26cf   :  { %v16387_v33 = vpop.f32.mrb[42].mxu0 }
0x26d0   :  { %v6393_v35 = vadd.f32 %v16387_v33, %v15238_v32  ;;  %v6375_v36 = vpop.f32.mrb[43].mxu0 }
0x26d1   :  { %v6392_v34 = vadd.f32 %v15238_v32, %v6375_v36 }
0x26d2   :  { %v19322_v37 = vadd.f32 %v6393_v35, %v19186_v16  ;;  %v15240_v35 = vld [vmem:[#allocation14] ss:$0 sm:$0xff] }
0x26d3   :  { %v19325_v38 = vadd.f32 %v6392_v34, %v19179_v7 }
0x26d4   :  { %v6401_v40 = vsel %vm369_vm0, %v19322_v37, 0.0 }
0x26d5   :  { %6402 = vadd.xlane.f32.xlu1 %v6401_v40  ;;  %v6398_v24 = vsel %vm369_vm0, %v19325_v38, 0.0 }
0x26d6   :  { %6399 = vadd.xlane.f32.xlu0 %v6398_v24 }
0x26e6   :  { %17492 = vrot.lane.b32.xlu1 %v17491_v42, %s18294_s13 }
0x26ea   :  { %17502 = vrot.lane.b32.xlu1 %v17491_v42, %s18295_s5 }
0x2762   :  { %v6403_v16 = vpop.xlane.xlu1 %6402 }
0x2763   :  { %v6405_v7 = vmul.f32 0.03125, %v6403_v16  ;;  %v6400_v27 = vpop.xlane.xlu0 %6399 }
0x2764   :  { %v6404_v12 = vmul.f32 0.03125, %v6400_v27 }
0x2765   :  { %v19336_v31 = vsub.f32 %v19322_v37, %v6405_v7 }
0x2766   :  { %v19339_v25 = vsub.f32 %v19325_v38, %v6404_v12  ;;  %v17493_v53 = vpop.permute.xlu1 %17492 }
0x2767   :  { %v6409_v39 = vmul.f32 %v19336_v31, %v19336_v31  ;;  %v17495_v55 = vunpack.i.h.bf16 %v17493_v53  ;;  %v17494_v56 = vunpack.i.l.bf16 %v17493_v53  ;;  %v6443_v40 = vmul.f32 %v15239_v30, %v19336_v31 }
0x2768   :  { %v6408_v47 = vmul.f32 %v19339_v25, %v19339_v25  ;;  %v6442_v32 = vmul.f32 %v15239_v30, %v19339_v25 }
0x2769   :  { %v6413_v48 = vsel %vm369_vm0, %v6409_v39, 0.0  ;;  %v17152_v6 = vpack.c.bf16 %v17495_v55, %v17494_v56 }
0x276a   :  { %v6410_v44 = vsel %vm369_vm0, %v6408_v47, 0.0  ;;  %v17503_v36 = vpop.permute.xlu1 %17502 }
0x276b   :  { %6411 = vadd.xlane.f32.xlu0 %v6410_v44  ;;  %v17505_v11 = vunpack.i.h.bf16 %v17503_v36  ;;  %v17504_v13 = vunpack.i.l.bf16 %v17503_v36 }
0x276d   :  { %v17160_v27 = vpack.c.bf16 %v17505_v11, %v17504_v13 }
0x276f   :  { %6414 = vadd.xlane.f32.xlu0 %v6413_v48 }
0x2785   :  { %17487 = vrot.lane.b32.xlu0 %v17486_v50, %s18294_s13 }
0x2789   :  { %17497 = vrot.lane.b32.xlu0 %v17486_v50, %s18295_s5 }
0x278d   :  { %6567 = vrot.lane.b32.xlu0 %v19351_v18, %s18294_s13 }
0x27f8   :  { %v6412_v52 = vpop.xlane.xlu0 %6411 }
0x27f9   :  { %v6416_v43 = vmul.f32 0.032258064, %v6412_v52 }
0x27fb   :  { %17694 = vrsqrt.f32 %v6416_v43  ;;  %vm6420_vm1 = vcmp.eq.f32.partialorder %v6416_v43, inf  ;;  %v6423_v20 = vand.u32 2147483648, %v6416_v43  ;;  %vm6422_vm2 = vcmp.eq.f32.partialorder %v6416_v43, 0.0 }
0x27fc   :  { %v6415_v45 = vpop.xlane.xlu0 %6414 }
0x27fd   :  { %v6417_v54 = vmul.f32 0.032258064, %v6415_v45 }
0x27ff   :  { %17696 = vrsqrt.f32 %v6417_v54  ;;  %vm6427_vm3 = vcmp.eq.f32.partialorder %v6417_v54, inf  ;;  %v6430_v21 = vand.u32 2147483648, %v6417_v54  ;;  %vm6429_vm4 = vcmp.eq.f32.partialorder %v6417_v54, 0.0 }
0x2800   :  { %v17488_v59 = vpop.permute.xlu0 %17487 }
0x2801   :  { %v17490_v60 = vunpack.i.h.bf16 %v17488_v59  ;;  %v17489_v63 = vunpack.i.l.bf16 %v17488_v59 }
0x2803   :  { %v17148_v5 = vpack.c.bf16 %v17490_v60, %v17489_v63 }
0x2804   :  { %v17498_v28 = vpop.permute.xlu0 %17497 }
0x2805   :  { %v17695_v8 = vpop.eup %17694  ;;  %17149 = vmatprep.subr.bf16.mxu0 %v17148_v5  ;;  %v17500_v0 = vunpack.i.h.bf16 %v17498_v28  ;;  %v17499_v9 = vunpack.i.l.bf16 %v17498_v28  ;;  %v19408_v28 = vld [vmem:[%s20394_s24] sm:$0xff] }
0x2806   :  { %v6419_v10 = vmul.f32 %v17695_v8, %v6416_v43  ;;  %17151 = vmatpush3.bf16.msra.mxu0 %v17148_v5  ;;  %vm6735_vm8 = vcmp.gt.f32.partialorder %v19408_v28, 0.0 }
0x2807   :  { %17153 = vmatprep.subr.bf16.mxu0 %v17152_v6  ;;  %v17156_v15 = vpack.c.bf16 %v17500_v0, %v17499_v9 }
0x2808   :  { %v6421_v57 = vsel %vm6420_vm1, %v6416_v43, %v6419_v10  ;;  %v6568_v12 = vpop.permute.xlu0 %6567 }
0x2809   :  { %v17697_v17 = vpop.eup %17696  ;;  %v6424_v61 = vsel %vm6422_vm2, %v6423_v20, %v6421_v57  ;;  %17157 = vmatprep.subr.bf16.mxu1 %v17156_v15 }
0x280a   :  { %v6426_v62 = vmul.f32 %v17697_v17, %v6417_v54  ;;  %v6432_v19 = vadd.f32 1e-06, %v6424_v61  ;;  %17155 = vmatpush3.bf16.msra.mxu0 %v17152_v6 }
0x280b   :  { %16421 = vmatprep.subr.mxu0 %v18296_v4 }
0x280c   :  { %v6428_v41 = vsel %vm6427_vm3, %v6417_v54, %v6426_v62  ;;  %17698 = vrcp.f32 %v6432_v19 }
0x280d   :  { %v6431_v23 = vsel %vm6429_vm4, %v6430_v21, %v6428_v41 }
0x280e   :  { %v6433_v29 = vadd.f32 1e-06, %v6431_v23 }
0x2810   :  { %17700 = vrcp.f32 %v6433_v29 }
0x2816   :  { %v17699_v33 = vpop.eup %17698 }
0x2817   :  { %v6444_v34 = vmul.f32 %v17699_v33, %v6442_v32 }
0x2819   :  { %v6452_v24 = vadd.f32 %v15240_v35, %v6444_v34 }
0x281a   :  { %v17701_v42 = vpop.eup %17700 }
0x281b   :  { %v6445_v16 = vmul.f32 %v17701_v42, %v6443_v40  ;;  %16396 = vmatprep.mubr.msk.f32.mxu1 %vm369_vm0, %v6452_v24  ;;  %16407 = vmatprep.mubr.msk.f32.mxu0 %vm369_vm0, %v6452_v24 }
0x281d   :  { %v6453_v7 = vadd.f32 %v15240_v35, %v6445_v16 }
0x281f   :  { %16397 = vmatmul.mubr.msk.f32.vlgmr.msra.gmra.mrb[64].mxu1 %vm369_vm0, %v6453_v7  ;;  %16408 = vmatmul.mubr.msk.f32.vlgmr.msra.gmra.mrb[48].mxu0 %vm369_vm0, %v6453_v7 }
0x2820   :  { %17159 = vmatpush3.bf16.msra.mxu1 %v17156_v15  ;;  %16418 = vmatprep.mubr.msk.f32.mxu1 %vm369_vm0, %v6452_v24 }
0x2821   :  { %17161 = vmatprep.subr.bf16.mxu1 %v17160_v27  ;;  %16423 = vmatprep.mubr.msk.f32.mxu0 %vm18297_vm5, %v18296_v4 }
0x2824   :  { %17163 = vmatpush3.bf16.msra.mxu1 %v17160_v27 }
0x2825   :  { %16426 = vmatprep.subr.mxu1 %v18296_v4 }
0x2827   :  { %16419 = vmatmul.mubr.msk.f32.vlgmr.msra.gmra.mrb[66].mxu1 %vm369_vm0, %v6453_v7 }
0x2828   :  { %16428 = vmatprep.mubr.msk.f32.mxu1 %vm18297_vm5, %v18296_v4 }
0x28f2   :  { %v16398_v31 = vpop.f32.mrb[64].mxu1  ;;  %v16409_v25 = vpop.f32.mrb[48].mxu0 }
0x28f3   :  { %v19369_v47 = vadd.f32 %v16409_v25, %v6568_v12  ;;  %v6542_v44 = vpop.f32.mrb[65].mxu1  ;;  %v6636_v39 = vpop.f32.mrb[49].mxu0  ;;  %v19376_v46 = vadd.f32 %v16398_v31, %v19351_v18 }
0x28f4   :  { %v19371_v48 = vadd.f32 %v6636_v39, %v6568_v12  ;;  %v19382_v49 = vadd.f32 %v19351_v18, %v6542_v44 }
0x28f5   :  { %16427 = vmatpush3.xpose.msk.msra.mxu1 %vm723_vm6, %v19369_v47 }
0x28f6   :  { %16422 = vmatpush3.xpose.msk.msra.mxu0 %vm723_vm6, %v19371_v48  ;;  %16436 = vmatprep.subr.mxu1 %v18296_v4 }
0x28f7   :  { %16431 = vmatprep.subr.mxu0 %v18296_v4 }
0x28f8   :  { %16429 = vmatmul.mubr.msk.f32.vlgmr.msra.gmra.mrb[68].mxu1 %vm723_vm6, %v19376_v46 }
0x28f9   :  { %16424 = vmatmul.mubr.msk.f32.vlgmr.msra.gmra.mrb[50].mxu0 %vm723_vm6, %v19382_v49  ;;  %16438 = vmatprep.mubr.msk.f32.mxu1 %vm18297_vm5, %v18296_v4 }
0x28fa   :  { %v16420_v50 = vpop.f32.mrb[66].mxu1  ;;  %16433 = vmatprep.mubr.msk.f32.mxu0 %vm18297_vm5, %v18296_v4 }
0x28fb   :  { %v6726_v58 = vpop.f32.mrb[67].mxu1 }
0x29cb   :  { %v6885_v52 = vpop.f32.mrb[68].mxu1 }
0x29cc   :  { %v6890_v43 = vmul.f32 0.35355338, %v6885_v52  ;;  %v6809_v45 = vpop.f32.mrb[50].mxu0  ;;  %v16430_v53 = vpop.f32.mrb[69].mxu1 }
0x29cd   :  { %v16425_v54 = vpop.f32.mrb[51].mxu0  ;;  %v6889_v8 = vmul.f32 0.35355338, %v6809_v45 }
0x29ce   :  { %v6892_v55 = vsel %vm6736_vm7, %v6890_v43, -1e+09 }
0x29cf   :  { %v6896_v56 = vsel %vm723_vm6, %v6892_v55, -inf  ;;  %v6891_v0 = vsel %vm6735_vm8, %v6889_v8, -1e+09 }
0x29d0   :  { %6897 = vmax.xlane.f32.xlu1 %v6896_v56  ;;  %v6893_v9 = vsel %vm723_vm6, %v6891_v0, -inf }
0x29e1   :  { %7141 = vrot.lane.b32.xlu1 %v19369_v47, %s18299_s3 }
0x29e5   :  { %7139 = vrot.lane.b32.xlu1 %v19376_v46, %s18299_s3 }
0x2a5d   :  { %v6898_v59 = vpop.xlane.xlu1 %6897 }
0x2a5e   :  { %v6900_v60 = vsub.f32 %v6892_v55, %v6898_v59 }
0x2a60   :  { %v6903_v63 = vmul.f32 1.442695, %v6900_v60 }
0x2a61   :  { %v7142_v17 = vpop.permute.xlu1 %7141 }
0x2a62   :  { %17702 = vpow2.f32 %v6903_v63 }
0x2a65   :  { %v7140_v62 = vpop.permute.xlu1 %7139 }
0x2a6c   :  { %v17703_v5 = vpop.eup %17702 }
0x2a6d   :  { %v6908_v6 = vsel %vm723_vm6, %v17703_v5, 0.0 }
0x2a6e   :  { %6909 = vadd.xlane.f32.xlu0 %v6908_v6 }
0x2a84   :  { %6657 = vrot.lane.b32.xlu0 %v19351_v18, %s18295_s5 }
0x2aa3   :  { %6894 = vmax.xlane.f32.xlu0 %v6893_v9 }
0x2ab9   :  { %7063 = vrot.lane.b32.xlu0 %v19371_v48, %s18299_s3 }
0x2afb   :  { %v6910_v10 = vpop.xlane.xlu0 %6909 }
0x2afc   :  { %17704 = vrcp.f32 %v6910_v10 }
0x2aff   :  { %v6658_v20 = vpop.permute.xlu0 %6657 }
0x2b00   :  { %v19416_v15 = vadd.f32 %v6726_v58, %v6658_v20  ;;  %v19418_v18 = vadd.f32 %v16420_v50, %v6658_v20 }
0x2b02   :  { %16432 = vmatpush3.msra.mxu0 %v19416_v15  ;;  %16437 = vmatpush3.msra.mxu1 %v19418_v18 }
0x2b03   :  { %16446 = vmatprep.subr.mxu1 %v18296_v4  ;;  %16441 = vmatprep.subr.mxu0 %v18296_v4 }
0x2b06   :  { %v17705_v57 = vpop.eup %17704 }
0x2b07   :  { %v6914_v61 = vmul.f32 %v17705_v57, %v17703_v5 }
0x2b09   :  { %16439 = vmatmul.mubr.msk.f32.vlgmr.msra.gmra.mrb[70].mxu1 %vm723_vm6, %v6914_v61 }
0x2b0a   :  { %16447 = vmatpush3.xpose.msk.msra.mxu1 %vm723_vm6, %v7142_v17  ;;  %16448 = vmatprep.mubr.msk.f32.mxu1 %vm18297_vm5, %v18296_v4 }
0x2b0b   :  { %16456 = vmatprep.subr.mxu1 %v18296_v4 }
0x2b0d   :  { %16449 = vmatmul.mubr.msk.f32.vlgmr.msra.gmra.mrb[72].mxu1 %vm723_vm6, %v7140_v62 }
0x2b0e   :  { %16458 = vmatprep.mubr.msk.f32.mxu1 %vm18297_vm5, %v18296_v4 }
0x2b30   :  { %v6895_v19 = vpop.xlane.xlu0 %6894 }
0x2b31   :  { %v6899_v21 = vsub.f32 %v6891_v0, %v6895_v19 }
0x2b33   :  { %v6901_v41 = vmul.f32 1.442695, %v6899_v21 }
0x2b34   :  { %v7064_v35 = vpop.permute.xlu0 %7063 }
0x2b35   :  { %17706 = vpow2.f32 %v6901_v41 }
0x2b3f   :  { %v17707_v23 = vpop.eup %17706 }
0x2b40   :  { %v6905_v29 = vsel %vm723_vm6, %v17707_v23, 0.0 }
0x2b41   :  { %6906 = vadd.xlane.f32.xlu1 %v6905_v29 }
0x2b52   :  { %7061 = vrot.lane.b32.xlu1 %v19382_v49, %s18299_s3 }
0x2b56   :  { %7561 = vrot.lane.b32.xlu1 %v19371_v48, %s18300_s12 }
0x2bce   :  { %v6907_v30 = vpop.xlane.xlu1 %6906 }
0x2bcf   :  { %17708 = vrcp.f32 %v6907_v30 }
0x2bd2   :  { %v7062_v40 = vpop.permute.xlu1 %7061 }
0x2bd6   :  { %v7562_v54 = vpop.permute.xlu1 %7561 }
0x2bd9   :  { %v17709_v32 = vpop.eup %17708 }
0x2bda   :  { %v6913_v33 = vmul.f32 %v17709_v32, %v17707_v23 }
0x2bdc   :  { %16434 = vmatmul.mubr.msk.f32.vlgmr.msra.gmra.mrb[52].mxu0 %vm723_vm6, %v6913_v33  ;;  %v19438_v36 = vpop.f32.mrb[70].mxu1 }
0x2bdd   :  { %16442 = vmatpush3.xpose.msk.msra.mxu0 %vm723_vm6, %v7064_v35  ;;  %v16440_v34 = vpop.f32.mrb[71].mxu1  ;;  %16443 = vmatprep.mubr.msk.f32.mxu0 %vm18297_vm5, %v18296_v4 }
0x2bde   :  { %16451 = vmatprep.subr.mxu0 %v18296_v4  ;;  %v6460_v34 = vld [vmem:[%s20395_s9 + $0x8] sm:$0xff] }
0x2be0   :  { %16444 = vmatmul.mubr.msk.f32.vlgmr.msra.gmra.mrb[54].mxu0 %vm723_vm6, %v7062_v40  ;;  %v7213_v24 = vpop.f32.mrb[72].mxu1  ;;  %v6459_v40 = vld [vmem:[%s20395_s9] sm:$0xff] }
0x2be1   :  { %v7218_v11 = vmul.f32 0.35355338, %v7213_v24  ;;  %v16450_v13 = vpop.f32.mrb[73].mxu1  ;;  %16453 = vmatprep.mubr.msk.f32.mxu0 %vm18297_vm5, %v18296_v4 }
0x2be3   :  { %v7220_v42 = vsel %vm6736_vm7, %v7218_v11, -1e+09 }
0x2be4   :  { %v7224_v16 = vsel %vm723_vm6, %v7220_v42, -inf }
0x2be5   :  { %7225 = vmax.xlane.f32.xlu0 %v7224_v16 }
0x2bfb   :  { %7321 = vrot.lane.b32.xlu0 %v19418_v18, %s18299_s3 }
0x2bff   :  { %7559 = vrot.lane.b32.xlu0 %v19382_v49, %s18300_s12 }
0x2c03   :  { %7637 = vrot.lane.b32.xlu0 %v19376_v46, %s18300_s12 }
0x2c72   :  { %v7226_v7 = vpop.xlane.xlu0 %7225 }
0x2c73   :  { %v7228_v27 = vsub.f32 %v7220_v42, %v7226_v7 }
0x2c75   :  { %v7231_v12 = vmul.f32 1.442695, %v7228_v27 }
0x2c76   :  { %v7322_v31 = vpop.permute.xlu0 %7321 }
0x2c77   :  { %17710 = vpow2.f32 %v7231_v12  ;;  %16457 = vmatpush3.msra.mxu1 %v7322_v31 }
0x2c78   :  { %16471 = vmatprep.subr.mxu1 %v18296_v4 }
0x2c7a   :  { %v7560_v60 = vpop.permute.xlu0 %7559 }
0x2c7e   :  { %v7638_v5 = vpop.permute.xlu0 %7637 }
0x2c81   :  { %v17711_v25 = vpop.eup %17710 }
0x2c82   :  { %v7236_v44 = vsel %vm723_vm6, %v17711_v25, 0.0 }
0x2c83   :  { %7237 = vadd.xlane.f32.xlu1 %v7236_v44 }
0x2c94   :  { %7639 = vrot.lane.b32.xlu1 %v19369_v47, %s18300_s12 }
0x2caf   :  { %v19460_v39 = vpop.f32.mrb[52].mxu0 }
0x2cb0   :  { %v16435_v50 = vpop.f32.mrb[53].mxu0 }
0x2cb3   :  { %v7135_v58 = vpop.f32.mrb[54].mxu0 }
0x2cb4   :  { %v7217_v52 = vmul.f32 0.35355338, %v7135_v58  ;;  %v16445_v43 = vpop.f32.mrb[55].mxu0 }
0x2cb6   :  { %v7219_v45 = vsel %vm6735_vm8, %v7217_v52, -1e+09  ;;  %v6461_v52 = vld [vmem:[%s20395_s9 + $0x10] sm:$0xff] }
0x2cb7   :  { %v7221_v53 = vsel %vm723_vm6, %v7219_v45, -inf }
0x2cb8   :  { %7222 = vmax.xlane.f32.xlu1 %v7221_v53 }
0x2d10   :  { %v7238_v55 = vpop.xlane.xlu1 %7237 }
0x2d11   :  { %17712 = vrcp.f32 %v7238_v55 }
0x2d14   :  { %v7640_v63 = vpop.permute.xlu1 %7639 }
0x2d1b   :  { %v17713_v56 = vpop.eup %17712 }
0x2d1c   :  { %v7242_v59 = vmul.f32 %v17713_v56, %v17711_v25 }
0x2d1e   :  { %16459 = vmatmul.mubr.msk.f32.vlgmr.msra.gmra.mrb[74].mxu1 %vm723_vm6, %v7242_v59 }
0x2d1f   :  { %16472 = vmatpush3.xpose.msk.msra.mxu1 %vm723_vm6, %v7562_v54  ;;  %16473 = vmatprep.mubr.msk.f32.mxu1 %vm18297_vm5, %v18296_v4 }
0x2d20   :  { %16476 = vmatprep.subr.mxu1 %v18296_v4 }
0x2d22   :  { %16474 = vmatmul.mubr.msk.f32.vlgmr.msra.gmra.mrb[76].mxu1 %vm723_vm6, %v7560_v60 }
0x2d23   :  { %16477 = vmatpush3.xpose.msk.msra.mxu1 %vm723_vm6, %v7640_v63  ;;  %16478 = vmatprep.mubr.msk.f32.mxu1 %vm18297_vm5, %v18296_v4 }
0x2d24   :  { %16486 = vmatprep.subr.mxu1 %v18296_v4 }
0x2d26   :  { %16479 = vmatmul.mubr.msk.f32.vlgmr.msra.gmra.mrb[78].mxu1 %vm723_vm6, %v7638_v5 }
0x2d27   :  { %16488 = vmatprep.mubr.msk.f32.mxu1 %vm18297_vm5, %v18296_v4 }
0x2d45   :  { %v7223_v6 = vpop.xlane.xlu1 %7222 }
0x2d46   :  { %v7227_v8 = vsub.f32 %v7219_v45, %v7223_v6 }
0x2d48   :  { %v7229_v0 = vmul.f32 1.442695, %v7227_v8 }
0x2d4a   :  { %17714 = vpow2.f32 %v7229_v0 }
0x2d54   :  { %v17715_v9 = vpop.eup %17714 }
0x2d55   :  { %v7233_v10 = vsel %vm723_vm6, %v17715_v9, 0.0 }
0x2d56   :  { %7234 = vadd.xlane.f32.xlu0 %v7233_v10 }
0x2d6c   :  { %7244 = vrot.lane.b32.xlu0 %v19416_v15, %s18299_s3 }
0x2d70   :  { %7817 = vrot.lane.b32.xlu0 %v19418_v18, %s18300_s12 }
0x2d74   :  { %7978 = vrot.lane.b32.xlu0 %v19371_v48, %s18301_s2 }
0x2d78   :  { %8056 = vrot.lane.b32.xlu0 %v19369_v47, %s18301_s2 }
0x2d7c   :  { %7976 = vrot.lane.b32.xlu0 %v19382_v49, %s18301_s2 }
0x2de3   :  { %v7235_v20 = vpop.xlane.xlu0 %7234 }
0x2de4   :  { %17716 = vrcp.f32 %v7235_v20 }
0x2de7   :  { %v7245_v57 = vpop.permute.xlu0 %7244 }
0x2de8   :  { %16452 = vmatpush3.msra.mxu0 %v7245_v57 }
0x2de9   :  { %16461 = vmatprep.subr.mxu0 %v6460_v34 }
0x2deb   :  { %v7818_v17 = vpop.permute.xlu0 %7817 }
0x2dec   :  { %16487 = vmatpush3.msra.mxu1 %v7818_v17 }
0x2ded   :  { %16496 = vmatprep.subr.mxu1 %v18296_v4 }
0x2dee   :  { %v17717_v61 = vpop.eup %17716 }
0x2def   :  { %v7241_v62 = vmul.f32 %v17717_v61, %v17715_v9  ;;  %v7979_v45 = vpop.permute.xlu0 %7978 }
0x2df1   :  { %16454 = vmatmul.mubr.msk.f32.vlgmr.msra.gmra.mrb[56].mxu0 %vm723_vm6, %v7241_v62  ;;  %v7393_v48 = vpop.f32.mrb[74].mxu1 }
0x2df2   :  { %v16460_v19 = vpop.f32.mrb[75].mxu1  ;;  %16462 = vmatpush3.msra.mxu0 %v6460_v34 }
0x2df3   :  { %16466 = vmatprep.subr.mxu0 %v6459_v40  ;;  %v8057_v55 = vpop.permute.xlu0 %8056 }
0x2df5   :  { %v7633_v47 = vpop.f32.mrb[76].mxu1 }
0x2df6   :  { %v7715_v21 = vmul.f32 0.35355338, %v7633_v47  ;;  %v16475_v41 = vpop.f32.mrb[77].mxu1 }
0x2df7   :  { %v7977_v56 = vpop.permute.xlu0 %7976 }
0x2df8   :  { %v7717_v49 = vsel %vm6735_vm8, %v7715_v21, -1e+09 }
0x2df9   :  { %v7711_v23 = vpop.f32.mrb[78].mxu1  ;;  %v7719_v29 = vsel %vm723_vm6, %v7717_v49, -inf }
0x2dfa   :  { %v7716_v30 = vmul.f32 0.35355338, %v7711_v23  ;;  %v16480_v32 = vpop.f32.mrb[79].mxu1  ;;  %7720 = vmax.xlane.f32.xlu1 %v7719_v29  ;;  %v17886_v23 = vld [vmem:[%s20386_s18 + $0x1] ss:$0 sm:$0xff] }
0x2dfb   :  { %v4898_v29 = vadd.f32 %v17886_v23, %v19258_v1 }
0x2dfc   :  { %v7718_v33 = vsel %vm6736_vm7, %v7716_v30, -1e+09 }
0x2dfd   :  { %v7722_v35 = vsel %vm723_vm6, %v7718_v33, -inf  ;;  %v4906_v30 = vadd.f32 %v4898_v29, %v19122_v3  ;;  %v4907_v3 = vadd.f32 %v19256_v14, %v19119_v2 }
0x2dfe   :  { %7723 = vmax.xlane.f32.xlu1 %v7722_v35 }
0x2dff   :  { %v4910_v32 = vsel %vm369_vm0, %v4906_v30, 0.0  ;;  %v4913_v1 = vsel %vm369_vm0, %v4907_v3, 0.0 }
0x2e87   :  { %v7721_v24 = vpop.xlane.xlu1 %7720 }
0x2e88   :  { %v7725_v11 = vsub.f32 %v7717_v49, %v7721_v24 }
0x2e8a   :  { %v7727_v13 = vmul.f32 1.442695, %v7725_v11 }
0x2e8b   :  { %v7724_v42 = vpop.xlane.xlu1 %7723 }
0x2e8c   :  { %17718 = vpow2.f32 %v7727_v13  ;;  %v7726_v16 = vsub.f32 %v7718_v33, %v7724_v42 }
0x2e8e   :  { %v7729_v7 = vmul.f32 1.442695, %v7726_v16 }
0x2e90   :  { %17720 = vpow2.f32 %v7729_v7 }
0x2e96   :  { %v17719_v27 = vpop.eup %17718 }
0x2e97   :  { %v7731_v12 = vsel %vm723_vm6, %v17719_v27, 0.0 }
0x2e98   :  { %7732 = vadd.xlane.f32.xlu1 %v7731_v12 }
0x2e9a   :  { %v17721_v31 = vpop.eup %17720 }
0x2e9b   :  { %v7734_v25 = vsel %vm723_vm6, %v17721_v31, 0.0 }
0x2e9c   :  { %7735 = vadd.xlane.f32.xlu1 %v7734_v25 }
0x2ead   :  { %7741 = vrot.lane.b32.xlu1 %v19416_v15, %s18300_s12 }
0x2eb1   :  { %8054 = vrot.lane.b32.xlu1 %v19376_v46, %s18301_s2 }
0x2ec4   :  { %v7316_v44 = vpop.f32.mrb[56].mxu0 }
0x2ec5   :  { %v16455_v50 = vpop.f32.mrb[57].mxu0  ;;  %16463 = vmatprep.mubr.msk.f32.mxu0 %vm723_vm6, %v7316_v44 }
0x2ec6   :  { %16464 = vmatmul.mubr.msk.f32.vlgmr.msra.gmra.mrb[58].mxu0 %vm723_vm6, %v7393_v48 }
0x2ec7   :  { %16468 = vmatprep.mubr.msk.f32.mxu0 %vm723_vm6, %v19460_v39  ;;  %16467 = vmatpush3.msra.mxu0 %v6459_v40 }
0x2ec8   :  { %16481 = vmatprep.subr.mxu0 %v18296_v4 }
0x2ece   :  { %16469 = vmatmul.mubr.msk.f32.vlgmr.msra.gmra.mrb[58].mxu0 %vm723_vm6, %v19438_v36 }
0x2ecf   :  { %16483 = vmatprep.mubr.msk.f32.mxu0 %vm18297_vm5, %v18296_v4 }
0x2f25   :  { %v7733_v58 = vpop.xlane.xlu1 %7732 }
0x2f26   :  { %17722 = vrcp.f32 %v7733_v58 }
0x2f29   :  { %v7736_v46 = vpop.xlane.xlu1 %7735 }
0x2f2a   :  { %17724 = vrcp.f32 %v7736_v46 }
0x2f2d   :  { %v7742_v43 = vpop.permute.xlu1 %7741 }
0x2f2e   :  { %16482 = vmatpush3.msra.mxu0 %v7742_v43 }
0x2f2f   :  { %16491 = vmatprep.subr.mxu0 %v6461_v52 }
0x2f30   :  { %v17723_v53 = vpop.eup %17722 }
0x2f31   :  { %v7739_v39 = vmul.f32 %v17723_v53, %v17719_v27  ;;  %v8055_v6 = vpop.permute.xlu1 %8054 }
0x2f33   :  { %16484 = vmatmul.mubr.msk.f32.vlgmr.msra.gmra.mrb[60].mxu0 %vm723_vm6, %v7739_v39 }
0x2f34   :  { %v17725_v54 = vpop.eup %17724  ;;  %16492 = vmatpush3.msra.mxu0 %v6461_v52  ;;  %v15280_v52 = vld [vmem:[#allocation8] ss:$0 sm:$0xff] }
0x2f35   :  { %v7740_v36 = vmul.f32 %v17725_v54, %v17721_v31  ;;  %16501 = vmatprep.subr.mxu0 %v18296_v4 }
0x2f37   :  { %16489 = vmatmul.mubr.msk.f32.vlgmr.msra.gmra.mrb[80].mxu1 %vm723_vm6, %v7740_v36 }
0x2f38   :  { %16497 = vmatpush3.xpose.msk.msra.mxu1 %vm723_vm6, %v7979_v45  ;;  %16498 = vmatprep.mubr.msk.f32.mxu1 %vm18297_vm5, %v18296_v4 }
0x2f39   :  { %16506 = vmatprep.subr.mxu1 %v18296_v4 }
0x2f3b   :  { %16499 = vmatmul.mubr.msk.f32.vlgmr.msra.gmra.mrb[82].mxu1 %vm723_vm6, %v7977_v56 }
0x2f3c   :  { %16508 = vmatprep.mubr.msk.f32.mxu1 %vm18297_vm5, %v18296_v4 }
0x3006   :  { %v7813_v59 = vpop.f32.mrb[60].mxu0 }
0x3007   :  { %v16485_v60 = vpop.f32.mrb[61].mxu0  ;;  %16493 = vmatprep.mubr.msk.f32.mxu0 %vm723_vm6, %v7813_v59 }
0x300a   :  { %v7889_v63 = vpop.f32.mrb[80].mxu1 }
0x300b   :  { %v16490_v5 = vpop.f32.mrb[81].mxu1  ;;  %16494 = vmatmul.mubr.msk.f32.vlgmr.msra.gmra.mrb[58].mxu0 %vm723_vm6, %v7889_v63 }
0x300c   :  { %16502 = vmatpush3.xpose.msk.msra.mxu0 %vm723_vm6, %v8057_v55  ;;  %16503 = vmatprep.mubr.msk.f32.mxu0 %vm18297_vm5, %v18296_v4 }
0x300d   :  { %16511 = vmatprep.subr.mxu0 %v18296_v4 }
0x300e   :  { %v8050_v8 = vpop.f32.mrb[82].mxu1 }
0x300f   :  { %v8132_v0 = vmul.f32 0.35355338, %v8050_v8  ;;  %v16500_v9 = vpop.f32.mrb[83].mxu1  ;;  %16504 = vmatmul.mubr.msk.f32.vlgmr.msra.gmra.mrb[62].mxu0 %vm723_vm6, %v8055_v6 }
0x3010   :  { %16513 = vmatprep.mubr.msk.f32.mxu0 %vm18297_vm5, %v18296_v4 }
0x3011   :  { %v8134_v10 = vsel %vm6735_vm8, %v8132_v0, -1e+09 }
0x3012   :  { %v8136_v20 = vsel %vm723_vm6, %v8134_v10, -inf }
0x3013   :  { %8137 = vmax.xlane.f32.xlu0 %v8136_v20 }
0x30a0   :  { %v8138_v57 = vpop.xlane.xlu0 %8137 }
0x30a1   :  { %v8142_v17 = vsub.f32 %v8134_v10, %v8138_v57 }
0x30a3   :  { %v8144_v61 = vmul.f32 1.442695, %v8142_v17 }
0x30a5   :  { %17726 = vpow2.f32 %v8144_v61 }
0x30af   :  { %v17727_v62 = vpop.eup %17726 }
0x30b0   :  { %v8148_v48 = vsel %vm723_vm6, %v17727_v62, 0.0 }
0x30b1   :  { %8149 = vadd.xlane.f32.xlu0 %v8148_v48 }
0x30e2   :  { %v8128_v19 = vpop.f32.mrb[62].mxu0 }
0x30e3   :  { %v8133_v47 = vmul.f32 0.35355338, %v8128_v19  ;;  %v16505_v21 = vpop.f32.mrb[63].mxu0 }
0x30e5   :  { %v8135_v41 = vsel %vm6736_vm7, %v8133_v47, -1e+09 }
0x30e6   :  { %v8139_v49 = vsel %vm723_vm6, %v8135_v41, -inf }
0x30e7   :  { %8140 = vmax.xlane.f32.xlu1 %v8139_v49 }
0x30f8   :  { %8234 = vrot.lane.b32.xlu1 %v19418_v18, %s18301_s2 }
0x311c   :  { %4911 = vadd.xlane.f32.xlu1 %v4910_v32 }
0x313e   :  { %v8150_v18 = vpop.xlane.xlu0 %8149 }
0x3174   :  { %v8141_v33 = vpop.xlane.xlu1 %8140 }
0x3175   :  { %v8143_v35 = vsub.f32 %v8135_v41, %v8141_v33 }
0x3177   :  { %v8146_v34 = vmul.f32 1.442695, %v8143_v35  ;;  %v8463_v35 = vld [vmem:[%s20396_s23 + $0x10] sm:$0xff] }
0x3178   :  { %v8235_v40 = vpop.permute.xlu1 %8234 }
0x3179   :  { %17728 = vpow2.f32 %v8146_v34  ;;  %16512 = vmatpush3.msra.mxu0 %v8235_v40  ;;  %v8464_v34 = vld [vmem:[%s20396_s23 + $0x18] sm:$0xff] }
0x317a   :  { %17730 = vrcp.f32 %v8150_v18  ;;  %v17511_v18 = vpack.i.bf16 %v8464_v34, %v8463_v35 }
0x3183   :  { %v17729_v24 = vpop.eup %17728 }
0x3184   :  { %v8151_v11 = vsel %vm723_vm6, %v17729_v24, 0.0  ;;  %v17731_v42 = vpop.eup %17730 }
0x3185   :  { %8152 = vadd.xlane.f32.xlu0 %v8151_v11  ;;  %v8156_v7 = vmul.f32 %v17731_v42, %v17727_v62  ;;  %v8462_v42 = vld [vmem:[%s20396_s23 + $0x8] sm:$0xff] }
0x319b   :  { %8158 = vrot.lane.b32.xlu0 %v19416_v15, %s18301_s2  ;;  %v6462_v15 = vld [vmem:[%s20395_s9 + $0x18] sm:$0xff] }
0x319c   :  { %16516 = vmatprep.subr.mxu0 %v6462_v15 }
0x31a9   :  { %v4912_v50 = vpop.xlane.xlu1 %4911 }
0x31aa   :  { %v4916_v46 = vmul.f32 0.03125, %v4912_v50 }
0x31ac   :  { %v4918_v54 = vsub.f32 %v4906_v30, %v4916_v46  ;;  %v17168_v46 = vpack.c.bf16 %v8464_v34, %v8463_v35 }
0x31ae   :  { %v4920_v5 = vmul.f32 %v4918_v54, %v4918_v54 }
0x31ba   :  { %4914 = vadd.xlane.f32.xlu0 %v4913_v1 }
0x3212   :  { %v8153_v13 = vpop.xlane.xlu0 %8152 }
0x3213   :  { %17732 = vrcp.f32 %v8153_v13  ;;  %v8461_v13 = vld [vmem:[%s20396_s23] sm:$0xff] }
0x3216   :  { %v8159_v16 = vpop.permute.xlu0 %8158 }
0x3217   :  { %16507 = vmatpush3.msra.mxu1 %v8159_v16  ;;  %v17516_v16 = vpack.i.bf16 %v8462_v42, %v8461_v13 }
0x3218   :  { %16509 = vmatmul.mubr.msk.f32.vlgmr.msra.gmra.mrb[84].mxu1 %vm723_vm6, %v8156_v7  ;;  %v15197_v7 = vld [vmem:[%s20397_s26] ss:$0 sm:$0xff] }
0x321d   :  { %v17733_v27 = vpop.eup %17732 }
0x321e   :  { %v8157_v12 = vmul.f32 %v17733_v27, %v17729_v24 }
0x3220   :  { %16514 = vmatmul.mubr.msk.f32.vlgmr.msra.gmra.mrb[64].mxu0 %vm723_vm6, %v8157_v12 }
0x3221   :  { %16517 = vmatpush3.msra.mxu0 %v6462_v15  ;;  %v4954_v15 = vmul.f32 %v15197_v7, %v4918_v54 }
0x3247   :  { %v4915_v44 = vpop.xlane.xlu0 %4914 }
0x3248   :  { %v4917_v58 = vmul.f32 0.03125, %v4915_v44 }
0x324a   :  { %v19558_v45 = vsub.f32 %v4907_v3, %v4917_v58  ;;  %v17164_v58 = vpack.c.bf16 %v8462_v42, %v8461_v13 }
0x324c   :  { %v4921_v60 = vmul.f32 %v19558_v45, %v19558_v45  ;;  %v4955_v27 = vmul.f32 %v15197_v7, %v19558_v45  ;;  %17165 = vmatprep.subr.bf16.mxu1 %v17164_v58 }
0x324d   :  { %17167 = vmatpush3.bf16.msra.mxu1 %v17164_v58 }
0x324e   :  { %v4925_v6 = vsel %vm369_vm0, %v4921_v60, 0.0  ;;  %17169 = vmatprep.subr.bf16.mxu1 %v17168_v46 }
0x3251   :  { %17171 = vmatpush3.bf16.msra.mxu1 %v17168_v46 }
0x32eb   :  { %v8230_v2 = vpop.f32.mrb[84].mxu1 }
0x32ec   :  { %v16510_v14 = vpop.f32.mrb[85].mxu1  ;;  %16518 = vmatprep.mubr.msk.f32.mxu0 %vm723_vm6, %v8230_v2  ;;  %v15198_v2 = vld [vmem:[%s20398_s30] ss:$0 sm:$0xff] }
0x32f3   :  { %v8306_v31 = vpop.f32.mrb[64].mxu0 }
0x32f4   :  { %v16515_v25 = vpop.f32.mrb[65].mxu0  ;;  %16519 = vmatmul.mubr.msk.f32.vlgmr.msra.gmra.mrb[58].mxu0 %vm723_vm6, %v8306_v31 }
0x33c7   :  { %v16520_v43 = vpop.f32.mrb[58].mxu0 }
0x33c8   :  { %v8400_v53 = vadd.f32 %v16520_v43, %v15280_v52  ;;  %v8382_v39 = vpop.f32.mrb[59].mxu0 }
0x33c9   :  { %v8399_v55 = vadd.f32 %v15280_v52, %v8382_v39  ;;  %v19604_v52 = vld [vmem:[%s20399_s16] ss:$0 sm:$0xff] }
0x33ca   :  { %v19561_v36 = vadd.f32 %v8400_v53, %v19322_v37  ;;  %v4922_v37 = vsel %vm369_vm0, %v4920_v5, 0.0 }
0x33cb   :  { %v19564_v56 = vadd.f32 %v8399_v55, %v19325_v38 }
0x33cc   :  { %v8408_v59 = vsel %vm369_vm0, %v19561_v36, 0.0 }
0x33cd   :  { %8409 = vadd.xlane.f32.xlu1 %v8408_v59  ;;  %v8405_v63 = vsel %vm369_vm0, %v19564_v56, 0.0 }
0x33ce   :  { %8406 = vadd.xlane.f32.xlu0 %v8405_v63 }
0x33d1   :  { %4926 = vadd.xlane.f32.xlu1 %v4925_v6 }
0x33d2   :  { %4923 = vadd.xlane.f32.xlu0 %v4922_v37 }
0x345a   :  { %v8410_v38 = vpop.xlane.xlu1 %8409 }
0x345b   :  { %v8412_v8 = vmul.f32 0.03125, %v8410_v38  ;;  %v8407_v0 = vpop.xlane.xlu0 %8406 }
0x345c   :  { %v8411_v9 = vmul.f32 0.03125, %v8407_v0 }
0x345d   :  { %v19575_v10 = vsub.f32 %v19561_v36, %v8412_v8 }
0x345e   :  { %v19578_v20 = vsub.f32 %v19564_v56, %v8411_v9  ;;  %v4927_v57 = vpop.xlane.xlu1 %4926 }
0x345f   :  { %v4929_v17 = vmul.f32 0.032258064, %v4927_v57  ;;  %v4924_v61 = vpop.xlane.xlu0 %4923  ;;  %v8416_v62 = vmul.f32 %v19575_v10, %v19575_v10 }
0x3460   :  { %v4928_v48 = vmul.f32 0.032258064, %v4924_v61  ;;  %v8415_v19 = vmul.f32 %v19578_v20, %v19578_v20 }
0x3461   :  { %17734 = vrsqrt.f32 %v4929_v17  ;;  %v8420_v47 = vsel %vm369_vm0, %v8416_v62, 0.0  ;;  %vm4939_vm11 = vcmp.eq.f32.partialorder %v4929_v17, inf  ;;  %v4942_v29 = vand.u32 2147483648, %v4929_v17 }
0x3462   :  { %17736 = vrsqrt.f32 %v4928_v48  ;;  %v8417_v21 = vsel %vm369_vm0, %v8415_v19, 0.0  ;;  %8421 = vadd.xlane.f32.xlu1 %v8420_v47  ;;  %vm4941_vm12 = vcmp.eq.f32.partialorder %v4929_v17, 0.0  ;;  %vm4932_vm13 = vcmp.eq.f32.partialorder %v4928_v48, inf }
0x3463   :  { %8418 = vadd.xlane.f32.xlu0 %v8417_v21  ;;  %v4935_v33 = vand.u32 2147483648, %v4928_v48  ;;  %vm4934_vm14 = vcmp.eq.f32.partialorder %v4928_v48, 0.0 }
0x346b   :  { %v17735_v41 = vpop.eup %17734 }
0x346c   :  { %v17737_v49 = vpop.eup %17736  ;;  %v4938_v23 = vmul.f32 %v17735_v41, %v4929_v17 }
0x346d   :  { %v4931_v30 = vmul.f32 %v17737_v49, %v4928_v48 }
0x346e   :  { %v4940_v32 = vsel %vm4939_vm11, %v4929_v17, %v4938_v23 }
0x346f   :  { %v4943_v40 = vsel %vm4941_vm12, %v4942_v29, %v4940_v32  ;;  %v4933_v24 = vsel %vm4932_vm13, %v4928_v48, %v4931_v30  ;;  %v15281_v30 = vld [vmem:[#allocation16] ss:$0 sm:$0xff] }
0x3470   :  { %v4945_v11 = vadd.f32 1e-06, %v4943_v40  ;;  %v4936_v3 = vsel %vm4934_vm14, %v4935_v33, %v4933_v24  ;;  %v8450_v33 = vmul.f32 %v15281_v30, %v19575_v10  ;;  %v8449_v34 = vmul.f32 %v15281_v30, %v19578_v20 }
0x3471   :  { %v4944_v1 = vadd.f32 1e-06, %v4936_v3  ;;  %v15282_v3 = vld [vmem:[#allocation17] ss:$0 sm:$0xff] }
0x3472   :  { %17738 = vrcp.f32 %v4945_v11 }
0x3473   :  { %17740 = vrcp.f32 %v4944_v1  ;;  %17512 = vrot.lane.b32.xlu1 %v17511_v18, %s18294_s13 }
0x3477   :  { %17517 = vrot.lane.b32.xlu1 %v17516_v16, %s18295_s5 }
0x3479   :  { %17507 = vrot.lane.b32.xlu0 %v17516_v16, %s18294_s13 }
0x347b   :  { %17522 = vrot.lane.b32.xlu1 %v17511_v18, %s18295_s5 }
0x347c   :  { %v17739_v12 = vpop.eup %17738 }
0x347d   :  { %v17741_v14 = vpop.eup %17740  ;;  %v4957_v31 = vmul.f32 %v17739_v12, %v4955_v27  ;;  %8574 = vrot.lane.b32.xlu0 %v19604_v52, %s18294_s13 }
0x347e   :  { %v4956_v25 = vmul.f32 %v17741_v14, %v4954_v15 }
0x347f   :  { %v19597_v44 = vadd.f32 %v15198_v2, %v4957_v31 }
0x3480   :  { %v19599_v50 = vadd.f32 %v15198_v2, %v4956_v25 }
0x3482   :  { %16540 = vmatprep.mubr.msk.f32.mxu0 %vm369_vm0, %v19599_v50 }
0x34ef   :  { %v8422_v43 = vpop.xlane.xlu1 %8421 }
0x34f0   :  { %v8419_v45 = vpop.xlane.xlu0 %8418  ;;  %v8424_v53 = vmul.f32 0.032258064, %v8422_v43 }
0x34f1   :  { %v8423_v39 = vmul.f32 0.032258064, %v8419_v45 }
0x34f2   :  { %17742 = vrsqrt.f32 %v8424_v53  ;;  %vm8434_vm1 = vcmp.eq.f32.partialorder %v8424_v53, inf  ;;  %v8437_v62 = vand.u32 2147483648, %v8424_v53  ;;  %vm8436_vm2 = vcmp.eq.f32.partialorder %v8424_v53, 0.0 }
0x34f3   :  { %17744 = vrsqrt.f32 %v8423_v39  ;;  %v17513_v55 = vpop.permute.xlu1 %17512  ;;  %vm8427_vm3 = vcmp.eq.f32.partialorder %v8423_v39, inf  ;;  %v8430_v47 = vand.u32 2147483648, %v8423_v39  ;;  %vm8429_vm4 = vcmp.eq.f32.partialorder %v8423_v39, 0.0 }
0x34f4   :  { %v17508_v54 = vpop.permute.xlu0 %17507  ;;  %v17515_v63 = vunpack.i.h.bf16 %v17513_v55  ;;  %v17514_v5 = vunpack.i.l.bf16 %v17513_v55 }
0x34f5   :  { %v17510_v59 = vunpack.i.h.bf16 %v17508_v54  ;;  %v17509_v60 = vunpack.i.l.bf16 %v17508_v54 }
0x34f6   :  { %v17176_v37 = vpack.c.bf16 %v17515_v63, %v17514_v5 }
0x34f7   :  { %v17172_v6 = vpack.c.bf16 %v17510_v59, %v17509_v60  ;;  %v17518_v38 = vpop.permute.xlu1 %17517 }
0x34f8   :  { %v17520_v8 = vunpack.i.h.bf16 %v17518_v38  ;;  %v17519_v0 = vunpack.i.l.bf16 %v17518_v38  ;;  %v8575_v10 = vpop.permute.xlu0 %8574 }
0x34f9   :  { %17173 = vmatprep.subr.bf16.mxu0 %v17172_v6 }
0x34fa   :  { %17175 = vmatpush3.bf16.msra.mxu0 %v17172_v6  ;;  %v17180_v9 = vpack.c.bf16 %v17520_v8, %v17519_v0 }
0x34fb   :  { %17177 = vmatprep.subr.bf16.mxu0 %v17176_v37  ;;  %v17523_v32 = vpop.permute.xlu1 %17522 }
0x34fc   :  { %v17743_v57 = vpop.eup %17742  ;;  %17181 = vmatprep.subr.bf16.mxu1 %v17180_v9  ;;  %v17525_v24 = vunpack.i.h.bf16 %v17523_v32  ;;  %v17524_v11 = vunpack.i.l.bf16 %v17523_v32 }
0x34fd   :  { %v17745_v17 = vpop.eup %17744  ;;  %v8433_v61 = vmul.f32 %v17743_v57, %v8424_v53 }
0x34fe   :  { %17179 = vmatpush3.bf16.msra.mxu0 %v17176_v37  ;;  %v8426_v48 = vmul.f32 %v17745_v17, %v8423_v39  ;;  %v17184_v16 = vpack.c.bf16 %v17525_v24, %v17524_v11 }
0x34ff   :  { %16554 = vmatprep.subr.mxu0 %v18296_v4  ;;  %v8435_v19 = vsel %vm8434_vm1, %v8424_v53, %v8433_v61 }
0x3500   :  { %v8438_v21 = vsel %vm8436_vm2, %v8437_v62, %v8435_v19  ;;  %v8428_v41 = vsel %vm8427_vm3, %v8423_v39, %v8426_v48 }
0x3501   :  { %16541 = vmatmul.mubr.msk.f32.vlgmr.msra.gmra.mrb[66].mxu0 %vm369_vm0, %v19597_v44  ;;  %v8440_v49 = vadd.f32 1e-06, %v8438_v21  ;;  %v8431_v23 = vsel %vm8429_vm4, %v8430_v47, %v8428_v41 }
0x3502   :  { %16556 = vmatprep.mubr.msk.f32.mxu0 %vm18297_vm5, %v18296_v4  ;;  %v8439_v29 = vadd.f32 1e-06, %v8431_v23 }
0x3503   :  { %17746 = vrcp.f32 %v8440_v49 }
0x3504   :  { %17748 = vrcp.f32 %v8439_v29 }
0x350d   :  { %v17747_v35 = vpop.eup %17746 }
0x350e   :  { %v17749_v40 = vpop.eup %17748  ;;  %v8452_v1 = vmul.f32 %v17747_v35, %v8450_v33 }
0x350f   :  { %v8451_v18 = vmul.f32 %v17749_v40, %v8449_v34 }
0x3510   :  { %v8460_v42 = vadd.f32 %v15282_v3, %v8452_v1 }
0x3511   :  { %v8459_v13 = vadd.f32 %v15282_v3, %v8451_v18 }
0x3513   :  { %16529 = vmatprep.mubr.msk.f32.mxu1 %vm369_vm0, %v8459_v13 }
0x3514   :  { %16530 = vmatmul.mubr.msk.f32.vlgmr.msra.gmra.mrb[86].mxu1 %vm369_vm0, %v8460_v42 }
0x3515   :  { %17183 = vmatpush3.bf16.msra.mxu1 %v17180_v9  ;;  %16551 = vmatprep.mubr.msk.f32.mxu1 %vm369_vm0, %v19599_v50 }
0x3516   :  { %17185 = vmatprep.subr.bf16.mxu1 %v17184_v16 }
0x3519   :  { %17187 = vmatpush3.bf16.msra.mxu1 %v17184_v16 }
0x351a   :  { %16559 = vmatprep.subr.mxu1 %v18296_v4 }
0x351c   :  { %16552 = vmatmul.mubr.msk.f32.vlgmr.msra.gmra.mrb[88].mxu1 %vm369_vm0, %v19597_v44 }
0x351d   :  { %16561 = vmatprep.mubr.msk.f32.mxu1 %vm18297_vm5, %v18296_v4 }
0x35d4   :  { %v16542_v20 = vpop.f32.mrb[66].mxu0 }
0x35d5   :  { %v19624_v7 = vadd.f32 %v16542_v20, %v8575_v10  ;;  %v8649_v27 = vpop.f32.mrb[67].mxu0 }
0x35d6   :  { %v19626_v12 = vadd.f32 %v8649_v27, %v8575_v10 }
0x35d7   :  { %16560 = vmatpush3.xpose.msk.msra.mxu1 %vm723_vm6, %v19624_v7 }
0x35d8   :  { %16555 = vmatpush3.xpose.msk.msra.mxu0 %vm723_vm6, %v19626_v12  ;;  %16569 = vmatprep.subr.mxu1 %v18296_v4 }
0x35d9   :  { %16564 = vmatprep.subr.mxu0 %v18296_v4 }
0x35e7   :  { %v16531_v15 = vpop.f32.mrb[86].mxu1 }
0x35e8   :  { %v19635_v2 = vadd.f32 %v16531_v15, %v19604_v52  ;;  %v8549_v14 = vpop.f32.mrb[87].mxu1 }
0x35e9   :  { %v19638_v31 = vadd.f32 %v19604_v52, %v8549_v14 }
0x35ea   :  { %16562 = vmatmul.mubr.msk.f32.vlgmr.msra.gmra.mrb[90].mxu1 %vm723_vm6, %v19635_v2 }
0x35eb   :  { %16557 = vmatmul.mubr.msk.f32.vlgmr.msra.gmra.mrb[68].mxu0 %vm723_vm6, %v19638_v31  ;;  %16571 = vmatprep.mubr.msk.f32.mxu1 %vm18297_vm5, %v18296_v4 }
0x35ec   :  { %16566 = vmatprep.mubr.msk.f32.mxu0 %vm18297_vm5, %v18296_v4 }
0x35ef   :  { %v16553_v25 = vpop.f32.mrb[88].mxu1 }
0x35f0   :  { %v8739_v58 = vpop.f32.mrb[89].mxu1 }
0x36bd   :  { %v8896_v46 = vpop.f32.mrb[90].mxu1 }
0x36be   :  { %v8901_v43 = vmul.f32 0.35355338, %v8896_v46  ;;  %v8820_v45 = vpop.f32.mrb[68].mxu0  ;;  %v16563_v53 = vpop.f32.mrb[91].mxu1 }
0x36bf   :  { %v16558_v39 = vpop.f32.mrb[69].mxu0  ;;  %v8900_v37 = vmul.f32 0.35355338, %v8820_v45 }
0x36c0   :  { %v8903_v54 = vsel %vm722_vm9, %v8901_v43, -1e+09 }
0x36c1   :  { %v8907_v55 = vsel %vm723_vm6, %v8903_v54, -inf  ;;  %v8902_v38 = vsel %vm721_vm10, %v8900_v37, -1e+09 }
0x36c2   :  { %8908 = vmax.xlane.f32.xlu1 %v8907_v55  ;;  %v8904_v8 = vsel %vm723_vm6, %v8902_v38, -inf }
0x36d3   :  { %9152 = vrot.lane.b32.xlu1 %v19624_v7, %s18299_s3 }
0x36d7   :  { %9150 = vrot.lane.b32.xlu1 %v19635_v2, %s18299_s3 }
0x374f   :  { %v8909_v59 = vpop.xlane.xlu1 %8908 }
0x3750   :  { %v8911_v60 = vsub.f32 %v8903_v54, %v8909_v59 }
0x3752   :  { %v8914_v63 = vmul.f32 1.442695, %v8911_v60 }
0x3753   :  { %v9153_v61 = vpop.permute.xlu1 %9152 }
0x3754   :  { %17750 = vpow2.f32 %v8914_v63 }
0x3757   :  { %v9151_v48 = vpop.permute.xlu1 %9150 }
0x375e   :  { %v17751_v5 = vpop.eup %17750 }
0x375f   :  { %v8919_v6 = vsel %vm723_vm6, %v17751_v5, 0.0 }
0x3760   :  { %8920 = vadd.xlane.f32.xlu0 %v8919_v6 }
0x3776   :  { %8670 = vrot.lane.b32.xlu0 %v19604_v52, %s18295_s5 }
0x3795   :  { %8905 = vmax.xlane.f32.xlu0 %v8904_v8 }
0x37ab   :  { %9074 = vrot.lane.b32.xlu0 %v19626_v12, %s18299_s3 }
0x37ed   :  { %v8921_v0 = vpop.xlane.xlu0 %8920 }
0x37ee   :  { %17752 = vrcp.f32 %v8921_v0 }
0x37f1   :  { %v8671_v9 = vpop.permute.xlu0 %8670 }
0x37f2   :  { %v19663_v57 = vadd.f32 %v8739_v58, %v8671_v9  ;;  %v19665_v17 = vadd.f32 %v16553_v25, %v8671_v9 }
0x37f4   :  { %16565 = vmatpush3.msra.mxu0 %v19663_v57  ;;  %16570 = vmatpush3.msra.mxu1 %v19665_v17 }
0x37f5   :  { %16579 = vmatprep.subr.mxu1 %v18296_v4  ;;  %16574 = vmatprep.subr.mxu0 %v18296_v4 }
0x37f8   :  { %v17753_v52 = vpop.eup %17752 }
0x37f9   :  { %v8925_v62 = vmul.f32 %v17753_v52, %v17751_v5 }
0x37fb   :  { %16572 = vmatmul.mubr.msk.f32.vlgmr.msra.gmra.mrb[92].mxu1 %vm723_vm6, %v8925_v62 }
0x37fc   :  { %16580 = vmatpush3.xpose.msk.msra.mxu1 %vm723_vm6, %v9153_v61  ;;  %16581 = vmatprep.mubr.msk.f32.mxu1 %vm18297_vm5, %v18296_v4 }
0x37fd   :  { %16589 = vmatprep.subr.mxu1 %v18296_v4 }
0x37ff   :  { %16582 = vmatmul.mubr.msk.f32.vlgmr.msra.gmra.mrb[94].mxu1 %vm723_vm6, %v9151_v48 }
0x3800   :  { %16591 = vmatprep.mubr.msk.f32.mxu1 %vm18297_vm5, %v18296_v4 }
0x3822   :  { %v8906_v19 = vpop.xlane.xlu0 %8905 }
0x3823   :  { %v8910_v47 = vsub.f32 %v8902_v38, %v8906_v19 }
0x3825   :  { %v8912_v21 = vmul.f32 1.442695, %v8910_v47 }
0x3826   :  { %v9075_v32 = vpop.permute.xlu0 %9074 }
0x3827   :  { %17754 = vpow2.f32 %v8912_v21 }
0x3831   :  { %v17755_v41 = vpop.eup %17754 }
0x3832   :  { %v8916_v49 = vsel %vm723_vm6, %v17755_v41, 0.0 }
0x3833   :  { %8917 = vadd.xlane.f32.xlu1 %v8916_v49 }
0x3844   :  { %9072 = vrot.lane.b32.xlu1 %v19638_v31, %s18299_s3 }
0x3848   :  { %9572 = vrot.lane.b32.xlu1 %v19626_v12, %s18300_s12 }
0x38c0   :  { %v8918_v23 = vpop.xlane.xlu1 %8917 }
0x38c1   :  { %17756 = vrcp.f32 %v8918_v23 }
0x38c4   :  { %v9073_v34 = vpop.permute.xlu1 %9072 }
0x38c8   :  { %v9573_v45 = vpop.permute.xlu1 %9572 }
0x38cb   :  { %v17757_v29 = vpop.eup %17756 }
0x38cc   :  { %v8924_v30 = vmul.f32 %v17757_v29, %v17755_v41 }
0x38ce   :  { %16567 = vmatmul.mubr.msk.f32.vlgmr.msra.gmra.mrb[70].mxu0 %vm723_vm6, %v8924_v30  ;;  %v19685_v33 = vpop.f32.mrb[92].mxu1  ;;  %v8467_v30 = vld [vmem:[%s20400_s8 + $0x8] sm:$0xff] }
0x38cf   :  { %16575 = vmatpush3.xpose.msk.msra.mxu0 %vm723_vm6, %v9075_v32  ;;  %v16573_v35 = vpop.f32.mrb[93].mxu1  ;;  %16576 = vmatprep.mubr.msk.f32.mxu0 %vm18297_vm5, %v18296_v4  ;;  %v8466_v32 = vld [vmem:[%s20400_s8] sm:$0xff] }
0x38d0   :  { %16584 = vmatprep.subr.mxu0 %v18296_v4 }
0x38d2   :  { %16577 = vmatmul.mubr.msk.f32.vlgmr.msra.gmra.mrb[72].mxu0 %vm723_vm6, %v9073_v34  ;;  %v9224_v40 = vpop.f32.mrb[94].mxu1 }
0x38d3   :  { %v9229_v24 = vmul.f32 0.35355338, %v9224_v40  ;;  %v16583_v11 = vpop.f32.mrb[95].mxu1  ;;  %16586 = vmatprep.mubr.msk.f32.mxu0 %vm18297_vm5, %v18296_v4 }
0x38d5   :  { %v9231_v3 = vsel %vm722_vm9, %v9229_v24, -1e+09 }
0x38d6   :  { %v9235_v1 = vsel %vm723_vm6, %v9231_v3, -inf }
0x38d7   :  { %9236 = vmax.xlane.f32.xlu0 %v9235_v1 }
0x38ed   :  { %9332 = vrot.lane.b32.xlu0 %v19665_v17, %s18299_s3 }
0x38f1   :  { %9570 = vrot.lane.b32.xlu0 %v19638_v31, %s18300_s12 }
0x38f5   :  { %9648 = vrot.lane.b32.xlu0 %v19635_v2, %s18300_s12 }
0x3964   :  { %v9237_v18 = vpop.xlane.xlu0 %9236 }
0x3965   :  { %v9239_v13 = vsub.f32 %v9231_v3, %v9237_v18 }
0x3967   :  { %v9242_v42 = vmul.f32 1.442695, %v9239_v13 }
0x3968   :  { %v9333_v16 = vpop.permute.xlu0 %9332 }
0x3969   :  { %17758 = vpow2.f32 %v9242_v42  ;;  %16590 = vmatpush3.msra.mxu1 %v9333_v16 }
0x396a   :  { %16604 = vmatprep.subr.mxu1 %v18296_v4 }
0x396c   :  { %v9571_v55 = vpop.permute.xlu0 %9570 }
0x3970   :  { %v9649_v60 = vpop.permute.xlu0 %9648 }
0x3973   :  { %v17759_v10 = vpop.eup %17758 }
0x3974   :  { %v9247_v20 = vsel %vm723_vm6, %v17759_v10, 0.0 }
0x3975   :  { %9248 = vadd.xlane.f32.xlu1 %v9247_v20 }
0x3986   :  { %9650 = vrot.lane.b32.xlu1 %v19624_v7, %s18300_s12 }
0x39a1   :  { %v19707_v27 = vpop.f32.mrb[70].mxu0 }
0x39a2   :  { %v16568_v15 = vpop.f32.mrb[71].mxu0 }
0x39a3   :  { %v8468_v15 = vld [vmem:[%s20400_s8 + $0x10] sm:$0xff] }
0x39a5   :  { %v9146_v14 = vpop.f32.mrb[72].mxu0 }
0x39a6   :  { %v9228_v25 = vmul.f32 0.35355338, %v9146_v14  ;;  %v16578_v58 = vpop.f32.mrb[73].mxu0 }
0x39a8   :  { %v9230_v46 = vsel %vm721_vm10, %v9228_v25, -1e+09 }
0x39a9   :  { %v9232_v43 = vsel %vm723_vm6, %v9230_v46, -inf }
0x39aa   :  { %9233 = vmax.xlane.f32.xlu1 %v9232_v43 }
0x3a02   :  { %v9249_v53 = vpop.xlane.xlu1 %9248 }
0x3a03   :  { %17760 = vrcp.f32 %v9249_v53 }
0x3a06   :  { %v9651_v59 = vpop.permute.xlu1 %9650 }
0x3a0d   :  { %v17761_v39 = vpop.eup %17760 }
0x3a0e   :  { %v9253_v54 = vmul.f32 %v17761_v39, %v17759_v10 }
0x3a10   :  { %16592 = vmatmul.mubr.msk.f32.vlgmr.msra.gmra.mrb[96].mxu1 %vm723_vm6, %v9253_v54 }
0x3a11   :  { %16605 = vmatpush3.xpose.msk.msra.mxu1 %vm723_vm6, %v9573_v45  ;;  %16606 = vmatprep.mubr.msk.f32.mxu1 %vm18297_vm5, %v18296_v4 }
0x3a12   :  { %16609 = vmatprep.subr.mxu1 %v18296_v4 }
0x3a14   :  { %16607 = vmatmul.mubr.msk.f32.vlgmr.msra.gmra.mrb[98].mxu1 %vm723_vm6, %v9571_v55 }
0x3a15   :  { %16610 = vmatpush3.xpose.msk.msra.mxu1 %vm723_vm6, %v9651_v59  ;;  %16611 = vmatprep.mubr.msk.f32.mxu1 %vm18297_vm5, %v18296_v4 }
0x3a16   :  { %16619 = vmatprep.subr.mxu1 %v18296_v4 }
0x3a18   :  { %16612 = vmatmul.mubr.msk.f32.vlgmr.msra.gmra.mrb[100].mxu1 %vm723_vm6, %v9649_v60 }
0x3a19   :  { %16621 = vmatprep.mubr.msk.f32.mxu1 %vm18297_vm5, %v18296_v4 }
0x3a37   :  { %v9234_v63 = vpop.xlane.xlu1 %9233 }
0x3a38   :  { %v9238_v5 = vsub.f32 %v9230_v46, %v9234_v63 }
0x3a3a   :  { %v9240_v6 = vmul.f32 1.442695, %v9238_v5 }
0x3a3c   :  { %17762 = vpow2.f32 %v9240_v6 }
0x3a46   :  { %v17763_v37 = vpop.eup %17762 }
0x3a47   :  { %v9244_v38 = vsel %vm723_vm6, %v17763_v37, 0.0 }
0x3a48   :  { %9245 = vadd.xlane.f32.xlu0 %v9244_v38 }
0x3a5e   :  { %9255 = vrot.lane.b32.xlu0 %v19663_v57, %s18299_s3 }
0x3a62   :  { %9828 = vrot.lane.b32.xlu0 %v19665_v17, %s18300_s12 }
0x3a66   :  { %9989 = vrot.lane.b32.xlu0 %v19626_v12, %s18301_s2 }
0x3a6a   :  { %10067 = vrot.lane.b32.xlu0 %v19624_v7, %s18301_s2 }
0x3a6e   :  { %9987 = vrot.lane.b32.xlu0 %v19638_v31, %s18301_s2 }
0x3ad5   :  { %v9246_v8 = vpop.xlane.xlu0 %9245 }
0x3ad6   :  { %17764 = vrcp.f32 %v9246_v8 }
0x3ad9   :  { %v9256_v0 = vpop.permute.xlu0 %9255 }
0x3ada   :  { %16585 = vmatpush3.msra.mxu0 %v9256_v0 }
0x3adb   :  { %16594 = vmatprep.subr.mxu0 %v8467_v30 }
0x3add   :  { %v9829_v9 = vpop.permute.xlu0 %9828 }
0x3ade   :  { %16620 = vmatpush3.msra.mxu1 %v9829_v9 }
0x3adf   :  { %16629 = vmatprep.subr.mxu1 %v18296_v4 }
0x3ae0   :  { %v17765_v52 = vpop.eup %17764 }
0x3ae1   :  { %v9252_v61 = vmul.f32 %v17765_v52, %v17763_v37  ;;  %v9990_v25 = vpop.permute.xlu0 %9989 }
0x3ae3   :  { %16587 = vmatmul.mubr.msk.f32.vlgmr.msra.gmra.mrb[74].mxu0 %vm723_vm6, %v9252_v61  ;;  %v9404_v12 = vpop.f32.mrb[96].mxu1 }
0x3ae4   :  { %v16593_v62 = vpop.f32.mrb[97].mxu1  ;;  %16595 = vmatpush3.msra.mxu0 %v8467_v30 }
0x3ae5   :  { %16599 = vmatprep.subr.mxu0 %v8466_v32  ;;  %v10068_v43 = vpop.permute.xlu0 %10067 }
0x3ae7   :  { %v9644_v7 = vpop.f32.mrb[98].mxu1 }
0x3ae8   :  { %v9726_v48 = vmul.f32 0.35355338, %v9644_v7  ;;  %v16608_v19 = vpop.f32.mrb[99].mxu1 }
0x3ae9   :  { %v9988_v45 = vpop.permute.xlu0 %9987 }
0x3aea   :  { %v9728_v31 = vsel %vm721_vm10, %v9726_v48, -1e+09 }
0x3aeb   :  { %v9722_v47 = vpop.f32.mrb[100].mxu1  ;;  %v9730_v21 = vsel %vm723_vm6, %v9728_v31, -inf }
0x3aec   :  { %v9727_v41 = vmul.f32 0.35355338, %v9722_v47  ;;  %v16613_v49 = vpop.f32.mrb[101].mxu1  ;;  %9731 = vmax.xlane.f32.xlu1 %v9730_v21 }
0x3aee   :  { %v9729_v23 = vsel %vm722_vm9, %v9727_v41, -1e+09 }
0x3aef   :  { %v9733_v29 = vsel %vm723_vm6, %v9729_v23, -inf }
0x3af0   :  { %9734 = vmax.xlane.f32.xlu1 %v9733_v29 }
0x3b79   :  { %v9732_v35 = vpop.xlane.xlu1 %9731 }
0x3b7a   :  { %v9736_v34 = vsub.f32 %v9728_v31, %v9732_v35 }
0x3b7c   :  { %v9738_v40 = vmul.f32 1.442695, %v9736_v34 }
0x3b7d   :  { %v9735_v24 = vpop.xlane.xlu1 %9734 }
0x3b7e   :  { %17766 = vpow2.f32 %v9738_v40  ;;  %v9737_v11 = vsub.f32 %v9729_v23, %v9735_v24  ;;  %v8469_v40 = vld [vmem:[%s20400_s8 + $0x18] sm:$0xff] }
0x3b80   :  { %v9740_v3 = vmul.f32 1.442695, %v9737_v11 }
0x3b82   :  { %17768 = vpow2.f32 %v9740_v3 }
0x3b88   :  { %v17767_v1 = vpop.eup %17766 }
0x3b89   :  { %v9742_v18 = vsel %vm723_vm6, %v17767_v1, 0.0 }
0x3b8a   :  { %9743 = vadd.xlane.f32.xlu1 %v9742_v18 }
0x3b8c   :  { %v17769_v13 = vpop.eup %17768 }
0x3b8d   :  { %v9745_v42 = vsel %vm723_vm6, %v17769_v13, 0.0 }
0x3b8e   :  { %9746 = vadd.xlane.f32.xlu1 %v9745_v42 }
0x3b9f   :  { %9752 = vrot.lane.b32.xlu1 %v19663_v57, %s18300_s12 }
0x3ba3   :  { %10065 = vrot.lane.b32.xlu1 %v19635_v2, %s18301_s2 }
0x3bb6   :  { %v9327_v16 = vpop.f32.mrb[74].mxu0 }
0x3bb7   :  { %v16588_v10 = vpop.f32.mrb[75].mxu0  ;;  %16596 = vmatprep.mubr.msk.f32.mxu0 %vm723_vm6, %v9327_v16 }
0x3bb8   :  { %16597 = vmatmul.mubr.msk.f32.vlgmr.msra.gmra.mrb[76].mxu0 %vm723_vm6, %v9404_v12 }
0x3bb9   :  { %16601 = vmatprep.mubr.msk.f32.mxu0 %vm723_vm6, %v19707_v27  ;;  %16600 = vmatpush3.msra.mxu0 %v8466_v32 }
0x3bba   :  { %16614 = vmatprep.subr.mxu0 %v18296_v4 }
0x3bc0   :  { %16602 = vmatmul.mubr.msk.f32.vlgmr.msra.gmra.mrb[76].mxu0 %vm723_vm6, %v19685_v33 }
0x3bc1   :  { %16616 = vmatprep.mubr.msk.f32.mxu0 %vm18297_vm5, %v18296_v4 }
0x3c17   :  { %v9744_v20 = vpop.xlane.xlu1 %9743 }
0x3c18   :  { %17770 = vrcp.f32 %v9744_v20 }
0x3c1b   :  { %v9747_v2 = vpop.xlane.xlu1 %9746 }
0x3c1c   :  { %17772 = vrcp.f32 %v9747_v2 }
0x3c1f   :  { %v9753_v14 = vpop.permute.xlu1 %9752 }
0x3c20   :  { %16615 = vmatpush3.msra.mxu0 %v9753_v14 }
0x3c21   :  { %16624 = vmatprep.subr.mxu0 %v8468_v15 }
0x3c22   :  { %v17771_v58 = vpop.eup %17770 }
0x3c23   :  { %v9750_v27 = vmul.f32 %v17771_v58, %v17767_v1  ;;  %v10066_v59 = vpop.permute.xlu1 %10065  ;;  %v15322_v1 = vld [vmem:[%s20401_s0] ss:$0 sm:$0xff] }
0x3c25   :  { %16617 = vmatmul.mubr.msk.f32.vlgmr.msra.gmra.mrb[78].mxu0 %vm723_vm6, %v9750_v27 }
0x3c26   :  { %v17773_v46 = vpop.eup %17772  ;;  %16625 = vmatpush3.msra.mxu0 %v8468_v15 }
0x3c27   :  { %v9751_v33 = vmul.f32 %v17773_v46, %v17769_v13  ;;  %16634 = vmatprep.subr.mxu0 %v18296_v4 }
0x3c29   :  { %16622 = vmatmul.mubr.msk.f32.vlgmr.msra.gmra.mrb[102].mxu1 %vm723_vm6, %v9751_v33 }
0x3c2a   :  { %16630 = vmatpush3.xpose.msk.msra.mxu1 %vm723_vm6, %v9990_v25  ;;  %16631 = vmatprep.mubr.msk.f32.mxu1 %vm18297_vm5, %v18296_v4 }
0x3c2b   :  { %16639 = vmatprep.subr.mxu1 %v18296_v4 }
0x3c2d   :  { %16632 = vmatmul.mubr.msk.f32.vlgmr.msra.gmra.mrb[104].mxu1 %vm723_vm6, %v9988_v45 }
0x3c2e   :  { %16641 = vmatprep.mubr.msk.f32.mxu1 %vm18297_vm5, %v18296_v4 }
0x3cf8   :  { %v9824_v53 = vpop.f32.mrb[78].mxu0 }
0x3cf9   :  { %v16618_v39 = vpop.f32.mrb[79].mxu0  ;;  %16626 = vmatprep.mubr.msk.f32.mxu0 %vm723_vm6, %v9824_v53  ;;  %v10472_v53 = vld [vmem:[%s20402_s28] sm:$0xff] }
0x3cfa   :  { %v10473_v39 = vld [vmem:[%s20402_s28 + $0x8] sm:$0xff] }
0x3cfc   :  { %v9900_v54 = vpop.f32.mrb[102].mxu1 }
0x3cfd   :  { %v16623_v55 = vpop.f32.mrb[103].mxu1  ;;  %16627 = vmatmul.mubr.msk.f32.vlgmr.msra.gmra.mrb[76].mxu0 %vm723_vm6, %v9900_v54  ;;  %v10474_v54 = vld [vmem:[%s20402_s28 + $0x10] sm:$0xff] }
0x3cfe   :  { %16635 = vmatpush3.xpose.msk.msra.mxu0 %vm723_vm6, %v10068_v43  ;;  %16636 = vmatprep.mubr.msk.f32.mxu0 %vm18297_vm5, %v18296_v4  ;;  %v17188_v55 = vpack.c.bf16 %v10473_v39, %v10472_v53 }
0x3cff   :  { %16644 = vmatprep.subr.mxu0 %v18296_v4 }
0x3d00   :  { %v10061_v60 = vpop.f32.mrb[104].mxu1 }
0x3d01   :  { %v10143_v63 = vmul.f32 0.35355338, %v10061_v60  ;;  %v16633_v5 = vpop.f32.mrb[105].mxu1  ;;  %16637 = vmatmul.mubr.msk.f32.vlgmr.msra.gmra.mrb[80].mxu0 %vm723_vm6, %v10066_v59  ;;  %v10475_v59 = vld [vmem:[%s20402_s28 + $0x18] sm:$0xff] }
0x3d02   :  { %16646 = vmatprep.mubr.msk.f32.mxu0 %vm18297_vm5, %v18296_v4  ;;  %v17192_v60 = vpack.c.bf16 %v10475_v59, %v10474_v54  ;;  %v10478_v5 = vld [vmem:[%s20403_s17 + $0x8] sm:$0xff] }
0x3d03   :  { %v10145_v6 = vsel %vm721_vm10, %v10143_v63, -1e+09  ;;  %v10477_v63 = vld [vmem:[%s20403_s17] sm:$0xff] }
0x3d04   :  { %v10147_v37 = vsel %vm723_vm6, %v10145_v6, -inf }
0x3d05   :  { %10148 = vmax.xlane.f32.xlu0 %v10147_v37  ;;  %v17196_v37 = vpack.c.bf16 %v10478_v5, %v10477_v63 }
0x3d92   :  { %v10149_v38 = vpop.xlane.xlu0 %10148 }
0x3d93   :  { %v10153_v8 = vsub.f32 %v10145_v6, %v10149_v38  ;;  %v10479_v6 = vld [vmem:[%s20403_s17 + $0x10] sm:$0xff]  ;;  %v10480_v38 = vld [vmem:[%s20403_s17 + $0x18] sm:$0xff] }
0x3d95   :  { %v10155_v0 = vmul.f32 1.442695, %v10153_v8  ;;  %v17200_v8 = vpack.c.bf16 %v10480_v38, %v10479_v6 }
0x3d97   :  { %17774 = vpow2.f32 %v10155_v0  ;;  %v10481_v0 = vld [vmem:[%s20403_s17 + $0x20] sm:$0xff] }
0x3da1   :  { %v17775_v9 = vpop.eup %17774 }
0x3da2   :  { %v10159_v52 = vsel %vm723_vm6, %v17775_v9, 0.0 }
0x3da3   :  { %10160 = vadd.xlane.f32.xlu0 %v10159_v52 }
0x3dd4   :  { %v10139_v61 = vpop.f32.mrb[80].mxu0 }
0x3dd5   :  { %v10144_v12 = vmul.f32 0.35355338, %v10139_v61  ;;  %v16638_v62 = vpop.f32.mrb[81].mxu0 }
0x3dd7   :  { %v10146_v7 = vsel %vm722_vm9, %v10144_v12, -1e+09 }
0x3dd8   :  { %v10150_v48 = vsel %vm723_vm6, %v10146_v7, -inf }
0x3dd9   :  { %10151 = vmax.xlane.f32.xlu1 %v10150_v48 }
0x3dea   :  { %10245 = vrot.lane.b32.xlu1 %v19665_v17, %s18301_s2 }
0x3e30   :  { %v10161_v23 = vpop.xlane.xlu0 %10160 }
0x3e66   :  { %v10152_v19 = vpop.xlane.xlu1 %10151 }
0x3e67   :  { %v10154_v31 = vsub.f32 %v10146_v7, %v10152_v19 }
0x3e69   :  { %v10157_v47 = vmul.f32 1.442695, %v10154_v31 }
0x3e6a   :  { %v10246_v21 = vpop.permute.xlu1 %10245 }
0x3e6b   :  { %17776 = vpow2.f32 %v10157_v47  ;;  %16645 = vmatpush3.msra.mxu0 %v10246_v21 }
0x3e6c   :  { %17778 = vrcp.f32 %v10161_v23  ;;  %16649 = vmatprep.subr.mxu0 %v8469_v40 }
0x3e75   :  { %v17777_v41 = vpop.eup %17776 }
0x3e76   :  { %v10162_v49 = vsel %vm723_vm6, %v17777_v41, 0.0  ;;  %v17779_v30 = vpop.eup %17778 }
0x3e77   :  { %10163 = vadd.xlane.f32.xlu0 %v10162_v49  ;;  %v10167_v32 = vmul.f32 %v17779_v30, %v17775_v9  ;;  %v10482_v9 = vld [vmem:[%s20403_s17 + $0x28] sm:$0xff] }
0x3e78   :  { %v17204_v52 = vpack.c.bf16 %v10482_v9, %v10481_v0  ;;  %v15335_v9 = vld [vmem:[%s20393_s25 + $0x30] sm:$0xff] }
0x3e8d   :  { %10169 = vrot.lane.b32.xlu0 %v19663_v57, %s18301_s2 }
0x3f04   :  { %v10164_v29 = vpop.xlane.xlu0 %10163 }
0x3f05   :  { %17780 = vrcp.f32 %v10164_v29 }
0x3f08   :  { %v10170_v17 = vpop.permute.xlu0 %10169 }
0x3f09   :  { %16640 = vmatpush3.msra.mxu1 %v10170_v17 }
0x3f0a   :  { %16642 = vmatmul.mubr.msk.f32.vlgmr.msra.gmra.mrb[106].mxu1 %vm723_vm6, %v10167_v32  ;;  %17189 = vmatprep.subr.bf16.mxu1 %v17188_v55 }
0x3f0b   :  { %17191 = vmatpush3.bf16.msra.mxu1 %v17188_v55 }
0x3f0c   :  { %17193 = vmatprep.subr.bf16.mxu1 %v17192_v60 }
0x3f0f   :  { %v17781_v35 = vpop.eup %17780  ;;  %17195 = vmatpush3.bf16.msra.mxu1 %v17192_v60 }
0x3f10   :  { %v10168_v34 = vmul.f32 %v17781_v35, %v17777_v41  ;;  %v15323_v35 = vld [vmem:[#allocation19] ss:$0 sm:$0xff] }
0x3f12   :  { %16647 = vmatmul.mubr.msk.f32.vlgmr.msra.gmra.mrb[82].mxu0 %vm723_vm6, %v10168_v34 }
0x3f13   :  { %16650 = vmatpush3.msra.mxu0 %v8469_v40 }
0x3f14   :  { %17197 = vmatprep.subr.bf16.mxu0 %v17196_v37 }
0x3fdd   :  { %v10241_v24 = vpop.f32.mrb[106].mxu1 }
0x3fde   :  { %v16643_v57 = vpop.f32.mrb[107].mxu1  ;;  %16651 = vmatprep.mubr.msk.f32.mxu0 %vm723_vm6, %v10241_v24 }
0x3fe5   :  { %v10317_v11 = vpop.f32.mrb[82].mxu0 }
0x3fe6   :  { %v16648_v3 = vpop.f32.mrb[83].mxu0  ;;  %16652 = vmatmul.mubr.msk.f32.vlgmr.msra.gmra.mrb[76].mxu0 %vm723_vm6, %v10317_v11  ;;  %v15324_v11 = vld [vmem:[#allocation20] ss:$0 sm:$0xff] }
0x3fe7   :  { %17199 = vmatpush3.bf16.msra.mxu0 %v17196_v37 }
0x3fe8   :  { %17201 = vmatprep.subr.bf16.mxu0 %v17200_v8 }
0x3feb   :  { %17203 = vmatpush3.bf16.msra.mxu0 %v17200_v8 }
0x3fec   :  { %17205 = vmatprep.subr.bf16.mxu0 %v17204_v52 }
0x3fef   :  { %17207 = vmatpush3.bf16.msra.mxu0 %v17204_v52  ;;  %v15336_v52 = vld [vmem:[%s20393_s25 + $0x38] sm:$0xff] }
0x40b9   :  { %v16653_v18 = vpop.f32.mrb[76].mxu0 }
0x40ba   :  { %v10411_v13 = vadd.f32 %v16653_v18, %v15322_v1  ;;  %v10393_v42 = vpop.f32.mrb[77].mxu0 }
0x40bb   :  { %v10410_v16 = vadd.f32 %v15322_v1, %v10393_v42  ;;  %v10483_v42 = vld [vmem:[%s20403_s17 + $0x30] sm:$0xff] }
0x40bc   :  { %v19800_v10 = vadd.f32 %v10411_v13, %v19561_v36 }
0x40bd   :  { %v19803_v20 = vadd.f32 %v10410_v16, %v19564_v56  ;;  %v10484_v16 = vld [vmem:[%s20403_s17 + $0x38] sm:$0xff] }
0x40be   :  { %v10419_v2 = vsel %vm369_vm0, %v19800_v10, 0.0 }
0x40bf   :  { %10420 = vadd.xlane.f32.xlu0 %v10419_v2  ;;  %v10416_v15 = vsel %vm369_vm0, %v19803_v20, 0.0  ;;  %v17208_v2 = vpack.c.bf16 %v10484_v16, %v10483_v42 }
0x40c0   :  { %10417 = vadd.xlane.f32.xlu1 %v10416_v15  ;;  %v15325_v15 = vld [vmem:[#allocation10] ss:$0 sm:$0xff] }
0x40c1   :  { %17209 = vmatprep.subr.bf16.mxu0 %v17208_v2 }
0x40c2   :  { %17211 = vmatpush3.bf16.msra.mxu0 %v17208_v2 }
0x414c   :  { %v10421_v14 = vpop.xlane.xlu0 %10420 }
0x414d   :  { %v10423_v25 = vmul.f32 0.03125, %v10421_v14  ;;  %v10418_v58 = vpop.xlane.xlu1 %10417 }
0x414e   :  { %v10422_v36 = vmul.f32 0.03125, %v10418_v58 }
0x414f   :  { %v10425_v27 = vsub.f32 %v19800_v10, %v10423_v25 }
0x4150   :  { %v10424_v56 = vsub.f32 %v19803_v20, %v10422_v36 }
0x4151   :  { %v10427_v46 = vmul.f32 %v10425_v27, %v10425_v27  ;;  %v10461_v34 = vmul.f32 %v15323_v35, %v10425_v27 }
0x4152   :  { %v10426_v43 = vmul.f32 %v10424_v56, %v10424_v56  ;;  %v10460_v24 = vmul.f32 %v15323_v35, %v10424_v56 }
0x4153   :  { %v10431_v33 = vsel %vm369_vm0, %v10427_v46, 0.0  ;;  %v15328_v46 = vld [vmem:[#allocation11] ss:$0 sm:$0xff] }
0x4154   :  { %10432 = vadd.xlane.f32.xlu1 %v10431_v33  ;;  %v10428_v45 = vsel %vm369_vm0, %v10426_v43, 0.0 }
0x4155   :  { %10429 = vadd.xlane.f32.xlu0 %v10428_v45 }
0x41e1   :  { %v10433_v61 = vpop.xlane.xlu1 %10432 }
0x41e2   :  { %v10435_v12 = vmul.f32 0.032258064, %v10433_v61  ;;  %v10430_v62 = vpop.xlane.xlu0 %10429  ;;  %v17531_v61 = vpack.i.bf16 %v15336_v52, %v15335_v9 }
0x41e3   :  { %v10434_v7 = vmul.f32 0.032258064, %v10430_v62  ;;  %v15334_v62 = vld [vmem:[%s20393_s25 + $0x28] sm:$0xff] }
0x41e4   :  { %17782 = vrsqrt.f32 %v10435_v12  ;;  %vm10445_vm11 = vcmp.eq.f32.partialorder %v10435_v12, inf  ;;  %v10448_v47 = vand.u32 2147483648, %v10435_v12  ;;  %vm10447_vm12 = vcmp.eq.f32.partialorder %v10435_v12, 0.0 }
0x41e5   :  { %17784 = vrsqrt.f32 %v10434_v7  ;;  %vm10438_vm13 = vcmp.eq.f32.partialorder %v10434_v7, inf  ;;  %v10441_v49 = vand.u32 2147483648, %v10434_v7  ;;  %vm10440_vm14 = vcmp.eq.f32.partialorder %v10434_v7, 0.0 }
0x41ee   :  { %v17783_v48 = vpop.eup %17782 }
0x41ef   :  { %v17785_v19 = vpop.eup %17784  ;;  %v10444_v31 = vmul.f32 %v17783_v48, %v10435_v12 }
0x41f0   :  { %v10437_v21 = vmul.f32 %v17785_v19, %v10434_v7 }
0x41f1   :  { %v10446_v41 = vsel %vm10445_vm11, %v10435_v12, %v10444_v31  ;;  %v15333_v12 = vld [vmem:[%s20393_s25 + $0x20] sm:$0xff]  ;;  %v17216_v31 = vpack.c.bf16 %v15336_v52, %v15335_v9 }
0x41f2   :  { %v10449_v23 = vsel %vm10447_vm12, %v10448_v47, %v10446_v41  ;;  %v10439_v29 = vsel %vm10438_vm13, %v10434_v7, %v10437_v21  ;;  %v19856_v7 = vld [vmem:[#allocation7 + $0x1] ss:$0 sm:$0xff]  ;;  %v17526_v48 = vpack.i.bf16 %v15334_v62, %v15333_v12  ;;  %v17212_v19 = vpack.c.bf16 %v15334_v62, %v15333_v12 }
0x41f3   :  { %v10451_v30 = vadd.f32 1e-06, %v10449_v23  ;;  %v10442_v17 = vsel %vm10440_vm14, %v10441_v49, %v10439_v29 }
0x41f4   :  { %v10450_v32 = vadd.f32 1e-06, %v10442_v17  ;;  %17213 = vmatprep.subr.bf16.mxu1 %v17212_v19 }
0x41f5   :  { %17786 = vrcp.f32 %v10451_v30 }
0x41f6   :  { %17788 = vrcp.f32 %v10450_v32 }
0x41ff   :  { %v17787_v40 = vpop.eup %17786 }
0x4200   :  { %v17789_v57 = vpop.eup %17788  ;;  %v10463_v3 = vmul.f32 %v17787_v40, %v10461_v34 }
0x4201   :  { %v10462_v1 = vmul.f32 %v17789_v57, %v10460_v24 }
0x4202   :  { %v10471_v13 = vadd.f32 %v15324_v11, %v10463_v3 }
0x4203   :  { %v10470_v18 = vadd.f32 %v15324_v11, %v10462_v1 }
0x4205   :  { %16662 = vmatprep.mubr.msk.f32.mxu1 %vm369_vm0, %v10470_v18 }
0x4206   :  { %16663 = vmatmul.mubr.msk.f32.vlgmr.msra.gmra.mrb[108].mxu1 %vm369_vm0, %v10471_v13 }
0x4207   :  { %17215 = vmatpush3.bf16.msra.mxu1 %v17212_v19 }
0x4208   :  { %17217 = vmatprep.subr.bf16.mxu1 %v17216_v31 }
0x420b   :  { %17219 = vmatpush3.bf16.msra.mxu1 %v17216_v31 }
0x42d9   :  { %v16664_v14 = vpop.f32.mrb[108].mxu1 }
0x42da   :  { %v10570_v25 = vadd.f32 %v16664_v14, %v15325_v15  ;;  %v10564_v58 = vpop.f32.mrb[109].mxu1 }
0x42db   :  { %v10565_v36 = vadd.f32 %v15325_v15, %v10564_v58 }
0x42dc   :  { %v10574_v56 = vmax.f32 %v10570_v25, 0.0 }
0x42dd   :  { %v10573_v27 = vmax.f32 %v10565_v36, 0.0 }
0x42df   :  { %16681 = vmatprep.mubr.msk.f32.mxu0 %vm2557_vm15, %v10573_v27 }
0x42e0   :  { %16682 = vmatmul.mubr.msk.f32.vlgmr.msra.gmra.mrb[84].mxu0 %vm2557_vm15, %v10574_v56 }
0x43b3   :  { %v16683_v43 = vpop.f32.mrb[84].mxu0 }
0x43b4   :  { %v10659_v33 = vadd.f32 %v16683_v43, %v15328_v46  ;;  %v10653_v45 = vpop.f32.mrb[85].mxu0  ;;  %v15331_v43 = vld [vmem:[#allocation13 + $0x1] ss:$0 sm:$0xff] }
0x43b5   :  { %v10654_v53 = vadd.f32 %v15328_v46, %v10653_v45 }
0x43b6   :  { %v19830_v39 = vadd.f32 %v10659_v33, %v19800_v10 }
0x43b7   :  { %v19833_v54 = vadd.f32 %v10654_v53, %v19803_v20 }
0x43b8   :  { %v10671_v55 = vsel %vm369_vm0, %v19830_v39, 0.0 }
0x43b9   :  { %10672 = vadd.xlane.f32.xlu1 %v10671_v55  ;;  %v10668_v59 = vsel %vm369_vm0, %v19833_v54, 0.0 }
0x43ba   :  { %10669 = vadd.xlane.f32.xlu0 %v10668_v59 }
0x4446   :  { %v10673_v60 = vpop.xlane.xlu1 %10672 }
0x4447   :  { %v10675_v63 = vmul.f32 0.03125, %v10673_v60  ;;  %v10670_v5 = vpop.xlane.xlu0 %10669 }
0x4448   :  { %v10674_v10 = vmul.f32 0.03125, %v10670_v5 }
0x4449   :  { %v19840_v6 = vsub.f32 %v19830_v39, %v10675_v63  ;;  %v15332_v63 = vld [vmem:[#allocation14 + $0x1] ss:$0 sm:$0xff] }
0x444a   :  { %v19843_v20 = vsub.f32 %v19833_v54, %v10674_v10 }
0x444b   :  { %v10679_v37 = vmul.f32 %v19840_v6, %v19840_v6  ;;  %v10713_v33 = vmul.f32 %v15331_v43, %v19840_v6 }
0x444c   :  { %v10678_v38 = vmul.f32 %v19843_v20, %v19843_v20  ;;  %v10712_v53 = vmul.f32 %v15331_v43, %v19843_v20 }
0x444d   :  { %v10683_v8 = vsel %vm369_vm0, %v10679_v37, 0.0 }
0x444e   :  { %10684 = vadd.xlane.f32.xlu1 %v10683_v8  ;;  %v10680_v0 = vsel %vm369_vm0, %v10678_v38, 0.0 }
0x444f   :  { %10681 = vadd.xlane.f32.xlu0 %v10680_v0 }
0x445f   :  { %17532 = vrot.lane.b32.xlu1 %v17531_v61, %s18294_s13 }
0x4463   :  { %10841 = vrot.lane.b32.xlu1 %v19856_v7, %s18294_s13 }
0x4465   :  { %17527 = vrot.lane.b32.xlu0 %v17526_v48, %s18294_s13 }
0x4467   :  { %17537 = vrot.lane.b32.xlu1 %v17526_v48, %s18295_s5 }
0x4469   :  { %17542 = vrot.lane.b32.xlu0 %v17531_v61, %s18295_s5 }
0x44db   :  { %v10685_v47 = vpop.xlane.xlu1 %10684 }
0x44dc   :  { %v10687_v21 = vmul.f32 0.032258064, %v10685_v47  ;;  %v10682_v41 = vpop.xlane.xlu0 %10681 }
0x44dd   :  { %v10686_v49 = vmul.f32 0.032258064, %v10682_v41 }
0x44de   :  { %17790 = vrsqrt.f32 %v10687_v21  ;;  %vm10697_vm1 = vcmp.eq.f32.partialorder %v10687_v21, inf  ;;  %v10700_v42 = vand.u32 2147483648, %v10687_v21  ;;  %vm10699_vm2 = vcmp.eq.f32.partialorder %v10687_v21, 0.0 }
0x44df   :  { %17792 = vrsqrt.f32 %v10686_v49  ;;  %v17533_v23 = vpop.permute.xlu1 %17532  ;;  %vm10690_vm3 = vcmp.eq.f32.partialorder %v10686_v49, inf  ;;  %v10693_v25 = vand.u32 2147483648, %v10686_v49  ;;  %vm10692_vm4 = vcmp.eq.f32.partialorder %v10686_v49, 0.0 }
0x44e0   :  { %v17528_v29 = vpop.permute.xlu0 %17527  ;;  %v17535_v59 = vunpack.i.h.bf16 %v17533_v23  ;;  %v17534_v60 = vunpack.i.l.bf16 %v17533_v23 }
0x44e1   :  { %v17530_v30 = vunpack.i.h.bf16 %v17528_v29  ;;  %v17529_v17 = vunpack.i.l.bf16 %v17528_v29 }
0x44e2   :  { %v17224_v38 = vpack.c.bf16 %v17535_v59, %v17534_v60 }
0x44e3   :  { %v19863_v32 = vpop.permute.xlu1 %10841  ;;  %v17220_v35 = vpack.c.bf16 %v17530_v30, %v17529_v17 }
0x44e4   :  { %v17543_v34 = vpop.permute.xlu0 %17542 }
0x44e5   :  { %17221 = vmatprep.subr.bf16.mxu1 %v17220_v35  ;;  %v17545_v40 = vunpack.i.h.bf16 %v17543_v34  ;;  %v17544_v24 = vunpack.i.l.bf16 %v17543_v34 }
0x44e7   :  { %v17538_v57 = vpop.permute.xlu1 %17537  ;;  %v17232_v15 = vpack.c.bf16 %v17545_v40, %v17544_v24 }
0x44e8   :  { %v17791_v11 = vpop.eup %17790  ;;  %v17540_v3 = vunpack.i.h.bf16 %v17538_v57  ;;  %v17539_v1 = vunpack.i.l.bf16 %v17538_v57 }
0x44e9   :  { %v17793_v18 = vpop.eup %17792  ;;  %v10696_v13 = vmul.f32 %v17791_v11, %v10687_v21 }
0x44ea   :  { %v10689_v16 = vmul.f32 %v17793_v18, %v10686_v49  ;;  %v17228_v2 = vpack.c.bf16 %v17540_v3, %v17539_v1 }
0x44eb   :  { %v10698_v14 = vsel %vm10697_vm1, %v10687_v21, %v10696_v13 }
0x44ec   :  { %v10701_v58 = vsel %vm10699_vm2, %v10700_v42, %v10698_v14  ;;  %v10691_v36 = vsel %vm10690_vm3, %v10686_v49, %v10689_v16  ;;  %17229 = vmatprep.subr.bf16.mxu0 %v17228_v2 }
0x44ed   :  { %v10703_v27 = vadd.f32 1e-06, %v10701_v58  ;;  %v10694_v56 = vsel %vm10692_vm4, %v10693_v25, %v10691_v36  ;;  %17231 = vmatpush3.bf16.msra.mxu0 %v17228_v2 }
0x44ee   :  { %17233 = vmatprep.subr.bf16.mxu0 %v17232_v15  ;;  %v10702_v46 = vadd.f32 1e-06, %v10694_v56 }
0x44ef   :  { %17794 = vrcp.f32 %v10703_v27 }
0x44f0   :  { %17796 = vrcp.f32 %v10702_v46 }
0x44f1   :  { %17235 = vmatpush3.bf16.msra.mxu0 %v17232_v15 }
0x44f2   :  { %16727 = vmatprep.subr.mxu0 %v18296_v4 }
0x44f9   :  { %v17795_v45 = vpop.eup %17794 }
0x44fa   :  { %v17797_v55 = vpop.eup %17796  ;;  %v10715_v5 = vmul.f32 %v17795_v45, %v10713_v33 }
0x44fb   :  { %v10714_v10 = vmul.f32 %v17797_v55, %v10712_v53 }
0x44fc   :  { %v10723_v8 = vadd.f32 %v15332_v63, %v10715_v5 }
0x44fd   :  { %v10722_v37 = vadd.f32 %v15332_v63, %v10714_v10 }
0x44ff   :  { %16692 = vmatprep.mubr.msk.f32.mxu1 %vm369_vm0, %v10722_v37  ;;  %16714 = vmatprep.mubr.msk.f32.mxu0 %vm369_vm0, %v10722_v37 }
0x4500   :  { %16693 = vmatmul.mubr.msk.f32.vlgmr.msra.gmra.mrb[110].mxu1 %vm369_vm0, %v10723_v8  ;;  %16715 = vmatmul.mubr.msk.f32.vlgmr.msra.gmra.mrb[86].mxu0 %vm369_vm0, %v10723_v8 }
0x4501   :  { %17223 = vmatpush3.bf16.msra.mxu1 %v17220_v35  ;;  %16703 = vmatprep.mubr.msk.f32.mxu1 %vm369_vm0, %v10722_v37 }
0x4502   :  { %17225 = vmatprep.subr.bf16.mxu1 %v17224_v38  ;;  %16729 = vmatprep.mubr.msk.f32.mxu0 %vm18297_vm5, %v18296_v4 }
0x4505   :  { %17227 = vmatpush3.bf16.msra.mxu1 %v17224_v38 }
0x4506   :  { %16717 = vmatprep.subr.mxu1 %v18296_v4 }
0x4508   :  { %16704 = vmatmul.mubr.msk.f32.vlgmr.msra.gmra.mrb[112].mxu1 %vm369_vm0, %v10723_v8 }
0x4509   :  { %16719 = vmatprep.mubr.msk.f32.mxu1 %vm18297_vm5, %v18296_v4 }
0x45d3   :  { %v16694_v6 = vpop.f32.mrb[110].mxu1  ;;  %v16716_v20 = vpop.f32.mrb[86].mxu0 }
0x45d4   :  { %v10816_v0 = vpop.f32.mrb[111].mxu1  ;;  %v11000_v9 = vpop.f32.mrb[87].mxu0  ;;  %v19898_v19 = vadd.f32 %v16694_v6, %v19856_v7 }
0x45d5   :  { %v19885_v62 = vadd.f32 %v19856_v7, %v10816_v0 }
0x45db   :  { %v16705_v52 = vpop.f32.mrb[112].mxu1 }
0x45dc   :  { %v10910_v61 = vpop.f32.mrb[113].mxu1  ;;  %v19889_v48 = vadd.f32 %v16705_v52, %v19863_v32 }
0x45dd   :  { %v19880_v12 = vadd.f32 %v10910_v61, %v19863_v32 }
0x45df   :  { %16718 = vmatpush3.xpose.msk.msra.mxu1 %vm723_vm6, %v19880_v12 }
0x45e0   :  { %16722 = vmatprep.subr.mxu1 %v18296_v4 }
0x45e2   :  { %16720 = vmatmul.mubr.msk.f32.vlgmr.msra.gmra.mrb[114].mxu1 %vm723_vm6, %v19885_v62 }
0x45e3   :  { %16723 = vmatpush3.xpose.msk.msra.mxu1 %vm723_vm6, %v19889_v48  ;;  %16724 = vmatprep.mubr.msk.f32.mxu1 %vm18297_vm5, %v18296_v4 }
0x45e4   :  { %16732 = vmatprep.subr.mxu1 %v18296_v4 }
0x45e6   :  { %16725 = vmatmul.mubr.msk.f32.vlgmr.msra.gmra.mrb[116].mxu1 %vm723_vm6, %v19898_v19 }
0x45e7   :  { %16734 = vmatprep.mubr.msk.f32.mxu1 %vm18297_vm5, %v18296_v4 }
0x46b5   :  { %v11081_v31 = vpop.f32.mrb[114].mxu1 }
0x46b6   :  { %v16721_v47 = vpop.f32.mrb[115].mxu1  ;;  %v11161_v40 = vmul.f32 0.35355338, %v11081_v31 }
0x46b8   :  { %v11163_v24 = vsel %vm6735_vm8, %v11161_v40, -1e+09 }
0x46b9   :  { %v11157_v21 = vpop.f32.mrb[116].mxu1  ;;  %v11165_v57 = vsel %vm723_vm6, %v11163_v24, -inf }
0x46ba   :  { %v11162_v41 = vmul.f32 0.35355338, %v11157_v21  ;;  %v16726_v49 = vpop.f32.mrb[117].mxu1 }
0x46bc   :  { %v11164_v23 = vsel %vm6736_vm7, %v11162_v41, -1e+09 }
0x46bd   :  { %v11168_v29 = vsel %vm723_vm6, %v11164_v23, -inf }
0x46be   :  { %11169 = vmax.xlane.f32.xlu1 %v11168_v29 }
0x46cf   :  { %11413 = vrot.lane.b32.xlu1 %v19889_v48, %s18299_s3 }
0x46d3   :  { %11411 = vrot.lane.b32.xlu1 %v19898_v19, %s18299_s3 }
0x474b   :  { %v11170_v30 = vpop.xlane.xlu1 %11169 }
0x474c   :  { %v11172_v17 = vsub.f32 %v11164_v23, %v11170_v30 }
0x474e   :  { %v11175_v32 = vmul.f32 1.442695, %v11172_v17 }
0x474f   :  { %v11414_v13 = vpop.permute.xlu1 %11413 }
0x4750   :  { %17798 = vpow2.f32 %v11175_v32 }
0x4753   :  { %v11412_v16 = vpop.permute.xlu1 %11411 }
0x475a   :  { %v17799_v35 = vpop.eup %17798 }
0x475b   :  { %v11180_v34 = vsel %vm723_vm6, %v17799_v35, 0.0 }
0x475c   :  { %11181 = vadd.xlane.f32.xlu0 %v11180_v34 }
0x4772   :  { %10931 = vrot.lane.b32.xlu0 %v19856_v7, %s18295_s5 }
0x4791   :  { %11166 = vmax.xlane.f32.xlu0 %v11165_v57 }
0x47a7   :  { %11335 = vrot.lane.b32.xlu0 %v19880_v12, %s18299_s3 }
0x47e9   :  { %v11182_v11 = vpop.xlane.xlu0 %11181 }
0x47ea   :  { %17800 = vrcp.f32 %v11182_v11 }
0x47ed   :  { %v10932_v3 = vpop.permute.xlu0 %10931 }
0x47ee   :  { %v19920_v1 = vadd.f32 %v11000_v9, %v10932_v3  ;;  %v19922_v18 = vadd.f32 %v16716_v20, %v10932_v3 }
0x47f0   :  { %16728 = vmatpush3.msra.mxu0 %v19920_v1  ;;  %16733 = vmatpush3.msra.mxu1 %v19922_v18 }
0x47f1   :  { %16742 = vmatprep.subr.mxu1 %v18296_v4  ;;  %16737 = vmatprep.subr.mxu0 %v18296_v4 }
0x47f4   :  { %v17801_v7 = vpop.eup %17800 }
0x47f5   :  { %v11186_v42 = vmul.f32 %v17801_v7, %v17799_v35 }
0x47f7   :  { %16735 = vmatmul.mubr.msk.f32.vlgmr.msra.gmra.mrb[118].mxu1 %vm723_vm6, %v11186_v42 }
0x47f8   :  { %16743 = vmatpush3.xpose.msk.msra.mxu1 %vm723_vm6, %v11414_v13  ;;  %16744 = vmatprep.mubr.msk.f32.mxu1 %vm18297_vm5, %v18296_v4 }
0x47f9   :  { %16752 = vmatprep.subr.mxu1 %v18296_v4 }
0x47fb   :  { %16745 = vmatmul.mubr.msk.f32.vlgmr.msra.gmra.mrb[120].mxu1 %vm723_vm6, %v11412_v16 }
0x47fc   :  { %16754 = vmatprep.mubr.msk.f32.mxu1 %vm18297_vm5, %v18296_v4 }
0x481e   :  { %v11167_v2 = vpop.xlane.xlu0 %11166 }
0x481f   :  { %v11171_v15 = vsub.f32 %v11163_v24, %v11167_v2 }
0x4821   :  { %v11173_v14 = vmul.f32 1.442695, %v11171_v15 }
0x4822   :  { %v11336_v46 = vpop.permute.xlu0 %11335 }
0x4823   :  { %17802 = vpow2.f32 %v11173_v14 }
0x482d   :  { %v17803_v25 = vpop.eup %17802 }
0x482e   :  { %v11177_v58 = vsel %vm723_vm6, %v17803_v25, 0.0 }
0x482f   :  { %11178 = vadd.xlane.f32.xlu1 %v11177_v58 }
0x4840   :  { %11333 = vrot.lane.b32.xlu1 %v19885_v62, %s18299_s3 }
0x4844   :  { %11833 = vrot.lane.b32.xlu1 %v19880_v12, %s18300_s12 }
0x48bc   :  { %v11179_v36 = vpop.xlane.xlu1 %11178 }
0x48bd   :  { %17804 = vrcp.f32 %v11179_v36 }
0x48c0   :  { %v11334_v45 = vpop.permute.xlu1 %11333 }
0x48c4   :  { %v11834_v21 = vpop.permute.xlu1 %11833 }
0x48c7   :  { %v17805_v27 = vpop.eup %17804 }
0x48c8   :  { %v11185_v56 = vmul.f32 %v17805_v27, %v17803_v25 }
0x48ca   :  { %16730 = vmatmul.mubr.msk.f32.vlgmr.msra.gmra.mrb[88].mxu0 %vm723_vm6, %v11185_v56  ;;  %v19942_v43 = vpop.f32.mrb[118].mxu1  ;;  %v15338_v56 = vld [vmem:[%s20395_s9 + $0x28] sm:$0xff] }
0x48cb   :  { %16738 = vmatpush3.xpose.msk.msra.mxu0 %vm723_vm6, %v11336_v46  ;;  %v16736_v33 = vpop.f32.mrb[119].mxu1  ;;  %16739 = vmatprep.mubr.msk.f32.mxu0 %vm18297_vm5, %v18296_v4  ;;  %v15337_v46 = vld [vmem:[%s20395_s9 + $0x20] sm:$0xff] }
0x48cc   :  { %16747 = vmatprep.subr.mxu0 %v18296_v4 }
0x48ce   :  { %16740 = vmatmul.mubr.msk.f32.vlgmr.msra.gmra.mrb[90].mxu0 %vm723_vm6, %v11334_v45  ;;  %v11485_v53 = vpop.f32.mrb[120].mxu1 }
0x48cf   :  { %v11490_v55 = vmul.f32 0.35355338, %v11485_v53  ;;  %v16746_v59 = vpop.f32.mrb[121].mxu1  ;;  %16749 = vmatprep.mubr.msk.f32.mxu0 %vm18297_vm5, %v18296_v4 }
0x48d1   :  { %v11492_v60 = vsel %vm6736_vm7, %v11490_v55, -1e+09 }
0x48d2   :  { %v11496_v63 = vsel %vm723_vm6, %v11492_v60, -inf }
0x48d3   :  { %11497 = vmax.xlane.f32.xlu0 %v11496_v63 }
0x48e9   :  { %11593 = vrot.lane.b32.xlu0 %v19922_v18, %s18299_s3 }
0x48ed   :  { %11831 = vrot.lane.b32.xlu0 %v19885_v62, %s18300_s12 }
0x48f1   :  { %11909 = vrot.lane.b32.xlu0 %v19898_v19, %s18300_s12 }
0x4960   :  { %v11498_v5 = vpop.xlane.xlu0 %11497 }
0x4961   :  { %v11500_v10 = vsub.f32 %v11492_v60, %v11498_v5 }
0x4963   :  { %v11503_v37 = vmul.f32 1.442695, %v11500_v10 }
0x4964   :  { %v11594_v38 = vpop.permute.xlu0 %11593 }
0x4965   :  { %17806 = vpow2.f32 %v11503_v37  ;;  %16753 = vmatpush3.msra.mxu1 %v11594_v38 }
0x4966   :  { %16767 = vmatprep.subr.mxu1 %v18296_v4 }
0x4968   :  { %v11832_v29 = vpop.permute.xlu0 %11831 }
0x496c   :  { %v11910_v17 = vpop.permute.xlu0 %11909 }
0x496f   :  { %v17807_v8 = vpop.eup %17806 }
0x4970   :  { %v11508_v6 = vsel %vm723_vm6, %v17807_v8, 0.0 }
0x4971   :  { %11509 = vadd.xlane.f32.xlu1 %v11508_v6 }
0x4982   :  { %11911 = vrot.lane.b32.xlu1 %v19889_v48, %s18300_s12 }
0x499d   :  { %v19964_v20 = vpop.f32.mrb[88].mxu0 }
0x499e   :  { %v16731_v0 = vpop.f32.mrb[89].mxu0 }
0x499f   :  { %v15339_v0 = vld [vmem:[%s20395_s9 + $0x30] sm:$0xff] }
0x49a1   :  { %v11407_v9 = vpop.f32.mrb[90].mxu0 }
0x49a2   :  { %v11489_v52 = vmul.f32 0.35355338, %v11407_v9  ;;  %v16741_v61 = vpop.f32.mrb[91].mxu0 }
0x49a4   :  { %v11491_v31 = vsel %vm6735_vm8, %v11489_v52, -1e+09 }
0x49a5   :  { %v11493_v47 = vsel %vm723_vm6, %v11491_v31, -inf }
0x49a6   :  { %11494 = vmax.xlane.f32.xlu1 %v11493_v47 }
0x49fe   :  { %v11510_v41 = vpop.xlane.xlu1 %11509 }
0x49ff   :  { %17808 = vrcp.f32 %v11510_v41 }
0x4a02   :  { %v11912_v30 = vpop.permute.xlu1 %11911 }
0x4a09   :  { %v17809_v49 = vpop.eup %17808 }
0x4a0a   :  { %v11514_v23 = vmul.f32 %v17809_v49, %v17807_v8 }
0x4a0c   :  { %16755 = vmatmul.mubr.msk.f32.vlgmr.msra.gmra.mrb[122].mxu1 %vm723_vm6, %v11514_v23 }
0x4a0d   :  { %16768 = vmatpush3.xpose.msk.msra.mxu1 %vm723_vm6, %v11834_v21  ;;  %16769 = vmatprep.mubr.msk.f32.mxu1 %vm18297_vm5, %v18296_v4 }
0x4a0e   :  { %16772 = vmatprep.subr.mxu1 %v18296_v4 }
0x4a10   :  { %16770 = vmatmul.mubr.msk.f32.vlgmr.msra.gmra.mrb[124].mxu1 %vm723_vm6, %v11832_v29 }
0x4a11   :  { %16773 = vmatpush3.xpose.msk.msra.mxu1 %vm723_vm6, %v11912_v30  ;;  %16774 = vmatprep.mubr.msk.f32.mxu1 %vm18297_vm5, %v18296_v4 }
0x4a12   :  { %16782 = vmatprep.subr.mxu1 %v18296_v4 }
0x4a14   :  { %16775 = vmatmul.mubr.msk.f32.vlgmr.msra.gmra.mrb[126].mxu1 %vm723_vm6, %v11910_v17 }
0x4a15   :  { %16784 = vmatprep.mubr.msk.f32.mxu1 %vm18297_vm5, %v18296_v4 }
0x4a33   :  { %v11495_v32 = vpop.xlane.xlu1 %11494 }
0x4a34   :  { %v11499_v35 = vsub.f32 %v11491_v31, %v11495_v32 }
0x4a36   :  { %v11501_v34 = vmul.f32 1.442695, %v11499_v35 }
0x4a38   :  { %17810 = vpow2.f32 %v11501_v34 }
0x4a42   :  { %v17811_v40 = vpop.eup %17810 }
0x4a43   :  { %v11505_v24 = vsel %vm723_vm6, %v17811_v40, 0.0 }
0x4a44   :  { %11506 = vadd.xlane.f32.xlu0 %v11505_v24 }
0x4a5a   :  { %11516 = vrot.lane.b32.xlu0 %v19920_v1, %s18299_s3 }
0x4a5e   :  { %12089 = vrot.lane.b32.xlu0 %v19922_v18, %s18300_s12 }
0x4a62   :  { %12250 = vrot.lane.b32.xlu0 %v19880_v12, %s18301_s2 }
0x4a66   :  { %12328 = vrot.lane.b32.xlu0 %v19889_v48, %s18301_s2 }
0x4a6a   :  { %12248 = vrot.lane.b32.xlu0 %v19885_v62, %s18301_s2 }
0x4ad1   :  { %v11507_v57 = vpop.xlane.xlu0 %11506 }
0x4ad2   :  { %17812 = vrcp.f32 %v11507_v57 }
0x4ad5   :  { %v11517_v11 = vpop.permute.xlu0 %11516 }
0x4ad6   :  { %16748 = vmatpush3.msra.mxu0 %v11517_v11 }
0x4ad7   :  { %16757 = vmatprep.subr.mxu0 %v15338_v56 }
0x4ad9   :  { %v12090_v3 = vpop.permute.xlu0 %12089 }
0x4ada   :  { %16783 = vmatpush3.msra.mxu1 %v12090_v3 }
0x4adb   :  { %16792 = vmatprep.subr.mxu1 %v18296_v4 }
0x4adc   :  { %v17813_v7 = vpop.eup %17812 }
0x4add   :  { %v11513_v13 = vmul.f32 %v17813_v7, %v17811_v40  ;;  %v12251_v52 = vpop.permute.xlu0 %12250 }
0x4adf   :  { %16750 = vmatmul.mubr.msk.f32.vlgmr.msra.gmra.mrb[92].mxu0 %vm723_vm6, %v11513_v13  ;;  %v11665_v12 = vpop.f32.mrb[122].mxu1 }
0x4ae0   :  { %v16756_v42 = vpop.f32.mrb[123].mxu1  ;;  %16758 = vmatpush3.msra.mxu0 %v15338_v56 }
0x4ae1   :  { %16762 = vmatprep.subr.mxu0 %v15337_v46  ;;  %v12329_v47 = vpop.permute.xlu0 %12328 }
0x4ae3   :  { %v11905_v48 = vpop.f32.mrb[124].mxu1 }
0x4ae4   :  { %v11987_v16 = vmul.f32 0.35355338, %v11905_v48  ;;  %v16771_v2 = vpop.f32.mrb[125].mxu1 }
0x4ae5   :  { %v12249_v21 = vpop.permute.xlu0 %12248 }
0x4ae6   :  { %v11989_v62 = vsel %vm6735_vm8, %v11987_v16, -1e+09 }
0x4ae7   :  { %v11983_v15 = vpop.f32.mrb[126].mxu1  ;;  %v11991_v14 = vsel %vm723_vm6, %v11989_v62, -inf }
0x4ae8   :  { %v11988_v25 = vmul.f32 0.35355338, %v11983_v15  ;;  %11992 = vmax.xlane.f32.xlu1 %v11991_v14  ;;  %v16776_v58 = vpop.f32.mrb[127].mxu1 }
0x4aea   :  { %v11990_v36 = vsel %vm6736_vm7, %v11988_v25, -1e+09 }
0x4aeb   :  { %v11994_v27 = vsel %vm723_vm6, %v11990_v36, -inf }
0x4aec   :  { %11995 = vmax.xlane.f32.xlu1 %v11994_v27 }
0x4b75   :  { %v11993_v33 = vpop.xlane.xlu1 %11992 }
0x4b76   :  { %v11997_v45 = vsub.f32 %v11989_v62, %v11993_v33  ;;  %v15340_v33 = vld [vmem:[%s20395_s9 + $0x38] sm:$0xff] }
0x4b78   :  { %v11999_v53 = vmul.f32 1.442695, %v11997_v45 }
0x4b79   :  { %v11996_v55 = vpop.xlane.xlu1 %11995 }
0x4b7a   :  { %17814 = vpow2.f32 %v11999_v53  ;;  %v11998_v59 = vsub.f32 %v11990_v36, %v11996_v55 }
0x4b7c   :  { %v12001_v60 = vmul.f32 1.442695, %v11998_v59  ;;  %v15380_v59 = vld [vmem:[#allocation8 + $0x1] ss:$0 sm:$0xff] }
0x4b7e   :  { %17816 = vpow2.f32 %v12001_v60 }
0x4b84   :  { %v17815_v63 = vpop.eup %17814 }
0x4b85   :  { %v12003_v5 = vsel %vm723_vm6, %v17815_v63, 0.0 }
0x4b86   :  { %12004 = vadd.xlane.f32.xlu1 %v12003_v5 }
0x4b88   :  { %v17817_v10 = vpop.eup %17816 }
0x4b89   :  { %v12006_v37 = vsel %vm723_vm6, %v17817_v10, 0.0 }
0x4b8a   :  { %12007 = vadd.xlane.f32.xlu1 %v12006_v37 }
0x4b9b   :  { %12013 = vrot.lane.b32.xlu1 %v19920_v1, %s18300_s12 }
0x4b9f   :  { %12326 = vrot.lane.b32.xlu1 %v19898_v19, %s18301_s2 }
0x4bb2   :  { %v11588_v38 = vpop.f32.mrb[92].mxu0 }
0x4bb3   :  { %v16751_v8 = vpop.f32.mrb[93].mxu0  ;;  %16759 = vmatprep.mubr.msk.f32.mxu0 %vm723_vm6, %v11588_v38 }
0x4bb4   :  { %16760 = vmatmul.mubr.msk.f32.vlgmr.msra.gmra.mrb[94].mxu0 %vm723_vm6, %v11665_v12 }
0x4bb5   :  { %16764 = vmatprep.mubr.msk.f32.mxu0 %vm723_vm6, %v19964_v20  ;;  %16763 = vmatpush3.msra.mxu0 %v15337_v46 }
0x4bb6   :  { %16777 = vmatprep.subr.mxu0 %v18296_v4 }
0x4bbc   :  { %16765 = vmatmul.mubr.msk.f32.vlgmr.msra.gmra.mrb[94].mxu0 %vm723_vm6, %v19942_v43 }
0x4bbd   :  { %16779 = vmatprep.mubr.msk.f32.mxu0 %vm18297_vm5, %v18296_v4 }
0x4c13   :  { %v12005_v6 = vpop.xlane.xlu1 %12004 }
0x4c14   :  { %17818 = vrcp.f32 %v12005_v6 }
0x4c17   :  { %v12008_v19 = vpop.xlane.xlu1 %12007 }
0x4c18   :  { %17820 = vrcp.f32 %v12008_v19 }
0x4c1b   :  { %v12014_v9 = vpop.permute.xlu1 %12013 }
0x4c1c   :  { %16778 = vmatpush3.msra.mxu0 %v12014_v9 }
0x4c1d   :  { %16787 = vmatprep.subr.mxu0 %v15339_v0 }
0x4c1e   :  { %v17819_v61 = vpop.eup %17818 }
0x4c1f   :  { %v12011_v20 = vmul.f32 %v17819_v61, %v17815_v63  ;;  %v12327_v30 = vpop.permute.xlu1 %12326 }
0x4c21   :  { %16780 = vmatmul.mubr.msk.f32.vlgmr.msra.gmra.mrb[96].mxu0 %vm723_vm6, %v12011_v20 }
0x4c22   :  { %v17821_v31 = vpop.eup %17820  ;;  %16788 = vmatpush3.msra.mxu0 %v15339_v0 }
0x4c23   :  { %v12012_v43 = vmul.f32 %v17821_v31, %v17817_v10  ;;  %16797 = vmatprep.subr.mxu0 %v18296_v4 }
0x4c25   :  { %16785 = vmatmul.mubr.msk.f32.vlgmr.msra.gmra.mrb[128].mxu1 %vm723_vm6, %v12012_v43  ;;  %v15385_v43 = vld [vmem:[%s20396_s23 + $0x30] sm:$0xff] }
0x4c26   :  { %16793 = vmatpush3.xpose.msk.msra.mxu1 %vm723_vm6, %v12251_v52  ;;  %16794 = vmatprep.mubr.msk.f32.mxu1 %vm18297_vm5, %v18296_v4 }
0x4c27   :  { %16802 = vmatprep.subr.mxu1 %v18296_v4 }
0x4c29   :  { %16795 = vmatmul.mubr.msk.f32.vlgmr.msra.gmra.mrb[130].mxu1 %vm723_vm6, %v12249_v21  ;;  %v15386_v21 = vld [vmem:[%s20396_s23 + $0x38] sm:$0xff] }
0x4c2a   :  { %16804 = vmatprep.mubr.msk.f32.mxu1 %vm18297_vm5, %v18296_v4 }
0x4cf4   :  { %v12085_v41 = vpop.f32.mrb[96].mxu0 }
0x4cf5   :  { %v16781_v49 = vpop.f32.mrb[97].mxu0  ;;  %16789 = vmatprep.mubr.msk.f32.mxu0 %vm723_vm6, %v12085_v41  ;;  %v17551_v41 = vpack.i.bf16 %v15386_v21, %v15385_v43 }
0x4cf6   :  { %v15383_v49 = vld [vmem:[%s20396_s23 + $0x20] sm:$0xff] }
0x4cf8   :  { %v12161_v23 = vpop.f32.mrb[128].mxu1 }
0x4cf9   :  { %v16786_v29 = vpop.f32.mrb[129].mxu1  ;;  %16790 = vmatmul.mubr.msk.f32.vlgmr.msra.gmra.mrb[94].mxu0 %vm723_vm6, %v12161_v23  ;;  %v15384_v23 = vld [vmem:[%s20396_s23 + $0x28] sm:$0xff] }
0x4cfa   :  { %16798 = vmatpush3.xpose.msk.msra.mxu0 %vm723_vm6, %v12329_v47  ;;  %16799 = vmatprep.mubr.msk.f32.mxu0 %vm18297_vm5, %v18296_v4  ;;  %v17556_v29 = vpack.i.bf16 %v15384_v23, %v15383_v49 }
0x4cfb   :  { %16807 = vmatprep.subr.mxu0 %v18296_v4 }
0x4cfc   :  { %v12322_v17 = vpop.f32.mrb[130].mxu1 }
0x4cfd   :  { %v12404_v32 = vmul.f32 0.35355338, %v12322_v17  ;;  %v16796_v35 = vpop.f32.mrb[131].mxu1  ;;  %16800 = vmatmul.mubr.msk.f32.vlgmr.msra.gmra.mrb[98].mxu0 %vm723_vm6, %v12327_v30  ;;  %v17236_v30 = vpack.c.bf16 %v15384_v23, %v15383_v49  ;;  %v17240_v17 = vpack.c.bf16 %v15386_v21, %v15385_v43 }
0x4cfe   :  { %16809 = vmatprep.mubr.msk.f32.mxu0 %vm18297_vm5, %v18296_v4 }
0x4cff   :  { %v12406_v34 = vsel %vm6735_vm8, %v12404_v32, -1e+09  ;;  %v20088_v32 = vld [vmem:[%s20399_s16 + $0x1] ss:$0 sm:$0xff] }
0x4d00   :  { %v12408_v40 = vsel %vm723_vm6, %v12406_v34, -inf }
0x4d01   :  { %12409 = vmax.xlane.f32.xlu0 %v12408_v40 }
0x4d8e   :  { %v12410_v24 = vpop.xlane.xlu0 %12409 }
0x4d8f   :  { %v12414_v57 = vsub.f32 %v12406_v34, %v12410_v24 }
0x4d91   :  { %v12416_v11 = vmul.f32 1.442695, %v12414_v57 }
0x4d93   :  { %17822 = vpow2.f32 %v12416_v11 }
0x4d9d   :  { %v17823_v3 = vpop.eup %17822 }
0x4d9e   :  { %v12420_v7 = vsel %vm723_vm6, %v17823_v3, 0.0 }
0x4d9f   :  { %12421 = vadd.xlane.f32.xlu0 %v12420_v7 }
0x4dd0   :  { %v12400_v13 = vpop.f32.mrb[98].mxu0 }
0x4dd1   :  { %v12405_v12 = vmul.f32 0.35355338, %v12400_v13  ;;  %v16801_v42 = vpop.f32.mrb[99].mxu0 }
0x4dd3   :  { %v12407_v48 = vsel %vm6736_vm7, %v12405_v12, -1e+09 }
0x4dd4   :  { %v12411_v28 = vsel %vm723_vm6, %v12407_v48, -inf }
0x4dd5   :  { %12412 = vmax.xlane.f32.xlu1 %v12411_v28 }
0x4de6   :  { %12506 = vrot.lane.b32.xlu1 %v19922_v18, %s18301_s2 }
0x4e2c   :  { %v12422_v51 = vpop.xlane.xlu0 %12421 }
0x4e62   :  { %v12413_v16 = vpop.xlane.xlu1 %12412 }
0x4e63   :  { %v12415_v2 = vsub.f32 %v12407_v48, %v12413_v16 }
0x4e65   :  { %v12418_v62 = vmul.f32 1.442695, %v12415_v2 }
0x4e66   :  { %v12507_v15 = vpop.permute.xlu1 %12506 }
0x4e67   :  { %17824 = vpow2.f32 %v12418_v62  ;;  %16808 = vmatpush3.msra.mxu0 %v12507_v15 }
0x4e68   :  { %17826 = vrcp.f32 %v12422_v51  ;;  %16812 = vmatprep.subr.mxu0 %v15340_v33 }
0x4e71   :  { %v17825_v14 = vpop.eup %17824 }
0x4e72   :  { %v12423_v25 = vsel %vm723_vm6, %v17825_v14, 0.0  ;;  %v17827_v36 = vpop.eup %17826 }
0x4e73   :  { %12424 = vadd.xlane.f32.xlu0 %v12423_v25  ;;  %v12428_v18 = vmul.f32 %v17827_v36, %v17823_v3 }
0x4e89   :  { %12430 = vrot.lane.b32.xlu0 %v19920_v1, %s18301_s2 }
0x4f00   :  { %v12425_v58 = vpop.xlane.xlu0 %12424 }
0x4f01   :  { %17828 = vrcp.f32 %v12425_v58 }
0x4f04   :  { %v12431_v27 = vpop.permute.xlu0 %12430 }
0x4f05   :  { %16803 = vmatpush3.msra.mxu1 %v12431_v27 }
0x4f06   :  { %16805 = vmatmul.mubr.msk.f32.vlgmr.msra.gmra.mrb[132].mxu1 %vm723_vm6, %v12428_v18  ;;  %17237 = vmatprep.subr.bf16.mxu1 %v17236_v30 }
0x4f07   :  { %17239 = vmatpush3.bf16.msra.mxu1 %v17236_v30 }
0x4f08   :  { %17241 = vmatprep.subr.bf16.mxu1 %v17240_v17 }
0x4f0b   :  { %v17829_v56 = vpop.eup %17828  ;;  %17243 = vmatpush3.bf16.msra.mxu1 %v17240_v17 }
0x4f0c   :  { %v12429_v46 = vmul.f32 %v17829_v56, %v17825_v14 }
0x4f0e   :  { %16810 = vmatmul.mubr.msk.f32.vlgmr.msra.gmra.mrb[100].mxu0 %vm723_vm6, %v12429_v46 }
0x4f0f   :  { %16813 = vmatpush3.msra.mxu0 %v15340_v33 }
0x4fd9   :  { %v12502_v45 = vpop.f32.mrb[132].mxu1 }
0x4fda   :  { %v16806_v53 = vpop.f32.mrb[133].mxu1  ;;  %16814 = vmatprep.mubr.msk.f32.mxu0 %vm723_vm6, %v12502_v45 }
0x4fdb   :  { %v15381_v53 = vld [vmem:[#allocation16 + $0x1] ss:$0 sm:$0xff] }
0x4fe1   :  { %v12578_v1 = vpop.f32.mrb[100].mxu0 }
0x4fe2   :  { %v16811_v55 = vpop.f32.mrb[101].mxu0  ;;  %16815 = vmatmul.mubr.msk.f32.vlgmr.msra.gmra.mrb[94].mxu0 %vm723_vm6, %v12578_v1 }
0x4fe3   :  { %16836 = vmatprep.mubr.msk.f32.mxu0 %vm369_vm0, %v19599_v50 }
0x50b5   :  { %v16816_v60 = vpop.f32.mrb[94].mxu0 }
0x50b6   :  { %v12672_v63 = vadd.f32 %v16816_v60, %v15380_v59  ;;  %v12654_v5 = vpop.f32.mrb[95].mxu0 }
0x50b7   :  { %v12671_v10 = vadd.f32 %v15380_v59, %v12654_v5 }
0x50b8   :  { %v20058_v37 = vadd.f32 %v12672_v63, %v19830_v39 }
0x50b9   :  { %v20061_v38 = vadd.f32 %v12671_v10, %v19833_v54 }
0x50ba   :  { %v12682_v8 = vsel %vm369_vm0, %v20058_v37, 0.0 }
0x50bb   :  { %12683 = vadd.xlane.f32.xlu0 %v12682_v8  ;;  %v12679_v6 = vsel %vm369_vm0, %v20061_v38, 0.0  ;;  %v15382_v8 = vld [vmem:[#allocation17 + $0x1] ss:$0 sm:$0xff] }
0x50bc   :  { %12680 = vadd.xlane.f32.xlu1 %v12679_v6 }
0x5148   :  { %v12684_v19 = vpop.xlane.xlu0 %12683 }
0x5149   :  { %v12686_v0 = vmul.f32 0.03125, %v12684_v19  ;;  %v12681_v9 = vpop.xlane.xlu1 %12680 }
0x514a   :  { %v12685_v39 = vmul.f32 0.03125, %v12681_v9 }
0x514b   :  { %v20068_v52 = vsub.f32 %v20058_v37, %v12686_v0 }
0x514c   :  { %v20071_v54 = vsub.f32 %v20061_v38, %v12685_v39 }
0x514d   :  { %v12690_v61 = vmul.f32 %v20068_v52, %v20068_v52  ;;  %v12724_v55 = vmul.f32 %v15381_v53, %v20068_v52 }
0x514e   :  { %v12689_v20 = vmul.f32 %v20071_v54, %v20071_v54  ;;  %v12723_v60 = vmul.f32 %v15381_v53, %v20071_v54 }
0x514f   :  { %v12694_v31 = vsel %vm369_vm0, %v12690_v61, 0.0 }
0x5150   :  { %12695 = vadd.xlane.f32.xlu1 %v12694_v31  ;;  %v12691_v47 = vsel %vm369_vm0, %v12689_v20, 0.0 }
0x5151   :  { %12692 = vadd.xlane.f32.xlu0 %v12691_v47 }
0x5161   :  { %17552 = vrot.lane.b32.xlu1 %v17551_v41, %s18294_s13 }
0x5165   :  { %17557 = vrot.lane.b32.xlu1 %v17556_v29, %s18295_s5 }
0x5167   :  { %17547 = vrot.lane.b32.xlu0 %v17556_v29, %s18294_s13 }
0x5169   :  { %17562 = vrot.lane.b32.xlu1 %v17551_v41, %s18295_s5 }
0x516b   :  { %12852 = vrot.lane.b32.xlu0 %v20088_v32, %s18294_s13  ;;  %s18302_s13 = smov [#allocation25]  }
0x51dd   :  { %v12696_v35 = vpop.xlane.xlu1 %12695 }
0x51de   :  { %v12698_v34 = vmul.f32 0.032258064, %v12696_v35  ;;  %v12693_v40 = vpop.xlane.xlu0 %12692 }
0x51df   :  { %v12697_v24 = vmul.f32 0.032258064, %v12693_v40 }
0x51e0   :  { %17830 = vrsqrt.f32 %v12698_v34  ;;  %vm12708_vm7 = vcmp.eq.f32.partialorder %v12698_v34, inf  ;;  %v12711_v51 = vand.u32 2147483648, %v12698_v34  ;;  %vm12710_vm8 = vcmp.eq.f32.partialorder %v12698_v34, 0.0 }
0x51e1   :  { %17832 = vrsqrt.f32 %v12697_v24  ;;  %v17553_v57 = vpop.permute.xlu1 %17552  ;;  %vm12701_vm11 = vcmp.eq.f32.partialorder %v12697_v24, inf  ;;  %v12704_v18 = vand.u32 2147483648, %v12697_v24  ;;  %vm12703_vm12 = vcmp.eq.f32.partialorder %v12697_v24, 0.0 }
0x51e2   :  { %v17548_v11 = vpop.permute.xlu0 %17547  ;;  %v17555_v3 = vunpack.i.h.bf16 %v17553_v57  ;;  %v17554_v7 = vunpack.i.l.bf16 %v17553_v57 }
0x51e3   :  { %v17550_v13 = vunpack.i.h.bf16 %v17548_v11  ;;  %v17549_v12 = vunpack.i.l.bf16 %v17548_v11 }
0x51e4   :  { %v17248_v48 = vpack.c.bf16 %v17555_v3, %v17554_v7 }
0x51e5   :  { %v17244_v42 = vpack.c.bf16 %v17550_v13, %v17549_v12  ;;  %v17558_v28 = vpop.permute.xlu1 %17557 }
0x51e6   :  { %v17560_v16 = vunpack.i.h.bf16 %v17558_v28  ;;  %v17559_v2 = vunpack.i.l.bf16 %v17558_v28  ;;  %v12853_v52 = vpop.permute.xlu0 %12852 }
0x51e7   :  { %17245 = vmatprep.subr.bf16.mxu0 %v17244_v42 }
0x51e8   :  { %17247 = vmatpush3.bf16.msra.mxu0 %v17244_v42  ;;  %v17252_v62 = vpack.c.bf16 %v17560_v16, %v17559_v2 }
0x51e9   :  { %17249 = vmatprep.subr.bf16.mxu0 %v17248_v48  ;;  %v17563_v1 = vpop.permute.xlu1 %17562 }
0x51ea   :  { %v17831_v15 = vpop.eup %17830  ;;  %17253 = vmatprep.subr.bf16.mxu1 %v17252_v62  ;;  %v17565_v5 = vunpack.i.h.bf16 %v17563_v1  ;;  %v17564_v10 = vunpack.i.l.bf16 %v17563_v1 }
0x51eb   :  { %v17833_v14 = vpop.eup %17832  ;;  %v12707_v25 = vmul.f32 %v17831_v15, %v12698_v34 }
0x51ec   :  { %v12700_v58 = vmul.f32 %v17833_v14, %v12697_v24  ;;  %17251 = vmatpush3.bf16.msra.mxu0 %v17248_v48  ;;  %v17256_v9 = vpack.c.bf16 %v17565_v5, %v17564_v10 }
0x51ed   :  { %v12709_v36 = vsel %vm12708_vm7, %v12698_v34, %v12707_v25  ;;  %16850 = vmatprep.subr.mxu0 %v18296_v4 }
0x51ee   :  { %v12712_v27 = vsel %vm12710_vm8, %v12711_v51, %v12709_v36  ;;  %v12702_v56 = vsel %vm12701_vm11, %v12697_v24, %v12700_v58 }
0x51ef   :  { %v12714_v46 = vadd.f32 1e-06, %v12712_v27  ;;  %v12705_v33 = vsel %vm12703_vm12, %v12704_v18, %v12702_v56  ;;  %16837 = vmatmul.mubr.msk.f32.vlgmr.msra.gmra.mrb[102].mxu0 %vm369_vm0, %v19597_v44 }
0x51f0   :  { %v12713_v45 = vadd.f32 1e-06, %v12705_v33  ;;  %16852 = vmatprep.mubr.msk.f32.mxu0 %vm18297_vm5, %v18296_v4 }
0x51f1   :  { %17834 = vrcp.f32 %v12714_v46 }
0x51f2   :  { %17836 = vrcp.f32 %v12713_v45 }
0x51fb   :  { %v17835_v59 = vpop.eup %17834 }
0x51fc   :  { %v17837_v63 = vpop.eup %17836  ;;  %v12726_v6 = vmul.f32 %v17835_v59, %v12724_v55 }
0x51fd   :  { %v12725_v19 = vmul.f32 %v17837_v63, %v12723_v60 }
0x51fe   :  { %v12734_v39 = vadd.f32 %v15382_v8, %v12726_v6 }
0x51ff   :  { %v12733_v0 = vadd.f32 %v15382_v8, %v12725_v19 }
0x5201   :  { %16825 = vmatprep.mubr.msk.f32.mxu1 %vm369_vm0, %v12733_v0 }
0x5202   :  { %16826 = vmatmul.mubr.msk.f32.vlgmr.msra.gmra.mrb[134].mxu1 %vm369_vm0, %v12734_v39 }
0x5203   :  { %17255 = vmatpush3.bf16.msra.mxu1 %v17252_v62  ;;  %16847 = vmatprep.mubr.msk.f32.mxu1 %vm369_vm0, %v19599_v50 }
0x5204   :  { %17257 = vmatprep.subr.bf16.mxu1 %v17256_v9 }
0x5207   :  { %17259 = vmatpush3.bf16.msra.mxu1 %v17256_v9 }
0x5208   :  { %16855 = vmatprep.subr.mxu1 %v18296_v4 }
0x520a   :  { %16848 = vmatmul.mubr.msk.f32.vlgmr.msra.gmra.mrb[136].mxu1 %vm369_vm0, %v19597_v44 }
0x520b   :  { %16857 = vmatprep.mubr.msk.f32.mxu1 %vm18297_vm5, %v18296_v4 }
0x52c2   :  { %v16838_v54 = vpop.f32.mrb[102].mxu0 }
0x52c3   :  { %v20108_v61 = vadd.f32 %v16838_v54, %v12853_v52  ;;  %v12921_v20 = vpop.f32.mrb[103].mxu0 }
0x52c4   :  { %v20110_v31 = vadd.f32 %v12921_v20, %v12853_v52 }
0x52c5   :  { %16856 = vmatpush3.xpose.msk.msra.mxu1 %vm723_vm6, %v20108_v61 }
0x52c6   :  { %16851 = vmatpush3.xpose.msk.msra.mxu0 %vm723_vm6, %v20110_v31  ;;  %16865 = vmatprep.subr.mxu1 %v18296_v4 }
0x52c7   :  { %16860 = vmatprep.subr.mxu0 %v18296_v4 }
0x52d5   :  { %v16827_v44 = vpop.f32.mrb[134].mxu1 }
0x52d6   :  { %v20119_v50 = vadd.f32 %v16827_v44, %v20088_v32  ;;  %v12827_v47 = vpop.f32.mrb[135].mxu1 }
0x52d7   :  { %v20122_v43 = vadd.f32 %v20088_v32, %v12827_v47 }
0x52d8   :  { %16858 = vmatmul.mubr.msk.f32.vlgmr.msra.gmra.mrb[138].mxu1 %vm723_vm6, %v20119_v50 }
0x52d9   :  { %16853 = vmatmul.mubr.msk.f32.vlgmr.msra.gmra.mrb[104].mxu0 %vm723_vm6, %v20122_v43  ;;  %16867 = vmatprep.mubr.msk.f32.mxu1 %vm18297_vm5, %v18296_v4 }
0x52da   :  { %16862 = vmatprep.mubr.msk.f32.mxu0 %vm18297_vm5, %v18296_v4 }
0x52dd   :  { %v16849_v21 = vpop.f32.mrb[136].mxu1 }
0x52de   :  { %v13011_v41 = vpop.f32.mrb[137].mxu1 }
0x53ab   :  { %v13168_v49 = vpop.f32.mrb[138].mxu1 }
0x53ac   :  { %v13173_v23 = vmul.f32 0.35355338, %v13168_v49  ;;  %v13092_v29 = vpop.f32.mrb[104].mxu0  ;;  %v16859_v30 = vpop.f32.mrb[139].mxu1 }
0x53ad   :  { %v16854_v17 = vpop.f32.mrb[105].mxu0  ;;  %v13172_v7 = vmul.f32 0.35355338, %v13092_v29 }
0x53ae   :  { %v13175_v35 = vsel %vm722_vm9, %v13173_v23, -1e+09 }
0x53af   :  { %v13179_v34 = vsel %vm723_vm6, %v13175_v35, -inf  ;;  %v13174_v13 = vsel %vm721_vm10, %v13172_v7, -1e+09 }
0x53b0   :  { %13180 = vmax.xlane.f32.xlu1 %v13179_v34  ;;  %v13176_v12 = vsel %vm723_vm6, %v13174_v13, -inf }
0x53c1   :  { %13424 = vrot.lane.b32.xlu1 %v20108_v61, %s18299_s3 }
0x53c5   :  { %13422 = vrot.lane.b32.xlu1 %v20119_v50, %s18299_s3 }
0x543d   :  { %v13181_v40 = vpop.xlane.xlu1 %13180 }
0x543e   :  { %v13183_v24 = vsub.f32 %v13175_v35, %v13181_v40 }
0x5440   :  { %v13186_v57 = vmul.f32 1.442695, %v13183_v24 }
0x5441   :  { %v13425_v2 = vpop.permute.xlu1 %13424 }
0x5442   :  { %17838 = vpow2.f32 %v13186_v57 }
0x5445   :  { %v13423_v15 = vpop.permute.xlu1 %13422 }
0x544c   :  { %v17839_v11 = vpop.eup %17838 }
0x544d   :  { %v13191_v3 = vsel %vm723_vm6, %v17839_v11, 0.0 }
0x544e   :  { %13192 = vadd.xlane.f32.xlu0 %v13191_v3 }
0x5464   :  { %12942 = vrot.lane.b32.xlu0 %v20088_v32, %s18295_s5  ;;  %s15007_s5 = sshll.u32 %s18302_s13, 4  ;;  %s15008_s5 = int_to_ptr.vmem [resolvable:$true] %s15007_s5 }
0x5465   :  { %s18195_s1 = scalar_lea.vmem %s15008_s5, 256  ;;  %p18200_p1 = scmp.lt.s32.totalorder %s15008_s5, %s15008_s5 }
0x5466   :  { %p18196_p0 = scmp.ne.s32.totalorder %s15008_s5, %s18195_s1  ;;  %p18201_p2 = scmp.lt.s32.totalorder %s18195_s1, %s18195_s1 }
0x5468   :  { %p18202_p3 = por %p18201_p2, %p18200_p1 }
0x546a   :  { %p18203_p4 = pnand %p18202_p3, %p18196_p0 }
0x5483   :  { %13177 = vmax.xlane.f32.xlu0 %v13176_v12 }
0x5499   :  { %13346 = vrot.lane.b32.xlu0 %v20110_v31, %s18299_s3 }
0x54db   :  { %v13193_v42 = vpop.xlane.xlu0 %13192 }
0x54dc   :  { %17840 = vrcp.f32 %v13193_v42 }
0x54df   :  { %v12943_v48 = vpop.permute.xlu0 %12942 }
0x54e0   :  { %v20147_v28 = vadd.f32 %v13011_v41, %v12943_v48  ;;  %v20149_v16 = vadd.f32 %v16849_v21, %v12943_v48 }
0x54e2   :  { %16861 = vmatpush3.msra.mxu0 %v20147_v28  ;;  %16866 = vmatpush3.msra.mxu1 %v20149_v16 }
0x54e3   :  { %16875 = vmatprep.subr.mxu1 %v18296_v4  ;;  %16870 = vmatprep.subr.mxu0 %v18296_v4 }
0x54e6   :  { %v17841_v32 = vpop.eup %17840 }
0x54e7   :  { %v13197_v62 = vmul.f32 %v17841_v32, %v17839_v11 }
0x54e9   :  { %16868 = vmatmul.mubr.msk.f32.vlgmr.msra.gmra.mrb[140].mxu1 %vm723_vm6, %v13197_v62 }
0x54ea   :  { %16876 = vmatpush3.xpose.msk.msra.mxu1 %vm723_vm6, %v13425_v2  ;;  %16877 = vmatprep.mubr.msk.f32.mxu1 %vm18297_vm5, %v18296_v4 }
0x54eb   :  { %16885 = vmatprep.subr.mxu1 %v18296_v4 }
0x54ed   :  { %16878 = vmatmul.mubr.msk.f32.vlgmr.msra.gmra.mrb[142].mxu1 %vm723_vm6, %v13423_v15 }
0x54ee   :  { %16887 = vmatprep.mubr.msk.f32.mxu1 %vm18297_vm5, %v18296_v4 }
0x5510   :  { %v13178_v14 = vpop.xlane.xlu0 %13177 }
0x5511   :  { %v13182_v25 = vsub.f32 %v13174_v13, %v13178_v14 }
0x5513   :  { %v13184_v51 = vmul.f32 1.442695, %v13182_v25 }
0x5514   :  { %v13347_v46 = vpop.permute.xlu0 %13346 }
0x5515   :  { %17842 = vpow2.f32 %v13184_v51 }
0x551f   :  { %v17843_v58 = vpop.eup %17842 }
0x5520   :  { %v13188_v36 = vsel %vm723_vm6, %v17843_v58, 0.0 }
0x5521   :  { %13189 = vadd.xlane.f32.xlu1 %v13188_v36  ;;  %v15388_v36 = vld [vmem:[%s20400_s8 + $0x20] sm:$0xff] }
0x5532   :  { %13344 = vrot.lane.b32.xlu1 %v20122_v43, %s18299_s3 }
0x5536   :  { %13844 = vrot.lane.b32.xlu1 %v20110_v31, %s18300_s12 }
0x55ae   :  { %v13190_v18 = vpop.xlane.xlu1 %13189 }
0x55af   :  { %17844 = vrcp.f32 %v13190_v18 }
0x55b2   :  { %v13345_v53 = vpop.permute.xlu1 %13344 }
0x55b6   :  { %v13845_v21 = vpop.permute.xlu1 %13844 }
0x55b9   :  { %v17845_v27 = vpop.eup %17844 }
0x55ba   :  { %v13196_v56 = vmul.f32 %v17845_v27, %v17843_v58  ;;  %v15389_v58 = vld [vmem:[%s20400_s8 + $0x28] sm:$0xff] }
0x55bc   :  { %16863 = vmatmul.mubr.msk.f32.vlgmr.msra.gmra.mrb[106].mxu0 %vm723_vm6, %v13196_v56  ;;  %v20169_v33 = vpop.f32.mrb[140].mxu1 }
0x55bd   :  { %16871 = vmatpush3.xpose.msk.msra.mxu0 %vm723_vm6, %v13347_v46  ;;  %v16869_v45 = vpop.f32.mrb[141].mxu1  ;;  %16872 = vmatprep.mubr.msk.f32.mxu0 %vm18297_vm5, %v18296_v4 }
0x55be   :  { %16880 = vmatprep.subr.mxu0 %v18296_v4 }
0x55c0   :  { %16873 = vmatmul.mubr.msk.f32.vlgmr.msra.gmra.mrb[108].mxu0 %vm723_vm6, %v13345_v53  ;;  %v13496_v1 = vpop.f32.mrb[142].mxu1 }
0x55c1   :  { %v13501_v55 = vmul.f32 0.35355338, %v13496_v1  ;;  %v16879_v59 = vpop.f32.mrb[143].mxu1  ;;  %16882 = vmatprep.mubr.msk.f32.mxu0 %vm18297_vm5, %v18296_v4 }
0x55c3   :  { %v13503_v60 = vsel %vm722_vm9, %v13501_v55, -1e+09 }
0x55c4   :  { %v13507_v63 = vsel %vm723_vm6, %v13503_v60, -inf }
0x55c5   :  { %13508 = vmax.xlane.f32.xlu0 %v13507_v63 }
0x55db   :  { %13604 = vrot.lane.b32.xlu0 %v20149_v16, %s18299_s3 }
0x55df   :  { %13842 = vrot.lane.b32.xlu0 %v20122_v43, %s18300_s12 }
0x55e3   :  { %13920 = vrot.lane.b32.xlu0 %v20119_v50, %s18300_s12 }
0x5652   :  { %v13509_v5 = vpop.xlane.xlu0 %13508 }
0x5653   :  { %v13511_v10 = vsub.f32 %v13503_v60, %v13509_v5 }
0x5655   :  { %v13514_v8 = vmul.f32 1.442695, %v13511_v10 }
0x5656   :  { %v13605_v6 = vpop.permute.xlu0 %13604 }
0x5657   :  { %17846 = vpow2.f32 %v13514_v8  ;;  %16886 = vmatpush3.msra.mxu1 %v13605_v6  ;;  %v15390_v8 = vld [vmem:[%s20400_s8 + $0x30] sm:$0xff] }
0x5658   :  { %16900 = vmatprep.subr.mxu1 %v18296_v4 }
0x565a   :  { %v13843_v29 = vpop.permute.xlu0 %13842 }
0x565e   :  { %v13921_v17 = vpop.permute.xlu0 %13920 }
0x5661   :  { %v17847_v19 = vpop.eup %17846 }
0x5662   :  { %v13519_v0 = vsel %vm723_vm6, %v17847_v19, 0.0 }
0x5663   :  { %13520 = vadd.xlane.f32.xlu1 %v13519_v0 }
0x5674   :  { %13922 = vrot.lane.b32.xlu1 %v20108_v61, %s18300_s12 }
0x568f   :  { %v20191_v9 = vpop.f32.mrb[106].mxu0 }
0x5690   :  { %v16864_v39 = vpop.f32.mrb[107].mxu0 }
0x5693   :  { %v13418_v52 = vpop.f32.mrb[108].mxu0 }
0x5694   :  { %v13500_v54 = vmul.f32 0.35355338, %v13418_v52  ;;  %v16874_v20 = vpop.f32.mrb[109].mxu0 }
0x5696   :  { %v13502_v44 = vsel %vm721_vm10, %v13500_v54, -1e+09 }
0x5697   :  { %v13504_v47 = vsel %vm723_vm6, %v13502_v44, -inf }
0x5698   :  { %13505 = vmax.xlane.f32.xlu1 %v13504_v47 }
0x56f0   :  { %v13521_v41 = vpop.xlane.xlu1 %13520 }
0x56f1   :  { %17848 = vrcp.f32 %v13521_v41 }
0x56f4   :  { %v13923_v30 = vpop.permute.xlu1 %13922 }
0x56fb   :  { %v17849_v49 = vpop.eup %17848 }
0x56fc   :  { %v13525_v23 = vmul.f32 %v17849_v49, %v17847_v19 }
0x56fe   :  { %16888 = vmatmul.mubr.msk.f32.vlgmr.msra.gmra.mrb[144].mxu1 %vm723_vm6, %v13525_v23 }
0x56ff   :  { %16901 = vmatpush3.xpose.msk.msra.mxu1 %vm723_vm6, %v13845_v21  ;;  %16902 = vmatprep.mubr.msk.f32.mxu1 %vm18297_vm5, %v18296_v4 }
0x5700   :  { %16905 = vmatprep.subr.mxu1 %v18296_v4 }
0x5702   :  { %16903 = vmatmul.mubr.msk.f32.vlgmr.msra.gmra.mrb[146].mxu1 %vm723_vm6, %v13843_v29 }
0x5703   :  { %16906 = vmatpush3.xpose.msk.msra.mxu1 %vm723_vm6, %v13923_v30  ;;  %16907 = vmatprep.mubr.msk.f32.mxu1 %vm18297_vm5, %v18296_v4 }
0x5704   :  { %16915 = vmatprep.subr.mxu1 %v18296_v4 }
0x5706   :  { %16908 = vmatmul.mubr.msk.f32.vlgmr.msra.gmra.mrb[148].mxu1 %vm723_vm6, %v13921_v17 }
0x5707   :  { %16917 = vmatprep.mubr.msk.f32.mxu1 %vm18297_vm5, %v18296_v4 }
0x5725   :  { %v13506_v35 = vpop.xlane.xlu1 %13505 }
0x5726   :  { %v13510_v34 = vsub.f32 %v13502_v44, %v13506_v35 }
0x5728   :  { %v13512_v40 = vmul.f32 1.442695, %v13510_v34 }
0x572a   :  { %17850 = vpow2.f32 %v13512_v40 }
0x5734   :  { %v17851_v24 = vpop.eup %17850 }
0x5735   :  { %v13516_v57 = vsel %vm723_vm6, %v17851_v24, 0.0 }
0x5736   :  { %13517 = vadd.xlane.f32.xlu0 %v13516_v57 }
0x574c   :  { %13527 = vrot.lane.b32.xlu0 %v20147_v28, %s18299_s3 }
0x5750   :  { %14100 = vrot.lane.b32.xlu0 %v20149_v16, %s18300_s12 }
0x5754   :  { %14261 = vrot.lane.b32.xlu0 %v20110_v31, %s18301_s2 }
0x5758   :  { %14339 = vrot.lane.b32.xlu0 %v20108_v61, %s18301_s2 }
0x575c   :  { %14259 = vrot.lane.b32.xlu0 %v20122_v43, %s18301_s2 }
0x57c3   :  { %v13518_v11 = vpop.xlane.xlu0 %13517 }
0x57c4   :  { %17852 = vrcp.f32 %v13518_v11 }
0x57c7   :  { %v13528_v3 = vpop.permute.xlu0 %13527 }
0x57c8   :  { %16881 = vmatpush3.msra.mxu0 %v13528_v3 }
0x57c9   :  { %16890 = vmatprep.subr.mxu0 %v15389_v58 }
0x57cb   :  { %v14101_v7 = vpop.permute.xlu0 %14100 }
0x57cc   :  { %16916 = vmatpush3.msra.mxu1 %v14101_v7 }
0x57cd   :  { %16925 = vmatprep.subr.mxu1 %v18296_v4 }
0x57ce   :  { %v17853_v13 = vpop.eup %17852 }
0x57cf   :  { %v13524_v12 = vmul.f32 %v17853_v13, %v17851_v24  ;;  %v14262_v19 = vpop.permute.xlu0 %14261 }
0x57d1   :  { %16883 = vmatmul.mubr.msk.f32.vlgmr.msra.gmra.mrb[110].mxu0 %vm723_vm6, %v13524_v12  ;;  %v13676_v31 = vpop.f32.mrb[144].mxu1 }
0x57d2   :  { %v16889_v42 = vpop.f32.mrb[145].mxu1  ;;  %16891 = vmatpush3.msra.mxu0 %v15389_v58 }
0x57d3   :  { %16895 = vmatprep.subr.mxu0 %v15388_v36  ;;  %v14340_v52 = vpop.permute.xlu0 %14339 }
0x57d5   :  { %v13916_v61 = vpop.f32.mrb[146].mxu1 }
0x57d6   :  { %v13998_v48 = vmul.f32 0.35355338, %v13916_v61  ;;  %v16904_v32 = vpop.f32.mrb[147].mxu1 }
0x57d7   :  { %v14260_v54 = vpop.permute.xlu0 %14259 }
0x57d8   :  { %v14000_v43 = vsel %vm721_vm10, %v13998_v48, -1e+09 }
0x57d9   :  { %v13994_v2 = vpop.f32.mrb[148].mxu1  ;;  %v14002_v62 = vsel %vm723_vm6, %v14000_v43, -inf }
0x57da   :  { %v13999_v15 = vmul.f32 0.35355338, %v13994_v2  ;;  %v16909_v14 = vpop.f32.mrb[149].mxu1  ;;  %14003 = vmax.xlane.f32.xlu1 %v14002_v62 }
0x57db   :  { %v15391_v14 = vld [vmem:[%s20400_s8 + $0x38] sm:$0xff] }
0x57dc   :  { %v14001_v25 = vsel %vm722_vm9, %v13999_v15, -1e+09 }
0x57dd   :  { %v14005_v51 = vsel %vm723_vm6, %v14001_v25, -inf }
0x57de   :  { %14006 = vmax.xlane.f32.xlu1 %v14005_v51 }
0x5867   :  { %v14004_v18 = vpop.xlane.xlu1 %14003 }
0x5868   :  { %v14008_v27 = vsub.f32 %v14000_v43, %v14004_v18 }
0x586a   :  { %v14010_v56 = vmul.f32 1.442695, %v14008_v27 }
0x586b   :  { %v14007_v46 = vpop.xlane.xlu1 %14006 }
0x586c   :  { %17854 = vpow2.f32 %v14010_v56  ;;  %v14009_v45 = vsub.f32 %v14001_v25, %v14007_v46 }
0x586e   :  { %v14012_v53 = vmul.f32 1.442695, %v14009_v45 }
0x5870   :  { %17856 = vpow2.f32 %v14012_v53 }
0x5876   :  { %v17855_v1 = vpop.eup %17854 }
0x5877   :  { %v14014_v55 = vsel %vm723_vm6, %v17855_v1, 0.0 }
0x5878   :  { %14015 = vadd.xlane.f32.xlu1 %v14014_v55 }
0x587a   :  { %v17857_v59 = vpop.eup %17856 }
0x587b   :  { %v14017_v60 = vsel %vm723_vm6, %v17857_v59, 0.0 }
0x587c   :  { %14018 = vadd.xlane.f32.xlu1 %v14017_v60 }
0x588d   :  { %14024 = vrot.lane.b32.xlu1 %v20147_v28, %s18300_s12 }
0x5891   :  { %14337 = vrot.lane.b32.xlu1 %v20119_v50, %s18301_s2 }
0x58a4   :  { %v13599_v63 = vpop.f32.mrb[110].mxu0 }
0x58a5   :  { %v16884_v5 = vpop.f32.mrb[111].mxu0  ;;  %16892 = vmatprep.mubr.msk.f32.mxu0 %vm723_vm6, %v13599_v63 }
0x58a6   :  { %16893 = vmatmul.mubr.msk.f32.vlgmr.msra.gmra.mrb[112].mxu0 %vm723_vm6, %v13676_v31 }
0x58a7   :  { %16897 = vmatprep.mubr.msk.f32.mxu0 %vm723_vm6, %v20191_v9  ;;  %16896 = vmatpush3.msra.mxu0 %v15388_v36  ;;  %v15432_v36 = vld [vmem:[%s20401_s0 + $0x1] ss:$0 sm:$0xff] }
0x58a8   :  { %16910 = vmatprep.subr.mxu0 %v18296_v4 }
0x58ae   :  { %16898 = vmatmul.mubr.msk.f32.vlgmr.msra.gmra.mrb[112].mxu0 %vm723_vm6, %v20169_v33 }
0x58af   :  { %16912 = vmatprep.mubr.msk.f32.mxu0 %vm18297_vm5, %v18296_v4 }
0x5905   :  { %v14016_v10 = vpop.xlane.xlu1 %14015 }
0x5906   :  { %17858 = vrcp.f32 %v14016_v10 }
0x5909   :  { %v14019_v50 = vpop.xlane.xlu1 %14018 }
0x590a   :  { %17860 = vrcp.f32 %v14019_v50 }
0x590d   :  { %v14025_v6 = vpop.permute.xlu1 %14024 }
0x590e   :  { %16911 = vmatpush3.msra.mxu0 %v14025_v6 }
0x590f   :  { %16920 = vmatprep.subr.mxu0 %v15390_v8 }
0x5910   :  { %v17859_v0 = vpop.eup %17858 }
0x5911   :  { %v14022_v9 = vmul.f32 %v17859_v0, %v17855_v1  ;;  %v14338_v41 = vpop.permute.xlu1 %14337  ;;  %v15436_v0 = vld [vmem:[%s20402_s28 + $0x28] sm:$0xff] }
0x5913   :  { %16913 = vmatmul.mubr.msk.f32.vlgmr.msra.gmra.mrb[114].mxu0 %vm723_vm6, %v14022_v9  ;;  %v15437_v9 = vld [vmem:[%s20402_s28 + $0x30] sm:$0xff] }
0x5914   :  { %v17861_v39 = vpop.eup %17860  ;;  %16921 = vmatpush3.msra.mxu0 %v15390_v8 }
0x5915   :  { %v14023_v33 = vmul.f32 %v17861_v39, %v17857_v59  ;;  %16930 = vmatprep.subr.mxu0 %v18296_v4 }
0x5917   :  { %16918 = vmatmul.mubr.msk.f32.vlgmr.msra.gmra.mrb[150].mxu1 %vm723_vm6, %v14023_v33 }
0x5918   :  { %16926 = vmatpush3.xpose.msk.msra.mxu1 %vm723_vm6, %v14262_v19  ;;  %16927 = vmatprep.mubr.msk.f32.mxu1 %vm18297_vm5, %v18296_v4  ;;  %v15435_v19 = vld [vmem:[%s20402_s28 + $0x20] sm:$0xff] }
0x5919   :  { %16935 = vmatprep.subr.mxu1 %v18296_v4  ;;  %v17260_v39 = vpack.c.bf16 %v15436_v0, %v15435_v19 }
0x591b   :  { %16928 = vmatmul.mubr.msk.f32.vlgmr.msra.gmra.mrb[152].mxu1 %vm723_vm6, %v14260_v54  ;;  %v15439_v54 = vld [vmem:[%s20403_s17 + $0x40] sm:$0xff] }
0x591c   :  { %16937 = vmatprep.mubr.msk.f32.mxu1 %vm18297_vm5, %v18296_v4 }
0x59e6   :  { %v14096_v20 = vpop.f32.mrb[114].mxu0 }
0x59e7   :  { %v16914_v44 = vpop.f32.mrb[115].mxu0  ;;  %16922 = vmatprep.mubr.msk.f32.mxu0 %vm723_vm6, %v14096_v20  ;;  %v15440_v20 = vld [vmem:[%s20403_s17 + $0x48] sm:$0xff] }
0x59e8   :  { %v15441_v44 = vld [vmem:[%s20403_s17 + $0x50] sm:$0xff] }
0x59ea   :  { %v14172_v47 = vpop.f32.mrb[150].mxu1 }
0x59eb   :  { %v16919_v21 = vpop.f32.mrb[151].mxu1  ;;  %16923 = vmatmul.mubr.msk.f32.vlgmr.msra.gmra.mrb[112].mxu0 %vm723_vm6, %v14172_v47  ;;  %v17268_v47 = vpack.c.bf16 %v15440_v20, %v15439_v54 }
0x59ec   :  { %16931 = vmatpush3.xpose.msk.msra.mxu0 %vm723_vm6, %v14340_v52  ;;  %16932 = vmatprep.mubr.msk.f32.mxu0 %vm18297_vm5, %v18296_v4  ;;  %v15438_v52 = vld [vmem:[%s20402_s28 + $0x38] sm:$0xff] }
0x59ed   :  { %16940 = vmatprep.subr.mxu0 %v18296_v4  ;;  %v17264_v33 = vpack.c.bf16 %v15438_v52, %v15437_v9  ;;  %v15442_v21 = vld [vmem:[%s20403_s17 + $0x58] sm:$0xff] }
0x59ee   :  { %v14333_v49 = vpop.f32.mrb[152].mxu1 }
0x59ef   :  { %v14415_v23 = vmul.f32 0.35355338, %v14333_v49  ;;  %v16929_v29 = vpop.f32.mrb[153].mxu1  ;;  %16933 = vmatmul.mubr.msk.f32.vlgmr.msra.gmra.mrb[116].mxu0 %vm723_vm6, %v14338_v41  ;;  %v17272_v41 = vpack.c.bf16 %v15442_v21, %v15441_v44  ;;  %v15443_v49 = vld [vmem:[%s20403_s17 + $0x60] sm:$0xff] }
0x59f0   :  { %16942 = vmatprep.mubr.msk.f32.mxu0 %vm18297_vm5, %v18296_v4 }
0x59f1   :  { %v14417_v30 = vsel %vm721_vm10, %v14415_v23, -1e+09  ;;  %v15444_v23 = vld [vmem:[%s20403_s17 + $0x68] sm:$0xff] }
0x59f2   :  { %v14419_v17 = vsel %vm723_vm6, %v14417_v30, -inf  ;;  %v17276_v29 = vpack.c.bf16 %v15444_v23, %v15443_v49 }
0x59f3   :  { %14420 = vmax.xlane.f32.xlu0 %v14419_v17 }
0x5a80   :  { %v14421_v35 = vpop.xlane.xlu0 %14420 }
0x5a81   :  { %v14425_v34 = vsub.f32 %v14417_v30, %v14421_v35 }
0x5a83   :  { %v14427_v40 = vmul.f32 1.442695, %v14425_v34 }
0x5a85   :  { %17862 = vpow2.f32 %v14427_v40 }
0x5a8f   :  { %v17863_v24 = vpop.eup %17862 }
0x5a90   :  { %v14431_v57 = vsel %vm723_vm6, %v17863_v24, 0.0 }
0x5a91   :  { %14432 = vadd.xlane.f32.xlu0 %v14431_v57 }
0x5ac2   :  { %v14411_v11 = vpop.f32.mrb[116].mxu0 }
0x5ac3   :  { %v14416_v3 = vmul.f32 0.35355338, %v14411_v11  ;;  %v16934_v7 = vpop.f32.mrb[117].mxu0 }
0x5ac5   :  { %v14418_v4 = vsel %vm722_vm9, %v14416_v3, -1e+09 }
0x5ac6   :  { %v14422_v22 = vsel %vm723_vm6, %v14418_v4, -inf }
0x5ac7   :  { %14423 = vmax.xlane.f32.xlu1 %v14422_v22 }
0x5ad8   :  { %14517 = vrot.lane.b32.xlu1 %v20149_v16, %s18301_s2 }
0x5b1e   :  { %v14433_v26 = vpop.xlane.xlu0 %14432 }
0x5b54   :  { %v14424_v13 = vpop.xlane.xlu1 %14423 }
0x5b55   :  { %v14426_v12 = vsub.f32 %v14418_v4, %v14424_v13 }
0x5b57   :  { %v14429_v31 = vmul.f32 1.442695, %v14426_v12 }
0x5b58   :  { %v14518_v42 = vpop.permute.xlu1 %14517 }
0x5b59   :  { %17864 = vpow2.f32 %v14429_v31  ;;  %16941 = vmatpush3.msra.mxu0 %v14518_v42 }
0x5b5a   :  { %17866 = vrcp.f32 %v14433_v26  ;;  %16945 = vmatprep.subr.mxu0 %v15391_v14 }
0x5b63   :  { %v17865_v61 = vpop.eup %17864 }
0x5b64   :  { %v14434_v48 = vsel %vm723_vm6, %v17865_v61, 0.0  ;;  %v17867_v43 = vpop.eup %17866 }
0x5b65   :  { %14435 = vadd.xlane.f32.xlu0 %v14434_v48  ;;  %v14439_v16 = vmul.f32 %v17867_v43, %v17863_v24 }
0x5b7b   :  { %14441 = vrot.lane.b32.xlu0 %v20147_v28, %s18301_s2 }
0x5bf2   :  { %v14436_v32 = vpop.xlane.xlu0 %14435 }
0x5bf3   :  { %17868 = vrcp.f32 %v14436_v32 }
0x5bf6   :  { %v14442_v2 = vpop.permute.xlu0 %14441 }
0x5bf7   :  { %16936 = vmatpush3.msra.mxu1 %v14442_v2 }
0x5bf8   :  { %16938 = vmatmul.mubr.msk.f32.vlgmr.msra.gmra.mrb[154].mxu1 %vm723_vm6, %v14439_v16  ;;  %17261 = vmatprep.subr.bf16.mxu1 %v17260_v39  ;;  %v15434_v16 = vld [vmem:[#allocation20 + $0x1] ss:$0 sm:$0xff] }
0x5bf9   :  { %17263 = vmatpush3.bf16.msra.mxu1 %v17260_v39 }
0x5bfa   :  { %17265 = vmatprep.subr.bf16.mxu1 %v17264_v33 }
0x5bfd   :  { %v17869_v62 = vpop.eup %17868  ;;  %17267 = vmatpush3.bf16.msra.mxu1 %v17264_v33 }
0x5bfe   :  { %v14440_v15 = vmul.f32 %v17869_v62, %v17865_v61  ;;  %v15433_v61 = vld [vmem:[#allocation19 + $0x1] ss:$0 sm:$0xff] }
0x5c00   :  { %16943 = vmatmul.mubr.msk.f32.vlgmr.msra.gmra.mrb[118].mxu0 %vm723_vm6, %v14440_v15 }
0x5c01   :  { %16946 = vmatpush3.msra.mxu0 %v15391_v14 }
0x5c02   :  { %17269 = vmatprep.subr.bf16.mxu0 %v17268_v47 }
0x5ccb   :  { %v14513_v25 = vpop.f32.mrb[154].mxu1 }
0x5ccc   :  { %v16939_v28 = vpop.f32.mrb[155].mxu1  ;;  %16947 = vmatprep.mubr.msk.f32.mxu0 %vm723_vm6, %v14513_v25  ;;  %v15445_v25 = vld [vmem:[%s20403_s17 + $0x70] sm:$0xff] }
0x5ccd   :  { %v15446_v28 = vld [vmem:[%s20403_s17 + $0x78] sm:$0xff] }
0x5cd3   :  { %v14589_v51 = vpop.f32.mrb[118].mxu0 }
0x5cd4   :  { %v16944_v58 = vpop.f32.mrb[119].mxu0  ;;  %16948 = vmatmul.mubr.msk.f32.vlgmr.msra.gmra.mrb[112].mxu0 %vm723_vm6, %v14589_v51  ;;  %v17280_v51 = vpack.c.bf16 %v15446_v28, %v15445_v25 }
0x5cd5   :  { %17271 = vmatpush3.bf16.msra.mxu0 %v17268_v47  ;;  %v15447_v58 = vld [vmem:[#allocation10 + $0x1] ss:$0 sm:$0xff] }
0x5cd6   :  { %17273 = vmatprep.subr.bf16.mxu0 %v17272_v41 }
0x5cd9   :  { %17275 = vmatpush3.bf16.msra.mxu0 %v17272_v41 }
0x5cda   :  { %17277 = vmatprep.subr.bf16.mxu0 %v17276_v29 }
0x5cdd   :  { %17279 = vmatpush3.bf16.msra.mxu0 %v17276_v29 }
0x5cde   :  { %17281 = vmatprep.subr.bf16.mxu0 %v17280_v51 }
0x5ce1   :  { %17283 = vmatpush3.bf16.msra.mxu0 %v17280_v51 }
0x5da7   :  { %v16949_v18 = vpop.f32.mrb[112].mxu0 }
0x5da8   :  { %v14683_v27 = vadd.f32 %v16949_v18, %v15432_v36  ;;  %v14665_v56 = vpop.f32.mrb[113].mxu0 }
0x5da9   :  { %v14682_v46 = vadd.f32 %v15432_v36, %v14665_v56 }
0x5daa   :  { %v20284_v45 = vadd.f32 %v14683_v27, %v20058_v37 }
0x5dab   :  { %v20287_v53 = vadd.f32 %v14682_v46, %v20061_v38 }
0x5dac   :  { %v14693_v1 = vsel %vm369_vm0, %v20284_v45, 0.0 }
0x5dad   :  { %14694 = vadd.xlane.f32.xlu0 %v14693_v1  ;;  %v14690_v55 = vsel %vm369_vm0, %v20287_v53, 0.0 }
0x5dae   :  { %14691 = vadd.xlane.f32.xlu1 %v14690_v55  ;;  %v15450_v55 = vld [vmem:[#allocation11 + $0x1] ss:$0 sm:$0xff] }
0x5e3a   :  { %v14695_v59 = vpop.xlane.xlu0 %14694 }
0x5e3b   :  { %v14697_v60 = vmul.f32 0.03125, %v14695_v59  ;;  %v14692_v63 = vpop.xlane.xlu1 %14691 }
0x5e3c   :  { %v14696_v37 = vmul.f32 0.03125, %v14692_v63 }
0x5e3d   :  { %v14699_v5 = vsub.f32 %v20284_v45, %v14697_v60 }
0x5e3e   :  { %v14698_v38 = vsub.f32 %v20287_v53, %v14696_v37 }
0x5e3f   :  { %v14701_v10 = vmul.f32 %v14699_v5, %v14699_v5  ;;  %v14735_v48 = vmul.f32 %v15433_v61, %v14699_v5 }
0x5e40   :  { %v14700_v50 = vmul.f32 %v14698_v38, %v14698_v38  ;;  %v14734_v32 = vmul.f32 %v15433_v61, %v14698_v38 }
0x5e41   :  { %v14705_v8 = vsel %vm369_vm0, %v14701_v10, 0.0 }
0x5e42   :  { %14706 = vadd.xlane.f32.xlu1 %v14705_v8  ;;  %v14702_v6 = vsel %vm369_vm0, %v14700_v50, 0.0 }
0x5e43   :  { %14703 = vadd.xlane.f32.xlu0 %v14702_v6 }
0x5ecf   :  { %v14707_v30 = vpop.xlane.xlu1 %14706 }
0x5ed0   :  { %v14709_v17 = vmul.f32 0.032258064, %v14707_v30  ;;  %v14704_v35 = vpop.xlane.xlu0 %14703 }
0x5ed1   :  { %v14708_v34 = vmul.f32 0.032258064, %v14704_v35 }
0x5ed2   :  { %17870 = vrsqrt.f32 %v14709_v17  ;;  %vm14719_vm5 = vcmp.eq.f32.partialorder %v14709_v17, inf  ;;  %v14722_v11 = vand.u32 2147483648, %v14709_v17  ;;  %vm14721_vm6 = vcmp.eq.f32.partialorder %v14709_v17, 0.0 }
0x5ed3   :  { %17872 = vrsqrt.f32 %v14708_v34  ;;  %vm14712_vm9 = vcmp.eq.f32.partialorder %v14708_v34, inf  ;;  %v14715_v4 = vand.u32 2147483648, %v14708_v34  ;;  %vm14714_vm10 = vcmp.eq.f32.partialorder %v14708_v34, 0.0 }
0x5edc   :  { %v17871_v40 = vpop.eup %17870 }
0x5edd   :  { %v17873_v24 = vpop.eup %17872  ;;  %v14718_v57 = vmul.f32 %v17871_v40, %v14709_v17 }
0x5ede   :  { %v14711_v3 = vmul.f32 %v17873_v24, %v14708_v34 }
0x5edf   :  { %v14720_v7 = vsel %vm14719_vm5, %v14709_v17, %v14718_v57 }
0x5ee0   :  { %v14723_v22 = vsel %vm14721_vm6, %v14722_v11, %v14720_v7  ;;  %v14713_v13 = vsel %vm14712_vm9, %v14708_v34, %v14711_v3  ;;  %v15453_v11 = vld [vmem:[#allocation22] ss:$0 sm:$0xff] }
0x5ee1   :  { %v14725_v12 = vadd.f32 1e-06, %v14723_v22  ;;  %v14716_v31 = vsel %vm14714_vm10, %v14715_v4, %v14713_v13  ;;  %v15454_v22 = vld [vmem:[#allocation23] ss:$0 sm:$0xff] }
0x5ee2   :  { %v14724_v42 = vadd.f32 1e-06, %v14716_v31 }
0x5ee3   :  { %17874 = vrcp.f32 %v14725_v12 }
0x5ee4   :  { %17876 = vrcp.f32 %v14724_v42 }
0x5eed   :  { %v17875_v26 = vpop.eup %17874 }
0x5eee   :  { %v17877_v43 = vpop.eup %17876  ;;  %v14737_v2 = vmul.f32 %v17875_v26, %v14735_v48 }
0x5eef   :  { %v14736_v62 = vmul.f32 %v17877_v43, %v14734_v32 }
0x5ef0   :  { %v14745_v14 = vadd.f32 %v15434_v16, %v14737_v2 }
0x5ef1   :  { %v14744_v15 = vadd.f32 %v15434_v16, %v14736_v62 }
0x5ef3   :  { %16958 = vmatprep.mubr.msk.f32.mxu1 %vm369_vm0, %v14744_v15 }
0x5ef4   :  { %16959 = vmatmul.mubr.msk.f32.vlgmr.msra.gmra.mrb[156].mxu1 %vm369_vm0, %v14745_v14 }
0x5fc7   :  { %v16960_v36 = vpop.f32.mrb[156].mxu1 }
0x5fc8   :  { %v14848_v18 = vadd.f32 %v16960_v36, %v15447_v58  ;;  %v14842_v27 = vpop.f32.mrb[157].mxu1 }
0x5fc9   :  { %v14843_v56 = vadd.f32 %v15447_v58, %v14842_v27 }
0x5fca   :  { %v14852_v1 = vmax.f32 %v14848_v18, 0.0 }
0x5fcb   :  { %v14851_v46 = vmax.f32 %v14843_v56, 0.0 }
0x5fcd   :  { %16977 = vmatprep.mubr.msk.f32.mxu0 %vm2557_vm15, %v14851_v46 }
0x5fce   :  { %16978 = vmatmul.mubr.msk.f32.vlgmr.msra.gmra.mrb[120].mxu0 %vm2557_vm15, %v14852_v1 }
0x60a1   :  { %v16979_v59 = vpop.f32.mrb[120].mxu0 }
0x60a2   :  { %v14937_v60 = vadd.f32 %v16979_v59, %v15450_v55  ;;  %v14931_v63 = vpop.f32.mrb[121].mxu0 }
0x60a3   :  { %v14932_v37 = vadd.f32 %v15450_v55, %v14931_v63 }
0x60a4   :  { %v14941_v5 = vadd.f32 %v14937_v60, %v20284_v45 }
0x60a5   :  { %v14940_v38 = vadd.f32 %v14932_v37, %v20287_v53 }
0x60a6   :  { %v14947_v10 = vsel %vm369_vm0, %v14941_v5, 0.0 }
0x60a7   :  { %14948 = vadd.xlane.f32.xlu1 %v14947_v10  ;;  %v14944_v50 = vsel %vm369_vm0, %v14940_v38, 0.0 }
0x60a8   :  { %14945 = vadd.xlane.f32.xlu0 %v14944_v50 }
0x6134   :  { %v14949_v8 = vpop.xlane.xlu1 %14948 }
0x6135   :  { %v14951_v6 = vmul.f32 0.03125, %v14949_v8  ;;  %v14946_v19 = vpop.xlane.xlu0 %14945 }
0x6136   :  { %v14950_v0 = vmul.f32 0.03125, %v14946_v19 }
0x6137   :  { %v14953_v9 = vsub.f32 %v14941_v5, %v14951_v6 }
0x6138   :  { %v14952_v39 = vsub.f32 %v14940_v38, %v14950_v0 }
0x6139   :  { %v14955_v52 = vmul.f32 %v14953_v9, %v14953_v9  ;;  %v14989_v3 = vmul.f32 %v15453_v11, %v14953_v9 }
0x613a   :  { %v14954_v33 = vmul.f32 %v14952_v39, %v14952_v39  ;;  %v14988_v4 = vmul.f32 %v15453_v11, %v14952_v39 }
0x613b   :  { %v14959_v54 = vsel %vm369_vm0, %v14955_v52, 0.0 }
0x613c   :  { %14960 = vadd.xlane.f32.xlu1 %v14959_v54  ;;  %v14956_v45 = vsel %vm369_vm0, %v14954_v33, 0.0 }
0x613d   :  { %14957 = vadd.xlane.f32.xlu0 %v14956_v45 }
0x61c9   :  { %v14961_v53 = vpop.xlane.xlu1 %14960 }
0x61ca   :  { %v14963_v20 = vmul.f32 0.032258064, %v14961_v53  ;;  %v14958_v44 = vpop.xlane.xlu0 %14957 }
0x61cb   :  { %v14962_v47 = vmul.f32 0.032258064, %v14958_v44 }
0x61cc   :  { %17878 = vrsqrt.f32 %v14963_v20  ;;  %vm14973_vm15 = vcmp.eq.f32.partialorder %v14963_v20, inf  ;;  %v14976_v23 = vand.u32 2147483648, %v14963_v20  ;;  %vm14975_vm13 = vcmp.eq.f32.partialorder %v14963_v20, 0.0 }
0x61cd   :  { %17880 = vrsqrt.f32 %v14962_v47  ;;  %vm14966_vm14 = vcmp.eq.f32.partialorder %v14962_v47, inf  ;;  %v14969_v17 = vand.u32 2147483648, %v14962_v47  ;;  %vm14968_vm1 = vcmp.eq.f32.partialorder %v14962_v47, 0.0 }
0x61d6   :  { %v17879_v21 = vpop.eup %17878 }
0x61d7   :  { %v17881_v41 = vpop.eup %17880  ;;  %v14972_v49 = vmul.f32 %v17879_v21, %v14963_v20 }
0x61d8   :  { %v14965_v29 = vmul.f32 %v17881_v41, %v14962_v47 }
0x61d9   :  { %v14974_v30 = vsel %vm14973_vm15, %v14963_v20, %v14972_v49 }
0x61da   :  { %v14977_v35 = vsel %vm14975_vm13, %v14976_v23, %v14974_v30  ;;  %v14967_v34 = vsel %vm14966_vm14, %v14962_v47, %v14965_v29 }
0x61db   :  { %v14979_v40 = vadd.f32 1e-06, %v14977_v35  ;;  %v14970_v24 = vsel %vm14968_vm1, %v14969_v17, %v14967_v34 }
0x61dc   :  { %v14978_v57 = vadd.f32 1e-06, %v14970_v24 }
0x61dd   :  { %17882 = vrcp.f32 %v14979_v40 }
0x61de   :  { %17884 = vrcp.f32 %v14978_v57 }
0x61e7   :  { %v17883_v7 = vpop.eup %17882 }
0x61e8   :  { %v17885_v13 = vpop.eup %17884  ;;  %v14991_v12 = vmul.f32 %v17883_v7, %v14989_v3 }
0x61e9   :  { %v14990_v31 = vmul.f32 %v17885_v13, %v14988_v4 }
0x61ea   :  { %v14999_v42 = vadd.f32 %v15454_v22, %v14991_v12 }
0x61eb   :  { %v14998_v61 = vadd.f32 %v15454_v22, %v14990_v31 }
0x61ec   :  { %15001 = vst.msk [vmem:[#allocation25 + $0x8] sm:$0xff] %vm369_vm0, %v14999_v42 }
0x61ed   :  { %15000 = vst.msk [vmem:[#allocation25] sm:$0xff] %vm369_vm0, %v14998_v61 }
0x61ee   :  { %18206 = shalt.err (!%p18203_p4)
}
0x61ef   :  { %s18207_s29 = scalar_lea.hbm %s18528_s4, 256 }
0x61f0   :  { %p18208_p5 = scmp.ne.s32.totalorder %s18528_s4, %s18207_s29  ;;  %p18211_p6 = scmp.lt.u32.totalorder %s18207_s29, %s18528_s4 }
0x61f2   :  { %p18213_p7 = pnand %p18211_p6, %p18208_p5 }
0x61f4   :  { %18216 = shalt.err (!%p18213_p7)
}
0x61f5   :  { %s18303_s3 = smov 128   ;;  %s18304_s12 = smov 8  }
0x61f6   :  { %15013 = dma.vmem_to_hbm [thread:$0]  %s15008_s5, 256, %s18528_s4, [#allocation4], %s18303_s3, %s18303_s3, %s18304_s12  }
0x61f7   :  { %18233 = dma.done.wait [#allocation4], 256  }
0x61f8   :  { %18234 = vsyncadd [#allocation4], 4294967040 }
0x61f9   :  { %15017 = vsyncpa [#allocation3], 1 }
0x61fa   :  { %15018 = vsyncpa [#allocation6], 1 }
0x61fb   :  { %15019 = vsyncpa [#allocation9], 1 }
0x61fc   :  { %15020 = vsyncpa [#allocation12], 1 }
0x61fd   :  { %15021 = vsyncpa [#allocation15], 1 }
0x61fe   :  { %15022 = vsyncpa [#allocation18], 1 }
0x61ff   :  { %15023 = vsyncpa [#allocation21], 1 }
0x6200   :  { %15024 = vsyncpa [#allocation24], 1 }
0x6201   :  { %15025 = vsyncpa [#allocation4], 1 }

</bundles_post_ra>
